<compile_context>
chip_gen: v7x
topology: tpu7x:2x2x1
jax: 0.10.0
libtpu: 0.0.40
codegen_flags: <defaults>
</compile_context>

<pallas_src>
import functools

import jax
import jax.numpy as jnp
from jax.experimental import pallas as pl
from jax.experimental.pallas import tpu as pltpu


NEG_INF = -1e9
LN_EPS = 1e-12


def _layernorm(x, g, b):
    mu = jnp.mean(x, axis=-1, keepdims=True)
    xc = x - mu
    var = jnp.mean(xc * xc, axis=-1, keepdims=True)
    return xc * jax.lax.rsqrt(var + LN_EPS) * g + b


def _encoder_kernel(ids_ref, mask_ref, wemb_ref, pemb_ref,
                    emb_g_ref, emb_b_ref,
                    wqkv_ref, bqkv_ref, wo_ref, bo_ref,
                    ln1_g_ref, ln1_b_ref, w1_ref, b1_ref,
                    w2_ref, b2_ref, ln2_g_ref, ln2_b_ref,
                    o_ref, *, num_layers, num_heads, head_dim, tb, seq):
    """MiniLM-style encoder for a TB-example batch tile, fully in VMEM."""
    H = num_heads * head_dim
    M = tb * seq
    Vp = wemb_ref.shape[0]
    scale = 1.0 / float(head_dim) ** 0.5

    ids = ids_ref[...]                                  # (TB, S) int32
    mask = mask_ref[...]                                # (TB, S) f32 (1/0)

    # ---- Token embedding as a one-hot (M, Vp) @ (Vp, H) MXU matmul ----------
    vocab_iota = jax.lax.broadcasted_iota(jnp.int32, (tb, seq, Vp), 2)
    onehot = (ids[:, :, None] == vocab_iota).astype(jnp.bfloat16).reshape(M, Vp)
    x = jnp.dot(onehot, wemb_ref[...], preferred_element_type=jnp.float32)
    pos = jnp.broadcast_to(pemb_ref[...][None], (tb, seq, H)).reshape(M, H)
    x = _layernorm(x + pos, emb_g_ref[...], emb_b_ref[...])    # (M, H) f32

    # ---- Block-diagonal attention bias (built with one tiny MXU matmul) -----
    # allowed[i, j] = (i and j belong to the same example) AND (key j is not pad)
    ex_iota = jax.lax.broadcasted_iota(jnp.int32, (tb, seq, tb), 2)
    own_iota = jax.lax.broadcasted_iota(jnp.int32, (tb, seq, tb), 0)
    same = ex_iota == own_iota                                   # (TB, S, TB)
    e_rows = same.astype(jnp.bfloat16).reshape(M, tb)            # row -> example
    k_rows = (same & (mask[:, :, None] > 0.5)).astype(jnp.bfloat16).reshape(M, tb)
    allowed = jax.lax.dot_general(e_rows, k_rows, (((1,), (1,)), ((), ())),
                                  preferred_element_type=jnp.float32)  # (M, M)
    bias = jnp.where(allowed > 0.5, 0.0, NEG_INF)                # (M, M) f32

    # ---- Transformer layers (static unroll, L is small) ---------------------
    for l in range(num_layers):
        x_bf = x.astype(jnp.bfloat16)
        # Fused QKV projection: (M, H) @ (H, 3H), f32 accumulate, bf16 for MXU.
        qkv = (jnp.dot(x_bf, wqkv_ref[l], preferred_element_type=jnp.float32)
               + bqkv_ref[l]).astype(jnp.bfloat16)               # (M, 3H)
        wo_l = wo_ref[l]                                         # (H, H) bf16

        attn = jnp.zeros((M, H), jnp.float32)
        for h in range(num_heads):
            lo, hi = h * head_dim, (h + 1) * head_dim
            qh = qkv[:, lo:hi]
            kh = qkv[:, H + lo:H + hi]
            vh = qkv[:, 2 * H + lo:2 * H + hi]
            s = jax.lax.dot_general(qh, kh, (((1,), (1,)), ((), ())),
                                    preferred_element_type=jnp.float32)
            s = s * scale + bias
            mx = jnp.max(s, axis=-1, keepdims=True)
            p = jnp.exp(s - mx)
            p = p * pl.reciprocal(jnp.sum(p, axis=-1, keepdims=True),
                                  approx=True)
            ctx_h = jnp.dot(p.astype(jnp.bfloat16), vh,
                            preferred_element_type=jnp.float32)  # (M, dh)
            # Fold the output projection into the head loop (no lane concat).
            attn = attn + jnp.dot(ctx_h.astype(jnp.bfloat16), wo_l[lo:hi, :],
                                  preferred_element_type=jnp.float32)
        attn = attn + bo_ref[l]
        x = _layernorm(x + attn, ln1_g_ref[l], ln1_b_ref[l])

        h1 = jnp.dot(x.astype(jnp.bfloat16), w1_ref[l],
                     preferred_element_type=jnp.float32) + b1_ref[l]
        # TODO(synk): HF MiniLM/BERT use exact erf GELU; tanh approx is close.
        h1 = jax.nn.gelu(h1, approximate=True)
        ffn = jnp.dot(h1.astype(jnp.bfloat16), w2_ref[l],
                      preferred_element_type=jnp.float32) + b2_ref[l]
        x = _layernorm(x + ffn, ln2_g_ref[l], ln2_b_ref[l])

    # ---- Attention-mask-weighted mean pooling (exact divide) ----------------
    summed = jnp.sum(x.reshape(tb, seq, H) * mask[:, :, None], axis=1)  # (TB, H)
    cnt = jnp.maximum(jnp.sum(mask, axis=-1, keepdims=True), 1.0)       # (TB, 1)
    o_ref[...] = summed / cnt


def fused_encode(ids, mask, params, *, num_layers, num_heads, head_dim, ffn,
                 seq, batch_tile=16):
    """ids: (B, S) int32; mask: (B, S) f32 -> pooled (B, H) f32."""
    B = ids.shape[0]
    TB = batch_tile                 # TB=16 -> M=128 rows per matmul (all gens);
    H = num_heads * head_dim        # bump to 32 on v6e/v7x to fill the 256 MXU.
    L, F, S = num_layers, ffn, seq
    Vp = params["word_emb"].shape[0]

    B_pad = pl.cdiv(B, TB) * TB
    if B_pad != B:                  # pad batch; padded rows have mask == 0
        ids = jnp.pad(ids, ((0, B_pad - B), (0, 0)))
        mask = jnp.pad(mask, ((0, B_pad - B), (0, 0)))

    blk = lambda b: (b, 0)
    c2 = lambda b: (0, 0)
    c3 = lambda b: (0, 0, 0)

    out = pl.pallas_call(
        functools.partial(_encoder_kernel, num_layers=L, num_heads=num_heads,
                          head_dim=head_dim, tb=TB, seq=S),
        out_shape=jax.ShapeDtypeStruct((B_pad, H), jnp.float32),
        grid_spec=pltpu.PrefetchScalarGridSpec(
            num_scalar_prefetch=0,
            grid=(B_pad // TB,),
            in_specs=[
                pl.BlockSpec((TB, S), blk),               # token ids
                pl.BlockSpec((TB, S), blk),               # attention mask
                pl.BlockSpec((Vp, H), c2),                # word_emb (bf16)
                pl.BlockSpec((S, H), c2),                 # pos_emb
                pl.BlockSpec((1, H), c2),                 # emb_ln gamma
                pl.BlockSpec((1, H), c2),                 # emb_ln beta
                pl.BlockSpec((L, H, 3 * H), c3),          # wqkv (bf16)
                pl.BlockSpec((L, 1, 3 * H), c3),          # bqkv
                pl.BlockSpec((L, H, H), c3),              # wo (bf16)
                pl.BlockSpec((L, 1, H), c3),              # bo
                pl.BlockSpec((L, 1, H), c3),              # ln1 gamma
                pl.BlockSpec((L, 1, H), c3),              # ln1 beta
                pl.BlockSpec((L, H, F), c3),              # w1 (bf16)
                pl.BlockSpec((L, 1, F), c3),              # b1
                pl.BlockSpec((L, F, H), c3),              # w2 (bf16)
                pl.BlockSpec((L, 1, H), c3),              # b2
                pl.BlockSpec((L, 1, H), c3),              # ln2 gamma
                pl.BlockSpec((L, 1, H), c3),              # ln2 beta
            ],
            out_specs=pl.BlockSpec((TB, H), blk),
        ),
        compiler_params=pltpu.CompilerParams(
            dimension_semantics=("parallel",)),           # megacore on v7x
    )(ids, mask,
      params["word_emb"], params["pos_emb"],
      params["emb_g"], params["emb_b"],
      params["wqkv"], params["bqkv"], params["wo"], params["bo"],
      params["ln1_g"], params["ln1_b"], params["w1"], params["b1"],
      params["w2"], params["b2"], params["ln2_g"], params["ln2_b"])
    return out[:B]


class VLMEncoderPallas:
    """Pallas equivalent of VLMEncoder: indices -> (len(indices), dimention) f32."""

    def __init__(self, data, dimention, *, vocab=100, hidden=128, heads=4,
                 layers=2, ffn=256, max_seq=8, batch_tile=16, key=None):
        assert hidden % heads == 0
        self.data = list(data)                 # stands in for the DataFrame
        self.dim = dimention
        self.vocab, self.H, self.nH = vocab, hidden, heads
        self.dh, self.L, self.F, self.S = hidden // heads, layers, ffn, max_seq
        self.TB = batch_tile

        if key is None:
            key = jax.random.PRNGKey(0)
        keys = iter(jax.random.split(key, 10))
        std = 0.02

        def nrm(shape):
            return (std * jax.random.normal(next(keys), shape)).astype(jnp.float32)

        H, L, F, S = hidden, layers, ffn, max_seq
        Vp = pl.cdiv(vocab, 128) * 128         # lane-dense vocab for one-hot matmul
        word = jnp.zeros((Vp, H), jnp.float32).at[:vocab].set(nrm((vocab, H)))

        self.params = dict(
            word_emb=word.astype(jnp.bfloat16),
            pos_emb=nrm((S, H)),
            emb_g=jnp.ones((1, H), jnp.float32),
            emb_b=jnp.zeros((1, H), jnp.float32),
            wqkv=nrm((L, H, 3 * H)).astype(jnp.bfloat16),
            bqkv=jnp.zeros((L, 1, 3 * H), jnp.float32),
            wo=nrm((L, H, H)).astype(jnp.bfloat16),
            bo=jnp.zeros((L, 1, H), jnp.float32),
            ln1_g=jnp.ones((L, 1, H), jnp.float32),
            ln1_b=jnp.zeros((L, 1, H), jnp.float32),
            w1=nrm((L, H, F)).astype(jnp.bfloat16),
            b1=jnp.zeros((L, 1, F), jnp.float32),
            w2=nrm((L, F, H)).astype(jnp.bfloat16),
            b2=jnp.zeros((L, 1, H), jnp.float32),
            ln2_g=jnp.ones((L, 1, H), jnp.float32),
            ln2_b=jnp.zeros((L, 1, H), jnp.float32),
        )

    # Deterministic toy tokenizer (glue; the real module uses the HF tokenizer).
    def _tokenize(self, sentences):
        B, S = len(sentences), self.S
        ids = [[0] * S for _ in range(B)]
        mask = [[0.0] * S for _ in range(B)]
        for i, sent in enumerate(sentences):
            words = sent.lower().split()[:S]
            for j, w in enumerate(words):
                ids[i][j] = (sum(ord(c) for c in w) % (self.vocab - 1)) + 1
                mask[i][j] = 1.0
        return jnp.asarray(ids, jnp.int32), jnp.asarray(mask, jnp.float32)

    def forward(self, indices):
        # pandas .loc lookup equivalent (host-side glue).
        idx = [int(i) for i in jax.device_get(jnp.asarray(indices)).reshape(-1)]
        sentences = [self.data[i] for i in idx]

        ids, mask = self._tokenize(sentences)
        pooled = fused_encode(ids, mask, self.params,
                              num_layers=self.L, num_heads=self.nH,
                              head_dim=self.dh, ffn=self.F, seq=self.S,
                              batch_tile=self.TB)
        # truncate_dim semantics of SentenceTransformer: keep first `dim` dims.
        return pooled[:, : self.dim].astype(jnp.float32)


if __name__ == "__main__":
    key = jax.random.PRNGKey(0)
    dimention = 32
    data = [
        "the quick brown fox jumps over the dog",
        "a recipe with tomatoes garlic and basil",
        "pallas tpu kernels encode sentences",
        "fused transformer layers stay resident in vmem",
    ]
    enc = VLMEncoderPallas(data, dimention, key=key)

    indices = jnp.asarray([0, 2], dtype=jnp.int32)
    emb = enc.forward(indices)
    emb = jax.block_until_ready(emb)

    assert emb.shape == (2, dimention), emb.shape
    assert emb.dtype == jnp.float32
    assert bool(jnp.all(jnp.isfinite(emb)))
    print("KERNEL_OK")
</pallas_src>

<mosaic_0001>
module attributes {stable_mosaic.version = 11 : i64} {
  func.func @_encoder_kernel(%arg0: i32, %arg1: memref<16x8xi32, #tpu.memory_space<vmem>>, %arg2: memref<16x8xf32, #tpu.memory_space<vmem>>, %arg3: memref<128x128xbf16, #tpu.memory_space<vmem>>, %arg4: memref<8x128xf32, #tpu.memory_space<vmem>>, %arg5: memref<1x128xf32, #tpu.memory_space<vmem>>, %arg6: memref<1x128xf32, #tpu.memory_space<vmem>>, %arg7: memref<2x128x384xbf16, #tpu.memory_space<vmem>>, %arg8: memref<2x1x384xf32, #tpu.memory_space<vmem>>, %arg9: memref<2x128x128xbf16, #tpu.memory_space<vmem>>, %arg10: memref<2x1x128xf32, #tpu.memory_space<vmem>>, %arg11: memref<2x1x128xf32, #tpu.memory_space<vmem>>, %arg12: memref<2x1x128xf32, #tpu.memory_space<vmem>>, %arg13: memref<2x128x256xbf16, #tpu.memory_space<vmem>>, %arg14: memref<2x1x256xf32, #tpu.memory_space<vmem>>, %arg15: memref<2x256x128xbf16, #tpu.memory_space<vmem>>, %arg16: memref<2x1x128xf32, #tpu.memory_space<vmem>>, %arg17: memref<2x1x128xf32, #tpu.memory_space<vmem>>, %arg18: memref<2x1x128xf32, #tpu.memory_space<vmem>>, %arg19: memref<16x128xf32, #tpu.memory_space<vmem>>) attributes {dimension_semantics = [#tpu.dimension_semantics<parallel>], iteration_bounds = array<i64: 1>, scalar_prefetch = 0 : i64, scratch_operands = 0 : i64, tpu.core_type = #tpu.core_type<tc>, window_params = [{transform_indices = @transform_0, window_bounds = array<i64: 16, 8>}, {transform_indices = @transform_1, window_bounds = array<i64: 16, 8>}, {pipeline_mode = #tpu.pipeline_mode<synchronous>, transform_indices = @transform_2, window_bounds = array<i64: 128, 128>}, {pipeline_mode = #tpu.pipeline_mode<synchronous>, transform_indices = @transform_3, window_bounds = array<i64: 8, 128>}, {pipeline_mode = #tpu.pipeline_mode<synchronous>, transform_indices = @transform_4, window_bounds = array<i64: 1, 128>}, {pipeline_mode = #tpu.pipeline_mode<synchronous>, transform_indices = @transform_5, window_bounds = array<i64: 1, 128>}, {pipeline_mode = #tpu.pipeline_mode<synchronous>, transform_indices = @transform_6, window_bounds = array<i64: 2, 128, 384>}, {pipeline_mode = #tpu.pipeline_mode<synchronous>, transform_indices = @transform_7, window_bounds = array<i64: 2, 1, 384>}, {pipeline_mode = #tpu.pipeline_mode<synchronous>, transform_indices = @transform_8, window_bounds = array<i64: 2, 128, 128>}, {pipeline_mode = #tpu.pipeline_mode<synchronous>, transform_indices = @transform_9, window_bounds = array<i64: 2, 1, 128>}, {pipeline_mode = #tpu.pipeline_mode<synchronous>, transform_indices = @transform_10, window_bounds = array<i64: 2, 1, 128>}, {pipeline_mode = #tpu.pipeline_mode<synchronous>, transform_indices = @transform_11, window_bounds = array<i64: 2, 1, 128>}, {pipeline_mode = #tpu.pipeline_mode<synchronous>, transform_indices = @transform_12, window_bounds = array<i64: 2, 128, 256>}, {pipeline_mode = #tpu.pipeline_mode<synchronous>, transform_indices = @transform_13, window_bounds = array<i64: 2, 1, 256>}, {pipeline_mode = #tpu.pipeline_mode<synchronous>, transform_indices = @transform_14, window_bounds = array<i64: 2, 256, 128>}, {pipeline_mode = #tpu.pipeline_mode<synchronous>, transform_indices = @transform_15, window_bounds = array<i64: 2, 1, 128>}, {pipeline_mode = #tpu.pipeline_mode<synchronous>, transform_indices = @transform_16, window_bounds = array<i64: 2, 1, 128>}, {pipeline_mode = #tpu.pipeline_mode<synchronous>, transform_indices = @transform_17, window_bounds = array<i64: 2, 1, 128>}, {transform_indices = @transform_18, window_bounds = array<i64: 16, 128>}]} {
    %c0 = arith.constant 0 : index
    %c0_0 = arith.constant 0 : index
    %0 = vector.load %arg1[%c0, %c0_0] : memref<16x8xi32, #tpu.memory_space<vmem>>, vector<16x8xi32>
    %c0_1 = arith.constant 0 : index
    %c0_2 = arith.constant 0 : index
    %1 = vector.load %arg2[%c0_1, %c0_2] : memref<16x8xf32, #tpu.memory_space<vmem>>, vector<16x8xf32>
    %2 = tpu.iota {dimensions = array<i32: 2>} : vector<16x8x128xi32>
    %3 = vector.shape_cast %0 : vector<16x8xi32> to vector<16x8x1xi32>
    %4 = vector.broadcast %3 : vector<16x8x1xi32> to vector<16x8x128xi32>
    %5 = arith.cmpi eq, %4, %2 : vector<16x8x128xi32>
    %6 = arith.extui %5 : vector<16x8x128xi1> to vector<16x8x128xi32>
    %7 = arith.sitofp %6 : vector<16x8x128xi32> to vector<16x8x128xf32>
    %8 = arith.truncf %7 : vector<16x8x128xf32> to vector<16x8x128xbf16>
    %9 = vector.shape_cast %8 : vector<16x8x128xbf16> to vector<128x128xbf16>
    %c0_3 = arith.constant 0 : index
    %c0_4 = arith.constant 0 : index
    %10 = vector.load %arg3[%c0_3, %c0_4] : memref<128x128xbf16, #tpu.memory_space<vmem>>, vector<128x128xbf16>
    %cst = arith.constant dense<0.000000e+00> : vector<128x128xf32>
    %11 = tpu.matmul %9, %10, %cst {dimension_numbers = #tpu.dot_dimension_numbers<[1], [0], [0], [1], [0, 0, 1, 1], [], []>} : vector<128x128xbf16>, vector<128x128xbf16>, vector<128x128xf32> -> vector<128x128xf32>
    %c0_5 = arith.constant 0 : index
    %c0_6 = arith.constant 0 : index
    %12 = vector.load %arg4[%c0_5, %c0_6] : memref<8x128xf32, #tpu.memory_space<vmem>>, vector<8x128xf32>
    %13 = vector.shape_cast %12 : vector<8x128xf32> to vector<1x8x128xf32>
    %14 = vector.shape_cast %13 : vector<1x8x128xf32> to vector<1x8x128xf32>
    %15 = vector.broadcast %14 : vector<1x8x128xf32> to vector<16x8x128xf32>
    %16 = vector.shape_cast %15 : vector<16x8x128xf32> to vector<128x128xf32>
    %17 = arith.addf %11, %16 : vector<128x128xf32>
    %c0_7 = arith.constant 0 : index
    %c0_8 = arith.constant 0 : index
    %18 = vector.load %arg5[%c0_7, %c0_8] : memref<1x128xf32, #tpu.memory_space<vmem>>, vector<1x128xf32>
    %c0_9 = arith.constant 0 : index
    %c0_10 = arith.constant 0 : index
    %19 = vector.load %arg6[%c0_9, %c0_10] : memref<1x128xf32, #tpu.memory_space<vmem>>, vector<1x128xf32>
    %cst_11 = arith.constant dense<0.000000e+00> : vector<128xf32>
    %20 = vector.multi_reduction <add>, %17, %cst_11 [1] : vector<128x128xf32> to vector<128xf32>
    %21 = vector.shape_cast %20 : vector<128xf32> to vector<128x1xf32>
    %cst_12 = arith.constant 1.280000e+02 : f32
    %22 = vector.broadcast %cst_12 : f32 to vector<128x1xf32>
    %23 = arith.divf %21, %22 : vector<128x1xf32>
    %24 = vector.broadcast %23 : vector<128x1xf32> to vector<128x128xf32>
    %25 = arith.subf %17, %24 : vector<128x128xf32>
    %26 = arith.mulf %25, %25 : vector<128x128xf32>
    %cst_13 = arith.constant dense<0.000000e+00> : vector<128xf32>
    %27 = vector.multi_reduction <add>, %26, %cst_13 [1] : vector<128x128xf32> to vector<128xf32>
    %28 = vector.shape_cast %27 : vector<128xf32> to vector<128x1xf32>
    %cst_14 = arith.constant 1.280000e+02 : f32
    %29 = vector.broadcast %cst_14 : f32 to vector<128x1xf32>
    %30 = arith.divf %28, %29 : vector<128x1xf32>
    %cst_15 = arith.constant 9.99999996E-13 : f32
    %31 = vector.broadcast %cst_15 : f32 to vector<128x1xf32>
    %32 = arith.addf %30, %31 : vector<128x1xf32>
    %33 = math.rsqrt %32 : vector<128x1xf32>
    %34 = vector.broadcast %33 : vector<128x1xf32> to vector<128x128xf32>
    %35 = arith.mulf %25, %34 : vector<128x128xf32>
    %36 = vector.broadcast %18 : vector<1x128xf32> to vector<128x128xf32>
    %37 = arith.mulf %35, %36 : vector<128x128xf32>
    %38 = vector.broadcast %19 : vector<1x128xf32> to vector<128x128xf32>
    %39 = arith.addf %37, %38 : vector<128x128xf32>
    %40 = tpu.iota {dimensions = array<i32: 2>} : vector<16x8x16xi32>
    %41 = tpu.iota {dimensions = array<i32: 0>} : vector<16x8x16xi32>
    %42 = arith.cmpi eq, %40, %41 : vector<16x8x16xi32>
    %43 = arith.extui %42 : vector<16x8x16xi1> to vector<16x8x16xi32>
    %44 = arith.sitofp %43 : vector<16x8x16xi32> to vector<16x8x16xf32>
    %45 = arith.truncf %44 : vector<16x8x16xf32> to vector<16x8x16xbf16>
    %46 = vector.shape_cast %45 : vector<16x8x16xbf16> to vector<128x16xbf16>
    %47 = vector.shape_cast %1 : vector<16x8xf32> to vector<16x8x1xf32>
    %cst_16 = arith.constant 5.000000e-01 : f32
    %48 = vector.broadcast %cst_16 : f32 to vector<16x8x1xf32>
    %49 = arith.cmpf ogt, %47, %48 : vector<16x8x1xf32>
    %50 = vector.broadcast %49 : vector<16x8x1xi1> to vector<16x8x16xi1>
    %51 = arith.andi %42, %50 : vector<16x8x16xi1>
    %52 = arith.extui %51 : vector<16x8x16xi1> to vector<16x8x16xi32>
    %53 = arith.sitofp %52 : vector<16x8x16xi32> to vector<16x8x16xf32>
    %54 = arith.truncf %53 : vector<16x8x16xf32> to vector<16x8x16xbf16>
    %55 = vector.shape_cast %54 : vector<16x8x16xbf16> to vector<128x16xbf16>
    %cst_17 = arith.constant dense<0.000000e+00> : vector<128x128xf32>
    %56 = tpu.matmul %46, %55, %cst_17 {dimension_numbers = #tpu.dot_dimension_numbers<[1], [1], [0], [0], [0, 0, 1, 0], [], []>} : vector<128x16xbf16>, vector<128x16xbf16>, vector<128x128xf32> -> vector<128x128xf32>
    %cst_18 = arith.constant 5.000000e-01 : f32
    %57 = vector.broadcast %cst_18 : f32 to vector<128x128xf32>
    %58 = arith.cmpf ogt, %56, %57 : vector<128x128xf32>
    %cst_19 = arith.constant 0.000000e+00 : f32
    %cst_20 = arith.constant -1.000000e+09 : f32
    %59 = vector.broadcast %cst_19 : f32 to vector<128x128xf32>
    %60 = vector.broadcast %cst_20 : f32 to vector<128x128xf32>
    %61 = arith.select %58, %59, %60 : vector<128x128xi1>, vector<128x128xf32>
    %62 = arith.truncf %39 : vector<128x128xf32> to vector<128x128xbf16>
    %c0_21 = arith.constant 0 : index
    %c0_22 = arith.constant 0 : index
    %c0_23 = arith.constant 0 : index
    %63 = vector.load %arg7[%c0_21, %c0_22, %c0_23] : memref<2x128x384xbf16, #tpu.memory_space<vmem>>, vector<1x128x384xbf16>
    %64 = vector.shape_cast %63 : vector<1x128x384xbf16> to vector<128x384xbf16>
    %cst_24 = arith.constant dense<0.000000e+00> : vector<128x384xf32>
    %65 = tpu.matmul %62, %64, %cst_24 {dimension_numbers = #tpu.dot_dimension_numbers<[1], [0], [0], [1], [0, 0, 1, 1], [], []>} : vector<128x128xbf16>, vector<128x384xbf16>, vector<128x384xf32> -> vector<128x384xf32>
    %c0_25 = arith.constant 0 : index
    %c0_26 = arith.constant 0 : index
    %c0_27 = arith.constant 0 : index
    %66 = vector.load %arg8[%c0_25, %c0_26, %c0_27] : memref<2x1x384xf32, #tpu.memory_space<vmem>>, vector<1x1x384xf32>
    %67 = vector.shape_cast %66 : vector<1x1x384xf32> to vector<1x384xf32>
    %68 = vector.broadcast %67 : vector<1x384xf32> to vector<128x384xf32>
    %69 = arith.addf %65, %68 : vector<128x384xf32>
    %70 = arith.truncf %69 : vector<128x384xf32> to vector<128x384xbf16>
    %c0_28 = arith.constant 0 : index
    %c0_29 = arith.constant 0 : index
    %c0_30 = arith.constant 0 : index
    %71 = vector.load %arg9[%c0_28, %c0_29, %c0_30] : memref<2x128x128xbf16, #tpu.memory_space<vmem>>, vector<1x128x128xbf16>
    %72 = vector.shape_cast %71 : vector<1x128x128xbf16> to vector<128x128xbf16>
    %cst_31 = arith.constant 0.000000e+00 : f32
    %73 = vector.broadcast %cst_31 : f32 to vector<128x128xf32>
    %74 = vector.extract_strided_slice %70 {offsets = [0, 0], sizes = [128, 32], strides = [1, 1]} : vector<128x384xbf16> to vector<128x32xbf16>
    %75 = vector.extract_strided_slice %70 {offsets = [0, 128], sizes = [128, 32], strides = [1, 1]} : vector<128x384xbf16> to vector<128x32xbf16>
    %76 = vector.extract_strided_slice %70 {offsets = [0, 256], sizes = [128, 32], strides = [1, 1]} : vector<128x384xbf16> to vector<128x32xbf16>
    %cst_32 = arith.constant dense<0.000000e+00> : vector<128x128xf32>
    %77 = tpu.matmul %74, %75, %cst_32 {dimension_numbers = #tpu.dot_dimension_numbers<[1], [1], [0], [0], [0, 0, 1, 0], [], []>} : vector<128x32xbf16>, vector<128x32xbf16>, vector<128x128xf32> -> vector<128x128xf32>
    %cst_33 = arith.constant 0.176776692 : f32
    %78 = vector.broadcast %cst_33 : f32 to vector<128x128xf32>
    %79 = arith.mulf %77, %78 : vector<128x128xf32>
    %80 = arith.addf %79, %61 : vector<128x128xf32>
    %cst_34 = arith.constant dense<0xFF800000> : vector<128xf32>
    %81 = vector.multi_reduction <maximumf>, %80, %cst_34 [1] : vector<128x128xf32> to vector<128xf32>
    %82 = vector.shape_cast %81 : vector<128xf32> to vector<128x1xf32>
    %83 = vector.broadcast %82 : vector<128x1xf32> to vector<128x128xf32>
    %84 = arith.subf %80, %83 : vector<128x128xf32>
    %85 = math.exp %84 : vector<128x128xf32>
    %cst_35 = arith.constant dense<0.000000e+00> : vector<128xf32>
    %86 = vector.multi_reduction <add>, %85, %cst_35 [1] : vector<128x128xf32> to vector<128xf32>
    %87 = vector.shape_cast %86 : vector<128xf32> to vector<128x1xf32>
    %88 = tpu.reciprocal %87 {approx = true} : vector<128x1xf32> -> vector<128x1xf32>
    %89 = vector.broadcast %88 : vector<128x1xf32> to vector<128x128xf32>
    %90 = arith.mulf %85, %89 : vector<128x128xf32>
    %91 = arith.truncf %90 : vector<128x128xf32> to vector<128x128xbf16>
    %cst_36 = arith.constant dense<0.000000e+00> : vector<128x32xf32>
    %92 = tpu.matmul %91, %76, %cst_36 {dimension_numbers = #tpu.dot_dimension_numbers<[1], [0], [0], [1], [0, 0, 1, 1], [], []>} : vector<128x128xbf16>, vector<128x32xbf16>, vector<128x32xf32> -> vector<128x32xf32>
    %93 = arith.truncf %92 : vector<128x32xf32> to vector<128x32xbf16>
    %94 = vector.extract_strided_slice %72 {offsets = [0, 0], sizes = [32, 128], strides = [1, 1]} : vector<128x128xbf16> to vector<32x128xbf16>
    %cst_37 = arith.constant dense<0.000000e+00> : vector<128x128xf32>
    %95 = tpu.matmul %93, %94, %cst_37 {dimension_numbers = #tpu.dot_dimension_numbers<[1], [0], [0], [1], [0, 0, 1, 1], [], []>} : vector<128x32xbf16>, vector<32x128xbf16>, vector<128x128xf32> -> vector<128x128xf32>
    %96 = arith.addf %73, %95 : vector<128x128xf32>
    %97 = vector.extract_strided_slice %70 {offsets = [0, 32], sizes = [128, 32], strides = [1, 1]} : vector<128x384xbf16> to vector<128x32xbf16>
    %98 = vector.extract_strided_slice %70 {offsets = [0, 160], sizes = [128, 32], strides = [1, 1]} : vector<128x384xbf16> to vector<128x32xbf16>
    %99 = vector.extract_strided_slice %70 {offsets = [0, 288], sizes = [128, 32], strides = [1, 1]} : vector<128x384xbf16> to vector<128x32xbf16>
    %cst_38 = arith.constant dense<0.000000e+00> : vector<128x128xf32>
    %100 = tpu.matmul %97, %98, %cst_38 {dimension_numbers = #tpu.dot_dimension_numbers<[1], [1], [0], [0], [0, 0, 1, 0], [], []>} : vector<128x32xbf16>, vector<128x32xbf16>, vector<128x128xf32> -> vector<128x128xf32>
    %cst_39 = arith.constant 0.176776692 : f32
    %101 = vector.broadcast %cst_39 : f32 to vector<128x128xf32>
    %102 = arith.mulf %100, %101 : vector<128x128xf32>
    %103 = arith.addf %102, %61 : vector<128x128xf32>
    %cst_40 = arith.constant dense<0xFF800000> : vector<128xf32>
    %104 = vector.multi_reduction <maximumf>, %103, %cst_40 [1] : vector<128x128xf32> to vector<128xf32>
    %105 = vector.shape_cast %104 : vector<128xf32> to vector<128x1xf32>
    %106 = vector.broadcast %105 : vector<128x1xf32> to vector<128x128xf32>
    %107 = arith.subf %103, %106 : vector<128x128xf32>
    %108 = math.exp %107 : vector<128x128xf32>
    %cst_41 = arith.constant dense<0.000000e+00> : vector<128xf32>
    %109 = vector.multi_reduction <add>, %108, %cst_41 [1] : vector<128x128xf32> to vector<128xf32>
    %110 = vector.shape_cast %109 : vector<128xf32> to vector<128x1xf32>
    %111 = tpu.reciprocal %110 {approx = true} : vector<128x1xf32> -> vector<128x1xf32>
    %112 = vector.broadcast %111 : vector<128x1xf32> to vector<128x128xf32>
    %113 = arith.mulf %108, %112 : vector<128x128xf32>
    %114 = arith.truncf %113 : vector<128x128xf32> to vector<128x128xbf16>
    %cst_42 = arith.constant dense<0.000000e+00> : vector<128x32xf32>
    %115 = tpu.matmul %114, %99, %cst_42 {dimension_numbers = #tpu.dot_dimension_numbers<[1], [0], [0], [1], [0, 0, 1, 1], [], []>} : vector<128x128xbf16>, vector<128x32xbf16>, vector<128x32xf32> -> vector<128x32xf32>
    %116 = arith.truncf %115 : vector<128x32xf32> to vector<128x32xbf16>
    %117 = vector.extract_strided_slice %72 {offsets = [32, 0], sizes = [32, 128], strides = [1, 1]} : vector<128x128xbf16> to vector<32x128xbf16>
    %cst_43 = arith.constant dense<0.000000e+00> : vector<128x128xf32>
    %118 = tpu.matmul %116, %117, %cst_43 {dimension_numbers = #tpu.dot_dimension_numbers<[1], [0], [0], [1], [0, 0, 1, 1], [], []>} : vector<128x32xbf16>, vector<32x128xbf16>, vector<128x128xf32> -> vector<128x128xf32>
    %119 = arith.addf %96, %118 : vector<128x128xf32>
    %120 = vector.extract_strided_slice %70 {offsets = [0, 64], sizes = [128, 32], strides = [1, 1]} : vector<128x384xbf16> to vector<128x32xbf16>
    %121 = vector.extract_strided_slice %70 {offsets = [0, 192], sizes = [128, 32], strides = [1, 1]} : vector<128x384xbf16> to vector<128x32xbf16>
    %122 = vector.extract_strided_slice %70 {offsets = [0, 320], sizes = [128, 32], strides = [1, 1]} : vector<128x384xbf16> to vector<128x32xbf16>
    %cst_44 = arith.constant dense<0.000000e+00> : vector<128x128xf32>
    %123 = tpu.matmul %120, %121, %cst_44 {dimension_numbers = #tpu.dot_dimension_numbers<[1], [1], [0], [0], [0, 0, 1, 0], [], []>} : vector<128x32xbf16>, vector<128x32xbf16>, vector<128x128xf32> -> vector<128x128xf32>
    %cst_45 = arith.constant 0.176776692 : f32
    %124 = vector.broadcast %cst_45 : f32 to vector<128x128xf32>
    %125 = arith.mulf %123, %124 : vector<128x128xf32>
    %126 = arith.addf %125, %61 : vector<128x128xf32>
    %cst_46 = arith.constant dense<0xFF800000> : vector<128xf32>
    %127 = vector.multi_reduction <maximumf>, %126, %cst_46 [1] : vector<128x128xf32> to vector<128xf32>
    %128 = vector.shape_cast %127 : vector<128xf32> to vector<128x1xf32>
    %129 = vector.broadcast %128 : vector<128x1xf32> to vector<128x128xf32>
    %130 = arith.subf %126, %129 : vector<128x128xf32>
    %131 = math.exp %130 : vector<128x128xf32>
    %cst_47 = arith.constant dense<0.000000e+00> : vector<128xf32>
    %132 = vector.multi_reduction <add>, %131, %cst_47 [1] : vector<128x128xf32> to vector<128xf32>
    %133 = vector.shape_cast %132 : vector<128xf32> to vector<128x1xf32>
    %134 = tpu.reciprocal %133 {approx = true} : vector<128x1xf32> -> vector<128x1xf32>
    %135 = vector.broadcast %134 : vector<128x1xf32> to vector<128x128xf32>
    %136 = arith.mulf %131, %135 : vector<128x128xf32>
    %137 = arith.truncf %136 : vector<128x128xf32> to vector<128x128xbf16>
    %cst_48 = arith.constant dense<0.000000e+00> : vector<128x32xf32>
    %138 = tpu.matmul %137, %122, %cst_48 {dimension_numbers = #tpu.dot_dimension_numbers<[1], [0], [0], [1], [0, 0, 1, 1], [], []>} : vector<128x128xbf16>, vector<128x32xbf16>, vector<128x32xf32> -> vector<128x32xf32>
    %139 = arith.truncf %138 : vector<128x32xf32> to vector<128x32xbf16>
    %140 = vector.extract_strided_slice %72 {offsets = [64, 0], sizes = [32, 128], strides = [1, 1]} : vector<128x128xbf16> to vector<32x128xbf16>
    %cst_49 = arith.constant dense<0.000000e+00> : vector<128x128xf32>
    %141 = tpu.matmul %139, %140, %cst_49 {dimension_numbers = #tpu.dot_dimension_numbers<[1], [0], [0], [1], [0, 0, 1, 1], [], []>} : vector<128x32xbf16>, vector<32x128xbf16>, vector<128x128xf32> -> vector<128x128xf32>
    %142 = arith.addf %119, %141 : vector<128x128xf32>
    %143 = vector.extract_strided_slice %70 {offsets = [0, 96], sizes = [128, 32], strides = [1, 1]} : vector<128x384xbf16> to vector<128x32xbf16>
    %144 = vector.extract_strided_slice %70 {offsets = [0, 224], sizes = [128, 32], strides = [1, 1]} : vector<128x384xbf16> to vector<128x32xbf16>
    %145 = vector.extract_strided_slice %70 {offsets = [0, 352], sizes = [128, 32], strides = [1, 1]} : vector<128x384xbf16> to vector<128x32xbf16>
    %cst_50 = arith.constant dense<0.000000e+00> : vector<128x128xf32>
    %146 = tpu.matmul %143, %144, %cst_50 {dimension_numbers = #tpu.dot_dimension_numbers<[1], [1], [0], [0], [0, 0, 1, 0], [], []>} : vector<128x32xbf16>, vector<128x32xbf16>, vector<128x128xf32> -> vector<128x128xf32>
    %cst_51 = arith.constant 0.176776692 : f32
    %147 = vector.broadcast %cst_51 : f32 to vector<128x128xf32>
    %148 = arith.mulf %146, %147 : vector<128x128xf32>
    %149 = arith.addf %148, %61 : vector<128x128xf32>
    %cst_52 = arith.constant dense<0xFF800000> : vector<128xf32>
    %150 = vector.multi_reduction <maximumf>, %149, %cst_52 [1] : vector<128x128xf32> to vector<128xf32>
    %151 = vector.shape_cast %150 : vector<128xf32> to vector<128x1xf32>
    %152 = vector.broadcast %151 : vector<128x1xf32> to vector<128x128xf32>
    %153 = arith.subf %149, %152 : vector<128x128xf32>
    %154 = math.exp %153 : vector<128x128xf32>
    %cst_53 = arith.constant dense<0.000000e+00> : vector<128xf32>
    %155 = vector.multi_reduction <add>, %154, %cst_53 [1] : vector<128x128xf32> to vector<128xf32>
    %156 = vector.shape_cast %155 : vector<128xf32> to vector<128x1xf32>
    %157 = tpu.reciprocal %156 {approx = true} : vector<128x1xf32> -> vector<128x1xf32>
    %158 = vector.broadcast %157 : vector<128x1xf32> to vector<128x128xf32>
    %159 = arith.mulf %154, %158 : vector<128x128xf32>
    %160 = arith.truncf %159 : vector<128x128xf32> to vector<128x128xbf16>
    %cst_54 = arith.constant dense<0.000000e+00> : vector<128x32xf32>
    %161 = tpu.matmul %160, %145, %cst_54 {dimension_numbers = #tpu.dot_dimension_numbers<[1], [0], [0], [1], [0, 0, 1, 1], [], []>} : vector<128x128xbf16>, vector<128x32xbf16>, vector<128x32xf32> -> vector<128x32xf32>
    %162 = arith.truncf %161 : vector<128x32xf32> to vector<128x32xbf16>
    %163 = vector.extract_strided_slice %72 {offsets = [96, 0], sizes = [32, 128], strides = [1, 1]} : vector<128x128xbf16> to vector<32x128xbf16>
    %cst_55 = arith.constant dense<0.000000e+00> : vector<128x128xf32>
    %164 = tpu.matmul %162, %163, %cst_55 {dimension_numbers = #tpu.dot_dimension_numbers<[1], [0], [0], [1], [0, 0, 1, 1], [], []>} : vector<128x32xbf16>, vector<32x128xbf16>, vector<128x128xf32> -> vector<128x128xf32>
    %165 = arith.addf %142, %164 : vector<128x128xf32>
    %c0_56 = arith.constant 0 : index
    %c0_57 = arith.constant 0 : index
    %c0_58 = arith.constant 0 : index
    %166 = vector.load %arg10[%c0_56, %c0_57, %c0_58] : memref<2x1x128xf32, #tpu.memory_space<vmem>>, vector<1x1x128xf32>
    %167 = vector.shape_cast %166 : vector<1x1x128xf32> to vector<1x128xf32>
    %168 = vector.broadcast %167 : vector<1x128xf32> to vector<128x128xf32>
    %169 = arith.addf %165, %168 : vector<128x128xf32>
    %170 = arith.addf %39, %169 : vector<128x128xf32>
    %c0_59 = arith.constant 0 : index
    %c0_60 = arith.constant 0 : index
    %c0_61 = arith.constant 0 : index
    %171 = vector.load %arg11[%c0_59, %c0_60, %c0_61] : memref<2x1x128xf32, #tpu.memory_space<vmem>>, vector<1x1x128xf32>
    %172 = vector.shape_cast %171 : vector<1x1x128xf32> to vector<1x128xf32>
    %c0_62 = arith.constant 0 : index
    %c0_63 = arith.constant 0 : index
    %c0_64 = arith.constant 0 : index
    %173 = vector.load %arg12[%c0_62, %c0_63, %c0_64] : memref<2x1x128xf32, #tpu.memory_space<vmem>>, vector<1x1x128xf32>
    %174 = vector.shape_cast %173 : vector<1x1x128xf32> to vector<1x128xf32>
    %cst_65 = arith.constant dense<0.000000e+00> : vector<128xf32>
    %175 = vector.multi_reduction <add>, %170, %cst_65 [1] : vector<128x128xf32> to vector<128xf32>
    %176 = vector.shape_cast %175 : vector<128xf32> to vector<128x1xf32>
    %cst_66 = arith.constant 1.280000e+02 : f32
    %177 = vector.broadcast %cst_66 : f32 to vector<128x1xf32>
    %178 = arith.divf %176, %177 : vector<128x1xf32>
    %179 = vector.broadcast %178 : vector<128x1xf32> to vector<128x128xf32>
    %180 = arith.subf %170, %179 : vector<128x128xf32>
    %181 = arith.mulf %180, %180 : vector<128x128xf32>
    %cst_67 = arith.constant dense<0.000000e+00> : vector<128xf32>
    %182 = vector.multi_reduction <add>, %181, %cst_67 [1] : vector<128x128xf32> to vector<128xf32>
    %183 = vector.shape_cast %182 : vector<128xf32> to vector<128x1xf32>
    %cst_68 = arith.constant 1.280000e+02 : f32
    %184 = vector.broadcast %cst_68 : f32 to vector<128x1xf32>
    %185 = arith.divf %183, %184 : vector<128x1xf32>
    %cst_69 = arith.constant 9.99999996E-13 : f32
    %186 = vector.broadcast %cst_69 : f32 to vector<128x1xf32>
    %187 = arith.addf %185, %186 : vector<128x1xf32>
    %188 = math.rsqrt %187 : vector<128x1xf32>
    %189 = vector.broadcast %188 : vector<128x1xf32> to vector<128x128xf32>
    %190 = arith.mulf %180, %189 : vector<128x128xf32>
    %191 = vector.broadcast %172 : vector<1x128xf32> to vector<128x128xf32>
    %192 = arith.mulf %190, %191 : vector<128x128xf32>
    %193 = vector.broadcast %174 : vector<1x128xf32> to vector<128x128xf32>
    %194 = arith.addf %192, %193 : vector<128x128xf32>
    %195 = arith.truncf %194 : vector<128x128xf32> to vector<128x128xbf16>
    %c0_70 = arith.constant 0 : index
    %c0_71 = arith.constant 0 : index
    %c0_72 = arith.constant 0 : index
    %196 = vector.load %arg13[%c0_70, %c0_71, %c0_72] : memref<2x128x256xbf16, #tpu.memory_space<vmem>>, vector<1x128x256xbf16>
    %197 = vector.shape_cast %196 : vector<1x128x256xbf16> to vector<128x256xbf16>
    %cst_73 = arith.constant dense<0.000000e+00> : vector<128x256xf32>
    %198 = tpu.matmul %195, %197, %cst_73 {dimension_numbers = #tpu.dot_dimension_numbers<[1], [0], [0], [1], [0, 0, 1, 1], [], []>} : vector<128x128xbf16>, vector<128x256xbf16>, vector<128x256xf32> -> vector<128x256xf32>
    %c0_74 = arith.constant 0 : index
    %c0_75 = arith.constant 0 : index
    %c0_76 = arith.constant 0 : index
    %199 = vector.load %arg14[%c0_74, %c0_75, %c0_76] : memref<2x1x256xf32, #tpu.memory_space<vmem>>, vector<1x1x256xf32>
    %200 = vector.shape_cast %199 : vector<1x1x256xf32> to vector<1x256xf32>
    %201 = vector.broadcast %200 : vector<1x256xf32> to vector<128x256xf32>
    %202 = arith.addf %198, %201 : vector<128x256xf32>
    %203 = arith.mulf %202, %202 : vector<128x256xf32>
    %204 = arith.mulf %202, %203 : vector<128x256xf32>
    %cst_77 = arith.constant 4.471500e-02 : f32
    %205 = vector.broadcast %cst_77 : f32 to vector<128x256xf32>
    %206 = arith.mulf %205, %204 : vector<128x256xf32>
    %207 = arith.addf %202, %206 : vector<128x256xf32>
    %cst_78 = arith.constant 0.797884583 : f32
    %208 = vector.broadcast %cst_78 : f32 to vector<128x256xf32>
    %209 = arith.mulf %208, %207 : vector<128x256xf32>
    %210 = math.tanh %209 : vector<128x256xf32>
    %cst_79 = arith.constant 1.000000e+00 : f32
    %211 = vector.broadcast %cst_79 : f32 to vector<128x256xf32>
    %212 = arith.addf %211, %210 : vector<128x256xf32>
    %cst_80 = arith.constant 5.000000e-01 : f32
    %213 = vector.broadcast %cst_80 : f32 to vector<128x256xf32>
    %214 = arith.mulf %213, %212 : vector<128x256xf32>
    %215 = arith.mulf %202, %214 : vector<128x256xf32>
    %216 = arith.truncf %215 : vector<128x256xf32> to vector<128x256xbf16>
    %c0_81 = arith.constant 0 : index
    %c0_82 = arith.constant 0 : index
    %c0_83 = arith.constant 0 : index
    %217 = vector.load %arg15[%c0_81, %c0_82, %c0_83] : memref<2x256x128xbf16, #tpu.memory_space<vmem>>, vector<1x256x128xbf16>
    %218 = vector.shape_cast %217 : vector<1x256x128xbf16> to vector<256x128xbf16>
    %cst_84 = arith.constant dense<0.000000e+00> : vector<128x128xf32>
    %219 = tpu.matmul %216, %218, %cst_84 {dimension_numbers = #tpu.dot_dimension_numbers<[1], [0], [0], [1], [0, 0, 1, 1], [], []>} : vector<128x256xbf16>, vector<256x128xbf16>, vector<128x128xf32> -> vector<128x128xf32>
    %c0_85 = arith.constant 0 : index
    %c0_86 = arith.constant 0 : index
    %c0_87 = arith.constant 0 : index
    %220 = vector.load %arg16[%c0_85, %c0_86, %c0_87] : memref<2x1x128xf32, #tpu.memory_space<vmem>>, vector<1x1x128xf32>
    %221 = vector.shape_cast %220 : vector<1x1x128xf32> to vector<1x128xf32>
    %222 = vector.broadcast %221 : vector<1x128xf32> to vector<128x128xf32>
    %223 = arith.addf %219, %222 : vector<128x128xf32>
    %224 = arith.addf %194, %223 : vector<128x128xf32>
    %c0_88 = arith.constant 0 : index
    %c0_89 = arith.constant 0 : index
    %c0_90 = arith.constant 0 : index
    %225 = vector.load %arg17[%c0_88, %c0_89, %c0_90] : memref<2x1x128xf32, #tpu.memory_space<vmem>>, vector<1x1x128xf32>
    %226 = vector.shape_cast %225 : vector<1x1x128xf32> to vector<1x128xf32>
    %c0_91 = arith.constant 0 : index
    %c0_92 = arith.constant 0 : index
    %c0_93 = arith.constant 0 : index
    %227 = vector.load %arg18[%c0_91, %c0_92, %c0_93] : memref<2x1x128xf32, #tpu.memory_space<vmem>>, vector<1x1x128xf32>
    %228 = vector.shape_cast %227 : vector<1x1x128xf32> to vector<1x128xf32>
    %cst_94 = arith.constant dense<0.000000e+00> : vector<128xf32>
    %229 = vector.multi_reduction <add>, %224, %cst_94 [1] : vector<128x128xf32> to vector<128xf32>
    %230 = vector.shape_cast %229 : vector<128xf32> to vector<128x1xf32>
    %cst_95 = arith.constant 1.280000e+02 : f32
    %231 = vector.broadcast %cst_95 : f32 to vector<128x1xf32>
    %232 = arith.divf %230, %231 : vector<128x1xf32>
    %233 = vector.broadcast %232 : vector<128x1xf32> to vector<128x128xf32>
    %234 = arith.subf %224, %233 : vector<128x128xf32>
    %235 = arith.mulf %234, %234 : vector<128x128xf32>
    %cst_96 = arith.constant dense<0.000000e+00> : vector<128xf32>
    %236 = vector.multi_reduction <add>, %235, %cst_96 [1] : vector<128x128xf32> to vector<128xf32>
    %237 = vector.shape_cast %236 : vector<128xf32> to vector<128x1xf32>
    %cst_97 = arith.constant 1.280000e+02 : f32
    %238 = vector.broadcast %cst_97 : f32 to vector<128x1xf32>
    %239 = arith.divf %237, %238 : vector<128x1xf32>
    %cst_98 = arith.constant 9.99999996E-13 : f32
    %240 = vector.broadcast %cst_98 : f32 to vector<128x1xf32>
    %241 = arith.addf %239, %240 : vector<128x1xf32>
    %242 = math.rsqrt %241 : vector<128x1xf32>
    %243 = vector.broadcast %242 : vector<128x1xf32> to vector<128x128xf32>
    %244 = arith.mulf %234, %243 : vector<128x128xf32>
    %245 = vector.broadcast %226 : vector<1x128xf32> to vector<128x128xf32>
    %246 = arith.mulf %244, %245 : vector<128x128xf32>
    %247 = vector.broadcast %228 : vector<1x128xf32> to vector<128x128xf32>
    %248 = arith.addf %246, %247 : vector<128x128xf32>
    %249 = arith.truncf %248 : vector<128x128xf32> to vector<128x128xbf16>
    %c1 = arith.constant 1 : index
    %c0_99 = arith.constant 0 : index
    %c0_100 = arith.constant 0 : index
    %250 = vector.load %arg7[%c1, %c0_99, %c0_100] : memref<2x128x384xbf16, #tpu.memory_space<vmem>>, vector<1x128x384xbf16>
    %251 = vector.shape_cast %250 : vector<1x128x384xbf16> to vector<128x384xbf16>
    %cst_101 = arith.constant dense<0.000000e+00> : vector<128x384xf32>
    %252 = tpu.matmul %249, %251, %cst_101 {dimension_numbers = #tpu.dot_dimension_numbers<[1], [0], [0], [1], [0, 0, 1, 1], [], []>} : vector<128x128xbf16>, vector<128x384xbf16>, vector<128x384xf32> -> vector<128x384xf32>
    %c1_102 = arith.constant 1 : index
    %c0_103 = arith.constant 0 : index
    %c0_104 = arith.constant 0 : index
    %253 = vector.load %arg8[%c1_102, %c0_103, %c0_104] : memref<2x1x384xf32, #tpu.memory_space<vmem>>, vector<1x1x384xf32>
    %254 = vector.shape_cast %253 : vector<1x1x384xf32> to vector<1x384xf32>
    %255 = vector.broadcast %254 : vector<1x384xf32> to vector<128x384xf32>
    %256 = arith.addf %252, %255 : vector<128x384xf32>
    %257 = arith.truncf %256 : vector<128x384xf32> to vector<128x384xbf16>
    %c1_105 = arith.constant 1 : index
    %c0_106 = arith.constant 0 : index
    %c0_107 = arith.constant 0 : index
    %258 = vector.load %arg9[%c1_105, %c0_106, %c0_107] : memref<2x128x128xbf16, #tpu.memory_space<vmem>>, vector<1x128x128xbf16>
    %259 = vector.shape_cast %258 : vector<1x128x128xbf16> to vector<128x128xbf16>
    %cst_108 = arith.constant 0.000000e+00 : f32
    %260 = vector.broadcast %cst_108 : f32 to vector<128x128xf32>
    %261 = vector.extract_strided_slice %257 {offsets = [0, 0], sizes = [128, 32], strides = [1, 1]} : vector<128x384xbf16> to vector<128x32xbf16>
    %262 = vector.extract_strided_slice %257 {offsets = [0, 128], sizes = [128, 32], strides = [1, 1]} : vector<128x384xbf16> to vector<128x32xbf16>
    %263 = vector.extract_strided_slice %257 {offsets = [0, 256], sizes = [128, 32], strides = [1, 1]} : vector<128x384xbf16> to vector<128x32xbf16>
    %cst_109 = arith.constant dense<0.000000e+00> : vector<128x128xf32>
    %264 = tpu.matmul %261, %262, %cst_109 {dimension_numbers = #tpu.dot_dimension_numbers<[1], [1], [0], [0], [0, 0, 1, 0], [], []>} : vector<128x32xbf16>, vector<128x32xbf16>, vector<128x128xf32> -> vector<128x128xf32>
    %cst_110 = arith.constant 0.176776692 : f32
    %265 = vector.broadcast %cst_110 : f32 to vector<128x128xf32>
    %266 = arith.mulf %264, %265 : vector<128x128xf32>
    %267 = arith.addf %266, %61 : vector<128x128xf32>
    %cst_111 = arith.constant dense<0xFF800000> : vector<128xf32>
    %268 = vector.multi_reduction <maximumf>, %267, %cst_111 [1] : vector<128x128xf32> to vector<128xf32>
    %269 = vector.shape_cast %268 : vector<128xf32> to vector<128x1xf32>
    %270 = vector.broadcast %269 : vector<128x1xf32> to vector<128x128xf32>
    %271 = arith.subf %267, %270 : vector<128x128xf32>
    %272 = math.exp %271 : vector<128x128xf32>
    %cst_112 = arith.constant dense<0.000000e+00> : vector<128xf32>
    %273 = vector.multi_reduction <add>, %272, %cst_112 [1] : vector<128x128xf32> to vector<128xf32>
    %274 = vector.shape_cast %273 : vector<128xf32> to vector<128x1xf32>
    %275 = tpu.reciprocal %274 {approx = true} : vector<128x1xf32> -> vector<128x1xf32>
    %276 = vector.broadcast %275 : vector<128x1xf32> to vector<128x128xf32>
    %277 = arith.mulf %272, %276 : vector<128x128xf32>
    %278 = arith.truncf %277 : vector<128x128xf32> to vector<128x128xbf16>
    %cst_113 = arith.constant dense<0.000000e+00> : vector<128x32xf32>
    %279 = tpu.matmul %278, %263, %cst_113 {dimension_numbers = #tpu.dot_dimension_numbers<[1], [0], [0], [1], [0, 0, 1, 1], [], []>} : vector<128x128xbf16>, vector<128x32xbf16>, vector<128x32xf32> -> vector<128x32xf32>
    %280 = arith.truncf %279 : vector<128x32xf32> to vector<128x32xbf16>
    %281 = vector.extract_strided_slice %259 {offsets = [0, 0], sizes = [32, 128], strides = [1, 1]} : vector<128x128xbf16> to vector<32x128xbf16>
    %cst_114 = arith.constant dense<0.000000e+00> : vector<128x128xf32>
    %282 = tpu.matmul %280, %281, %cst_114 {dimension_numbers = #tpu.dot_dimension_numbers<[1], [0], [0], [1], [0, 0, 1, 1], [], []>} : vector<128x32xbf16>, vector<32x128xbf16>, vector<128x128xf32> -> vector<128x128xf32>
    %283 = arith.addf %260, %282 : vector<128x128xf32>
    %284 = vector.extract_strided_slice %257 {offsets = [0, 32], sizes = [128, 32], strides = [1, 1]} : vector<128x384xbf16> to vector<128x32xbf16>
    %285 = vector.extract_strided_slice %257 {offsets = [0, 160], sizes = [128, 32], strides = [1, 1]} : vector<128x384xbf16> to vector<128x32xbf16>
    %286 = vector.extract_strided_slice %257 {offsets = [0, 288], sizes = [128, 32], strides = [1, 1]} : vector<128x384xbf16> to vector<128x32xbf16>
    %cst_115 = arith.constant dense<0.000000e+00> : vector<128x128xf32>
    %287 = tpu.matmul %284, %285, %cst_115 {dimension_numbers = #tpu.dot_dimension_numbers<[1], [1], [0], [0], [0, 0, 1, 0], [], []>} : vector<128x32xbf16>, vector<128x32xbf16>, vector<128x128xf32> -> vector<128x128xf32>
    %cst_116 = arith.constant 0.176776692 : f32
    %288 = vector.broadcast %cst_116 : f32 to vector<128x128xf32>
    %289 = arith.mulf %287, %288 : vector<128x128xf32>
    %290 = arith.addf %289, %61 : vector<128x128xf32>
    %cst_117 = arith.constant dense<0xFF800000> : vector<128xf32>
    %291 = vector.multi_reduction <maximumf>, %290, %cst_117 [1] : vector<128x128xf32> to vector<128xf32>
    %292 = vector.shape_cast %291 : vector<128xf32> to vector<128x1xf32>
    %293 = vector.broadcast %292 : vector<128x1xf32> to vector<128x128xf32>
    %294 = arith.subf %290, %293 : vector<128x128xf32>
    %295 = math.exp %294 : vector<128x128xf32>
    %cst_118 = arith.constant dense<0.000000e+00> : vector<128xf32>
    %296 = vector.multi_reduction <add>, %295, %cst_118 [1] : vector<128x128xf32> to vector<128xf32>
    %297 = vector.shape_cast %296 : vector<128xf32> to vector<128x1xf32>
    %298 = tpu.reciprocal %297 {approx = true} : vector<128x1xf32> -> vector<128x1xf32>
    %299 = vector.broadcast %298 : vector<128x1xf32> to vector<128x128xf32>
    %300 = arith.mulf %295, %299 : vector<128x128xf32>
    %301 = arith.truncf %300 : vector<128x128xf32> to vector<128x128xbf16>
    %cst_119 = arith.constant dense<0.000000e+00> : vector<128x32xf32>
    %302 = tpu.matmul %301, %286, %cst_119 {dimension_numbers = #tpu.dot_dimension_numbers<[1], [0], [0], [1], [0, 0, 1, 1], [], []>} : vector<128x128xbf16>, vector<128x32xbf16>, vector<128x32xf32> -> vector<128x32xf32>
    %303 = arith.truncf %302 : vector<128x32xf32> to vector<128x32xbf16>
    %304 = vector.extract_strided_slice %259 {offsets = [32, 0], sizes = [32, 128], strides = [1, 1]} : vector<128x128xbf16> to vector<32x128xbf16>
    %cst_120 = arith.constant dense<0.000000e+00> : vector<128x128xf32>
    %305 = tpu.matmul %303, %304, %cst_120 {dimension_numbers = #tpu.dot_dimension_numbers<[1], [0], [0], [1], [0, 0, 1, 1], [], []>} : vector<128x32xbf16>, vector<32x128xbf16>, vector<128x128xf32> -> vector<128x128xf32>
    %306 = arith.addf %283, %305 : vector<128x128xf32>
    %307 = vector.extract_strided_slice %257 {offsets = [0, 64], sizes = [128, 32], strides = [1, 1]} : vector<128x384xbf16> to vector<128x32xbf16>
    %308 = vector.extract_strided_slice %257 {offsets = [0, 192], sizes = [128, 32], strides = [1, 1]} : vector<128x384xbf16> to vector<128x32xbf16>
    %309 = vector.extract_strided_slice %257 {offsets = [0, 320], sizes = [128, 32], strides = [1, 1]} : vector<128x384xbf16> to vector<128x32xbf16>
    %cst_121 = arith.constant dense<0.000000e+00> : vector<128x128xf32>
    %310 = tpu.matmul %307, %308, %cst_121 {dimension_numbers = #tpu.dot_dimension_numbers<[1], [1], [0], [0], [0, 0, 1, 0], [], []>} : vector<128x32xbf16>, vector<128x32xbf16>, vector<128x128xf32> -> vector<128x128xf32>
    %cst_122 = arith.constant 0.176776692 : f32
    %311 = vector.broadcast %cst_122 : f32 to vector<128x128xf32>
    %312 = arith.mulf %310, %311 : vector<128x128xf32>
    %313 = arith.addf %312, %61 : vector<128x128xf32>
    %cst_123 = arith.constant dense<0xFF800000> : vector<128xf32>
    %314 = vector.multi_reduction <maximumf>, %313, %cst_123 [1] : vector<128x128xf32> to vector<128xf32>
    %315 = vector.shape_cast %314 : vector<128xf32> to vector<128x1xf32>
    %316 = vector.broadcast %315 : vector<128x1xf32> to vector<128x128xf32>
    %317 = arith.subf %313, %316 : vector<128x128xf32>
    %318 = math.exp %317 : vector<128x128xf32>
    %cst_124 = arith.constant dense<0.000000e+00> : vector<128xf32>
    %319 = vector.multi_reduction <add>, %318, %cst_124 [1] : vector<128x128xf32> to vector<128xf32>
    %320 = vector.shape_cast %319 : vector<128xf32> to vector<128x1xf32>
    %321 = tpu.reciprocal %320 {approx = true} : vector<128x1xf32> -> vector<128x1xf32>
    %322 = vector.broadcast %321 : vector<128x1xf32> to vector<128x128xf32>
    %323 = arith.mulf %318, %322 : vector<128x128xf32>
    %324 = arith.truncf %323 : vector<128x128xf32> to vector<128x128xbf16>
    %cst_125 = arith.constant dense<0.000000e+00> : vector<128x32xf32>
    %325 = tpu.matmul %324, %309, %cst_125 {dimension_numbers = #tpu.dot_dimension_numbers<[1], [0], [0], [1], [0, 0, 1, 1], [], []>} : vector<128x128xbf16>, vector<128x32xbf16>, vector<128x32xf32> -> vector<128x32xf32>
    %326 = arith.truncf %325 : vector<128x32xf32> to vector<128x32xbf16>
    %327 = vector.extract_strided_slice %259 {offsets = [64, 0], sizes = [32, 128], strides = [1, 1]} : vector<128x128xbf16> to vector<32x128xbf16>
    %cst_126 = arith.constant dense<0.000000e+00> : vector<128x128xf32>
    %328 = tpu.matmul %326, %327, %cst_126 {dimension_numbers = #tpu.dot_dimension_numbers<[1], [0], [0], [1], [0, 0, 1, 1], [], []>} : vector<128x32xbf16>, vector<32x128xbf16>, vector<128x128xf32> -> vector<128x128xf32>
    %329 = arith.addf %306, %328 : vector<128x128xf32>
    %330 = vector.extract_strided_slice %257 {offsets = [0, 96], sizes = [128, 32], strides = [1, 1]} : vector<128x384xbf16> to vector<128x32xbf16>
    %331 = vector.extract_strided_slice %257 {offsets = [0, 224], sizes = [128, 32], strides = [1, 1]} : vector<128x384xbf16> to vector<128x32xbf16>
    %332 = vector.extract_strided_slice %257 {offsets = [0, 352], sizes = [128, 32], strides = [1, 1]} : vector<128x384xbf16> to vector<128x32xbf16>
    %cst_127 = arith.constant dense<0.000000e+00> : vector<128x128xf32>
    %333 = tpu.matmul %330, %331, %cst_127 {dimension_numbers = #tpu.dot_dimension_numbers<[1], [1], [0], [0], [0, 0, 1, 0], [], []>} : vector<128x32xbf16>, vector<128x32xbf16>, vector<128x128xf32> -> vector<128x128xf32>
    %cst_128 = arith.constant 0.176776692 : f32
    %334 = vector.broadcast %cst_128 : f32 to vector<128x128xf32>
    %335 = arith.mulf %333, %334 : vector<128x128xf32>
    %336 = arith.addf %335, %61 : vector<128x128xf32>
    %cst_129 = arith.constant dense<0xFF800000> : vector<128xf32>
    %337 = vector.multi_reduction <maximumf>, %336, %cst_129 [1] : vector<128x128xf32> to vector<128xf32>
    %338 = vector.shape_cast %337 : vector<128xf32> to vector<128x1xf32>
    %339 = vector.broadcast %338 : vector<128x1xf32> to vector<128x128xf32>
    %340 = arith.subf %336, %339 : vector<128x128xf32>
    %341 = math.exp %340 : vector<128x128xf32>
    %cst_130 = arith.constant dense<0.000000e+00> : vector<128xf32>
    %342 = vector.multi_reduction <add>, %341, %cst_130 [1] : vector<128x128xf32> to vector<128xf32>
    %343 = vector.shape_cast %342 : vector<128xf32> to vector<128x1xf32>
    %344 = tpu.reciprocal %343 {approx = true} : vector<128x1xf32> -> vector<128x1xf32>
    %345 = vector.broadcast %344 : vector<128x1xf32> to vector<128x128xf32>
    %346 = arith.mulf %341, %345 : vector<128x128xf32>
    %347 = arith.truncf %346 : vector<128x128xf32> to vector<128x128xbf16>
    %cst_131 = arith.constant dense<0.000000e+00> : vector<128x32xf32>
    %348 = tpu.matmul %347, %332, %cst_131 {dimension_numbers = #tpu.dot_dimension_numbers<[1], [0], [0], [1], [0, 0, 1, 1], [], []>} : vector<128x128xbf16>, vector<128x32xbf16>, vector<128x32xf32> -> vector<128x32xf32>
    %349 = arith.truncf %348 : vector<128x32xf32> to vector<128x32xbf16>
    %350 = vector.extract_strided_slice %259 {offsets = [96, 0], sizes = [32, 128], strides = [1, 1]} : vector<128x128xbf16> to vector<32x128xbf16>
    %cst_132 = arith.constant dense<0.000000e+00> : vector<128x128xf32>
    %351 = tpu.matmul %349, %350, %cst_132 {dimension_numbers = #tpu.dot_dimension_numbers<[1], [0], [0], [1], [0, 0, 1, 1], [], []>} : vector<128x32xbf16>, vector<32x128xbf16>, vector<128x128xf32> -> vector<128x128xf32>
    %352 = arith.addf %329, %351 : vector<128x128xf32>
    %c1_133 = arith.constant 1 : index
    %c0_134 = arith.constant 0 : index
    %c0_135 = arith.constant 0 : index
    %353 = vector.load %arg10[%c1_133, %c0_134, %c0_135] : memref<2x1x128xf32, #tpu.memory_space<vmem>>, vector<1x1x128xf32>
    %354 = vector.shape_cast %353 : vector<1x1x128xf32> to vector<1x128xf32>
    %355 = vector.broadcast %354 : vector<1x128xf32> to vector<128x128xf32>
    %356 = arith.addf %352, %355 : vector<128x128xf32>
    %357 = arith.addf %248, %356 : vector<128x128xf32>
    %c1_136 = arith.constant 1 : index
    %c0_137 = arith.constant 0 : index
    %c0_138 = arith.constant 0 : index
    %358 = vector.load %arg11[%c1_136, %c0_137, %c0_138] : memref<2x1x128xf32, #tpu.memory_space<vmem>>, vector<1x1x128xf32>
    %359 = vector.shape_cast %358 : vector<1x1x128xf32> to vector<1x128xf32>
    %c1_139 = arith.constant 1 : index
    %c0_140 = arith.constant 0 : index
    %c0_141 = arith.constant 0 : index
    %360 = vector.load %arg12[%c1_139, %c0_140, %c0_141] : memref<2x1x128xf32, #tpu.memory_space<vmem>>, vector<1x1x128xf32>
    %361 = vector.shape_cast %360 : vector<1x1x128xf32> to vector<1x128xf32>
    %cst_142 = arith.constant dense<0.000000e+00> : vector<128xf32>
    %362 = vector.multi_reduction <add>, %357, %cst_142 [1] : vector<128x128xf32> to vector<128xf32>
    %363 = vector.shape_cast %362 : vector<128xf32> to vector<128x1xf32>
    %cst_143 = arith.constant 1.280000e+02 : f32
    %364 = vector.broadcast %cst_143 : f32 to vector<128x1xf32>
    %365 = arith.divf %363, %364 : vector<128x1xf32>
    %366 = vector.broadcast %365 : vector<128x1xf32> to vector<128x128xf32>
    %367 = arith.subf %357, %366 : vector<128x128xf32>
    %368 = arith.mulf %367, %367 : vector<128x128xf32>
    %cst_144 = arith.constant dense<0.000000e+00> : vector<128xf32>
    %369 = vector.multi_reduction <add>, %368, %cst_144 [1] : vector<128x128xf32> to vector<128xf32>
    %370 = vector.shape_cast %369 : vector<128xf32> to vector<128x1xf32>
    %cst_145 = arith.constant 1.280000e+02 : f32
    %371 = vector.broadcast %cst_145 : f32 to vector<128x1xf32>
    %372 = arith.divf %370, %371 : vector<128x1xf32>
    %cst_146 = arith.constant 9.99999996E-13 : f32
    %373 = vector.broadcast %cst_146 : f32 to vector<128x1xf32>
    %374 = arith.addf %372, %373 : vector<128x1xf32>
    %375 = math.rsqrt %374 : vector<128x1xf32>
    %376 = vector.broadcast %375 : vector<128x1xf32> to vector<128x128xf32>
    %377 = arith.mulf %367, %376 : vector<128x128xf32>
    %378 = vector.broadcast %359 : vector<1x128xf32> to vector<128x128xf32>
    %379 = arith.mulf %377, %378 : vector<128x128xf32>
    %380 = vector.broadcast %361 : vector<1x128xf32> to vector<128x128xf32>
    %381 = arith.addf %379, %380 : vector<128x128xf32>
    %382 = arith.truncf %381 : vector<128x128xf32> to vector<128x128xbf16>
    %c1_147 = arith.constant 1 : index
    %c0_148 = arith.constant 0 : index
    %c0_149 = arith.constant 0 : index
    %383 = vector.load %arg13[%c1_147, %c0_148, %c0_149] : memref<2x128x256xbf16, #tpu.memory_space<vmem>>, vector<1x128x256xbf16>
    %384 = vector.shape_cast %383 : vector<1x128x256xbf16> to vector<128x256xbf16>
    %cst_150 = arith.constant dense<0.000000e+00> : vector<128x256xf32>
    %385 = tpu.matmul %382, %384, %cst_150 {dimension_numbers = #tpu.dot_dimension_numbers<[1], [0], [0], [1], [0, 0, 1, 1], [], []>} : vector<128x128xbf16>, vector<128x256xbf16>, vector<128x256xf32> -> vector<128x256xf32>
    %c1_151 = arith.constant 1 : index
    %c0_152 = arith.constant 0 : index
    %c0_153 = arith.constant 0 : index
    %386 = vector.load %arg14[%c1_151, %c0_152, %c0_153] : memref<2x1x256xf32, #tpu.memory_space<vmem>>, vector<1x1x256xf32>
    %387 = vector.shape_cast %386 : vector<1x1x256xf32> to vector<1x256xf32>
    %388 = vector.broadcast %387 : vector<1x256xf32> to vector<128x256xf32>
    %389 = arith.addf %385, %388 : vector<128x256xf32>
    %390 = arith.mulf %389, %389 : vector<128x256xf32>
    %391 = arith.mulf %389, %390 : vector<128x256xf32>
    %cst_154 = arith.constant 4.471500e-02 : f32
    %392 = vector.broadcast %cst_154 : f32 to vector<128x256xf32>
    %393 = arith.mulf %392, %391 : vector<128x256xf32>
    %394 = arith.addf %389, %393 : vector<128x256xf32>
    %cst_155 = arith.constant 0.797884583 : f32
    %395 = vector.broadcast %cst_155 : f32 to vector<128x256xf32>
    %396 = arith.mulf %395, %394 : vector<128x256xf32>
    %397 = math.tanh %396 : vector<128x256xf32>
    %cst_156 = arith.constant 1.000000e+00 : f32
    %398 = vector.broadcast %cst_156 : f32 to vector<128x256xf32>
    %399 = arith.addf %398, %397 : vector<128x256xf32>
    %cst_157 = arith.constant 5.000000e-01 : f32
    %400 = vector.broadcast %cst_157 : f32 to vector<128x256xf32>
    %401 = arith.mulf %400, %399 : vector<128x256xf32>
    %402 = arith.mulf %389, %401 : vector<128x256xf32>
    %403 = arith.truncf %402 : vector<128x256xf32> to vector<128x256xbf16>
    %c1_158 = arith.constant 1 : index
    %c0_159 = arith.constant 0 : index
    %c0_160 = arith.constant 0 : index
    %404 = vector.load %arg15[%c1_158, %c0_159, %c0_160] : memref<2x256x128xbf16, #tpu.memory_space<vmem>>, vector<1x256x128xbf16>
    %405 = vector.shape_cast %404 : vector<1x256x128xbf16> to vector<256x128xbf16>
    %cst_161 = arith.constant dense<0.000000e+00> : vector<128x128xf32>
    %406 = tpu.matmul %403, %405, %cst_161 {dimension_numbers = #tpu.dot_dimension_numbers<[1], [0], [0], [1], [0, 0, 1, 1], [], []>} : vector<128x256xbf16>, vector<256x128xbf16>, vector<128x128xf32> -> vector<128x128xf32>
    %c1_162 = arith.constant 1 : index
    %c0_163 = arith.constant 0 : index
    %c0_164 = arith.constant 0 : index
    %407 = vector.load %arg16[%c1_162, %c0_163, %c0_164] : memref<2x1x128xf32, #tpu.memory_space<vmem>>, vector<1x1x128xf32>
    %408 = vector.shape_cast %407 : vector<1x1x128xf32> to vector<1x128xf32>
    %409 = vector.broadcast %408 : vector<1x128xf32> to vector<128x128xf32>
    %410 = arith.addf %406, %409 : vector<128x128xf32>
    %411 = arith.addf %381, %410 : vector<128x128xf32>
    %c1_165 = arith.constant 1 : index
    %c0_166 = arith.constant 0 : index
    %c0_167 = arith.constant 0 : index
    %412 = vector.load %arg17[%c1_165, %c0_166, %c0_167] : memref<2x1x128xf32, #tpu.memory_space<vmem>>, vector<1x1x128xf32>
    %413 = vector.shape_cast %412 : vector<1x1x128xf32> to vector<1x128xf32>
    %c1_168 = arith.constant 1 : index
    %c0_169 = arith.constant 0 : index
    %c0_170 = arith.constant 0 : index
    %414 = vector.load %arg18[%c1_168, %c0_169, %c0_170] : memref<2x1x128xf32, #tpu.memory_space<vmem>>, vector<1x1x128xf32>
    %415 = vector.shape_cast %414 : vector<1x1x128xf32> to vector<1x128xf32>
    %cst_171 = arith.constant dense<0.000000e+00> : vector<128xf32>
    %416 = vector.multi_reduction <add>, %411, %cst_171 [1] : vector<128x128xf32> to vector<128xf32>
    %417 = vector.shape_cast %416 : vector<128xf32> to vector<128x1xf32>
    %cst_172 = arith.constant 1.280000e+02 : f32
    %418 = vector.broadcast %cst_172 : f32 to vector<128x1xf32>
    %419 = arith.divf %417, %418 : vector<128x1xf32>
    %420 = vector.broadcast %419 : vector<128x1xf32> to vector<128x128xf32>
    %421 = arith.subf %411, %420 : vector<128x128xf32>
    %422 = arith.mulf %421, %421 : vector<128x128xf32>
    %cst_173 = arith.constant dense<0.000000e+00> : vector<128xf32>
    %423 = vector.multi_reduction <add>, %422, %cst_173 [1] : vector<128x128xf32> to vector<128xf32>
    %424 = vector.shape_cast %423 : vector<128xf32> to vector<128x1xf32>
    %cst_174 = arith.constant 1.280000e+02 : f32
    %425 = vector.broadcast %cst_174 : f32 to vector<128x1xf32>
    %426 = arith.divf %424, %425 : vector<128x1xf32>
    %cst_175 = arith.constant 9.99999996E-13 : f32
    %427 = vector.broadcast %cst_175 : f32 to vector<128x1xf32>
    %428 = arith.addf %426, %427 : vector<128x1xf32>
    %429 = math.rsqrt %428 : vector<128x1xf32>
    %430 = vector.broadcast %429 : vector<128x1xf32> to vector<128x128xf32>
    %431 = arith.mulf %421, %430 : vector<128x128xf32>
    %432 = vector.broadcast %413 : vector<1x128xf32> to vector<128x128xf32>
    %433 = arith.mulf %431, %432 : vector<128x128xf32>
    %434 = vector.broadcast %415 : vector<1x128xf32> to vector<128x128xf32>
    %435 = arith.addf %433, %434 : vector<128x128xf32>
    %436 = vector.shape_cast %435 : vector<128x128xf32> to vector<16x8x128xf32>
    %437 = vector.shape_cast %1 : vector<16x8xf32> to vector<16x8x1xf32>
    %438 = vector.broadcast %437 : vector<16x8x1xf32> to vector<16x8x128xf32>
    %439 = arith.mulf %436, %438 : vector<16x8x128xf32>
    %cst_176 = arith.constant dense<0.000000e+00> : vector<16x128xf32>
    %440 = vector.multi_reduction <add>, %439, %cst_176 [1] : vector<16x8x128xf32> to vector<16x128xf32>
    %cst_177 = arith.constant dense<0.000000e+00> : vector<16xf32>
    %441 = vector.multi_reduction <add>, %1, %cst_177 [1] : vector<16x8xf32> to vector<16xf32>
    %442 = vector.shape_cast %441 : vector<16xf32> to vector<16x1xf32>
    %cst_178 = arith.constant 1.000000e+00 : f32
    %443 = vector.broadcast %cst_178 : f32 to vector<16x1xf32>
    %444 = arith.maximumf %442, %443 : vector<16x1xf32>
    %445 = vector.broadcast %444 : vector<16x1xf32> to vector<16x128xf32>
    %446 = arith.divf %440, %445 : vector<16x128xf32>
    %c0_179 = arith.constant 0 : index
    %c0_180 = arith.constant 0 : index
    %447 = vector.load %arg19[%c0_179, %c0_180] : memref<16x128xf32, #tpu.memory_space<vmem>>, vector<16x128xf32>
    tpu.vector_store %arg19[%c0_179, %c0_180], %446 {strides = array<i32>} : memref<16x128xf32, #tpu.memory_space<vmem>>, vector<16x128xf32>,
    return
  }
  func.func @transform_0(%arg0: i32) -> (i32, i32) {
    %c0_i32 = arith.constant 0 : i32
    %c0_i32_0 = arith.constant 0 : i32
    return %arg0, %c0_i32 : i32, i32
  }
  func.func @transform_1(%arg0: i32) -> (i32, i32) {
    %c0_i32 = arith.constant 0 : i32
    %c0_i32_0 = arith.constant 0 : i32
    return %arg0, %c0_i32 : i32, i32
  }
  func.func @transform_2(%arg0: i32) -> (i32, i32) {
    %c0_i32 = arith.constant 0 : i32
    %c0_i32_0 = arith.constant 0 : i32
    %c0_i32_1 = arith.constant 0 : i32
    return %c0_i32, %c0_i32_0 : i32, i32
  }
  func.func @transform_3(%arg0: i32) -> (i32, i32) {
    %c0_i32 = arith.constant 0 : i32
    %c0_i32_0 = arith.constant 0 : i32
    %c0_i32_1 = arith.constant 0 : i32
    return %c0_i32, %c0_i32_0 : i32, i32
  }
  func.func @transform_4(%arg0: i32) -> (i32, i32) {
    %c0_i32 = arith.constant 0 : i32
    %c0_i32_0 = arith.constant 0 : i32
    %c0_i32_1 = arith.constant 0 : i32
    return %c0_i32, %c0_i32_0 : i32, i32
  }
  func.func @transform_5(%arg0: i32) -> (i32, i32) {
    %c0_i32 = arith.constant 0 : i32
    %c0_i32_0 = arith.constant 0 : i32
    %c0_i32_1 = arith.constant 0 : i32
    return %c0_i32, %c0_i32_0 : i32, i32
  }
  func.func @transform_6(%arg0: i32) -> (i32, i32, i32) {
    %c0_i32 = arith.constant 0 : i32
    %c0_i32_0 = arith.constant 0 : i32
    %c0_i32_1 = arith.constant 0 : i32
    %c0_i32_2 = arith.constant 0 : i32
    return %c0_i32, %c0_i32_0, %c0_i32_1 : i32, i32, i32
  }
  func.func @transform_7(%arg0: i32) -> (i32, i32, i32) {
    %c0_i32 = arith.constant 0 : i32
    %c0_i32_0 = arith.constant 0 : i32
    %c0_i32_1 = arith.constant 0 : i32
    %c0_i32_2 = arith.constant 0 : i32
    return %c0_i32, %c0_i32_0, %c0_i32_1 : i32, i32, i32
  }
  func.func @transform_8(%arg0: i32) -> (i32, i32, i32) {
    %c0_i32 = arith.constant 0 : i32
    %c0_i32_0 = arith.constant 0 : i32
    %c0_i32_1 = arith.constant 0 : i32
    %c0_i32_2 = arith.constant 0 : i32
    return %c0_i32, %c0_i32_0, %c0_i32_1 : i32, i32, i32
  }
  func.func @transform_9(%arg0: i32) -> (i32, i32, i32) {
    %c0_i32 = arith.constant 0 : i32
    %c0_i32_0 = arith.constant 0 : i32
    %c0_i32_1 = arith.constant 0 : i32
    %c0_i32_2 = arith.constant 0 : i32
    return %c0_i32, %c0_i32_0, %c0_i32_1 : i32, i32, i32
  }
  func.func @transform_10(%arg0: i32) -> (i32, i32, i32) {
    %c0_i32 = arith.constant 0 : i32
    %c0_i32_0 = arith.constant 0 : i32
    %c0_i32_1 = arith.constant 0 : i32
    %c0_i32_2 = arith.constant 0 : i32
    return %c0_i32, %c0_i32_0, %c0_i32_1 : i32, i32, i32
  }
  func.func @transform_11(%arg0: i32) -> (i32, i32, i32) {
    %c0_i32 = arith.constant 0 : i32
    %c0_i32_0 = arith.constant 0 : i32
    %c0_i32_1 = arith.constant 0 : i32
    %c0_i32_2 = arith.constant 0 : i32
    return %c0_i32, %c0_i32_0, %c0_i32_1 : i32, i32, i32
  }
  func.func @transform_12(%arg0: i32) -> (i32, i32, i32) {
    %c0_i32 = arith.constant 0 : i32
    %c0_i32_0 = arith.constant 0 : i32
    %c0_i32_1 = arith.constant 0 : i32
    %c0_i32_2 = arith.constant 0 : i32
    return %c0_i32, %c0_i32_0, %c0_i32_1 : i32, i32, i32
  }
  func.func @transform_13(%arg0: i32) -> (i32, i32, i32) {
    %c0_i32 = arith.constant 0 : i32
    %c0_i32_0 = arith.constant 0 : i32
    %c0_i32_1 = arith.constant 0 : i32
    %c0_i32_2 = arith.constant 0 : i32
    return %c0_i32, %c0_i32_0, %c0_i32_1 : i32, i32, i32
  }
  func.func @transform_14(%arg0: i32) -> (i32, i32, i32) {
    %c0_i32 = arith.constant 0 : i32
    %c0_i32_0 = arith.constant 0 : i32
    %c0_i32_1 = arith.constant 0 : i32
    %c0_i32_2 = arith.constant 0 : i32
    return %c0_i32, %c0_i32_0, %c0_i32_1 : i32, i32, i32
  }
  func.func @transform_15(%arg0: i32) -> (i32, i32, i32) {
    %c0_i32 = arith.constant 0 : i32
    %c0_i32_0 = arith.constant 0 : i32
    %c0_i32_1 = arith.constant 0 : i32
    %c0_i32_2 = arith.constant 0 : i32
    return %c0_i32, %c0_i32_0, %c0_i32_1 : i32, i32, i32
  }
  func.func @transform_16(%arg0: i32) -> (i32, i32, i32) {
    %c0_i32 = arith.constant 0 : i32
    %c0_i32_0 = arith.constant 0 : i32
    %c0_i32_1 = arith.constant 0 : i32
    %c0_i32_2 = arith.constant 0 : i32
    return %c0_i32, %c0_i32_0, %c0_i32_1 : i32, i32, i32
  }
  func.func @transform_17(%arg0: i32) -> (i32, i32, i32) {
    %c0_i32 = arith.constant 0 : i32
    %c0_i32_0 = arith.constant 0 : i32
    %c0_i32_1 = arith.constant 0 : i32
    %c0_i32_2 = arith.constant 0 : i32
    return %c0_i32, %c0_i32_0, %c0_i32_1 : i32, i32, i32
  }
  func.func @transform_18(%arg0: i32) -> (i32, i32) {
    %c0_i32 = arith.constant 0 : i32
    %c0_i32_0 = arith.constant 0 : i32
    return %arg0, %c0_i32 : i32, i32
  }
}

</mosaic_0001>

<bundles_post_ra>
// kernel: tpu_custom_call.1
= control target key start
LH: loop header
LB: loop body
LE: loop exit
PB: predicated region body
PF: predicated region fallthrough
CT: control target
= control target key end

     0   :  { %s17915_s0 = inlined_call_operand.vmem [shape: s32[16,8], index: 0, kind: input, shape index: {}]   ;;  %s17916_s1 = inlined_call_operand.vmem [shape: f32[16,8], index: 1, kind: input, shape index: {}]   ;;  %s17917_s2 = inlined_call_operand.hbm [shape: bf16[128,128], index: 2, kind: input, shape index: {}]   ;;  %s17918_s3 = inlined_call_operand.vmem [shape: f32[8,128], index: 3, kind: input, shape index: {}]   ;;  %s17919_s4 = inlined_call_operand.vmem [shape: f32[1,128], index: 4, kind: input, shape index: {}]   ;;  %s17920_s5 = inlined_call_operand.vmem [shape: f32[1,128], index: 5, kind: input, shape index: {}]   ;;  %s17921_s6 = inlined_call_operand.hbm [shape: bf16[2,128,384], index: 6, kind: input, shape index: {}]   ;;  %s17922_s7 = inlined_call_operand.vmem [shape: f32[2,1,384], index: 7, kind: input, shape index: {}]   ;;  %s17923_s8 = inlined_call_operand.hbm [shape: bf16[2,128,128], index: 8, kind: input, shape index: {}]   ;;  %s17924_s9 = inlined_call_operand.vmem [shape: f32[2,1,128], index: 9, kind: input, shape index: {}]   ;;  %s17925_s10 = inlined_call_operand.vmem [shape: f32[2,1,128], index: 10, kind: input, shape index: {}]   ;;  %s17926_s11 = inlined_call_operand.vmem [shape: f32[2,1,128], index: 11, kind: input, shape index: {}]   ;;  %s17927_s12 = inlined_call_operand.hbm [shape: bf16[2,128,256], index: 12, kind: input, shape index: {}]   ;;  %s17928_s13 = inlined_call_operand.vmem [shape: f32[2,1,256], index: 13, kind: input, shape index: {}]   ;;  %s17929_s14 = inlined_call_operand.hbm [shape: bf16[2,256,128], index: 14, kind: input, shape index: {}]   ;;  %s17930_s15 = inlined_call_operand.vmem [shape: f32[2,1,128], index: 15, kind: input, shape index: {}]   ;;  %s17931_s16 = inlined_call_operand.vmem [shape: f32[2,1,128], index: 16, kind: input, shape index: {}]   ;;  %s17932_s17 = inlined_call_operand.vmem [shape: f32[2,1,128], index: 17, kind: input, shape index: {}]   ;;  %s17933_s18 = inlined_call_operand.hbm [shape: f32[16,128], index: 18, kind: output, shape index: {}]  }
   0x1   :  { %18111 = sst [smem:[#allocation94_spill]] %s17915_s0 }
   0x2   :  { %18112 = sst [smem:[#allocation95_spill]] %s17916_s1 }
   0x3   :  { %18113 = sst [smem:[#allocation96_spill]] %s17917_s2 }
   0x4   :  { %23 = vsyncpa [#allocation3], 0 }
   0x5   :  { %24 = vsyncpa [#allocation6], 0 }
   0x6   :  { %25 = vsyncpa [#allocation9], 0 }
   0x7   :  { %26 = vsyncpa [#allocation4], 0  ;;  %s13022_s27 = smov [#allocation5]   ;;  %s12882_s0 = scalar_lea.hbm %s17921_s6, 6144 }
   0x8   :  { %s54_s28 = sshll.u32 %s13022_s27, 4  ;;  %p12883_p0 = scmp.ne.s32.totalorder %s17921_s6, %s12882_s0  ;;  %s55_s28 = int_to_ptr.vmem [resolvable:$true] %s54_s28 }
   0x9   :  { %p12886_p1 = scmp.lt.u32.totalorder %s12882_s0, %s17921_s6 }
   0xb   :  { %p12888_p2 = pnand %p12886_p1, %p12883_p0 }
   0xd   :  { %12891 = shalt.err (!%p12888_p2)
}
   0xe   :  { %s12892_s22 = scalar_lea.vmem %s55_s28, 6144  ;;  %p12897_p4 = scmp.lt.s32.totalorder %s55_s28, %s55_s28 }
   0xf   :  { %p12893_p3 = scmp.ne.s32.totalorder %s55_s28, %s12892_s22  ;;  %p12898_p5 = scmp.lt.s32.totalorder %s12892_s22, %s12892_s22 }
  0x11   :  { %p12899_p6 = por %p12898_p5, %p12897_p4 }
  0x13   :  { %p12900_p7 = pnand %p12899_p6, %p12893_p3 }
  0x15   :  { %12903 = shalt.err (!%p12900_p7)
}
  0x16   :  { %s13023_s2 = smov 192   ;;  %s13024_s23 = smov 12  }
  0x17   :  { %60 = dma.hbm_to_vmem [thread:$0]  %s17921_s6, 6144, %s55_s28, [#allocation6], %s13023_s2, %s13023_s2, %s13024_s23  }
  0x18   :  { %s13025_s26 = smov [#allocation8]   ;;  %s12904_s0 = scalar_lea.hbm %s17927_s12, 4096 }
  0x19   :  { %s86_s27 = sshll.u32 %s13025_s26, 4  ;;  %p12905_p8 = scmp.ne.s32.totalorder %s17927_s12, %s12904_s0  ;;  %s87_s27 = int_to_ptr.vmem [resolvable:$true] %s86_s27 }
  0x1a   :  { %p12908_p9 = scmp.lt.u32.totalorder %s12904_s0, %s17927_s12 }
  0x1c   :  { %p12910_p10 = pnand %p12908_p9, %p12905_p8 }
  0x1e   :  { %12913 = shalt.err (!%p12910_p10)
}
  0x1f   :  { %s12914_s22 = scalar_lea.vmem %s87_s27, 4096  ;;  %p12919_p12 = scmp.lt.s32.totalorder %s87_s27, %s87_s27 }
  0x20   :  { %p12915_p11 = scmp.ne.s32.totalorder %s87_s27, %s12914_s22  ;;  %p12920_p13 = scmp.lt.s32.totalorder %s12914_s22, %s12914_s22 }
  0x22   :  { %p12921_p0 = por %p12920_p13, %p12919_p12 }
  0x24   :  { %p12922_p1 = pnand %p12921_p0, %p12915_p11 }
  0x26   :  { %12925 = shalt.err (!%p12922_p1)
}
  0x27   :  { %s17937_s6 = smov 128   ;;  %s17938_s28 = smov 8  }
  0x28   :  { %92 = dma.hbm_to_vmem [thread:$0]  %s17927_s12, 4096, %s87_s27, [#allocation9], %s17937_s6, %s17937_s6, %s17938_s28  }
  0x29   :  { %s13028_s24 = smov [#allocation2]   ;;  %s18114_s30 = sld [smem:[#allocation96_spill]] }
  0x2a   :  { %s36_s25 = sshll.u32 %s13028_s24, 4  ;;  %s37_s25 = int_to_ptr.vmem [resolvable:$true] %s36_s25 }
  0x2f   :  { %s12926_s0 = scalar_lea.hbm %s18114_s30, 1024 }
  0x30   :  { %p12927_p2 = scmp.ne.s32.totalorder %s18114_s30, %s12926_s0  ;;  %p12930_p3 = scmp.lt.u32.totalorder %s12926_s0, %s18114_s30 }
  0x32   :  { %p12932_p4 = pnand %p12930_p3, %p12927_p2 }
  0x34   :  { %12935 = shalt.err (!%p12932_p4)
}
  0x35   :  { %s12936_s22 = scalar_lea.vmem %s37_s25, 1024  ;;  %p12941_p6 = scmp.lt.s32.totalorder %s37_s25, %s37_s25 }
  0x36   :  { %p12937_p5 = scmp.ne.s32.totalorder %s37_s25, %s12936_s22  ;;  %p12942_p7 = scmp.lt.s32.totalorder %s12936_s22, %s12936_s22 }
  0x38   :  { %p12943_p8 = por %p12942_p7, %p12941_p6 }
  0x3a   :  { %p12944_p9 = pnand %p12943_p8, %p12937_p5 }
  0x3c   :  { %12947 = shalt.err (!%p12944_p9)
}
  0x3d   :  { %s13029_s12 = smov 64   ;;  %s13030_s27 = smov 4  }
  0x3e   :  { %42 = dma.hbm_to_vmem [thread:$0]  %s18114_s30, 1024, %s37_s25, [#allocation3], %s13029_s12, %s13029_s12, %s13030_s27  }
  0x3f   :  { %s13031_s24 = smov [#allocation7]   ;;  %s13032_s29 = smov [#allocation10]  }
  0x40   :  { %s68_s26 = sshll.u32 %s13031_s24, 4  ;;  %s100_s0 = sshll.u32 %s13032_s29, 4  ;;  %s69_s26 = int_to_ptr.vmem [resolvable:$true] %s68_s26  ;;  %s101_s0 = int_to_ptr.vmem [resolvable:$true] %s100_s0 }
  0x41   :  { %s12948_s20 = scalar_lea.hbm %s17923_s8, 2048 }
  0x42   :  { %p12949_p10 = scmp.ne.s32.totalorder %s17923_s8, %s12948_s20  ;;  %p12952_p11 = scmp.lt.u32.totalorder %s12948_s20, %s17923_s8 }
  0x44   :  { %p12954_p12 = pnand %p12952_p11, %p12949_p10 }
  0x46   :  { %12957 = shalt.err (!%p12954_p12)
}
  0x47   :  { %s12958_s25 = scalar_lea.vmem %s69_s26, 2048  ;;  %p12963_p0 = scmp.lt.s32.totalorder %s69_s26, %s69_s26 }
  0x48   :  { %p12959_p13 = scmp.ne.s32.totalorder %s69_s26, %s12958_s25  ;;  %p12964_p1 = scmp.lt.s32.totalorder %s12958_s25, %s12958_s25 }
  0x4a   :  { %p12965_p2 = por %p12964_p1, %p12963_p0 }
  0x4c   :  { %p12966_p3 = pnand %p12965_p2, %p12959_p13 }
  0x4e   :  { %12969 = shalt.err (!%p12966_p3)
}
  0x4f   :  { %74 = dma.hbm_to_vmem [thread:$0]  %s17923_s8, 2048, %s69_s26, [#allocation6], %s13029_s12, %s13029_s12, %s13030_s27  }
  0x50   :  { %s12970_s28 = scalar_lea.hbm %s17929_s14, 4096 }
  0x51   :  { %p12971_p4 = scmp.ne.s32.totalorder %s17929_s14, %s12970_s28  ;;  %p12974_p5 = scmp.lt.u32.totalorder %s12970_s28, %s17929_s14 }
  0x53   :  { %p12976_p6 = pnand %p12974_p5, %p12971_p4 }
  0x55   :  { %12979 = shalt.err (!%p12976_p6)
}
  0x56   :  { %s12980_s20 = scalar_lea.vmem %s101_s0, 4096  ;;  %p12985_p8 = scmp.lt.s32.totalorder %s101_s0, %s101_s0 }
  0x57   :  { %p12981_p7 = scmp.ne.s32.totalorder %s101_s0, %s12980_s20  ;;  %p12986_p9 = scmp.lt.s32.totalorder %s12980_s20, %s12980_s20 }
  0x59   :  { %p12987_p10 = por %p12986_p9, %p12985_p8 }
  0x5b   :  { %p12988_p11 = pnand %p12987_p10, %p12981_p7 }
  0x5d   :  { %12991 = shalt.err (!%p12988_p11)
}
  0x5e   :  { %106 = dma.hbm_to_vmem [thread:$0]  %s17929_s14, 4096, %s101_s0, [#allocation9], %s13029_s12, %s13029_s12, %s13030_s27  }
  0x5f   :  { %13014 = dma.done.wait [#allocation3], 1024  }
  0x60   :  { %13015 = vsyncadd [#allocation3], 4294966272 }
  0x61   :  { %13016 = dma.done.wait [#allocation6], 8192  }
  0x62   :  { %13017 = vsyncadd [#allocation6], 4294959104 }
  0x63   :  { %13018 = dma.done.wait [#allocation9], 8192  }
  0x64   :  { %13019 = vsyncadd [#allocation9], 4294959104  ;;  %v133_v0 = vlaneseq  ;;  %s18118_s14 = sld [smem:[#allocation94_spill]]  ;;  %v11880_v11 = vld [vmem:[#allocation2] sm:$0xff]   ;;  %v11881_v14 = vld [vmem:[#allocation2 + $0x8] sm:$0xff]   ;;  %s18119_s23 = sld [smem:[#allocation95_spill]] }
  0x65   :  { %10878 = vmatprep.subr.bf16.mxu0 %v11880_v11  ;;  %v11882_v15 = vld [vmem:[#allocation2 + $0x10] sm:$0xff]   ;;  %v11883_v21 = vld [vmem:[#allocation2 + $0x18] sm:$0xff]   ;;  %v11884_v24 = vld [vmem:[#allocation2 + $0x20] sm:$0xff]   ;;  %v13033_v41 = vmov 1.0|1.0   ;;  %s13036_s20 = smov 96  }
  0x66   :  { %v136_v1 = vshrl.u32 %v133_v0, 7  ;;  %10879 = vmatpush3.bf16.msra.mxu0 %v11880_v11  ;;  %v11885_v27 = vld [vmem:[#allocation2 + $0x28] sm:$0xff]   ;;  %v11886_v30 = vld [vmem:[#allocation2 + $0x30] sm:$0xff]   ;;  %v11887_v33 = vld [vmem:[#allocation2 + $0x38] sm:$0xff]   ;;  %v13247_v38 = vand.u32 127, %v133_v0  ;;  %s13037_s8 = smov 32  }
  0x67   :  { %10880 = vmatprep.subr.bf16.mxu0 %v11881_v14  ;;  %v327_v54 = vld [vmem:[%s17918_s3] sm:$0xff] }
  0x68   :  { %v13208_v2 = vsub.s32 2, %v136_v1  ;;  %v13210_v3 = vsub.s32 0, %v136_v1  ;;  %v13212_v4 = vsub.s32 3, %v136_v1  ;;  %v13214_v5 = vsub.s32 1, %v136_v1 }
  0x69   :  { %v13221_v9 = vsub.s32 5, %v136_v1  ;;  %v13223_v10 = vsub.s32 4, %v136_v1  ;;  %v13229_v18 = vsub.s32 7, %v136_v1  ;;  %v13231_v19 = vsub.s32 6, %v136_v1 }
  0x6a   :  { %18115 = vst [vmem:[#allocation16_spill] sm:$0xff] %v13208_v2  ;;  %18116 = vst [vmem:[#allocation17_spill] sm:$0xff] %v13210_v3  ;;  %v129_v6 = vld [vmem:[%s18118_s14] sm:$0xff]  ;;  %10881 = vmatpush3.bf16.msra.mxu0 %v11881_v14  ;;  %v130_v20 = vld [vmem:[%s18118_s14 + $0x8] sm:$0xff] }
  0x6b   :  { %18117 = vst [vmem:[#allocation18_spill] sm:$0xff] %v13214_v5  ;;  %v152_v7 = vrot.slane %v129_v6, %v13208_v2  ;;  %v138_v8 = vrot.slane %v129_v6, %v13210_v3  ;;  %v159_v12 = vrot.slane %v129_v6, %v13212_v4  ;;  %v145_v13 = vrot.slane %v129_v6, %v13214_v5 }
  0x6c   :  { %v173_v16 = vrot.slane %v129_v6, %v13221_v9  ;;  %v166_v17 = vrot.slane %v129_v6, %v13223_v10  ;;  %10882 = vmatprep.subr.bf16.mxu0 %v11882_v15  ;;  %v187_v22 = vrot.slane %v129_v6, %v13229_v18  ;;  %v180_v23 = vrot.slane %v129_v6, %v13231_v19 }
  0x6d   :  { %154 = vbcast.lane.b32.xlu1 %v152_v7, 256  ;;  %140 = vbcast.lane.b32.xlu0 %v138_v8, 256  ;;  %v201_v25 = vrot.slane %v130_v20, %v13214_v5  ;;  %v194_v26 = vrot.slane %v130_v20, %v13210_v3  ;;  %v215_v28 = vrot.slane %v130_v20, %v13212_v4 }
  0x6e   :  { %10883 = vmatpush3.bf16.msra.mxu0 %v11882_v15  ;;  %v208_v29 = vrot.slane %v130_v20, %v13208_v2  ;;  %v229_v31 = vrot.slane %v130_v20, %v13221_v9  ;;  %v222_v32 = vrot.slane %v130_v20, %v13223_v10  ;;  %v243_v34 = vrot.slane %v130_v20, %v13229_v18 }
  0x6f   :  { %10884 = vmatprep.subr.bf16.mxu0 %v11883_v21  ;;  %v236_v35 = vrot.slane %v130_v20, %v13231_v19 }
  0x71   :  { %161 = vbcast.lane.b32.xlu1 %v159_v12, 256  ;;  %147 = vbcast.lane.b32.xlu0 %v145_v13, 256 }
  0x72   :  { %10885 = vmatpush3.bf16.msra.mxu0 %v11883_v21 }
  0x73   :  { %10886 = vmatprep.subr.bf16.mxu0 %v11884_v24 }
  0x75   :  { %175 = vbcast.lane.b32.xlu1 %v173_v16, 256  ;;  %168 = vbcast.lane.b32.xlu0 %v166_v17, 256 }
  0x76   :  { %10887 = vmatpush3.bf16.msra.mxu0 %v11884_v24 }
  0x77   :  { %10888 = vmatprep.subr.bf16.mxu0 %v11885_v27 }
  0x79   :  { %189 = vbcast.lane.b32.xlu1 %v187_v22, 256  ;;  %182 = vbcast.lane.b32.xlu0 %v180_v23, 256 }
  0x7a   :  { %10889 = vmatpush3.bf16.msra.mxu0 %v11885_v27 }
  0x7b   :  { %10890 = vmatprep.subr.bf16.mxu0 %v11886_v30 }
  0x7d   :  { %203 = vbcast.lane.b32.xlu1 %v201_v25, 256  ;;  %196 = vbcast.lane.b32.xlu0 %v194_v26, 256 }
  0x7e   :  { %10891 = vmatpush3.bf16.msra.mxu0 %v11886_v30 }
  0x7f   :  { %10892 = vmatprep.subr.bf16.mxu0 %v11887_v33 }
  0x81   :  { %217 = vbcast.lane.b32.xlu1 %v215_v28, 256  ;;  %210 = vbcast.lane.b32.xlu0 %v208_v29, 256 }
  0x82   :  { %10893 = vmatpush3.bf16.msra.mxu0 %v11887_v33  ;;  %v11893_v33 = vld [vmem:[#allocation5 + $0x1c] ss:$12 sps:$4 sm:$0xff]  }
  0x85   :  { %231 = vbcast.lane.b32.xlu1 %v229_v31, 256  ;;  %224 = vbcast.lane.b32.xlu0 %v222_v32, 256  ;;  %v11888_v31 = vld [vmem:[#allocation5] ss:$12 sps:$4 sm:$0xff]   ;;  %v11890_v32 = vld [vmem:[#allocation5 + $0x4] ss:$12 sps:$4 sm:$0xff]  }
  0x86   :  { %1475 = vmatprep.subr.bf16.mxu0 %v11890_v32 }
  0x89   :  { %245 = vbcast.lane.b32.xlu1 %v243_v34, 256  ;;  %238 = vbcast.lane.b32.xlu0 %v236_v35, 256  ;;  %v11891_v34 = vld [vmem:[#allocation5 + $0x18] ss:$12 sps:$4 sm:$0xff]  }
  0xdf   :  { %v155_v36 = vpop.permute.xlu1 %154  ;;  %v141_v37 = vpop.permute.xlu0 %140 }
  0xe0   :  { %vm249_vm0 = vcmp.eq.s32.totalorder %v155_v36, %v13247_v38  ;;  %vm247_vm4 = vcmp.eq.s32.totalorder %v141_v37, %v13247_v38 }
  0xe3   :  { %v162_v39 = vpop.permute.xlu1 %161  ;;  %v148_v40 = vpop.permute.xlu0 %147 }
  0xe4   :  { %vm250_vm1 = vcmp.eq.s32.totalorder %v162_v39, %v13247_v38  ;;  %vm248_vm2 = vcmp.eq.s32.totalorder %v148_v40, %v13247_v38 }
  0xe5   :  { %vm10320_vm3 = vmpackc.low %vm250_vm1, %vm249_vm0 }
  0xe6   :  { %vm10318_vm5 = vmpackc.low %vm248_vm2, %vm247_vm4 }
  0xe7   :  { %10894 = vmatprep.mubr.msk.bf16.mxu0 %vm10318_vm5, %v13033_v41  ;;  %v176_v42 = vpop.permute.xlu1 %175  ;;  %v169_v43 = vpop.permute.xlu0 %168 }
  0xe8   :  { %10895 = vmatmul.mubr.msk.bf16.vlgmr.msra.gmra.mrb[0].mxu0 %vm10320_vm3, %v13033_v41  ;;  %vm252_vm6 = vcmp.eq.s32.totalorder %v176_v42, %v13247_v38  ;;  %vm251_vm7 = vcmp.eq.s32.totalorder %v169_v43, %v13247_v38 }
  0xe9   :  { %vm10322_vm8 = vmpackc.low %vm252_vm6, %vm251_vm7  ;;  %1476 = vmatpush1.bf16.msra.mxu0 %v11888_v31 }
  0xea   :  { %10898 = vmatprep.mubr.msk.bf16.mxu0 %vm10322_vm8, %v13033_v41  ;;  %1477 = vmatprep.subr.bf16.mxu0 %v11893_v33  ;;  %v11899_v33 = vld [vmem:[#allocation5 + $0x4c] ss:$12 sps:$4 sm:$0xff]  }
  0xeb   :  { %v190_v44 = vpop.permute.xlu1 %189  ;;  %v183_v45 = vpop.permute.xlu0 %182 }
  0xec   :  { %vm254_vm9 = vcmp.eq.s32.totalorder %v190_v44, %v13247_v38  ;;  %vm253_vm10 = vcmp.eq.s32.totalorder %v183_v45, %v13247_v38 }
  0xed   :  { %vm10324_vm11 = vmpackc.low %vm254_vm9, %vm253_vm10  ;;  %1478 = vmatpush1.bf16.msra.mxu0 %v11891_v34  ;;  %vm746_vm10 = vcmp.eq.s32.totalorder %v13247_v38, 2 }
  0xef   :  { %v204_v46 = vpop.permute.xlu1 %203  ;;  %v197_v47 = vpop.permute.xlu0 %196 }
  0xf0   :  { %10899 = vmatmul.mubr.msk.bf16.gmra.mrb[4].mxu0 %vm10324_vm11, %v13033_v41  ;;  %vm256_vm12 = vcmp.eq.s32.totalorder %v204_v46, %v13247_v38  ;;  %vm255_vm13 = vcmp.eq.s32.totalorder %v197_v47, %v13247_v38  ;;  %vm744_vm11 = vcmp.eq.s32.totalorder %v13247_v38, 0 }
  0xf1   :  { %vm10326_vm14 = vmpackc.low %vm256_vm12, %vm255_vm13  ;;  %vm745_vm12 = vcmp.eq.s32.totalorder %v13247_v38, 1 }
  0xf2   :  { %10902 = vmatprep.mubr.msk.bf16.mxu0 %vm10326_vm14, %v13033_v41 }
  0xf3   :  { %v218_v48 = vpop.permute.xlu1 %217  ;;  %v211_v49 = vpop.permute.xlu0 %210 }
  0xf4   :  { %vm258_vm15 = vcmp.eq.s32.totalorder %v218_v48, %v13247_v38  ;;  %vm257_vm0 = vcmp.eq.s32.totalorder %v211_v49, %v13247_v38 }
  0xf5   :  { %vm10328_vm1 = vmpackc.low %vm258_vm15, %vm257_vm0 }
  0xf7   :  { %v232_v50 = vpop.permute.xlu1 %231  ;;  %v225_v51 = vpop.permute.xlu0 %224 }
  0xf8   :  { %10903 = vmatmul.mubr.msk.bf16.gmra.mrb[8].mxu0 %vm10328_vm1, %v13033_v41  ;;  %vm260_vm2 = vcmp.eq.s32.totalorder %v232_v50, %v13247_v38  ;;  %vm259_vm3 = vcmp.eq.s32.totalorder %v225_v51, %v13247_v38  ;;  %vm1112_vm1 = vcmask 130048  }
  0xf9   :  { %vm10330_vm4 = vmpackc.low %vm260_vm2, %vm259_vm3  ;;  %vm747_vm2 = vcmp.eq.s32.totalorder %v13247_v38, 3 }
  0xfa   :  { %10906 = vmatprep.mubr.msk.bf16.mxu0 %vm10330_vm4, %v13033_v41 }
  0xfb   :  { %v246_v52 = vpop.permute.xlu1 %245  ;;  %v239_v53 = vpop.permute.xlu0 %238 }
  0xfc   :  { %vm262_vm5 = vcmp.eq.s32.totalorder %v246_v52, %v13247_v38  ;;  %vm261_vm6 = vcmp.eq.s32.totalorder %v239_v53, %v13247_v38 }
  0xfd   :  { %vm10332_vm7 = vmpackc.low %vm262_vm5, %vm261_vm6  ;;  %vm749_vm5 = vcmp.eq.s32.totalorder %v13247_v38, 5  ;;  %vm748_vm6 = vcmp.eq.s32.totalorder %v13247_v38, 4 }
 0x100   :  { %10907 = vmatmul.mubr.msk.bf16.gmra.mrb[12].mxu0 %vm10332_vm7, %v13033_v41 }
 0x1bb   :  { %v10896_v55 = vpop.f32.mrb[0].mxu0 }
 0x1bc   :  { %v458_v56 = vpop.f32.mrb[1].mxu0  ;;  %v467_v61 = vadd.f32 %v10896_v55, %v327_v54 }
 0x1bd   :  { %v10897_v57 = vpop.f32.mrb[2].mxu0  ;;  %v459_v58 = vadd.f32 %v458_v56, %v327_v54 }
 0x1be   :  { %v461_v59 = vpop.f32.mrb[3].mxu0  ;;  %v13268_v0 = vadd.f32 %v10897_v57, %v327_v54 }
 0x1bf   :  { %523 = vadd.xlane.f32.xlu0 %v459_v58  ;;  %v462_v60 = vadd.f32 %v461_v59, %v327_v54 }
 0x1c1   :  { %525 = vadd.xlane.f32.xlu1 %v462_v60 }
 0x1c3   :  { %527 = vadd.xlane.f32.xlu0 %v467_v61  ;;  %v10900_v62 = vpop.f32.mrb[4].mxu0 }
 0x1c4   :  { %v474_v63 = vpop.f32.mrb[5].mxu0  ;;  %v13273_v11 = vadd.f32 %v10900_v62, %v327_v54 }
 0x1c5   :  { %v10901_v1 = vpop.f32.mrb[6].mxu0  ;;  %v475_v6 = vadd.f32 %v474_v63, %v327_v54 }
 0x1c6   :  { %v477_v7 = vpop.f32.mrb[7].mxu0  ;;  %v13277_v13 = vadd.f32 %v10901_v1, %v327_v54 }
 0x1c7   :  { %529 = vadd.xlane.f32.xlu0 %v13268_v0  ;;  %531 = vadd.xlane.f32.xlu1 %v475_v6  ;;  %v13271_v8 = vadd.f32 %v477_v7, %v327_v54 }
 0x1cb   :  { %533 = vadd.xlane.f32.xlu0 %v13271_v8  ;;  %535 = vadd.xlane.f32.xlu1 %v13273_v11  ;;  %v10904_v12 = vpop.f32.mrb[8].mxu0 }
 0x1cc   :  { %v490_v14 = vpop.f32.mrb[9].mxu0  ;;  %v13285_v21 = vadd.f32 %v10904_v12, %v327_v54 }
 0x1cd   :  { %v10905_v15 = vpop.f32.mrb[10].mxu0  ;;  %v13279_v16 = vadd.f32 %v490_v14, %v327_v54 }
 0x1ce   :  { %v493_v17 = vpop.f32.mrb[11].mxu0  ;;  %v13289_v23 = vadd.f32 %v10905_v15, %v327_v54  ;;  %v11896_v15 = vld [vmem:[#allocation5 + $0x34] ss:$12 sps:$4 sm:$0xff]  }
 0x1cf   :  { %537 = vadd.xlane.f32.xlu0 %v13277_v13  ;;  %539 = vadd.xlane.f32.xlu1 %v13279_v16  ;;  %v13283_v20 = vadd.f32 %v493_v17, %v327_v54 }
 0x1d0   :  { %1479 = vmatprep.subr.bf16.mxu0 %v11896_v15 }
 0x1d3   :  { %541 = vadd.xlane.f32.xlu0 %v13283_v20  ;;  %543 = vadd.xlane.f32.xlu1 %v13285_v21  ;;  %v10908_v22 = vpop.f32.mrb[12].mxu0 }
 0x1d4   :  { %v506_v24 = vpop.f32.mrb[13].mxu0  ;;  %v13297_v29 = vadd.f32 %v10908_v22, %v327_v54 }
 0x1d5   :  { %v10909_v25 = vpop.f32.mrb[14].mxu0  ;;  %v13291_v26 = vadd.f32 %v506_v24, %v327_v54 }
 0x1d6   :  { %v509_v27 = vpop.f32.mrb[15].mxu0  ;;  %v13301_v30 = vadd.f32 %v10909_v25, %v327_v54 }
 0x1d7   :  { %545 = vadd.xlane.f32.xlu0 %v13289_v23  ;;  %547 = vadd.xlane.f32.xlu1 %v13291_v26  ;;  %v13295_v28 = vadd.f32 %v509_v27, %v327_v54  ;;  %v11894_v27 = vld [vmem:[#allocation5 + $0x30] ss:$12 sps:$4 sm:$0xff]  }
 0x1d8   :  { %1480 = vmatpush1.bf16.msra.mxu0 %v11894_v27 }
 0x1d9   :  { %1481 = vmatprep.subr.bf16.mxu0 %v11899_v33 }
 0x1db   :  { %549 = vadd.xlane.f32.xlu0 %v13295_v28  ;;  %551 = vadd.xlane.f32.xlu1 %v13297_v29 }
 0x1df   :  { %553 = vadd.xlane.f32.xlu0 %v13301_v30 }
 0x24c   :  { %v524_v35 = vpop.xlane.xlu0 %523 }
 0x24d   :  { %v556_v36 = vmul.f32 0.0078125, %v524_v35 }
 0x24e   :  { %v526_v37 = vpop.xlane.xlu1 %525 }
 0x24f   :  { %v557_v39 = vmul.f32 0.0078125, %v526_v37  ;;  %v13304_v40 = vsub.f32 %v459_v58, %v556_v36 }
 0x250   :  { %v528_v41 = vpop.xlane.xlu0 %527 }
 0x251   :  { %v558_v42 = vmul.f32 0.0078125, %v528_v41  ;;  %v588_v43 = vmul.f32 %v13304_v40, %v13304_v40  ;;  %v13308_v44 = vsub.f32 %v462_v60, %v557_v39  ;;  %v11897_v39 = vld [vmem:[#allocation5 + $0x48] ss:$12 sps:$4 sm:$0xff]  }
 0x252   :  { %1482 = vmatpush1.bf16.msra.mxu0 %v11897_v39 }
 0x253   :  { %604 = vadd.xlane.f32.xlu1 %v588_v43  ;;  %v589_v45 = vmul.f32 %v13308_v44, %v13308_v44  ;;  %v13312_v46 = vsub.f32 %v467_v61, %v558_v42 }
 0x254   :  { %v532_v47 = vpop.xlane.xlu1 %531  ;;  %v530_v48 = vpop.xlane.xlu0 %529 }
 0x255   :  { %v560_v49 = vmul.f32 0.0078125, %v532_v47  ;;  %v559_v50 = vmul.f32 0.0078125, %v530_v48  ;;  %606 = vadd.xlane.f32.xlu0 %v589_v45  ;;  %v590_v51 = vmul.f32 %v13312_v46, %v13312_v46 }
 0x257   :  { %608 = vadd.xlane.f32.xlu1 %v590_v51  ;;  %v13316_v52 = vsub.f32 %v475_v6, %v560_v49  ;;  %v13319_v53 = vsub.f32 %v13268_v0, %v559_v50  ;;  %v11902_v49 = vld [vmem:[#allocation5 + $0x64] ss:$12 sps:$4 sm:$0xff]   ;;  %v11900_v50 = vld [vmem:[#allocation5 + $0x60] ss:$12 sps:$4 sm:$0xff]  }
 0x258   :  { %v536_v54 = vpop.xlane.xlu1 %535  ;;  %v534_v55 = vpop.xlane.xlu0 %533  ;;  %1483 = vmatprep.subr.bf16.mxu0 %v11902_v49 }
 0x259   :  { %v562_v56 = vmul.f32 0.0078125, %v536_v54  ;;  %v561_v57 = vmul.f32 0.0078125, %v534_v55  ;;  %v592_v58 = vmul.f32 %v13316_v52, %v13316_v52  ;;  %v591_v59 = vmul.f32 %v13319_v53, %v13319_v53  ;;  %1484 = vmatpush1.bf16.msra.mxu0 %v11900_v50 }
 0x25b   :  { %612 = vadd.xlane.f32.xlu1 %v592_v58  ;;  %610 = vadd.xlane.f32.xlu0 %v591_v59  ;;  %v13326_v60 = vsub.f32 %v13273_v11, %v562_v56  ;;  %v13329_v61 = vsub.f32 %v13271_v8, %v561_v57  ;;  %v11905_v57 = vld [vmem:[#allocation5 + $0x7c] ss:$12 sps:$4 sm:$0xff]   ;;  %v11903_v58 = vld [vmem:[#allocation5 + $0x78] ss:$12 sps:$4 sm:$0xff]   ;;  %v11908_v59 = vld [vmem:[#allocation5 + $0x94] ss:$12 sps:$4 sm:$0xff]  }
 0x25c   :  { %v540_v62 = vpop.xlane.xlu1 %539  ;;  %v538_v63 = vpop.xlane.xlu0 %537  ;;  %1485 = vmatprep.subr.bf16.mxu0 %v11905_v57 }
 0x25d   :  { %v564_v0 = vmul.f32 0.0078125, %v540_v62  ;;  %v563_v1 = vmul.f32 0.0078125, %v538_v63  ;;  %v594_v6 = vmul.f32 %v13326_v60, %v13326_v60  ;;  %v593_v7 = vmul.f32 %v13329_v61, %v13329_v61  ;;  %1486 = vmatpush1.bf16.msra.mxu0 %v11903_v58  ;;  %v11906_v62 = vld [vmem:[#allocation5 + $0x90] ss:$12 sps:$4 sm:$0xff]   ;;  %v11911_v63 = vld [vmem:[#allocation5 + $0xac] ss:$12 sps:$4 sm:$0xff]  }
 0x25e   :  { %1487 = vmatprep.subr.bf16.mxu0 %v11908_v59 }
 0x25f   :  { %616 = vadd.xlane.f32.xlu1 %v594_v6  ;;  %614 = vadd.xlane.f32.xlu0 %v593_v7  ;;  %v13336_v12 = vsub.f32 %v13279_v16, %v564_v0  ;;  %v13339_v11 = vsub.f32 %v13277_v13, %v563_v1  ;;  %v11909_v0 = vld [vmem:[#allocation5 + $0xa8] ss:$12 sps:$4 sm:$0xff]   ;;  %v17939_v1 = vmov 0  }
 0x260   :  { %v544_v8 = vpop.xlane.xlu1 %543  ;;  %v542_v14 = vpop.xlane.xlu0 %541  ;;  %1507 = vmatprep.mubr.bf16.mxu0 %v17939_v1 }
 0x261   :  { %v566_v17 = vmul.f32 0.0078125, %v544_v8  ;;  %v565_v22 = vmul.f32 0.0078125, %v542_v14  ;;  %v596_v24 = vmul.f32 %v13336_v12, %v13336_v12  ;;  %v595_v25 = vmul.f32 %v13339_v11, %v13339_v11  ;;  %1488 = vmatpush1.bf16.msra.mxu0 %v11906_v62 }
 0x262   :  { %1489 = vmatprep.subr.bf16.mxu0 %v11911_v63 }
 0x263   :  { %620 = vadd.xlane.f32.xlu1 %v596_v24  ;;  %618 = vadd.xlane.f32.xlu0 %v595_v25  ;;  %v13346_v16 = vsub.f32 %v13285_v21, %v566_v17  ;;  %v13349_v13 = vsub.f32 %v13283_v20, %v565_v22 }
 0x264   :  { %v548_v31 = vpop.xlane.xlu1 %547  ;;  %v546_v32 = vpop.xlane.xlu0 %545 }
 0x265   :  { %v568_v34 = vmul.f32 0.0078125, %v548_v31  ;;  %v567_v35 = vmul.f32 0.0078125, %v546_v32  ;;  %v598_v36 = vmul.f32 %v13346_v16, %v13346_v16  ;;  %v597_v37 = vmul.f32 %v13349_v13, %v13349_v13  ;;  %1490 = vmatpush1.bf16.msra.mxu0 %v11909_v0 }
 0x267   :  { %624 = vadd.xlane.f32.xlu1 %v598_v36  ;;  %622 = vadd.xlane.f32.xlu0 %v597_v37  ;;  %v13356_v21 = vsub.f32 %v13291_v26, %v568_v34  ;;  %v13359_v20 = vsub.f32 %v13289_v23, %v567_v35 }
 0x268   :  { %v552_v41 = vpop.xlane.xlu1 %551  ;;  %v550_v42 = vpop.xlane.xlu0 %549 }
 0x269   :  { %v570_v43 = vmul.f32 0.0078125, %v552_v41  ;;  %v569_v45 = vmul.f32 0.0078125, %v550_v42  ;;  %v600_v47 = vmul.f32 %v13356_v21, %v13356_v21  ;;  %v599_v48 = vmul.f32 %v13359_v20, %v13359_v20 }
 0x26b   :  { %628 = vadd.xlane.f32.xlu1 %v600_v47  ;;  %626 = vadd.xlane.f32.xlu0 %v599_v48  ;;  %v13366_v26 = vsub.f32 %v13297_v29, %v570_v43  ;;  %v13369_v23 = vsub.f32 %v13295_v28, %v569_v45 }
 0x26c   :  { %v554_v51 = vpop.xlane.xlu0 %553 }
 0x26d   :  { %v571_v54 = vmul.f32 0.0078125, %v554_v51  ;;  %v602_v55 = vmul.f32 %v13366_v26, %v13366_v26  ;;  %v601_v56 = vmul.f32 %v13369_v23, %v13369_v23 }
 0x26f   :  { %632 = vadd.xlane.f32.xlu1 %v602_v55  ;;  %630 = vadd.xlane.f32.xlu0 %v601_v56  ;;  %v13376_v29 = vsub.f32 %v13301_v30, %v571_v54  ;;  %v131_v30 = vld [vmem:[%s18119_s23] sm:$0xff] }
 0x270   :  { %v811_v6 = vrot.slane %v131_v30, %v13210_v3  ;;  %v818_v7 = vrot.slane %v131_v30, %v13214_v5  ;;  %v825_v8 = vrot.slane %v131_v30, %v13208_v2  ;;  %v839_v14 = vrot.slane %v131_v30, %v13223_v10  ;;  %v13395_v54 = vld [vmem:[%s17919_s4] ss:$0 sm:$0xff] }
 0x271   :  { %v603_v28 = vmul.f32 %v13376_v29, %v13376_v29  ;;  %v832_v15 = vrot.slane %v131_v30, %v13212_v4  ;;  %v853_v17 = vrot.slane %v131_v30, %v13231_v19  ;;  %v846_v22 = vrot.slane %v131_v30, %v13221_v9 }
 0x272   :  { %v860_v24 = vrot.slane %v131_v30, %v13229_v18 }
 0x273   :  { %634 = vadd.xlane.f32.xlu0 %v603_v28 }
 0x280   :  { %813 = vbcast.lane.b32.xlu1 %v811_v6, 256  ;;  %v13403_v6 = vld [vmem:[%s17920_s5] ss:$0 sm:$0xff] }
 0x284   :  { %827 = vbcast.lane.b32.xlu1 %v825_v8, 256 }
 0x288   :  { %834 = vbcast.lane.b32.xlu1 %v832_v15, 256 }
 0x289   :  { %820 = vbcast.lane.b32.xlu0 %v818_v7, 256 }
 0x28c   :  { %848 = vbcast.lane.b32.xlu1 %v846_v22, 256 }
 0x28d   :  { %841 = vbcast.lane.b32.xlu0 %v839_v14, 256 }
 0x290   :  { %862 = vbcast.lane.b32.xlu1 %v860_v24, 256 }
 0x291   :  { %855 = vbcast.lane.b32.xlu0 %v853_v17, 256 }
 0x2e0   :  { %v605_v25 = vpop.xlane.xlu1 %604 }
 0x2e1   :  { %v636_v27 = vmul.f32 0.0078125, %v605_v25 }
 0x2e2   :  { %v607_v31 = vpop.xlane.xlu0 %606 }
 0x2e3   :  { %v652_v32 = vadd.f32 1e-12, %v636_v27  ;;  %v637_v33 = vmul.f32 0.0078125, %v607_v31 }
 0x2e4   :  { %v609_v34 = vpop.xlane.xlu1 %608 }
 0x2e5   :  { %12048 = vrsqrt.f32 %v652_v32  ;;  %v653_v35 = vadd.f32 1e-12, %v637_v33  ;;  %v638_v36 = vmul.f32 0.0078125, %v609_v34 }
 0x2e7   :  { %12050 = vrsqrt.f32 %v653_v35  ;;  %v654_v37 = vadd.f32 1e-12, %v638_v36 }
 0x2e8   :  { %v613_v39 = vpop.xlane.xlu1 %612  ;;  %v611_v41 = vpop.xlane.xlu0 %610 }
 0x2e9   :  { %12052 = vrsqrt.f32 %v654_v37  ;;  %v640_v42 = vmul.f32 0.0078125, %v613_v39  ;;  %v639_v43 = vmul.f32 0.0078125, %v611_v41 }
 0x2eb   :  { %v655_v45 = vadd.f32 1e-12, %v639_v43  ;;  %v656_v48 = vadd.f32 1e-12, %v640_v42 }
 0x2ec   :  { %v615_v47 = vpop.xlane.xlu0 %614  ;;  %v617_v50 = vpop.xlane.xlu1 %616 }
 0x2ed   :  { %v641_v49 = vmul.f32 0.0078125, %v615_v47  ;;  %12054 = vrsqrt.f32 %v655_v45  ;;  %v642_v28 = vmul.f32 0.0078125, %v617_v50 }
 0x2ee   :  { %12056 = vrsqrt.f32 %v656_v48 }
 0x2ef   :  { %v12049_v51 = vpop.eup %12048  ;;  %v657_v55 = vadd.f32 1e-12, %v641_v49  ;;  %v658_v8 = vadd.f32 1e-12, %v642_v28 }
 0x2f0   :  { %v684_v56 = vmul.f32 %v12049_v51, %v13304_v40  ;;  %v619_v57 = vpop.xlane.xlu0 %618  ;;  %v621_v14 = vpop.xlane.xlu1 %620 }
 0x2f1   :  { %v12051_v58 = vpop.eup %12050  ;;  %v643_v59 = vmul.f32 0.0078125, %v619_v57  ;;  %12058 = vrsqrt.f32 %v657_v55  ;;  %v644_v27 = vmul.f32 0.0078125, %v621_v14 }
 0x2f2   :  { %v706_v62 = vmul.f32 %v13395_v54, %v684_v56  ;;  %v685_v63 = vmul.f32 %v12051_v58, %v13308_v44 }
 0x2f3   :  { %v12053_v0 = vpop.eup %12052  ;;  %v659_v30 = vadd.f32 1e-12, %v643_v59  ;;  %v660_v37 = vadd.f32 1e-12, %v644_v27 }
 0x2f4   :  { %v707_v7 = vmul.f32 %v13395_v54, %v685_v63  ;;  %v623_v40 = vpop.xlane.xlu0 %622  ;;  %v13407_v15 = vadd.f32 %v13403_v6, %v706_v62  ;;  %v686_v44 = vmul.f32 %v12053_v0, %v13312_v46  ;;  %v625_v41 = vpop.xlane.xlu1 %624 }
 0x2f5   :  { %12060 = vrsqrt.f32 %v659_v30  ;;  %v645_v22 = vmul.f32 0.0078125, %v623_v40  ;;  %v646_v50 = vmul.f32 0.0078125, %v625_v41 }
 0x2f6   :  { %18120 = vst [vmem:[#allocation19_spill] sm:$0xff] %v13407_v15  ;;  %v13410_v17 = vadd.f32 %v13403_v6, %v707_v7  ;;  %12062 = vrsqrt.f32 %v658_v8  ;;  %v708_v32 = vmul.f32 %v13395_v54, %v686_v44 }
 0x2f7   :  { %v12055_v24 = vpop.eup %12054  ;;  %v661_v34 = vadd.f32 1e-12, %v645_v22  ;;  %v662_v58 = vadd.f32 1e-12, %v646_v50 }
 0x2f8   :  { %18121 = vst [vmem:[#allocation20_spill] sm:$0xff] %v13410_v17  ;;  %v13415_v25 = vpack.c.bf16 %v13410_v17, %v13407_v15  ;;  %v687_v31 = vmul.f32 %v12055_v24, %v13319_v53  ;;  %v12057_v33 = vpop.eup %12056  ;;  %v627_v36 = vpop.xlane.xlu0 %626  ;;  %v13426_v42 = vadd.f32 %v13403_v6, %v708_v32 }
 0x2f9   :  { %v688_v53 = vmul.f32 %v12057_v33, %v13316_v52  ;;  %12064 = vrsqrt.f32 %v661_v34  ;;  %v647_v45 = vmul.f32 0.0078125, %v627_v36  ;;  %v629_v28 = vpop.xlane.xlu1 %628 }
 0x2fa   :  { %1508 = vmatmul.mubr.bf16.vlgmr.msra.gmra.mrb[16].mxu0 %v13415_v25  ;;  %v709_v46 = vmul.f32 %v13395_v54, %v687_v31  ;;  %18123 = vst [vmem:[#allocation22_spill] sm:$0xff] %v13426_v42  ;;  %12066 = vrsqrt.f32 %v660_v37  ;;  %v648_v40 = vmul.f32 0.0078125, %v629_v28 }
 0x2fb   :  { %1517 = vmatprep.mubr.bf16.mxu0 %v17939_v1  ;;  %v12059_v35 = vpop.eup %12058  ;;  %v710_v51 = vmul.f32 %v13395_v54, %v688_v53  ;;  %v663_v56 = vadd.f32 1e-12, %v647_v45 }
 0x2fc   :  { %v13423_v39 = vadd.f32 %v13403_v6, %v709_v46  ;;  %v689_v43 = vmul.f32 %v12059_v35, %v13329_v61  ;;  %v631_v52 = vpop.xlane.xlu0 %630  ;;  %v664_v24 = vadd.f32 1e-12, %v648_v40 }
 0x2fd   :  { %v13443_v59 = vadd.f32 %v13403_v6, %v710_v51  ;;  %12068 = vrsqrt.f32 %v663_v56  ;;  %v649_v63 = vmul.f32 0.0078125, %v631_v52  ;;  %v633_v27 = vpop.xlane.xlu1 %632 }
 0x2fe   :  { %18122 = vst [vmem:[#allocation21_spill] sm:$0xff] %v13423_v39  ;;  %v13432_v47 = vpack.c.bf16 %v13423_v39, %v13426_v42  ;;  %v711_v48 = vmul.f32 %v13395_v54, %v689_v43  ;;  %12070 = vrsqrt.f32 %v662_v58  ;;  %v650_v36 = vmul.f32 0.0078125, %v633_v27 }
 0x2ff   :  { %v12061_v49 = vpop.eup %12060  ;;  %18125 = vst [vmem:[#allocation24_spill] sm:$0xff] %v13443_v59  ;;  %v665_v14 = vadd.f32 1e-12, %v649_v63 }
 0x300   :  { %v12063_v55 = vpop.eup %12062  ;;  %v13439_v61 = vadd.f32 %v13403_v6, %v711_v48  ;;  %v691_v57 = vmul.f32 %v12061_v49, %v13339_v11  ;;  %v666_v43 = vadd.f32 1e-12, %v650_v36 }
 0x301   :  { %v690_v62 = vmul.f32 %v12063_v55, %v13326_v60  ;;  %v635_v60 = vpop.xlane.xlu0 %634  ;;  %12072 = vrsqrt.f32 %v665_v14  ;;  %v13540_v27 = vpop.permute.xlu1 %813 }
 0x302   :  { %1518 = vmatmul.mubr.bf16.gmra.mrb[20].mxu0 %v13432_v47  ;;  %18124 = vst [vmem:[#allocation23_spill] sm:$0xff] %v13439_v61  ;;  %v13448_v0 = vpack.c.bf16 %v13439_v61, %v13443_v59  ;;  %v713_v30 = vmul.f32 %v13395_v54, %v691_v57  ;;  %v651_v33 = vmul.f32 0.0078125, %v635_v60  ;;  %12074 = vrsqrt.f32 %v664_v24  ;;  %18136 = vst [vmem:[#allocation35_spill] sm:$0xff] %v13540_v27 }
 0x303   :  { %1527 = vmatprep.mubr.bf16.mxu0 %v17939_v1  ;;  %v12065_v7 = vpop.eup %12064  ;;  %v712_v11 = vmul.f32 %v13395_v54, %v690_v62  ;;  %vm920_vm8 = vcmp.gt.f32.partialorder %v13540_v27, 0.5 }
 0x304   :  { %v12067_v8 = vpop.eup %12066  ;;  %v13455_v44 = vadd.f32 %v13403_v6, %v713_v30  ;;  %v693_v22 = vmul.f32 %v12065_v7, %v13349_v13  ;;  %v667_v41 = vadd.f32 1e-12, %v651_v33  ;;  %vm968_vm13 = vmand %vm744_vm11, %vm920_vm8 }
 0x305   :  { %v13459_v31 = vadd.f32 %v13403_v6, %v712_v11  ;;  %v692_v32 = vmul.f32 %v12067_v8, %v13336_v12  ;;  %v13549_v33 = vpop.permute.xlu1 %827 }
 0x306   :  { %18126 = vst [vmem:[#allocation25_spill] sm:$0xff] %v13455_v44  ;;  %v715_v46 = vmul.f32 %v13395_v54, %v693_v22  ;;  %12076 = vrsqrt.f32 %v667_v41  ;;  %v13532_v22 = vld [vmem:[%s18119_s23 + $0x8] sm:$0xff]  ;;  %18138 = vst [vmem:[#allocation37_spill] sm:$0xff] %v13549_v33  ;;  %vm922_vm14 = vcmp.gt.f32.partialorder %v13549_v33, 0.5 }
 0x307   :  { %18127 = vst [vmem:[#allocation26_spill] sm:$0xff] %v13459_v31  ;;  %v13464_v34 = vpack.c.bf16 %v13455_v44, %v13459_v31  ;;  %v12069_v35 = vpop.eup %12068  ;;  %v714_v13 = vmul.f32 %v13395_v54, %v692_v32  ;;  %12078 = vrsqrt.f32 %v666_v43  ;;  %v867_v24 = vrot.slane %v13532_v22, %v13210_v3  ;;  %v13542_v32 = vpop.permute.xlu0 %820  ;;  %vm970_vm0 = vmand %vm746_vm10, %vm922_vm14 }
 0x308   :  { %v12071_v37 = vpop.eup %12070  ;;  %v13471_v12 = vadd.f32 %v13403_v6, %v715_v46  ;;  %v695_v53 = vmul.f32 %v12069_v35, %v13359_v20  ;;  %18137 = vst [vmem:[#allocation36_spill] sm:$0xff] %v13542_v32  ;;  %vm921_vm9 = vcmp.gt.f32.partialorder %v13542_v32, 0.5  ;;  %v17944_v46 = vmov 0.0  }
 0x309   :  { %v13475_v45 = vadd.f32 %v13403_v6, %v714_v13  ;;  %v694_v48 = vmul.f32 %v12071_v37, %v13346_v16  ;;  %869 = vbcast.lane.b32.xlu0 %v867_v24, 256  ;;  %vm969_vm15 = vmand %vm745_vm12, %vm921_vm9  ;;  %v9994_v35 = vsel %vm968_vm13, 1.0, %v17944_v46  ;;  %v13561_v37 = vpop.permute.xlu1 %834  ;;  %v9996_v41 = vsel %vm970_vm0, 1.0, %v17944_v46 }
 0x30a   :  { %1528 = vmatmul.mubr.bf16.gmra.mrb[24].mxu0 %v13448_v0  ;;  %18128 = vst [vmem:[#allocation27_spill] sm:$0xff] %v13471_v12  ;;  %v717_v50 = vmul.f32 %v13395_v54, %v695_v53  ;;  %v9995_v36 = vsel %vm969_vm15, 1.0, %v17944_v46  ;;  %18139 = vst [vmem:[#allocation38_spill] sm:$0xff] %v13561_v37  ;;  %vm923_vm3 = vcmp.gt.f32.partialorder %v13561_v37, 0.5  ;;  %vm751_vm14 = vcmp.eq.s32.totalorder %v13247_v38, 7 }
 0x30b   :  { %1537 = vmatprep.mubr.bf16.mxu0 %v17939_v1  ;;  %18129 = vst [vmem:[#allocation28_spill] sm:$0xff] %v13475_v45  ;;  %v13480_v49 = vpack.c.bf16 %v13471_v12, %v13475_v45  ;;  %v12073_v51 = vpop.eup %12072  ;;  %v716_v55 = vmul.f32 %v13395_v54, %v694_v48  ;;  %v10342_v13 = vpack.c.bf16 %v9995_v36, %v9994_v35  ;;  %vm971_vm4 = vmand %vm747_vm2, %vm923_vm3  ;;  %vm750_vm15 = vcmp.eq.s32.totalorder %v13247_v38, 6 }
 0x30c   :  { %v12075_v20 = vpop.eup %12074  ;;  %v13487_v56 = vadd.f32 %v13403_v6, %v717_v50  ;;  %v697_v16 = vmul.f32 %v12073_v51, %v13369_v23  ;;  %v9997_v43 = vsel %vm971_vm4, 1.0, %v17944_v46 }
 0x30d   :  { %v13491_v52 = vadd.f32 %v13403_v6, %v716_v55  ;;  %v696_v57 = vmul.f32 %v12075_v20, %v13356_v21  ;;  %11790 = vmatprep.subr.msk.bf16.mxu1 %vm1112_vm1, %v10342_v13  ;;  %v1138_v53 = vsel %vm1112_vm1, %v10342_v13, 0  ;;  %v10343_v48 = vpack.c.bf16 %v9997_v43, %v9996_v41  ;;  %v13573_v51 = vpop.permute.xlu1 %848  ;;  %v13576_v55 = vpop.permute.xlu0 %841 }
 0x30e   :  { %18130 = vst [vmem:[#allocation29_spill] sm:$0xff] %v13487_v56  ;;  %v719_v28 = vmul.f32 %v13395_v54, %v697_v16  ;;  %10911 = vmatpush3.bf16.xpose.msra.mxu1 %v1138_v53  ;;  %18140 = vst [vmem:[#allocation39_spill] sm:$0xff] %v13573_v51  ;;  %vm925_vm7 = vcmp.gt.f32.partialorder %v13573_v51, 0.5  ;;  %vm924_vm8 = vcmp.gt.f32.partialorder %v13576_v55, 0.5 }
 0x30f   :  { %18131 = vst [vmem:[#allocation30_spill] sm:$0xff] %v13491_v52  ;;  %v13496_v58 = vpack.c.bf16 %v13487_v56, %v13491_v52  ;;  %v718_v63 = vmul.f32 %v13395_v54, %v696_v57  ;;  %11791 = vmatprep.subr.msk.bf16.mxu1 %vm1112_vm1, %v10343_v48  ;;  %v1141_v50 = vsel %vm1112_vm1, %v10343_v48, 0  ;;  %18141 = vst [vmem:[#allocation40_spill] sm:$0xff] %v13576_v55 }
 0x310   :  { %v12077_v62 = vpop.eup %12076  ;;  %v13503_v23 = vadd.f32 %v13403_v6, %v719_v28  ;;  %vm973_vm9 = vmand %vm749_vm5, %vm925_vm7 }
 0x311   :  { %v12079_v30 = vpop.eup %12078  ;;  %v699_v7 = vmul.f32 %v12077_v62, %v13376_v29  ;;  %v13507_v21 = vadd.f32 %v13403_v6, %v718_v63  ;;  %v9999_v20 = vsel %vm973_vm9, 1.0, %v17944_v46  ;;  %vm972_vm13 = vmand %vm748_vm6, %vm924_vm8  ;;  %v13589_v62 = vpop.permute.xlu1 %862  ;;  %vm753_vm8 = vcmp.eq.s32.totalorder %v13247_v38, 9 }
 0x312   :  { %1538 = vmatmul.mubr.bf16.gmra.mrb[28].mxu0 %v13464_v34  ;;  %18132 = vst [vmem:[#allocation31_spill] sm:$0xff] %v13503_v23  ;;  %v698_v40 = vmul.f32 %v12079_v30, %v13366_v26  ;;  %v9998_v16 = vsel %vm972_vm13, 1.0, %v17944_v46  ;;  %18142 = vst [vmem:[#allocation41_spill] sm:$0xff] %v13589_v62  ;;  %v13592_v63 = vpop.permute.xlu0 %855  ;;  %vm927_vm0 = vcmp.gt.f32.partialorder %v13589_v62, 0.5  ;;  %vm752_vm9 = vcmp.eq.s32.totalorder %v13247_v38, 8 }
 0x313   :  { %1547 = vmatprep.mubr.bf16.mxu0 %v17939_v1  ;;  %18133 = vst [vmem:[#allocation32_spill] sm:$0xff] %v13507_v21  ;;  %v13512_v11 = vpack.c.bf16 %v13503_v23, %v13507_v21  ;;  %v721_v8 = vmul.f32 %v13395_v54, %v699_v7  ;;  %v10344_v57 = vpack.c.bf16 %v9999_v20, %v9998_v16  ;;  %18143 = vst [vmem:[#allocation42_spill] sm:$0xff] %v13592_v63 }
 0x314   :  { %v720_v14 = vmul.f32 %v13395_v54, %v698_v40  ;;  %v874_v54 = vrot.slane %v13532_v22, %v13214_v5  ;;  %vm926_vm3 = vcmp.gt.f32.partialorder %v13592_v63, 0.5  ;;  %vm975_vm4 = vmand %vm751_vm14, %vm927_vm0 }
 0x315   :  { %v13519_v60 = vadd.f32 %v13403_v6, %v721_v8  ;;  %v1144_v28 = vsel %vm1112_vm1, %v10344_v57, 0  ;;  %v10001_v30 = vsel %vm975_vm4, 1.0, %v17944_v46  ;;  %vm974_vm7 = vmand %vm750_vm15, %vm926_vm3 }
 0x316   :  { %v13522_v29 = vadd.f32 %v13403_v6, %v720_v14  ;;  %876 = vbcast.lane.b32.xlu1 %v874_v54, 256  ;;  %v881_v6 = vrot.slane %v13532_v22, %v13208_v2  ;;  %10913 = vmatpush3.bf16.xpose.msra.mxu1 %v1141_v50  ;;  %v10000_v7 = vsel %vm974_vm7, 1.0, %v17944_v46  ;;  %vm1725_vm7 = vcmask 261120  }
 0x317   :  { %18134 = vst [vmem:[#allocation33_spill] sm:$0xff] %v13519_v60  ;;  %11792 = vmatprep.subr.msk.bf16.mxu1 %vm1112_vm1, %v10344_v57  ;;  %v10345_v40 = vpack.c.bf16 %v10001_v30, %v10000_v7 }
 0x318   :  { %18135 = vst [vmem:[#allocation34_spill] sm:$0xff] %v13522_v29  ;;  %v13526_v26 = vpack.c.bf16 %v13519_v60, %v13522_v29 }
 0x319   :  { %v1147_v8 = vsel %vm1112_vm1, %v10345_v40, 0 }
 0x31a   :  { %1548 = vmatmul.mubr.bf16.gmra.mrb[32].mxu0 %v13480_v49  ;;  %883 = vbcast.lane.b32.xlu1 %v881_v6, 256  ;;  %v13620_v6 = vld [vmem:[%s17922_s7] sm:$0x7] }
 0x31b   :  { %1557 = vmatprep.mubr.bf16.mxu0 %v17939_v1  ;;  %v13625_v13 = vrot.slane %v13620_v6, %v13210_v3  ;;  %v13631_v53 = vrot.slane %v13620_v6, %v13214_v5  ;;  %v14070_v23 = vrot.slane %v13620_v6, %v13208_v2 }
 0x31e   :  { %10915 = vmatpush3.bf16.xpose.msra.mxu1 %v1144_v28 }
 0x31f   :  { %11793 = vmatprep.subr.msk.bf16.mxu1 %vm1112_vm1, %v10345_v40 }
 0x322   :  { %1558 = vmatmul.mubr.bf16.gmra.mrb[36].mxu0 %v13496_v58 }
 0x323   :  { %1567 = vmatprep.mubr.bf16.mxu0 %v17939_v1 }
 0x326   :  { %10917 = vmatpush3.bf16.xpose.msra.mxu1 %v1147_v8 }
 0x32a   :  { %1568 = vmatmul.mubr.bf16.gmra.mrb[40].mxu0 %v13512_v11 }
 0x32b   :  { %1577 = vmatprep.mubr.bf16.mxu0 %v17939_v1 }
 0x332   :  { %1578 = vmatmul.mubr.bf16.gmra.mrb[44].mxu0 %v13526_v26 }
 0x37b   :  { %v13608_v54 = vpop.permute.xlu0 %869 }
 0x37c   :  { %18145 = vst [vmem:[#allocation44_spill] sm:$0xff] %v13608_v54  ;;  %vm928_vm0 = vcmp.gt.f32.partialorder %v13608_v54, 0.5 }
 0x37d   :  { %vm976_vm4 = vmand %vm752_vm9, %vm928_vm0 }
 0x37e   :  { %v10002_v35 = vsel %vm976_vm4, 1.0, %v17944_v46 }
 0x388   :  { %v13605_v14 = vpop.permute.xlu1 %876 }
 0x389   :  { %18144 = vst [vmem:[#allocation43_spill] sm:$0xff] %v13605_v14  ;;  %vm929_vm13 = vcmp.gt.f32.partialorder %v13605_v14, 0.5 }
 0x38a   :  { %vm977_vm3 = vmand %vm753_vm8, %vm929_vm13 }
 0x38b   :  { %v10003_v24 = vsel %vm977_vm3, 1.0, %v17944_v46  ;;  %vm758_vm3 = vcmp.eq.s32.totalorder %v13247_v38, 14 }
 0x38c   :  { %v10346_v36 = vpack.c.bf16 %v10003_v24, %v10002_v35  ;;  %v888_v35 = vrot.slane %v13532_v22, %v13212_v4 }
 0x38e   :  { %11794 = vmatprep.subr.msk.bf16.mxu1 %vm1112_vm1, %v10346_v36  ;;  %v1150_v41 = vsel %vm1112_vm1, %v10346_v36, 0 }
 0x38f   :  { %10919 = vmatpush3.bf16.xpose.msra.mxu1 %v1150_v41 }
 0x3cd   :  { %v1509_v43 = vpop.f32.mrb[16].mxu0 }
 0x3ce   :  { %v1511_v48 = vpop.f32.mrb[17].mxu0  ;;  %v1510_v20 = vadd.f32 %v1509_v43, %v13625_v13 }
 0x3cf   :  { %v1513_v50 = vpop.f32.mrb[18].mxu0  ;;  %v1512_v28 = vadd.f32 %v1511_v48, %v13631_v53 }
 0x3d0   :  { %v1514_v16 = vadd.f32 %v1513_v50, %v13625_v13  ;;  %v1515_v57 = vpop.f32.mrb[19].mxu0 }
 0x3d1   :  { %v1516_v30 = vadd.f32 %v1515_v57, %v13631_v53 }
 0x3d2   :  { %v13637_v7 = vpack.c.bf16 %v1514_v16, %v1510_v20 }
 0x3d3   :  { %v13639_v40 = vpack.c.bf16 %v1516_v30, %v1512_v28  ;;  %v895_v28 = vrot.slane %v13532_v22, %v13223_v10 }
 0x3d4   :  { %18146 = vst [vmem:[#allocation45_spill] sm:$0xff] %v13637_v7  ;;  %10990 = vmatprep.mubr.msk.bf16.mxu0 %vm1725_vm7, %v13637_v7 }
 0x3d5   :  { %2192 = vrot.lane.b32.xlu0 %v13639_v40, %s13036_s20  ;;  %v1519_v8 = vpop.f32.mrb[20].mxu0  ;;  %11798 = vmatprep.subr.msk.bf16.mxu0 %vm1725_vm7, %v13639_v40  ;;  %v1751_v24 = vsel %vm1725_vm7, %v13639_v40, 0 }
 0x3d6   :  { %v1521_v36 = vpop.f32.mrb[21].mxu0  ;;  %10975 = vmatpush3.bf16.xpose.msra.mxu0 %v1751_v24  ;;  %v1520_v43 = vadd.f32 %v1519_v8, %v13625_v13  ;;  %v902_v24 = vrot.slane %v13532_v22, %v13221_v9 }
 0x3d7   :  { %v1523_v41 = vpop.f32.mrb[22].mxu0  ;;  %v1522_v20 = vadd.f32 %v1521_v36, %v13631_v53 }
 0x3d8   :  { %v1524_v48 = vadd.f32 %v1523_v41, %v13625_v13  ;;  %v1525_v50 = vpop.f32.mrb[23].mxu0 }
 0x3d9   :  { %v1526_v16 = vadd.f32 %v1525_v50, %v13631_v53  ;;  %890 = vbcast.lane.b32.xlu0 %v888_v35, 256 }
 0x3da   :  { %v13655_v57 = vpack.c.bf16 %v1524_v48, %v1520_v43 }
 0x3db   :  { %v13659_v30 = vpack.c.bf16 %v1526_v16, %v1522_v20  ;;  %v909_v16 = vrot.slane %v13532_v22, %v13231_v19  ;;  %v13695_v19 = vsel %vm747_vm2, 1.0, %v17944_v46  ;;  %vm755_vm2 = vcmp.eq.s32.totalorder %v13247_v38, 11 }
 0x3dc   :  { %18147 = vst [vmem:[#allocation46_spill] sm:$0xff] %v13655_v57 }
 0x3dd   :  { %2194 = vrot.lane.b32.xlu1 %v13659_v30, %s13036_s20  ;;  %v1529_v4 = vpop.f32.mrb[24].mxu0  ;;  %11799 = vmatprep.subr.msk.bf16.mxu0 %vm1725_vm7, %v13659_v30  ;;  %v1754_v8 = vsel %vm1725_vm7, %v13659_v30, 0 }
 0x3de   :  { %v1531_v35 = vpop.f32.mrb[25].mxu0  ;;  %10977 = vmatpush3.bf16.xpose.msra.mxu0 %v1754_v8  ;;  %897 = vbcast.lane.b32.xlu0 %v895_v28, 256  ;;  %v1530_v10 = vadd.f32 %v1529_v4, %v13625_v13  ;;  %v916_v8 = vrot.slane %v13532_v22, %v13229_v18  ;;  %v9978_v18 = vsel %vm744_vm11, 1.0, %v17944_v46  ;;  %v9979_v22 = vsel %vm745_vm12, 1.0, %v17944_v46 }
 0x3df   :  { %v1533_v36 = vpop.f32.mrb[26].mxu0  ;;  %v1532_v48 = vadd.f32 %v1531_v35, %v13631_v53 }
 0x3e0   :  { %v1534_v41 = vadd.f32 %v1533_v36, %v13625_v13  ;;  %v1535_v43 = vpop.f32.mrb[27].mxu0 }
 0x3e1   :  { %v1536_v50 = vadd.f32 %v1535_v43, %v13631_v53  ;;  %904 = vbcast.lane.b32.xlu1 %v902_v24, 256  ;;  %v13690_v24 = vsel %vm746_vm10, 1.0, %v17944_v46  ;;  %vm754_vm10 = vcmp.eq.s32.totalorder %v13247_v38, 10 }
 0x3e2   :  { %v13673_v20 = vpack.c.bf16 %v1534_v41, %v1530_v10 }
 0x3e3   :  { %v13677_v9 = vpack.c.bf16 %v1536_v50, %v1532_v48  ;;  %v10334_v48 = vpack.c.bf16 %v9979_v22, %v9978_v18  ;;  %v13722_v18 = vsel %vm748_vm6, 1.0, %v17944_v46  ;;  %v13738_v22 = vsel %vm750_vm15, 1.0, %v17944_v46 }
 0x3e4   :  { %18148 = vst [vmem:[#allocation47_spill] sm:$0xff] %v13673_v20 }
 0x3e5   :  { %2196 = vrot.lane.b32.xlu0 %v13677_v9, %s13036_s20  ;;  %v1539_v28 = vpop.f32.mrb[28].mxu0  ;;  %11800 = vmatprep.subr.msk.bf16.mxu0 %vm1725_vm7, %v13677_v9  ;;  %v1757_v4 = vsel %vm1725_vm7, %v13677_v9, 0 }
 0x3e6   :  { %v1540_v35 = vadd.f32 %v1539_v28, %v13625_v13  ;;  %v1541_v36 = vpop.f32.mrb[29].mxu0  ;;  %10979 = vmatpush3.bf16.xpose.msra.mxu0 %v1757_v4  ;;  %911 = vbcast.lane.b32.xlu1 %v909_v16, 256 }
 0x3e7   :  { %v1543_v10 = vpop.f32.mrb[30].mxu0  ;;  %v1542_v28 = vadd.f32 %v1541_v36, %v13631_v53  ;;  %10926 = vmatprep.mubr.msk.bf16.mxu1 %vm1112_vm1, %v10334_v48  ;;  %v13733_v36 = vsel %vm751_vm14, 1.0, %v17944_v46  ;;  %vm756_vm14 = vcmp.eq.s32.totalorder %v13247_v38, 12 }
 0x3e8   :  { %v1544_v41 = vadd.f32 %v1543_v10, %v13625_v13  ;;  %v1545_v43 = vpop.f32.mrb[31].mxu0  ;;  %v13717_v10 = vsel %vm749_vm5, 1.0, %v17944_v46 }
 0x3e9   :  { %v1546_v16 = vadd.f32 %v1545_v43, %v13631_v53  ;;  %918 = vbcast.lane.b32.xlu0 %v916_v8, 256 }
 0x3ea   :  { %v13709_v4 = vpack.c.bf16 %v1544_v41, %v1540_v35 }
 0x3eb   :  { %v13712_v1 = vpack.c.bf16 %v1546_v16, %v1542_v28 }
 0x3ec   :  { %18149 = vst [vmem:[#allocation48_spill] sm:$0xff] %v13709_v4 }
 0x3ed   :  { %18150 = vst [vmem:[#allocation49_spill] sm:$0xff] %v13712_v1  ;;  %2198 = vrot.lane.b32.xlu1 %v13712_v1, %s13036_s20  ;;  %v1549_v8 = vpop.f32.mrb[32].mxu0  ;;  %11801 = vmatprep.subr.msk.bf16.mxu0 %vm1725_vm7, %v13712_v1  ;;  %v1760_v35 = vsel %vm1725_vm7, %v13712_v1, 0 }
 0x3ee   :  { %v1551_v41 = vpop.f32.mrb[33].mxu0  ;;  %10981 = vmatpush3.bf16.xpose.msra.mxu0 %v1760_v35  ;;  %v1550_v28 = vadd.f32 %v1549_v8, %v13625_v13  ;;  %v18152_v35 = vmov 0.0  }
 0x3ef   :  { %v1553_v43 = vpop.f32.mrb[34].mxu0  ;;  %v1552_v14 = vadd.f32 %v1551_v41, %v13631_v53  ;;  %v13755_v48 = vsel %vm753_vm8, 1.0, %v18152_v35  ;;  %v13760_v8 = vsel %vm752_vm9, 1.0, %v18152_v35  ;;  %vm757_vm8 = vcmp.eq.s32.totalorder %v13247_v38, 13 }
 0x3f0   :  { %v1554_v16 = vadd.f32 %v1553_v43, %v13625_v13  ;;  %v1555_v50 = vpop.f32.mrb[35].mxu0 }
 0x3f1   :  { %v1556_v62 = vadd.f32 %v1555_v50, %v13631_v53 }
 0x3f2   :  { %v13748_v46 = vpack.c.bf16 %v1554_v16, %v1550_v28 }
 0x3f3   :  { %v13750_v63 = vpack.c.bf16 %v1556_v62, %v1552_v14 }
 0x3f4   :  { %18151 = vst [vmem:[#allocation50_spill] sm:$0xff] %v13748_v46 }
 0x3f5   :  { %2200 = vrot.lane.b32.xlu0 %v13750_v63, %s13036_s20  ;;  %v1559_v41 = vpop.f32.mrb[36].mxu0  ;;  %11802 = vmatprep.subr.msk.bf16.mxu0 %vm1725_vm7, %v13750_v63  ;;  %v1763_v62 = vsel %vm1725_vm7, %v13750_v63, 0 }
 0x3f6   :  { %v1560_v14 = vadd.f32 %v1559_v41, %v13625_v13  ;;  %v1561_v50 = vpop.f32.mrb[37].mxu0  ;;  %10983 = vmatpush3.bf16.xpose.msra.mxu0 %v1763_v62 }
 0x3f7   :  { %v1563_v43 = vpop.f32.mrb[38].mxu0  ;;  %v1562_v51 = vadd.f32 %v1561_v50, %v13631_v53 }
 0x3f8   :  { %v1564_v16 = vadd.f32 %v1563_v43, %v13625_v13  ;;  %v1565_v54 = vpop.f32.mrb[39].mxu0 }
 0x3f9   :  { %v1566_v55 = vadd.f32 %v1565_v54, %v13631_v53 }
 0x3fa   :  { %v13774_v37 = vpack.c.bf16 %v1564_v16, %v1560_v14 }
 0x3fb   :  { %v13776_v33 = vpack.c.bf16 %v1566_v55, %v1562_v51 }
 0x3fc   :  { %18153 = vst [vmem:[#allocation51_spill] sm:$0xff] %v13774_v37 }
 0x3fd   :  { %18154 = vst [vmem:[#allocation52_spill] sm:$0xff] %v13776_v33  ;;  %2202 = vrot.lane.b32.xlu1 %v13776_v33, %s13036_s20  ;;  %v1569_v41 = vpop.f32.mrb[40].mxu0  ;;  %11803 = vmatprep.subr.msk.bf16.mxu0 %vm1725_vm7, %v13776_v33  ;;  %v1766_v62 = vsel %vm1725_vm7, %v13776_v33, 0 }
 0x3fe   :  { %v1570_v43 = vadd.f32 %v1569_v41, %v13625_v13  ;;  %v1571_v28 = vpop.f32.mrb[41].mxu0  ;;  %10985 = vmatpush3.bf16.xpose.msra.mxu0 %v1766_v62 }
 0x3ff   :  { %v1573_v50 = vpop.f32.mrb[42].mxu0  ;;  %v1572_v51 = vadd.f32 %v1571_v28, %v13631_v53 }
 0x400   :  { %v1574_v54 = vadd.f32 %v1573_v50, %v13625_v13  ;;  %v1575_v14 = vpop.f32.mrb[43].mxu0 }
 0x401   :  { %v1576_v55 = vadd.f32 %v1575_v14, %v13631_v53 }
 0x402   :  { %v13788_v16 = vpack.c.bf16 %v1574_v54, %v1570_v43 }
 0x403   :  { %v13790_v27 = vpack.c.bf16 %v1576_v55, %v1572_v51 }
 0x404   :  { %18155 = vst [vmem:[#allocation53_spill] sm:$0xff] %v13788_v16 }
 0x405   :  { %18156 = vst [vmem:[#allocation54_spill] sm:$0xff] %v13790_v27  ;;  %2204 = vrot.lane.b32.xlu0 %v13790_v27, %s13036_s20  ;;  %v1579_v32 = vpop.f32.mrb[44].mxu0  ;;  %11804 = vmatprep.subr.msk.bf16.mxu0 %vm1725_vm7, %v13790_v27  ;;  %v1769_v41 = vsel %vm1725_vm7, %v13790_v27, 0 }
 0x406   :  { %v1580_v62 = vadd.f32 %v1579_v32, %v13625_v13  ;;  %v1581_v50 = vpop.f32.mrb[45].mxu0  ;;  %10987 = vmatpush3.bf16.xpose.msra.mxu0 %v1769_v41 }
 0x407   :  { %v1583_v28 = vpop.f32.mrb[46].mxu0  ;;  %v1582_v14 = vadd.f32 %v1581_v50, %v13631_v53 }
 0x408   :  { %v1584_v43 = vadd.f32 %v1583_v28, %v13625_v13  ;;  %v1585_v54 = vpop.f32.mrb[47].mxu0  ;;  %v13872_v13 = vpop.permute.xlu1 %883 }
 0x409   :  { %v1586_v51 = vadd.f32 %v1585_v54, %v13631_v53  ;;  %2168 = vrot.lane.b32.xlu0 %v13637_v7, %s13036_s20  ;;  %18158 = vst [vmem:[#allocation56_spill] sm:$0xff] %v13872_v13  ;;  %vm930_vm11 = vcmp.gt.f32.partialorder %v13872_v13, 0.5 }
 0x40a   :  { %v13804_v55 = vpack.c.bf16 %v1584_v43, %v1580_v62  ;;  %vm978_vm12 = vmand %vm754_vm10, %vm930_vm11 }
 0x40b   :  { %v13806_v5 = vpack.c.bf16 %v1586_v51, %v1582_v14  ;;  %v10004_v50 = vsel %vm978_vm12, 1.0, %v18152_v35  ;;  %vm759_vm12 = vcmp.eq.s32.totalorder %v13247_v38, 15 }
 0x40c   :  { %18157 = vst [vmem:[#allocation55_spill] sm:$0xff] %v13804_v55 }
 0x40d   :  { %2172 = vrot.lane.b32.xlu0 %v13673_v20, %s13036_s20  ;;  %2206 = vrot.lane.b32.xlu1 %v13806_v5, %s13036_s20  ;;  %v1772_v32 = vsel %vm1725_vm7, %v13806_v5, 0 }
 0x40e   :  { %11805 = vmatprep.subr.msk.bf16.mxu0 %vm1725_vm7, %v13806_v5 }
 0x40f   :  { %10989 = vmatpush3.bf16.xpose.msra.mxu0 %v1772_v32 }
 0x411   :  { %2176 = vrot.lane.b32.xlu0 %v13748_v46, %s13036_s20  ;;  %2170 = vrot.lane.b32.xlu1 %v13655_v57, %s13036_s20 }
 0x415   :  { %2180 = vrot.lane.b32.xlu0 %v13788_v16, %s13036_s20  ;;  %2174 = vrot.lane.b32.xlu1 %v13709_v4, %s13036_s20 }
 0x416   :  { %10991 = vmatmul.mubr.msk.bf16.vlgmr.msra.gmra.mrb[48].mxu0 %vm1725_vm7, %v13655_v57 }
 0x417   :  { %10994 = vmatprep.mubr.msk.bf16.mxu0 %vm1725_vm7, %v13673_v20 }
 0x419   :  { %2956 = vrot.lane.b32.xlu0 %v13639_v40, %s13029_s12  ;;  %2178 = vrot.lane.b32.xlu1 %v13774_v37, %s13036_s20 }
 0x41d   :  { %2960 = vrot.lane.b32.xlu0 %v13677_v9, %s13029_s12  ;;  %2182 = vrot.lane.b32.xlu1 %v13804_v55, %s13036_s20 }
 0x41e   :  { %10995 = vmatmul.mubr.msk.bf16.gmra.mrb[52].mxu0 %vm1725_vm7, %v13709_v4 }
 0x41f   :  { %10998 = vmatprep.mubr.msk.bf16.mxu0 %vm1725_vm7, %v13748_v46 }
 0x421   :  { %2968 = vrot.lane.b32.xlu0 %v13790_v27, %s13029_s12  ;;  %2958 = vrot.lane.b32.xlu1 %v13659_v30, %s13029_s12 }
 0x425   :  { %2940 = vrot.lane.b32.xlu0 %v13637_v7, %s13029_s12  ;;  %2962 = vrot.lane.b32.xlu1 %v13712_v1, %s13029_s12 }
 0x426   :  { %10999 = vmatmul.mubr.msk.bf16.gmra.mrb[56].mxu0 %vm1725_vm7, %v13774_v37 }
 0x427   :  { %11002 = vmatprep.mubr.msk.bf16.mxu0 %vm1725_vm7, %v13788_v16 }
 0x429   :  { %2942 = vrot.lane.b32.xlu0 %v13655_v57, %s13029_s12  ;;  %2964 = vrot.lane.b32.xlu1 %v13750_v63, %s13029_s12 }
 0x42d   :  { %2948 = vrot.lane.b32.xlu0 %v13748_v46, %s13029_s12  ;;  %2966 = vrot.lane.b32.xlu1 %v13776_v33, %s13029_s12 }
 0x42e   :  { %11003 = vmatmul.mubr.msk.bf16.gmra.mrb[60].mxu0 %vm1725_vm7, %v13804_v55 }
 0x431   :  { %2950 = vrot.lane.b32.xlu0 %v13774_v37, %s13029_s12  ;;  %2944 = vrot.lane.b32.xlu1 %v13673_v20, %s13029_s12 }
 0x435   :  { %2946 = vrot.lane.b32.xlu1 %v13709_v4, %s13029_s12 }
 0x439   :  { %2952 = vrot.lane.b32.xlu1 %v13788_v16, %s13029_s12 }
 0x43d   :  { %2954 = vrot.lane.b32.xlu1 %v13804_v55, %s13029_s12 }
 0x447   :  { %v2193_v53 = vpop.permute.xlu0 %2192 }
 0x448   :  { %11806 = vmatprep.subr.msk.bf16.mxu0 %vm1725_vm7, %v2193_v53  ;;  %v2233_v41 = vsel %vm1725_vm7, %v2193_v53, 0 }
 0x449   :  { %11039 = vmatpush3.bf16.xpose.msra.mxu0 %v2233_v41 }
 0x44b   :  { %v13881_v62 = vpop.permute.xlu0 %890 }
 0x44c   :  { %18159 = vst [vmem:[#allocation57_spill] sm:$0xff] %v13881_v62  ;;  %vm931_vm5 = vcmp.gt.f32.partialorder %v13881_v62, 0.5 }
 0x44d   :  { %vm979_vm6 = vmand %vm755_vm2, %vm931_vm5 }
 0x44e   :  { %v10005_v28 = vsel %vm979_vm6, 1.0, %v18152_v35 }
 0x44f   :  { %v10347_v43 = vpack.c.bf16 %v10005_v28, %v10004_v50  ;;  %v2195_v54 = vpop.permute.xlu1 %2194 }
 0x450   :  { %11807 = vmatprep.subr.msk.bf16.mxu0 %vm1725_vm7, %v2195_v54  ;;  %v2236_v14 = vsel %vm1725_vm7, %v2195_v54, 0  ;;  %v13891_v51 = vpop.permute.xlu0 %897 }
 0x451   :  { %18160 = vst [vmem:[#allocation58_spill] sm:$0xff] %v13891_v51  ;;  %11795 = vmatprep.subr.msk.bf16.mxu1 %vm1112_vm1, %v10347_v43  ;;  %11041 = vmatpush3.bf16.xpose.msra.mxu0 %v2236_v14  ;;  %v1153_v32 = vsel %vm1112_vm1, %v10347_v43, 0  ;;  %vm932_vm15 = vcmp.gt.f32.partialorder %v13891_v51, 0.5  ;;  %v11913_v51 = vld [vmem:[#allocation5 + $0x20] ss:$12 sps:$4 sm:$0xff]  }
 0x452   :  { %10921 = vmatpush3.bf16.xpose.msra.mxu1 %v1153_v32  ;;  %vm980_vm9 = vmand %vm756_vm14, %vm932_vm15 }
 0x453   :  { %v13899_v53 = vpop.permute.xlu1 %904  ;;  %v10006_v41 = vsel %vm980_vm9, 1.0, %v18152_v35 }
 0x454   :  { %18161 = vst [vmem:[#allocation59_spill] sm:$0xff] %v13899_v53  ;;  %vm933_vm13 = vcmp.gt.f32.partialorder %v13899_v53, 0.5 }
 0x455   :  { %vm981_vm0 = vmand %vm757_vm8, %vm933_vm13 }
 0x456   :  { %v10007_v50 = vsel %vm981_vm0, 1.0, %v18152_v35 }
 0x457   :  { %v10348_v28 = vpack.c.bf16 %v10007_v50, %v10006_v41  ;;  %v2197_v43 = vpop.permute.xlu0 %2196 }
 0x458   :  { %11808 = vmatprep.subr.msk.bf16.mxu0 %vm1725_vm7, %v2197_v43  ;;  %v2239_v54 = vsel %vm1725_vm7, %v2197_v43, 0  ;;  %v13909_v14 = vpop.permute.xlu1 %911 }
 0x459   :  { %18162 = vst [vmem:[#allocation60_spill] sm:$0xff] %v13909_v14  ;;  %11796 = vmatprep.subr.msk.bf16.mxu1 %vm1112_vm1, %v10348_v28  ;;  %11043 = vmatpush3.bf16.xpose.msra.mxu0 %v2239_v54  ;;  %v1156_v32 = vsel %vm1112_vm1, %v10348_v28, 0  ;;  %vm934_vm4 = vcmp.gt.f32.partialorder %v13909_v14, 0.5  ;;  %v11912_v14 = vld [vmem:[#allocation5 + $0x8] ss:$12 sps:$4 sm:$0xff]  }
 0x45a   :  { %10923 = vmatpush3.bf16.xpose.msra.mxu1 %v1156_v32  ;;  %vm982_vm11 = vmand %vm758_vm3, %vm934_vm4 }
 0x45b   :  { %v13917_v41 = vpop.permute.xlu0 %918  ;;  %v10008_v50 = vsel %vm982_vm11, 1.0, %v18152_v35 }
 0x45c   :  { %18163 = vst [vmem:[#allocation61_spill] sm:$0xff] %v13917_v41  ;;  %vm935_vm5 = vcmp.gt.f32.partialorder %v13917_v41, 0.5 }
 0x45d   :  { %vm983_vm6 = vmand %vm759_vm12, %vm935_vm5 }
 0x45e   :  { %v10009_v43 = vsel %vm983_vm6, 1.0, %v18152_v35 }
 0x45f   :  { %v10349_v28 = vpack.c.bf16 %v10009_v43, %v10008_v50  ;;  %v2199_v54 = vpop.permute.xlu1 %2198  ;;  %v18164_v50 = vpack.c.bf16 %v13695_v19, %v13690_v24  ;;  %v18165_v43 = vpack.c.bf16 %v13717_v10, %v13722_v18  ;;  %v18166_v24 = vpack.c.bf16 %v13733_v36, %v13738_v22 }
 0x460   :  { %11809 = vmatprep.subr.msk.bf16.mxu0 %vm1725_vm7, %v2199_v54  ;;  %v2242_v32 = vsel %vm1725_vm7, %v2199_v54, 0  ;;  %v11915_v54 = vld [vmem:[#allocation5 + $0x50] ss:$12 sps:$4 sm:$0xff]   ;;  %v9988_v19 = vsel %vm754_vm10, 1.0, %v18152_v35  ;;  %v9989_v10 = vsel %vm755_vm2, 1.0, %v18152_v35  ;;  %v18167_v18 = vpack.c.bf16 %v13755_v48, %v13760_v8 }
 0x461   :  { %11797 = vmatprep.subr.msk.bf16.mxu1 %vm1112_vm1, %v10349_v28  ;;  %11045 = vmatpush3.bf16.xpose.msra.mxu0 %v2242_v32  ;;  %v1159_v53 = vsel %vm1112_vm1, %v10349_v28, 0  ;;  %v9991_v36 = vsel %vm757_vm8, 1.0, %v18152_v35  ;;  %v9990_v22 = vsel %vm756_vm14, 1.0, %v18152_v35  ;;  %v9992_v8 = vsel %vm758_vm3, 1.0, %v18152_v35 }
 0x462   :  { %10925 = vmatpush3.bf16.xpose.msra.mxu1 %v1159_v53  ;;  %v11914_v53 = vld [vmem:[#allocation5 + $0x38] ss:$12 sps:$4 sm:$0xff]  }
 0x463   :  { %10942 = vmatprep.subr.bf16.mxu1 %v11912_v14 }
 0x467   :  { %v2201_v41 = vpop.permute.xlu0 %2200 }
 0x468   :  { %11810 = vmatprep.subr.msk.bf16.mxu0 %vm1725_vm7, %v2201_v41  ;;  %v2245_v62 = vsel %vm1725_vm7, %v2201_v41, 0 }
 0x469   :  { %10927 = vmatmul.mubr.msk.bf16.vlgmr.msra.gmra.mrb[0].mxu1 %vm1112_vm1, %v18164_v50  ;;  %11047 = vmatpush3.bf16.xpose.msra.mxu0 %v2245_v62  ;;  %v11916_v62 = vld [vmem:[#allocation5 + $0x68] ss:$12 sps:$4 sm:$0xff]   ;;  %v11917_v50 = vld [vmem:[#allocation5 + $0x80] ss:$12 sps:$4 sm:$0xff]  }
 0x46a   :  { %10943 = vmatpush3.bf16.msra.mxu1 %v11912_v14  ;;  %10930 = vmatprep.mubr.msk.bf16.mxu1 %vm1112_vm1, %v18165_v43  ;;  %v10340_v14 = vpack.c.bf16 %v9991_v36, %v9990_v22  ;;  %v9993_v43 = vsel %vm759_vm12, 1.0, %v18152_v35 }
 0x46b   :  { %10944 = vmatprep.subr.bf16.mxu1 %v11913_v51 }
 0x46e   :  { %10945 = vmatpush3.bf16.msra.mxu1 %v11913_v51  ;;  %v10339_v51 = vpack.c.bf16 %v9989_v10, %v9988_v19  ;;  %v11919_v19 = vld [vmem:[#allocation5 + $0xb0] ss:$12 sps:$4 sm:$0xff]  }
 0x46f   :  { %v2203_v28 = vpop.permute.xlu1 %2202  ;;  %10946 = vmatprep.subr.bf16.mxu1 %v11914_v53 }
 0x470   :  { %11811 = vmatprep.subr.msk.bf16.mxu0 %vm1725_vm7, %v2203_v28  ;;  %v2248_v41 = vsel %vm1725_vm7, %v2203_v28, 0  ;;  %v11918_v28 = vld [vmem:[#allocation5 + $0x98] ss:$12 sps:$4 sm:$0xff]  }
 0x471   :  { %10931 = vmatmul.mubr.msk.bf16.gmra.mrb[4].mxu1 %vm1112_vm1, %v18166_v24  ;;  %11049 = vmatpush3.bf16.xpose.msra.mxu0 %v2248_v41 }
 0x472   :  { %10947 = vmatpush3.bf16.msra.mxu1 %v11914_v53  ;;  %10934 = vmatprep.mubr.msk.bf16.mxu1 %vm1112_vm1, %v18167_v18 }
 0x473   :  { %10948 = vmatprep.subr.bf16.mxu1 %v11915_v54 }
 0x476   :  { %10949 = vmatpush3.bf16.msra.mxu1 %v11915_v54  ;;  %v10341_v54 = vpack.c.bf16 %v9993_v43, %v9992_v8 }
 0x477   :  { %v2205_v32 = vpop.permute.xlu0 %2204  ;;  %10950 = vmatprep.subr.bf16.mxu1 %v11916_v62 }
 0x478   :  { %11812 = vmatprep.subr.msk.bf16.mxu0 %vm1725_vm7, %v2205_v32  ;;  %v2251_v48 = vsel %vm1725_vm7, %v2205_v32, 0 }
 0x479   :  { %10935 = vmatmul.mubr.msk.bf16.gmra.mrb[8].mxu1 %vm1112_vm1, %v10339_v51  ;;  %11051 = vmatpush3.bf16.xpose.msra.mxu0 %v2251_v48 }
 0x47a   :  { %10951 = vmatpush3.bf16.msra.mxu1 %v11916_v62  ;;  %10938 = vmatprep.mubr.msk.bf16.mxu1 %vm1112_vm1, %v10340_v14 }
 0x47b   :  { %v2169_v53 = vpop.permute.xlu0 %2168  ;;  %10952 = vmatprep.subr.bf16.mxu1 %v11917_v50 }
 0x47c   :  { %11054 = vmatprep.mubr.msk.bf16.mxu0 %vm1725_vm7, %v2169_v53 }
 0x47e   :  { %10953 = vmatpush3.bf16.msra.mxu1 %v11917_v50 }
 0x47f   :  { %v2207_v41 = vpop.permute.xlu1 %2206  ;;  %v2173_v24 = vpop.permute.xlu0 %2172  ;;  %10954 = vmatprep.subr.bf16.mxu1 %v11918_v28 }
 0x480   :  { %11813 = vmatprep.subr.msk.bf16.mxu0 %vm1725_vm7, %v2207_v41  ;;  %v2254_v10 = vsel %vm1725_vm7, %v2207_v41, 0 }
 0x481   :  { %10939 = vmatmul.mubr.msk.bf16.gmra.mrb[12].mxu1 %vm1112_vm1, %v10341_v54  ;;  %11053 = vmatpush3.bf16.xpose.msra.mxu0 %v2254_v10 }
 0x482   :  { %10955 = vmatpush3.bf16.msra.mxu1 %v11918_v28  ;;  %10958 = vmatprep.mubr.bf16.mxu1 %v13415_v25 }
 0x483   :  { %v2171_v38 = vpop.permute.xlu1 %2170  ;;  %v2177_v35 = vpop.permute.xlu0 %2176  ;;  %10956 = vmatprep.subr.bf16.mxu1 %v11919_v19 }
 0x486   :  { %10957 = vmatpush3.bf16.msra.mxu1 %v11919_v19 }
 0x487   :  { %v2175_v18 = vpop.permute.xlu1 %2174  ;;  %v2181_v36 = vpop.permute.xlu0 %2180 }
 0x488   :  { %11055 = vmatmul.mubr.msk.bf16.vlgmr.msra.gmra.mrb[64].mxu0 %vm1725_vm7, %v2171_v38 }
 0x489   :  { %10959 = vmatmul.mubr.bf16.vlgmr.msra.gmra.mrb[16].mxu1 %v13432_v47  ;;  %11058 = vmatprep.mubr.msk.bf16.mxu0 %vm1725_vm7, %v2173_v24 }
 0x48a   :  { %10962 = vmatprep.mubr.bf16.mxu1 %v13448_v0 }
 0x48b   :  { %v2179_v22 = vpop.permute.xlu1 %2178  ;;  %v2957_v62 = vpop.permute.xlu0 %2956 }
 0x48c   :  { %11814 = vmatprep.subr.msk.bf16.mxu0 %vm1725_vm7, %v2957_v62  ;;  %v2997_v25 = vsel %vm1725_vm7, %v2957_v62, 0 }
 0x48d   :  { %11143 = vmatpush3.bf16.xpose.msra.mxu0 %v2997_v25 }
 0x48f   :  { %v2183_v51 = vpop.permute.xlu1 %2182  ;;  %v2961_v14 = vpop.permute.xlu0 %2960 }
 0x490   :  { %11059 = vmatmul.mubr.msk.bf16.gmra.mrb[68].mxu0 %vm1725_vm7, %v2175_v18 }
 0x491   :  { %10963 = vmatmul.mubr.bf16.gmra.mrb[20].mxu1 %v13464_v34  ;;  %11062 = vmatprep.mubr.msk.bf16.mxu0 %vm1725_vm7, %v2177_v35 }
 0x492   :  { %10966 = vmatprep.mubr.bf16.mxu1 %v13480_v49  ;;  %v3003_v49 = vsel %vm1725_vm7, %v2961_v14, 0 }
 0x493   :  { %v2959_v47 = vpop.permute.xlu1 %2958  ;;  %v2969_v34 = vpop.permute.xlu0 %2968 }
 0x494   :  { %11815 = vmatprep.subr.msk.bf16.mxu0 %vm1725_vm7, %v2959_v47  ;;  %v3000_v0 = vsel %vm1725_vm7, %v2959_v47, 0 }
 0x495   :  { %11145 = vmatpush3.bf16.xpose.msra.mxu0 %v3000_v0 }
 0x496   :  { %11816 = vmatprep.subr.msk.bf16.mxu0 %vm1725_vm7, %v2961_v14 }
 0x497   :  { %v2963_v32 = vpop.permute.xlu1 %2962  ;;  %v2941_v50 = vpop.permute.xlu0 %2940 }
 0x498   :  { %11063 = vmatmul.mubr.msk.bf16.gmra.mrb[72].mxu0 %vm1725_vm7, %v2179_v22 }
 0x499   :  { %10967 = vmatmul.mubr.bf16.gmra.mrb[24].mxu1 %v13496_v58  ;;  %11066 = vmatprep.mubr.msk.bf16.mxu0 %vm1725_vm7, %v2181_v36  ;;  %v3006_v58 = vsel %vm1725_vm7, %v2963_v32, 0 }
 0x49a   :  { %10970 = vmatprep.mubr.bf16.mxu1 %v13512_v11 }
 0x49b   :  { %v2965_v48 = vpop.permute.xlu1 %2964 }
 0x49c   :  { %v3009_v11 = vsel %vm1725_vm7, %v2965_v48, 0 }
 0x49d   :  { %11147 = vmatpush3.bf16.xpose.msra.mxu0 %v3003_v49 }
 0x49e   :  { %11817 = vmatprep.subr.msk.bf16.mxu0 %vm1725_vm7, %v2963_v32 }
 0x49f   :  { %v2967_v8 = vpop.permute.xlu1 %2966 }
 0x4a0   :  { %11067 = vmatmul.mubr.msk.bf16.gmra.mrb[76].mxu0 %vm1725_vm7, %v2183_v51  ;;  %v3012_v43 = vsel %vm1725_vm7, %v2967_v8, 0 }
 0x4a1   :  { %10971 = vmatmul.mubr.bf16.gmra.mrb[28].mxu1 %v13526_v26  ;;  %11158 = vmatprep.mubr.msk.bf16.mxu0 %vm1725_vm7, %v2941_v50  ;;  %v3015_v26 = vsel %vm1725_vm7, %v2969_v34, 0 }
 0x4a5   :  { %11149 = vmatpush3.bf16.xpose.msra.mxu0 %v3006_v58 }
 0x4a6   :  { %11818 = vmatprep.subr.msk.bf16.mxu0 %vm1725_vm7, %v2965_v48 }
 0x4ad   :  { %11151 = vmatpush3.bf16.xpose.msra.mxu0 %v3009_v11 }
 0x4ae   :  { %11819 = vmatprep.subr.msk.bf16.mxu0 %vm1725_vm7, %v2967_v8 }
 0x4b5   :  { %11153 = vmatpush3.bf16.xpose.msra.mxu0 %v3012_v43 }
 0x4b6   :  { %11820 = vmatprep.subr.msk.bf16.mxu0 %vm1725_vm7, %v2969_v34 }
 0x4bd   :  { %11155 = vmatpush3.bf16.xpose.msra.mxu0 %v3015_v26 }
 0x4e9   :  { %v14004_v53 = vpop.f32.mrb[48].mxu0 }
 0x4ea   :  { %v14006_v28 = vpop.f32.mrb[49].mxu0 }
 0x4eb   :  { %v14008_v54 = vpop.f32.mrb[50].mxu0 }
 0x4ec   :  { %v14010_v41 = vpop.f32.mrb[51].mxu0 }
 0x4f1   :  { %v14012_v24 = vpop.f32.mrb[52].mxu0 }
 0x4f2   :  { %v14014_v19 = vpop.f32.mrb[53].mxu0 }
 0x4f3   :  { %v14016_v10 = vpop.f32.mrb[54].mxu0 }
 0x4f4   :  { %v14018_v38 = vpop.f32.mrb[55].mxu0 }
 0x4f9   :  { %v14020_v35 = vpop.f32.mrb[56].mxu0 }
 0x4fa   :  { %v14022_v18 = vpop.f32.mrb[57].mxu0 }
 0x4fb   :  { %v14024_v36 = vpop.f32.mrb[58].mxu0 }
 0x4fc   :  { %v14026_v22 = vpop.f32.mrb[59].mxu0 }
 0x501   :  { %v14028_v62 = vpop.f32.mrb[60].mxu0 }
 0x502   :  { %v14030_v25 = vpop.f32.mrb[61].mxu0 }
 0x503   :  { %v14032_v51 = vpop.f32.mrb[62].mxu0 }
 0x504   :  { %v14034_v47 = vpop.f32.mrb[63].mxu0 }
 0x53c   :  { %v14036_v14 = vpop.f32.mrb[0].mxu1 }
 0x53d   :  { %v14038_v0 = vpop.f32.mrb[1].mxu1  ;;  %vm1260_vm1 = vcmp.gt.f32.partialorder %v14036_v14, 0.5 }
 0x53e   :  { %v14040_v34 = vpop.f32.mrb[2].mxu1  ;;  %vm1258_vm10 = vcmp.gt.f32.partialorder %v14038_v0, 0.5  ;;  %v1877_v0 = vmul.f32 0.17677669, %v14012_v24  ;;  %v1875_v24 = vmul.f32 0.17677669, %v14014_v19 }
 0x53f   :  { %v14042_v49 = vpop.f32.mrb[3].mxu1  ;;  %vm1261_vm2 = vcmp.gt.f32.partialorder %v14040_v34, 0.5 }
 0x540   :  { %vm1259_vm15 = vcmp.gt.f32.partialorder %v14042_v49, 0.5 }
 0x544   :  { %v14044_v32 = vpop.f32.mrb[4].mxu1 }
 0x545   :  { %v14046_v50 = vpop.f32.mrb[5].mxu1  ;;  %vm1264_vm14 = vcmp.gt.f32.partialorder %v14044_v32, 0.5 }
 0x546   :  { %v14048_v58 = vpop.f32.mrb[6].mxu1  ;;  %vm1262_vm8 = vcmp.gt.f32.partialorder %v14046_v50, 0.5 }
 0x547   :  { %v14050_v48 = vpop.f32.mrb[7].mxu1  ;;  %vm1265_vm13 = vcmp.gt.f32.partialorder %v14048_v58, 0.5  ;;  %v1878_v58 = vmul.f32 0.17677669, %v14016_v10 }
 0x548   :  { %vm1263_vm3 = vcmp.gt.f32.partialorder %v14050_v48, 0.5  ;;  %v1876_v48 = vmul.f32 0.17677669, %v14018_v38 }
 0x54c   :  { %v14052_v11 = vpop.f32.mrb[8].mxu1 }
 0x54d   :  { %v14054_v8 = vpop.f32.mrb[9].mxu1  ;;  %vm1268_vm11 = vcmp.gt.f32.partialorder %v14052_v11, 0.5  ;;  %v1881_v11 = vmul.f32 0.17677669, %v14020_v35 }
 0x54e   :  { %v14056_v43 = vpop.f32.mrb[10].mxu1  ;;  %vm1266_vm5 = vcmp.gt.f32.partialorder %v14054_v8, 0.5  ;;  %v1879_v8 = vmul.f32 0.17677669, %v14022_v18 }
 0x54f   :  { %v14058_v26 = vpop.f32.mrb[11].mxu1  ;;  %vm1269_vm6 = vcmp.gt.f32.partialorder %v14056_v43, 0.5 }
 0x550   :  { %vm1267_vm9 = vcmp.gt.f32.partialorder %v14058_v26, 0.5 }
 0x554   :  { %v14060_v13 = vpop.f32.mrb[12].mxu1 }
 0x555   :  { %v14062_v3 = vpop.f32.mrb[13].mxu1  ;;  %vm1272_vm0 = vcmp.gt.f32.partialorder %v14060_v13, 0.5  ;;  %v1885_v13 = vmul.f32 0.17677669, %v14028_v62 }
 0x556   :  { %v14064_v60 = vpop.f32.mrb[14].mxu1 }
 0x557   :  { %v14066_v29 = vpop.f32.mrb[15].mxu1  ;;  %vm1273_vm4 = vcmp.gt.f32.partialorder %v14064_v60, 0.5  ;;  %v1886_v60 = vmul.f32 0.17677669, %v14032_v51 }
 0x558   :  { %vm1271_vm12 = vcmp.gt.f32.partialorder %v14066_v29, 0.5  ;;  %v1884_v29 = vmul.f32 0.17677669, %v14034_v47 }
 0x55b   :  { %v14072_v21 = vpop.f32.mrb[64].mxu0 }
 0x55c   :  { %v10960_v56 = vpop.f32.mrb[16].mxu1  ;;  %v14074_v52 = vpop.f32.mrb[65].mxu0 }
 0x55d   :  { %v1631_v12 = vadd.f32 %v10960_v56, %v14070_v23  ;;  %v1622_v45 = vpop.f32.mrb[17].mxu1  ;;  %v14077_v44 = vpop.f32.mrb[66].mxu0 }
 0x55e   :  { %v1623_v31 = vadd.f32 %v1622_v45, %v14070_v23  ;;  %v10961_v61 = vpop.f32.mrb[18].mxu1  ;;  %v14080_v59 = vpop.f32.mrb[67].mxu0 }
 0x55f   :  { %v1634_v39 = vadd.f32 %v10961_v61, %v14070_v23  ;;  %v1625_v42 = vpop.f32.mrb[19].mxu1 }
 0x560   :  { %v1626_v6 = vadd.f32 %v1625_v42, %v14070_v23 }
 0x561   :  { %v14084_v2 = vpack.c.bf16 %v1634_v39, %v1631_v12 }
 0x562   :  { %v14086_v17 = vpack.c.bf16 %v1626_v6, %v1623_v31 }
 0x563   :  { %18168 = vst [vmem:[#allocation62_spill] sm:$0xff] %v14084_v2  ;;  %2547 = vrot.lane.b32.xlu1 %v14084_v2, %s13036_s20  ;;  %v14090_v56 = vpop.f32.mrb[68].mxu0 }
 0x564   :  { %18169 = vst [vmem:[#allocation63_spill] sm:$0xff] %v14086_v17  ;;  %v10964_v15 = vpop.f32.mrb[20].mxu1  ;;  %2545 = vrot.lane.b32.xlu0 %v14086_v17, %s13036_s20  ;;  %11006 = vmatprep.subr.bf16.mxu1 %v14086_v17  ;;  %v14095_v45 = vpop.f32.mrb[69].mxu0 }
 0x565   :  { %v1647_v61 = vadd.f32 %v10964_v15, %v14070_v23  ;;  %v1638_v42 = vpop.f32.mrb[21].mxu1  ;;  %11007 = vmatpush3.bf16.msra.mxu1 %v14086_v17  ;;  %v14099_v39 = vpop.f32.mrb[70].mxu0 }
 0x566   :  { %v1639_v31 = vadd.f32 %v1638_v42, %v14070_v23  ;;  %v10965_v12 = vpop.f32.mrb[22].mxu1  ;;  %11008 = vmatprep.subr.bf16.mxu1 %v14084_v2  ;;  %v14103_v6 = vpop.f32.mrb[71].mxu0 }
 0x567   :  { %v1650_v16 = vadd.f32 %v10965_v12, %v14070_v23  ;;  %v1641_v55 = vpop.f32.mrb[23].mxu1 }
 0x568   :  { %v1642_v46 = vadd.f32 %v1641_v55, %v14070_v23 }
 0x569   :  { %v14107_v37 = vpack.c.bf16 %v1650_v16, %v1647_v61  ;;  %11009 = vmatpush3.bf16.msra.mxu1 %v14084_v2 }
 0x56a   :  { %v14110_v15 = vpack.c.bf16 %v1642_v46, %v1639_v31 }
 0x56b   :  { %18170 = vst [vmem:[#allocation64_spill] sm:$0xff] %v14107_v37  ;;  %v14112_v17 = vpop.f32.mrb[72].mxu0 }
 0x56c   :  { %18171 = vst [vmem:[#allocation65_spill] sm:$0xff] %v14110_v15  ;;  %v10968_v4 = vpop.f32.mrb[24].mxu1  ;;  %2549 = vrot.lane.b32.xlu0 %v14110_v15, %s13036_s20  ;;  %11010 = vmatprep.subr.bf16.mxu1 %v14110_v15  ;;  %v14117_v42 = vpop.f32.mrb[73].mxu0 }
 0x56d   :  { %v1663_v12 = vadd.f32 %v10968_v4, %v14070_v23  ;;  %v1654_v57 = vpop.f32.mrb[25].mxu1  ;;  %11011 = vmatpush3.bf16.msra.mxu1 %v14110_v15  ;;  %v14121_v16 = vpop.f32.mrb[74].mxu0 }
 0x56e   :  { %v1655_v46 = vadd.f32 %v1654_v57, %v14070_v23  ;;  %v10969_v55 = vpop.f32.mrb[26].mxu1  ;;  %11012 = vmatprep.subr.bf16.mxu1 %v14107_v37  ;;  %v14125_v61 = vpop.f32.mrb[75].mxu0 }
 0x56f   :  { %v1666_v31 = vadd.f32 %v10969_v55, %v14070_v23  ;;  %v1657_v2 = vpop.f32.mrb[27].mxu1 }
 0x570   :  { %v1658_v33 = vadd.f32 %v1657_v2, %v14070_v23  ;;  %2551 = vrot.lane.b32.xlu0 %v14107_v37, %s13036_s20 }
 0x571   :  { %v14131_v4 = vpack.c.bf16 %v1666_v31, %v1663_v12  ;;  %11013 = vmatpush3.bf16.msra.mxu1 %v14107_v37 }
 0x572   :  { %v14134_v15 = vpack.c.bf16 %v1658_v33, %v1655_v46 }
 0x573   :  { %18172 = vst [vmem:[#allocation66_spill] sm:$0xff] %v14131_v4  ;;  %v14136_v57 = vpop.f32.mrb[76].mxu0 }
 0x574   :  { %18173 = vst [vmem:[#allocation67_spill] sm:$0xff] %v14134_v15  ;;  %v10972_v20 = vpop.f32.mrb[28].mxu1  ;;  %2553 = vrot.lane.b32.xlu1 %v14134_v15, %s13036_s20  ;;  %11014 = vmatprep.subr.bf16.mxu1 %v14134_v15  ;;  %v14141_v55 = vpop.f32.mrb[77].mxu0 }
 0x575   :  { %v1679_v2 = vadd.f32 %v10972_v20, %v14070_v23  ;;  %v1670_v7 = vpop.f32.mrb[29].mxu1  ;;  %11015 = vmatpush3.bf16.msra.mxu1 %v14134_v15  ;;  %v14145_v12 = vpop.f32.mrb[78].mxu0 }
 0x576   :  { %v1671_v33 = vadd.f32 %v1670_v7, %v14070_v23  ;;  %v10973_v46 = vpop.f32.mrb[30].mxu1  ;;  %11016 = vmatprep.subr.bf16.mxu1 %v14131_v4  ;;  %v14149_v31 = vpop.f32.mrb[79].mxu0 }
 0x577   :  { %v1682_v37 = vadd.f32 %v10973_v46, %v14070_v23  ;;  %v1673_v27 = vpop.f32.mrb[31].mxu1 }
 0x578   :  { %v1674_v1 = vadd.f32 %v1673_v27, %v14070_v23  ;;  %2555 = vrot.lane.b32.xlu1 %v14131_v4, %s13036_s20  ;;  %v1873_v27 = vmul.f32 0.17677669, %v14004_v53  ;;  %v1874_v53 = vmul.f32 0.17677669, %v14008_v54  ;;  %v1872_v54 = vmul.f32 0.17677669, %v14010_v41 }
 0x579   :  { %v14155_v20 = vpack.c.bf16 %v1682_v37, %v1679_v2  ;;  %11017 = vmatpush3.bf16.msra.mxu1 %v14131_v4  ;;  %v1880_v41 = vmul.f32 0.17677669, %v14026_v22 }
 0x57a   :  { %v14158_v15 = vpack.c.bf16 %v1674_v1, %v1671_v33  ;;  %v13038_v1 = vmov -1e+09  }
 0x57b   :  { %18174 = vst [vmem:[#allocation68_spill] sm:$0xff] %v14155_v20  ;;  %v14178_v23 = vsel %vm1260_vm1, 0.0, %v13038_v1  ;;  %v14186_v7 = vsel %vm1258_vm10, 0.0, %v13038_v1  ;;  %v14205_v14 = vsel %vm1264_vm14, 0.0, %v13038_v1  ;;  %v14209_v34 = vsel %vm1259_vm15, 0.0, %v13038_v1 }
 0x57c   :  { %18175 = vst [vmem:[#allocation69_spill] sm:$0xff] %v14158_v15  ;;  %2559 = vrot.lane.b32.xlu1 %v14155_v20, %s13036_s20  ;;  %2557 = vrot.lane.b32.xlu0 %v14158_v15, %s13036_s20  ;;  %18176 = vst [vmem:[#allocation70_spill] sm:$0xff] %v14178_v23  ;;  %v14183_v37 = vadd.f32 %v1873_v27, %v14178_v23  ;;  %v14216_v49 = vadd.f32 %v1877_v0, %v14205_v14  ;;  %v14219_v32 = vsel %vm1262_vm8, 0.0, %v13038_v1  ;;  %vm9887_vm10 = vcmask 1041409  }
 0x57d   :  { %11018 = vmatprep.subr.bf16.mxu1 %v14158_v15  ;;  %18177 = vst [vmem:[#allocation71_spill] sm:$0xff] %v14186_v7  ;;  %18179 = vst [vmem:[#allocation73_spill] sm:$0xff] %v14205_v14  ;;  %v14222_v2 = vadd.f32 %v1872_v54, %v14209_v34  ;;  %v14227_v50 = vsel %vm1267_vm9, 0.0, %v13038_v1  ;;  %v14234_v26 = vadd.f32 %v1875_v24, %v14219_v32  ;;  %v14237_v33 = vsel %vm1265_vm13, 0.0, %v13038_v1 }
 0x57e   :  { %11019 = vmatpush3.bf16.msra.mxu1 %v14158_v15  ;;  %18180 = vst [vmem:[#allocation74_spill] sm:$0xff] %v14209_v34  ;;  %18181 = vst [vmem:[#allocation75_spill] sm:$0xff] %v14219_v32  ;;  %v14240_v19 = vadd.f32 %v1880_v41, %v14227_v50  ;;  %v14245_v46 = vsel %vm1272_vm0, 0.0, %v13038_v1  ;;  %v14252_v22 = vadd.f32 %v1878_v58, %v14237_v33  ;;  %v14255_v27 = vsel %vm1263_vm3, 0.0, %v13038_v1 }
 0x57f   :  { %11020 = vmatprep.subr.bf16.mxu1 %v14155_v20  ;;  %18182 = vst [vmem:[#allocation76_spill] sm:$0xff] %v14227_v50  ;;  %18183 = vst [vmem:[#allocation77_spill] sm:$0xff] %v14237_v33  ;;  %v14258_v10 = vadd.f32 %v1885_v13, %v14245_v46  ;;  %v14270_v62 = vadd.f32 %v1876_v48, %v14255_v27  ;;  %v14281_v0 = vsel %vm1271_vm12, 0.0, %v13038_v1  ;;  %v14290_v54 = vsel %vm1266_vm5, 0.0, %v13038_v1 }
 0x580   :  { %3597 = vrot.lane.b32.xlu1 %v13659_v30, %s13037_s8  ;;  %3595 = vrot.lane.b32.xlu0 %v13639_v40, %s13037_s8  ;;  %v1871_v40 = vmul.f32 0.17677669, %v14006_v28  ;;  %18184 = vst [vmem:[#allocation78_spill] sm:$0xff] %v14245_v46  ;;  %18185 = vst [vmem:[#allocation79_spill] sm:$0xff] %v14255_v27  ;;  %v2354_v24 = vmul.f32 0.17677669, %v14080_v59  ;;  %v14294_v35 = vadd.f32 %v1884_v29, %v14281_v0 }
 0x581   :  { %18188 = vst [vmem:[#allocation82_spill] sm:$0xff] %v14281_v0  ;;  %18189 = vst [vmem:[#allocation83_spill] sm:$0xff] %v14290_v54  ;;  %v14301_v47 = vadd.f32 %v1879_v8, %v14290_v54  ;;  %v14304_v41 = vsel %vm1269_vm6, 0.0, %v13038_v1  ;;  %v2359_v59 = vmul.f32 0.17677669, %v14090_v56  ;;  %vm1270_vm1 = vcmp.gt.f32.partialorder %v14062_v3, 0.5 }
 0x582   :  { %11021 = vmatpush3.bf16.msra.mxu1 %v14155_v20  ;;  %v14192_v30 = vadd.f32 %v1871_v40, %v14186_v7  ;;  %v14263_v40 = vsel %vm1273_vm4, 0.0, %v13038_v1  ;;  %18190 = vst [vmem:[#allocation84_spill] sm:$0xff] %v14304_v41  ;;  %v14307_v58 = vadd.f32 %v2354_v24, %v14209_v34  ;;  %v1882_v13 = vmul.f32 0.17677669, %v14024_v36 }
 0x583   :  { %18186 = vst [vmem:[#allocation80_spill] sm:$0xff] %v14263_v40  ;;  %v14276_v38 = vadd.f32 %v1886_v60, %v14263_v40  ;;  %v14318_v43 = vsel %vm1270_vm1, 0.0, %v13038_v1  ;;  %v14321_v48 = vadd.f32 %v2359_v59, %v14205_v14  ;;  %v2360_v60 = vmul.f32 0.17677669, %v14099_v39  ;;  %v2945_v59 = vpop.permute.xlu1 %2944 }
 0x584   :  { %3599 = vrot.lane.b32.xlu1 %v13677_v9, %s13037_s8  ;;  %v14195_v9 = vsel %vm1261_vm2, 0.0, %v13038_v1  ;;  %v14315_v18 = vadd.f32 %v1882_v13, %v14304_v41  ;;  %18191 = vst [vmem:[#allocation85_spill] sm:$0xff] %v14318_v43  ;;  %v1883_v56 = vmul.f32 0.17677669, %v14030_v25  ;;  %v2355_v3 = vmul.f32 0.17677669, %v14072_v21 }
 0x585   :  { %18178 = vst [vmem:[#allocation72_spill] sm:$0xff] %v14195_v9  ;;  %v14202_v28 = vadd.f32 %v1874_v53, %v14195_v9  ;;  %v14273_v53 = vsel %vm1268_vm11, 0.0, %v13038_v1  ;;  %v14334_v1 = vadd.f32 %v2360_v60, %v14237_v33  ;;  %v2358_v29 = vmul.f32 0.17677669, %v14103_v6 }
 0x586   :  { %18187 = vst [vmem:[#allocation81_spill] sm:$0xff] %v14273_v53  ;;  %v14287_v51 = vadd.f32 %v1881_v11, %v14273_v53  ;;  %v14329_v36 = vadd.f32 %v1883_v56, %v14318_v43  ;;  %v14331_v11 = vpop.permute.xlu0 %2942  ;;  %v14340_v25 = vadd.f32 %v2355_v3, %v14178_v23  ;;  %v2353_v39 = vmul.f32 0.17677669, %v14074_v52 }
 0x587   :  { %v14344_v21 = vadd.f32 %v2358_v29, %v14255_v27  ;;  %v2362_v24 = vmul.f32 0.17677669, %v14125_v61  ;;  %v2356_v13 = vmul.f32 0.17677669, %v14077_v44  ;;  %v2367_v52 = vmul.f32 0.17677669, %v14136_v57  ;;  %v2947_v29 = vpop.permute.xlu1 %2946 }
 0x588   :  { %2970 = vrot.lane.b32.xlu1 %v13806_v5, %s13029_s12  ;;  %v14352_v6 = vadd.f32 %v2353_v39, %v14186_v7  ;;  %v2357_v56 = vmul.f32 0.17677669, %v14095_v45  ;;  %v2368_v44 = vmul.f32 0.17677669, %v14145_v12  ;;  %v2366_v45 = vmul.f32 0.17677669, %v14149_v31 }
 0x589   :  { %v14356_v60 = vadd.f32 %v2362_v24, %v14227_v50  ;;  %v14362_v61 = vadd.f32 %v2356_v13, %v14195_v9  ;;  %v14366_v39 = vadd.f32 %v2367_v52, %v14245_v46  ;;  %v2363_v24 = vmul.f32 0.17677669, %v14112_v17 }
 0x58a   :  { %v14348_v8 = vpop.permute.xlu0 %2948  ;;  %v14372_v57 = vadd.f32 %v2357_v56, %v14219_v32  ;;  %v14376_v13 = vadd.f32 %v2368_v44, %v14263_v40  ;;  %v2361_v56 = vmul.f32 0.17677669, %v14117_v42  ;;  %v14389_v17 = vadd.f32 %v2366_v45, %v14281_v0 }
 0x58b   :  { %v2953_v12 = vpop.permute.xlu1 %2952  ;;  %v14385_v52 = vadd.f32 %v2363_v24, %v14273_v53  ;;  %v2364_v44 = vmul.f32 0.17677669, %v14121_v16  ;;  %v2365_v42 = vmul.f32 0.17677669, %v14141_v55  ;;  %vm9890_vm2 = vcmask 1042434  }
 0x58c   :  { %v14394_v31 = vadd.f32 %v2361_v56, %v14290_v54  ;;  %v18192_v54 = vld [vmem:[#allocation49_spill] sm:$0xff]  ;;  %vm9893_vm14 = vcmask 1043459   ;;  %vm9896_vm15 = vcmask 1044484   ;;  %vm9899_vm8 = vcmask 1045509  }
 0x58d   :  { %v14399_v24 = vadd.f32 %v2364_v44, %v14304_v41  ;;  %v14406_v45 = vadd.f32 %v2365_v42, %v14318_v43  ;;  %vm9902_vm9 = vcmask 1046534   ;;  %vm9905_vm13 = vcmask 1047559  }
 0x58e   :  { %v2951_v3 = vpop.permute.xlu0 %2950 }
 0x58f   :  { %v2955_v15 = vpop.permute.xlu1 %2954 }
 0x59f   :  { %1907 = vmax.xlane.f32.xlu0 %v14183_v37 }
 0x5a3   :  { %1903 = vmax.xlane.f32.xlu0 %v14192_v30 }
 0x5a7   :  { %1909 = vmax.xlane.f32.xlu0 %v14202_v28 }
 0x5ab   :  { %1915 = vmax.xlane.f32.xlu0 %v14216_v49 }
 0x5ac   :  { %1905 = vmax.xlane.f32.xlu1 %v14222_v2 }
 0x5af   :  { %1911 = vmax.xlane.f32.xlu0 %v14234_v26 }
 0x5b0   :  { %1921 = vmax.xlane.f32.xlu1 %v14240_v19 }
 0x5b3   :  { %1917 = vmax.xlane.f32.xlu0 %v14252_v22 }
 0x5b4   :  { %1931 = vmax.xlane.f32.xlu1 %v14258_v10 }
 0x5b7   :  { %1913 = vmax.xlane.f32.xlu0 %v14270_v62 }
 0x5b8   :  { %1933 = vmax.xlane.f32.xlu1 %v14276_v38 }
 0x5bb   :  { %1923 = vmax.xlane.f32.xlu0 %v14287_v51 }
 0x5bc   :  { %1929 = vmax.xlane.f32.xlu1 %v14294_v35 }
 0x5bf   :  { %1919 = vmax.xlane.f32.xlu0 %v14301_v47 }
 0x5c0   :  { %2387 = vmax.xlane.f32.xlu1 %v14307_v58 }
 0x5c3   :  { %1925 = vmax.xlane.f32.xlu0 %v14315_v18 }
 0x5c4   :  { %2397 = vmax.xlane.f32.xlu1 %v14321_v48 }
 0x5c7   :  { %1927 = vmax.xlane.f32.xlu0 %v14329_v36 }
 0x5c8   :  { %2399 = vmax.xlane.f32.xlu1 %v14334_v1 }
 0x5cb   :  { %2389 = vmax.xlane.f32.xlu0 %v14340_v25 }
 0x5cc   :  { %2395 = vmax.xlane.f32.xlu1 %v14344_v21 }
 0x5cf   :  { %2385 = vmax.xlane.f32.xlu0 %v14352_v6 }
 0x5d0   :  { %2403 = vmax.xlane.f32.xlu1 %v14356_v60 }
 0x5d3   :  { %2391 = vmax.xlane.f32.xlu0 %v14362_v61 }
 0x5d4   :  { %2413 = vmax.xlane.f32.xlu1 %v14366_v39 }
 0x5d5   :  { %v14402_v4 = vpop.permute.xlu1 %2547 }
 0x5d6   :  { %v14379_v20 = vpop.permute.xlu0 %2545 }
 0x5d7   :  { %2393 = vmax.xlane.f32.xlu0 %v14372_v57  ;;  %11070 = vmatprep.subr.bf16.mxu1 %v14379_v20 }
 0x5d8   :  { %2415 = vmax.xlane.f32.xlu1 %v14376_v13 }
 0x5db   :  { %2405 = vmax.xlane.f32.xlu0 %v14385_v52 }
 0x5dc   :  { %2411 = vmax.xlane.f32.xlu1 %v14389_v17 }
 0x5de   :  { %v14413_v56 = vpop.permute.xlu0 %2549 }
 0x5df   :  { %2401 = vmax.xlane.f32.xlu0 %v14394_v31 }
 0x5e2   :  { %v14419_v55 = vpop.permute.xlu0 %2551 }
 0x5e3   :  { %2407 = vmax.xlane.f32.xlu0 %v14399_v24 }
 0x5e6   :  { %v14408_v46 = vpop.permute.xlu1 %2553 }
 0x5e7   :  { %2409 = vmax.xlane.f32.xlu0 %v14406_v45 }
 0x5ea   :  { %v14411_v16 = vpop.permute.xlu1 %2555 }
 0x5ed   :  { %3603 = vrot.lane.b32.xlu1 %v13750_v63, %s13037_s8 }
 0x5ee   :  { %v14417_v44 = vpop.permute.xlu1 %2559  ;;  %v14421_v0 = vpop.permute.xlu0 %2557 }
 0x5f2   :  { %v3598_v40 = vpop.permute.xlu1 %3597  ;;  %v3596_v41 = vpop.permute.xlu0 %3595 }
 0x5f3   :  { %v3636_v63 = vsel %vm1725_vm7, %v3596_v41, 0 }
 0x5f6   :  { %v3600_v42 = vpop.permute.xlu1 %3599 }
 0x5fa   :  { %v2971_v43 = vpop.permute.xlu1 %2970 }
 0x5fb   :  { %11821 = vmatprep.subr.msk.bf16.mxu0 %vm1725_vm7, %v2971_v43  ;;  %v3018_v53 = vsel %vm1725_vm7, %v2971_v43, 0  ;;  %v3639_v43 = vsel %vm1725_vm7, %v3598_v40, 0 }
 0x5fc   :  { %11157 = vmatpush3.bf16.xpose.msra.mxu0 %v3018_v53  ;;  %v3642_v53 = vsel %vm1725_vm7, %v3600_v42, 0 }
 0x5fd   :  { %3601 = vrot.lane.b32.xlu0 %v18192_v54, %s13037_s8  ;;  %11822 = vmatprep.subr.msk.bf16.mxu0 %vm1725_vm7, %v3596_v41 }
 0x603   :  { %11159 = vmatmul.mubr.msk.bf16.vlgmr.msra.gmra.mrb[80].mxu0 %vm1725_vm7, %v14331_v11 }
 0x604   :  { %11162 = vmatprep.mubr.msk.bf16.mxu0 %vm1725_vm7, %v2945_v59  ;;  %11227 = vmatpush3.bf16.xpose.msra.mxu0 %v3636_v63 }
 0x605   :  { %11823 = vmatprep.subr.msk.bf16.mxu0 %vm1725_vm7, %v3598_v40 }
 0x60b   :  { %11163 = vmatmul.mubr.msk.bf16.gmra.mrb[84].mxu0 %vm1725_vm7, %v2947_v29 }
 0x60c   :  { %11166 = vmatprep.mubr.msk.bf16.mxu0 %vm1725_vm7, %v14348_v8  ;;  %11229 = vmatpush3.bf16.xpose.msra.mxu0 %v3639_v43 }
 0x60d   :  { %11824 = vmatprep.subr.msk.bf16.mxu0 %vm1725_vm7, %v3600_v42 }
 0x613   :  { %11167 = vmatmul.mubr.msk.bf16.gmra.mrb[88].mxu0 %vm1725_vm7, %v2951_v3 }
 0x614   :  { %11170 = vmatprep.mubr.msk.bf16.mxu0 %vm1725_vm7, %v2953_v12  ;;  %11231 = vmatpush3.bf16.xpose.msra.mxu0 %v3642_v53 }
 0x61b   :  { %11171 = vmatmul.mubr.msk.bf16.gmra.mrb[92].mxu0 %vm1725_vm7, %v2955_v15 }
 0x62c   :  { %v1908_v54 = vpop.xlane.xlu0 %1907 }
 0x62d   :  { %v1937_v41 = vsub.f32 %v14183_v37, %v1908_v54 }
 0x62f   :  { %v1955_v11 = vmul.f32 1.442695, %v1937_v41 }
 0x630   :  { %v1904_v40 = vpop.xlane.xlu0 %1903 }
 0x631   :  { %12080 = vpow2.f32 %v1955_v11  ;;  %v1935_v8 = vsub.f32 %v14192_v30, %v1904_v40 }
 0x633   :  { %v1951_v59 = vmul.f32 1.442695, %v1935_v8 }
 0x634   :  { %v1910_v29 = vpop.xlane.xlu0 %1909 }
 0x635   :  { %12082 = vpow2.f32 %v1951_v59  ;;  %v1938_v3 = vsub.f32 %v14202_v28, %v1910_v29 }
 0x637   :  { %v1957_v63 = vmul.f32 1.442695, %v1938_v3 }
 0x638   :  { %v1916_v42 = vpop.xlane.xlu0 %1915 }
 0x639   :  { %12084 = vpow2.f32 %v1957_v63  ;;  %v1941_v12 = vsub.f32 %v14216_v49, %v1916_v42  ;;  %v1906_v43 = vpop.xlane.xlu1 %1905 }
 0x63a   :  { %v1936_v15 = vsub.f32 %v14222_v2, %v1906_v43 }
 0x63b   :  { %v14447_v53 = vpop.eup %12080  ;;  %v1963_v37 = vmul.f32 1.442695, %v1941_v12 }
 0x63c   :  { %v1953_v54 = vmul.f32 1.442695, %v1936_v15  ;;  %1987 = vadd.xlane.f32.xlu0 %v14447_v53  ;;  %v1912_v30 = vpop.xlane.xlu0 %1911 }
 0x63d   :  { %12086 = vpow2.f32 %v1963_v37  ;;  %v1939_v41 = vsub.f32 %v14234_v26, %v1912_v30  ;;  %v1922_v11 = vpop.xlane.xlu1 %1921 }
 0x63e   :  { %12088 = vpow2.f32 %v1953_v54 }
 0x63f   :  { %v14451_v28 = vpop.eup %12082  ;;  %v1959_v40 = vmul.f32 1.442695, %v1939_v41 }
 0x640   :  { %1983 = vadd.xlane.f32.xlu0 %v14451_v28  ;;  %v1918_v49 = vpop.xlane.xlu0 %1917 }
 0x641   :  { %12090 = vpow2.f32 %v1959_v40  ;;  %v1942_v2 = vsub.f32 %v14252_v22, %v1918_v49  ;;  %v1932_v8 = vpop.xlane.xlu1 %1931 }
 0x643   :  { %v14455_v59 = vpop.eup %12084  ;;  %v1965_v29 = vmul.f32 1.442695, %v1942_v2 }
 0x644   :  { %1989 = vadd.xlane.f32.xlu0 %v14455_v59  ;;  %v1914_v3 = vpop.xlane.xlu0 %1913 }
 0x645   :  { %12092 = vpow2.f32 %v1965_v29  ;;  %v1940_v26 = vsub.f32 %v14270_v62, %v1914_v3  ;;  %v1934_v63 = vpop.xlane.xlu1 %1933  ;;  %v1944_v62 = vsub.f32 %v14240_v19, %v1922_v11  ;;  %v1949_v3 = vsub.f32 %v14258_v10, %v1932_v8 }
 0x647   :  { %v14459_v42 = vpop.eup %12086  ;;  %v1961_v12 = vmul.f32 1.442695, %v1940_v26 }
 0x648   :  { %v14461_v43 = vpop.eup %12088  ;;  %1995 = vadd.xlane.f32.xlu0 %v14459_v42  ;;  %v1924_v15 = vpop.xlane.xlu0 %1923 }
 0x649   :  { %12094 = vpow2.f32 %v1961_v12  ;;  %v1945_v22 = vsub.f32 %v14287_v51, %v1924_v15  ;;  %v1930_v37 = vpop.xlane.xlu1 %1929  ;;  %1985 = vadd.xlane.f32.xlu1 %v14461_v43  ;;  %v1969_v51 = vmul.f32 1.442695, %v1944_v62  ;;  %v1950_v12 = vsub.f32 %v14276_v38, %v1934_v63 }
 0x64b   :  { %v14466_v54 = vpop.eup %12090  ;;  %v1971_v30 = vmul.f32 1.442695, %v1945_v22  ;;  %v1979_v22 = vmul.f32 1.442695, %v1949_v3  ;;  %v1981_v10 = vmul.f32 1.442695, %v1950_v12 }
 0x64c   :  { %1991 = vadd.xlane.f32.xlu0 %v14466_v54  ;;  %v1920_v41 = vpop.xlane.xlu0 %1919 }
 0x64d   :  { %12096 = vpow2.f32 %v1971_v30  ;;  %v1943_v40 = vsub.f32 %v14301_v47, %v1920_v41  ;;  %v14471_v49 = vpop.xlane.xlu1 %2387  ;;  %v1948_v30 = vsub.f32 %v14294_v35, %v1930_v37 }
 0x64f   :  { %v14473_v2 = vpop.eup %12092  ;;  %v1967_v29 = vmul.f32 1.442695, %v1943_v40 }
 0x650   :  { %1997 = vadd.xlane.f32.xlu0 %v14473_v2  ;;  %v1926_v26 = vpop.xlane.xlu0 %1925 }
 0x651   :  { %12098 = vpow2.f32 %v1967_v29  ;;  %v1946_v19 = vsub.f32 %v14315_v18, %v1926_v26  ;;  %v2398_v11 = vpop.xlane.xlu1 %2397  ;;  %v1977_v18 = vmul.f32 1.442695, %v1948_v30 }
 0x652   :  { %12100 = vpow2.f32 %v1969_v51  ;;  %v2423_v63 = vsub.f32 %v14321_v48, %v2398_v11 }
 0x653   :  { %v14479_v15 = vpop.eup %12094  ;;  %v1973_v47 = vmul.f32 1.442695, %v1946_v19 }
 0x654   :  { %1993 = vadd.xlane.f32.xlu0 %v14479_v15  ;;  %v1928_v62 = vpop.xlane.xlu0 %1927  ;;  %v2445_v51 = vmul.f32 1.442695, %v2423_v63 }
 0x655   :  { %12102 = vpow2.f32 %v1973_v47  ;;  %v1947_v8 = vsub.f32 %v14329_v36, %v1928_v62  ;;  %v2400_v41 = vpop.xlane.xlu1 %2399 }
 0x656   :  { %12104 = vpow2.f32 %v1979_v22 }
 0x657   :  { %v14484_v38 = vpop.eup %12096  ;;  %12106 = vpow2.f32 %v1981_v10  ;;  %v1975_v29 = vmul.f32 1.442695, %v1947_v8 }
 0x658   :  { %2003 = vadd.xlane.f32.xlu0 %v14484_v38  ;;  %v2390_v40 = vpop.xlane.xlu0 %2389  ;;  %12108 = vpow2.f32 %v1977_v18  ;;  %v2424_v18 = vsub.f32 %v14334_v1, %v2400_v41 }
 0x659   :  { %v2419_v35 = vsub.f32 %v14340_v25, %v2390_v40  ;;  %v2396_v3 = vpop.xlane.xlu1 %2395  ;;  %12110 = vpow2.f32 %v1975_v29 }
 0x65a   :  { %12112 = vpow2.f32 %v2445_v51  ;;  %v2422_v51 = vsub.f32 %v14344_v21, %v2396_v3 }
 0x65b   :  { %v14489_v37 = vpop.eup %12098  ;;  %v2437_v26 = vmul.f32 1.442695, %v2419_v35 }
 0x65c   :  { %1999 = vadd.xlane.f32.xlu0 %v14489_v37  ;;  %v2386_v36 = vpop.xlane.xlu0 %2385  ;;  %v14493_v48 = vpop.eup %12100 }
 0x65d   :  { %v2417_v12 = vsub.f32 %v14352_v6, %v2386_v36  ;;  %12114 = vpow2.f32 %v2437_v26  ;;  %v2404_v30 = vpop.xlane.xlu1 %2403  ;;  %v2418_v6 = vsub.f32 %v14307_v58, %v14471_v49  ;;  %v2447_v36 = vmul.f32 1.442695, %v2424_v18 }
 0x65e   :  { %v2443_v26 = vmul.f32 1.442695, %v2422_v51 }
 0x65f   :  { %v14495_v19 = vpop.eup %12102  ;;  %v2433_v11 = vmul.f32 1.442695, %v2417_v12  ;;  %v2435_v35 = vmul.f32 1.442695, %v2418_v6  ;;  %v2426_v12 = vsub.f32 %v14356_v60, %v2404_v30 }
 0x660   :  { %2001 = vadd.xlane.f32.xlu0 %v14493_v48  ;;  %2005 = vadd.xlane.f32.xlu1 %v14495_v19  ;;  %v2392_v25 = vpop.xlane.xlu0 %2391  ;;  %v14500_v22 = vpop.eup %12104 }
 0x661   :  { %v2420_v47 = vsub.f32 %v14362_v61, %v2392_v25  ;;  %v14502_v62 = vpop.eup %12106  ;;  %12116 = vpow2.f32 %v2433_v11  ;;  %v2414_v58 = vpop.xlane.xlu1 %2413 }
 0x662   :  { %v14510_v61 = vpop.eup %12108  ;;  %v2431_v6 = vsub.f32 %v14366_v39, %v2414_v58 }
 0x663   :  { %v2439_v10 = vmul.f32 1.442695, %v2420_v47  ;;  %v14512_v40 = vpop.eup %12110 }
 0x664   :  { %2011 = vadd.xlane.f32.xlu0 %v14500_v22  ;;  %2013 = vadd.xlane.f32.xlu1 %v14502_v62  ;;  %v2394_v8 = vpop.xlane.xlu0 %2393 }
 0x665   :  { %v2421_v63 = vsub.f32 %v14372_v57, %v2394_v8  ;;  %12118 = vpow2.f32 %v2439_v10  ;;  %v14518_v57 = vpop.eup %12112  ;;  %v2416_v11 = vpop.xlane.xlu1 %2415 }
 0x667   :  { %v2441_v29 = vmul.f32 1.442695, %v2421_v63  ;;  %v14520_v41 = vpop.eup %12114  ;;  %v2432_v63 = vsub.f32 %v14376_v13, %v2416_v11 }
 0x668   :  { %2009 = vadd.xlane.f32.xlu1 %v14510_v61  ;;  %2007 = vadd.xlane.f32.xlu0 %v14512_v40  ;;  %v2406_v49 = vpop.xlane.xlu0 %2405 }
 0x669   :  { %12120 = vpow2.f32 %v2441_v29  ;;  %v2427_v1 = vsub.f32 %v14385_v52, %v2406_v49  ;;  %v2451_v52 = vmul.f32 1.442695, %v2426_v12  ;;  %v2412_v29 = vpop.xlane.xlu1 %2411  ;;  %v2463_v49 = vmul.f32 1.442695, %v2432_v63  ;;  %v18195_v63 = vld [vmem:[#allocation45_spill] sm:$0xff] }
 0x66a   :  { %12122 = vpow2.f32 %v2435_v35 }
 0x66b   :  { %12124 = vpow2.f32 %v2447_v36  ;;  %v2453_v3 = vmul.f32 1.442695, %v2427_v1  ;;  %v14526_v47 = vpop.eup %12116  ;;  %v2430_v36 = vsub.f32 %v14389_v17, %v2412_v29  ;;  %v18196_v29 = vld [vmem:[#allocation47_spill] sm:$0xff] }
 0x66c   :  { %2477 = vadd.xlane.f32.xlu0 %v14518_v57  ;;  %2469 = vadd.xlane.f32.xlu1 %v14520_v41  ;;  %v2402_v21 = vpop.xlane.xlu0 %2401  ;;  %12126 = vpow2.f32 %v2443_v26 }
 0x66d   :  { %v2425_v25 = vsub.f32 %v14394_v31, %v2402_v21  ;;  %12128 = vpow2.f32 %v2453_v3  ;;  %v2461_v31 = vmul.f32 1.442695, %v2431_v6  ;;  %v3604_v12 = vpop.permute.xlu1 %3603  ;;  %v2459_v17 = vmul.f32 1.442695, %v2430_v36 }
 0x66e   :  { %12130 = vpow2.f32 %v2451_v52  ;;  %v3648_v11 = vsel %vm1725_vm7, %v3604_v12, 0 }
 0x66f   :  { %v2449_v60 = vmul.f32 1.442695, %v2425_v25  ;;  %v14531_v8 = vpop.eup %12118 }
 0x670   :  { %2465 = vadd.xlane.f32.xlu1 %v14526_v47  ;;  %v2408_v10 = vpop.xlane.xlu0 %2407 }
 0x671   :  { %v2428_v30 = vsub.f32 %v14399_v24, %v2408_v10  ;;  %12132 = vpow2.f32 %v2449_v60 }
 0x672   :  { %12134 = vpow2.f32 %v2461_v31  ;;  %v18194_v31 = vld [vmem:[#allocation54_spill] sm:$0xff] }
 0x673   :  { %v14533_v18 = vpop.eup %12120  ;;  %v2455_v35 = vmul.f32 1.442695, %v2428_v30 }
 0x674   :  { %2471 = vadd.xlane.f32.xlu1 %v14531_v8  ;;  %2473 = vadd.xlane.f32.xlu0 %v14533_v18  ;;  %v2410_v39 = vpop.xlane.xlu0 %2409  ;;  %v14539_v58 = vpop.eup %12122 }
 0x675   :  { %v2429_v51 = vsub.f32 %v14406_v45, %v2410_v39  ;;  %v14541_v24 = vpop.eup %12124  ;;  %12136 = vpow2.f32 %v2455_v35  ;;  %v18197_v39 = vld [vmem:[#allocation52_spill] sm:$0xff]  ;;  %v18198_v35 = vld [vmem:[#allocation46_spill] sm:$0xff] }
 0x676   :  { %v14548_v45 = vpop.eup %12126  ;;  %12138 = vpow2.f32 %v2463_v49 }
 0x677   :  { %v2457_v1 = vmul.f32 1.442695, %v2429_v51  ;;  %v14550_v21 = vpop.eup %12128  ;;  %v18199_v51 = vld [vmem:[#allocation48_spill] sm:$0xff] }
 0x678   :  { %2467 = vadd.xlane.f32.xlu1 %v14539_v58  ;;  %2479 = vadd.xlane.f32.xlu0 %v14541_v24  ;;  %v3602_v13 = vpop.permute.xlu0 %3601  ;;  %v14555_v3 = vpop.eup %12130 }
 0x679   :  { %11825 = vmatprep.subr.msk.bf16.mxu0 %vm1725_vm7, %v3602_v13  ;;  %v3645_v26 = vsel %vm1725_vm7, %v3602_v13, 0  ;;  %12140 = vpow2.f32 %v2457_v1 }
 0x67a   :  { %11233 = vmatpush3.bf16.xpose.msra.mxu0 %v3645_v26  ;;  %12142 = vpow2.f32 %v2459_v17 }
 0x67b   :  { %11826 = vmatprep.subr.msk.bf16.mxu0 %vm1725_vm7, %v3604_v12  ;;  %v14557_v25 = vpop.eup %12132 }
 0x67c   :  { %2475 = vadd.xlane.f32.xlu1 %v14548_v45  ;;  %2485 = vadd.xlane.f32.xlu0 %v14550_v21  ;;  %v14562_v52 = vpop.eup %12134 }
 0x67d   :  { %18193 = vst [vmem:[#allocation49_spill] sm:$0xff] %v14562_v52 }
 0x67f   :  { %v14564_v6 = vpop.eup %12136 }
 0x680   :  { %2483 = vadd.xlane.f32.xlu1 %v14555_v3  ;;  %2481 = vadd.xlane.f32.xlu0 %v14557_v25  ;;  %v14568_v10 = vpop.eup %12138 }
 0x682   :  { %11235 = vmatpush3.bf16.xpose.msra.mxu0 %v3648_v11 }
 0x683   :  { %v14570_v60 = vpop.eup %12140 }
 0x684   :  { %2493 = vadd.xlane.f32.xlu1 %v14562_v52  ;;  %2487 = vadd.xlane.f32.xlu0 %v14564_v6  ;;  %v14574_v30 = vpop.eup %12142 }
 0x688   :  { %2495 = vadd.xlane.f32.xlu0 %v14568_v10  ;;  %2489 = vadd.xlane.f32.xlu1 %v14570_v60 }
 0x68c   :  { %2491 = vadd.xlane.f32.xlu0 %v14574_v30 }
 0x699   :  { %3607 = vrot.lane.b32.xlu1 %v18194_v31, %s13037_s8 }
 0x69d   :  { %3579 = vrot.lane.b32.xlu1 %v18195_v63, %s13037_s8 }
 0x6a1   :  { %3583 = vrot.lane.b32.xlu1 %v18196_v29, %s13037_s8 }
 0x6a2   :  { %3605 = vrot.lane.b32.xlu0 %v18197_v39, %s13037_s8 }
 0x6a6   :  { %3609 = vrot.lane.b32.xlu0 %v13806_v5, %s13037_s8 }
 0x6aa   :  { %3581 = vrot.lane.b32.xlu0 %v18198_v35, %s13037_s8 }
 0x6ae   :  { %3585 = vrot.lane.b32.xlu0 %v18199_v51, %s13037_s8 }
 0x6c9   :  { %v1988_v49 = vpop.xlane.xlu0 %1987 }
 0x6cd   :  { %v1984_v13 = vpop.xlane.xlu0 %1983 }
 0x6d1   :  { %v1990_v36 = vpop.xlane.xlu0 %1989 }
 0x6d2   :  { %12144 = vrcp.f32 %v1990_v36 }
 0x6d3   :  { %12146 = vrcp.f32 %v1984_v13 }
 0x6d4   :  { %12148 = vrcp.f32 %v1988_v49 }
 0x6d5   :  { %v1996_v1 = vpop.xlane.xlu0 %1995 }
 0x6d6   :  { %v1986_v26 = vpop.xlane.xlu1 %1985  ;;  %v11160_v12 = vpop.f32.mrb[80].mxu0 }
 0x6d7   :  { %12150 = vrcp.f32 %v1986_v26  ;;  %v3054_v17 = vpop.f32.mrb[81].mxu0  ;;  %v3119_v51 = vmul.f32 0.17677669, %v11160_v12 }
 0x6d8   :  { %v3117_v11 = vmul.f32 0.17677669, %v3054_v17  ;;  %v11161_v31 = vpop.f32.mrb[82].mxu0 }
 0x6d9   :  { %v3057_v5 = vpop.f32.mrb[83].mxu0  ;;  %v1992_v63 = vpop.xlane.xlu0 %1991  ;;  %v3120_v39 = vmul.f32 0.17677669, %v11161_v31  ;;  %v14607_v12 = vadd.f32 %v3119_v51, %v14178_v23 }
 0x6da   :  { %v14592_v29 = vadd.f32 %v3117_v11, %v14186_v7  ;;  %v3118_v35 = vmul.f32 0.17677669, %v3057_v5  ;;  %12152 = vrcp.f32 %v1992_v63 }
 0x6db   :  { %v14599_v36 = vadd.f32 %v3120_v39, %v14195_v9 }
 0x6dc   :  { %v14595_v52 = vadd.f32 %v3118_v35, %v14209_v34  ;;  %3149 = vmax.xlane.f32.xlu1 %v14592_v29  ;;  %v12145_v13 = vpop.eup %12144 }
 0x6dd   :  { %v1998_v49 = vpop.xlane.xlu0 %1997  ;;  %18201 = vst [vmem:[#allocation45_spill] sm:$0xff] %v14599_v36  ;;  %v12147_v17 = vpop.eup %12146  ;;  %v2034_v39 = vmul.f32 %v12145_v13, %v14455_v59 }
 0x6de   :  { %18200 = vst [vmem:[#allocation54_spill] sm:$0xff] %v14595_v52  ;;  %v14601_v26 = vpop.f32.mrb[84].mxu0  ;;  %3151 = vmax.xlane.f32.xlu0 %v14595_v52  ;;  %v12149_v31 = vpop.eup %12148  ;;  %12154 = vrcp.f32 %v1998_v49  ;;  %v2031_v63 = vmul.f32 %v12147_v17, %v14451_v28 }
 0x6df   :  { %v14604_v11 = vpop.f32.mrb[85].mxu0  ;;  %12156 = vrcp.f32 %v1996_v1  ;;  %v2033_v49 = vmul.f32 %v12149_v31, %v14447_v53 }
 0x6e0   :  { %v14609_v5 = vpop.f32.mrb[86].mxu0  ;;  %3155 = vmax.xlane.f32.xlu1 %v14599_v36 }
 0x6e1   :  { %v12151_v35 = vpop.eup %12150  ;;  %v14613_v9 = vpop.f32.mrb[87].mxu0  ;;  %v2048_v52 = vpack.c.bf16 %v2034_v39, %v2033_v49 }
 0x6e2   :  { %v1994_v34 = vpop.xlane.xlu0 %1993  ;;  %3153 = vmax.xlane.f32.xlu0 %v14607_v12  ;;  %v2032_v51 = vmul.f32 %v12151_v35, %v14461_v43 }
 0x6e3   :  { %12158 = vrcp.f32 %v1994_v34 }
 0x6e4   :  { %v2047_v23 = vpack.c.bf16 %v2032_v51, %v2031_v63  ;;  %v12153_v1 = vpop.eup %12152 }
 0x6e6   :  { %v2004_v7 = vpop.xlane.xlu0 %2003  ;;  %11022 = vmatprep.mubr.bf16.mxu1 %v2047_v23  ;;  %v14619_v36 = vpop.f32.mrb[88].mxu0 }
 0x6e7   :  { %11023 = vmatmul.mubr.bf16.vlgmr.msra.gmra.mrb[32].mxu1 %v2048_v52  ;;  %v14621_v59 = vpop.f32.mrb[89].mxu0  ;;  %12160 = vrcp.f32 %v2004_v7 }
 0x6e8   :  { %11071 = vmatpush3.bf16.msra.mxu1 %v14379_v20  ;;  %v14624_v34 = vpop.f32.mrb[90].mxu0  ;;  %v12155_v53 = vpop.eup %12154  ;;  %v2035_v20 = vmul.f32 %v12153_v1, %v14466_v54 }
 0x6e9   :  { %11072 = vmatprep.subr.bf16.mxu1 %v14402_v4  ;;  %v14627_v28 = vpop.f32.mrb[91].mxu0  ;;  %v12157_v13 = vpop.eup %12156  ;;  %v2038_v35 = vmul.f32 %v12155_v53, %v14473_v2  ;;  %v18202_v2 = vld [vmem:[#allocation51_spill] sm:$0xff] }
 0x6ea   :  { %v2000_v43 = vpop.xlane.xlu0 %1999 }
 0x6eb   :  { %12162 = vrcp.f32 %v2000_v43 }
 0x6ec   :  { %11073 = vmatpush3.bf16.msra.mxu1 %v14402_v4  ;;  %v2037_v4 = vmul.f32 %v12157_v13, %v14459_v42 }
 0x6ed   :  { %v12159_v17 = vpop.eup %12158  ;;  %11074 = vmatprep.subr.bf16.mxu1 %v14413_v56  ;;  %v2006_v23 = vpop.xlane.xlu1 %2005 }
 0x6ee   :  { %v2002_v52 = vpop.xlane.xlu0 %2001  ;;  %v2036_v31 = vmul.f32 %v12159_v17, %v14479_v15  ;;  %12164 = vrcp.f32 %v2006_v23  ;;  %v14634_v39 = vpop.f32.mrb[92].mxu0  ;;  %v2050_v49 = vpack.c.bf16 %v2038_v35, %v2037_v4  ;;  %v18203_v17 = vld [vmem:[#allocation50_spill] sm:$0xff] }
 0x6ef   :  { %12166 = vrcp.f32 %v2002_v52  ;;  %v14636_v63 = vpop.f32.mrb[93].mxu0 }
 0x6f0   :  { %v2049_v7 = vpack.c.bf16 %v2036_v31, %v2035_v20  ;;  %11075 = vmatpush3.bf16.msra.mxu1 %v14413_v56  ;;  %v14640_v51 = vpop.f32.mrb[94].mxu0 }
 0x6f1   :  { %11076 = vmatprep.subr.bf16.mxu1 %v14419_v55  ;;  %v14643_v54 = vpop.f32.mrb[95].mxu0  ;;  %v2014_v15 = vpop.xlane.xlu1 %2013  ;;  %3589 = vrot.lane.b32.xlu1 %v18202_v2, %s13037_s8 }
 0x6f2   :  { %11026 = vmatprep.mubr.bf16.mxu1 %v2049_v7  ;;  %v2012_v1 = vpop.xlane.xlu0 %2011  ;;  %12168 = vrcp.f32 %v2014_v15  ;;  %v12161_v42 = vpop.eup %12160 }
 0x6f3   :  { %11027 = vmatmul.mubr.bf16.gmra.mrb[36].mxu1 %v2050_v49  ;;  %12170 = vrcp.f32 %v2012_v1 }
 0x6f4   :  { %11077 = vmatpush3.bf16.msra.mxu1 %v14419_v55  ;;  %v2041_v55 = vmul.f32 %v12161_v42, %v14484_v38 }
 0x6f5   :  { %11078 = vmatprep.subr.bf16.mxu1 %v14408_v46  ;;  %v2010_v56 = vpop.xlane.xlu1 %2009  ;;  %v12163_v53 = vpop.eup %12162 }
 0x6f6   :  { %12172 = vrcp.f32 %v2010_v56  ;;  %v2008_v43 = vpop.xlane.xlu0 %2007  ;;  %v2039_v31 = vmul.f32 %v12163_v53, %v14489_v37 }
 0x6f7   :  { %12174 = vrcp.f32 %v2008_v43 }
 0x6f8   :  { %v12165_v13 = vpop.eup %12164  ;;  %11079 = vmatpush3.bf16.msra.mxu1 %v14408_v46  ;;  %3587 = vrot.lane.b32.xlu0 %v18203_v17, %s13037_s8 }
 0x6f9   :  { %v12167_v23 = vpop.eup %12166  ;;  %11080 = vmatprep.subr.bf16.mxu1 %v14411_v16  ;;  %v2470_v52 = vpop.xlane.xlu1 %2469  ;;  %v2042_v20 = vmul.f32 %v12165_v13, %v14495_v19 }
 0x6fa   :  { %v2040_v35 = vmul.f32 %v12167_v23, %v14493_v48  ;;  %v2478_v15 = vpop.xlane.xlu0 %2477 }
 0x6fb   :  { %v2052_v7 = vpack.c.bf16 %v2042_v20, %v2041_v55 }
 0x6fc   :  { %11081 = vmatpush3.bf16.msra.mxu1 %v14411_v16  ;;  %v2051_v4 = vpack.c.bf16 %v2040_v35, %v2039_v31  ;;  %v12169_v46 = vpop.eup %12168  ;;  %v3122_v31 = vmul.f32 0.17677669, %v14613_v9 }
 0x6fd   :  { %11082 = vmatprep.subr.bf16.mxu1 %v14421_v0  ;;  %v2466_v2 = vpop.xlane.xlu1 %2465  ;;  %v12171_v49 = vpop.eup %12170  ;;  %v2046_v56 = vmul.f32 %v12169_v46, %v14502_v62 }
 0x6fe   :  { %11030 = vmatprep.mubr.bf16.mxu1 %v2051_v4  ;;  %v2045_v16 = vmul.f32 %v12171_v49, %v14500_v22 }
 0x6ff   :  { %11031 = vmatmul.mubr.bf16.gmra.mrb[40].mxu1 %v2052_v7 }
 0x700   :  { %v12173_v1 = vpop.eup %12172  ;;  %11083 = vmatpush3.bf16.msra.mxu1 %v14421_v0  ;;  %v2054_v13 = vpack.c.bf16 %v2046_v56, %v2045_v16 }
 0x701   :  { %v12175_v38 = vpop.eup %12174  ;;  %11084 = vmatprep.subr.bf16.mxu1 %v14417_v44  ;;  %v2472_v37 = vpop.xlane.xlu1 %2471  ;;  %v2044_v19 = vmul.f32 %v12173_v1, %v14510_v61 }
 0x702   :  { %v2474_v48 = vpop.xlane.xlu0 %2473  ;;  %v2043_v42 = vmul.f32 %v12175_v38, %v14512_v40  ;;  %12176 = vrcp.f32 %v2472_v37 }
 0x703   :  { %12178 = vrcp.f32 %v2466_v2 }
 0x704   :  { %11085 = vmatpush3.bf16.msra.mxu1 %v14417_v44  ;;  %v2053_v43 = vpack.c.bf16 %v2044_v19, %v2043_v42  ;;  %12180 = vrcp.f32 %v2470_v52  ;;  %v3121_v52 = vmul.f32 0.17677669, %v14604_v11  ;;  %v3124_v11 = vmul.f32 0.17677669, %v14609_v5 }
 0x705   :  { %v2468_v0 = vpop.xlane.xlu1 %2467 }
 0x706   :  { %v2480_v53 = vpop.xlane.xlu0 %2479  ;;  %12182 = vrcp.f32 %v2468_v0  ;;  %11034 = vmatprep.mubr.bf16.mxu1 %v2053_v43  ;;  %v14673_v49 = vadd.f32 %v3121_v52, %v14219_v32  ;;  %v14684_v16 = vadd.f32 %v3124_v11, %v14237_v33 }
 0x707   :  { %11035 = vmatmul.mubr.bf16.gmra.mrb[44].mxu1 %v2054_v13  ;;  %12184 = vrcp.f32 %v2474_v48  ;;  %v14678_v48 = vadd.f32 %v3122_v31, %v14255_v27  ;;  %v18206_v31 = vld [vmem:[#allocation81_spill] sm:$0xff] }
 0x709   :  { %v2476_v61 = vpop.xlane.xlu1 %2475 }
 0x70a   :  { %v2486_v17 = vpop.xlane.xlu0 %2485  ;;  %12186 = vrcp.f32 %v2476_v61 }
 0x70b   :  { %12188 = vrcp.f32 %v2480_v53 }
 0x70c   :  { %v12177_v22 = vpop.eup %12176  ;;  %12190 = vrcp.f32 %v2478_v15 }
 0x70d   :  { %v2484_v62 = vpop.xlane.xlu1 %2483  ;;  %v12179_v23 = vpop.eup %12178  ;;  %v2516_v20 = vmul.f32 %v12177_v22, %v14531_v8  ;;  %v3123_v8 = vmul.f32 0.17677669, %v14601_v26  ;;  %v3126_v26 = vmul.f32 0.17677669, %v14627_v28 }
 0x70e   :  { %v2482_v40 = vpop.xlane.xlu0 %2481  ;;  %12192 = vrcp.f32 %v2484_v62  ;;  %v12181_v44 = vpop.eup %12180  ;;  %v2513_v4 = vmul.f32 %v12179_v23, %v14526_v47  ;;  %v18204_v23 = vld [vmem:[#allocation83_spill] sm:$0xff] }
 0x70f   :  { %12194 = vrcp.f32 %v2482_v40  ;;  %v2515_v2 = vmul.f32 %v12181_v44, %v14520_v41  ;;  %v14690_v53 = vadd.f32 %v3123_v8, %v14205_v14  ;;  %v14699_v22 = vadd.f32 %v3126_v26, %v14227_v50 }
 0x710   :  { %v12183_v55 = vpop.eup %12182  ;;  %v3127_v40 = vmul.f32 0.17677669, %v14619_v36  ;;  %v3129_v26 = vmul.f32 0.17677669, %v14636_v63  ;;  %v18213_v63 = vld [vmem:[#allocation78_spill] sm:$0xff] }
 0x711   :  { %v2494_v35 = vpop.xlane.xlu1 %2493  ;;  %v2514_v46 = vmul.f32 %v12183_v55, %v14539_v58  ;;  %v12185_v15 = vpop.eup %12184  ;;  %v2530_v9 = vpack.c.bf16 %v2516_v20, %v2515_v2  ;;  %v18205_v55 = vld [vmem:[#allocation84_spill] sm:$0xff] }
 0x712   :  { %v2488_v7 = vpop.xlane.xlu0 %2487  ;;  %v2517_v58 = vmul.f32 %v12185_v15, %v14533_v18  ;;  %v3125_v18 = vmul.f32 0.17677669, %v14621_v59 }
 0x713   :  { %12196 = vrcp.f32 %v2488_v7  ;;  %v2529_v1 = vpack.c.bf16 %v2514_v46, %v2513_v4 }
 0x714   :  { %v12187_v38 = vpop.eup %12186  ;;  %12198 = vrcp.f32 %v2486_v17  ;;  %v14704_v44 = vadd.f32 %v3125_v18, %v18204_v23  ;;  %v3131_v18 = vmul.f32 0.17677669, %v14634_v39  ;;  %v18214_v39 = vld [vmem:[#allocation62_spill] sm:$0xff] }
 0x715   :  { %v12189_v37 = vpop.eup %12188  ;;  %3157 = vmax.xlane.f32.xlu1 %v14673_v49  ;;  %v2490_v47 = vpop.xlane.xlu1 %2489  ;;  %11086 = vmatprep.mubr.bf16.mxu1 %v2529_v1  ;;  %v2518_v5 = vmul.f32 %v12187_v38, %v14548_v45 }
 0x716   :  { %v2496_v41 = vpop.xlane.xlu0 %2495  ;;  %11087 = vmatmul.mubr.bf16.vlgmr.msra.gmra.mrb[48].mxu1 %v2530_v9  ;;  %v12191_v19 = vpop.eup %12190  ;;  %12200 = vrcp.f32 %v2490_v47  ;;  %v2520_v43 = vmul.f32 %v12189_v37, %v14541_v24  ;;  %v3128_v24 = vmul.f32 0.17677669, %v14624_v34 }
 0x717   :  { %3159 = vmax.xlane.f32.xlu0 %v14678_v48  ;;  %v2531_v56 = vpack.c.bf16 %v2518_v5, %v2517_v58  ;;  %v2519_v28 = vmul.f32 %v12191_v19, %v14518_v57 }
 0x718   :  { %v12193_v42 = vpop.eup %12192  ;;  %v14710_v20 = vadd.f32 %v3128_v24, %v18205_v55 }
 0x719   :  { %v12195_v0 = vpop.eup %12194  ;;  %3163 = vmax.xlane.f32.xlu1 %v14684_v16  ;;  %v3608_v45 = vpop.permute.xlu1 %3607  ;;  %11090 = vmatprep.mubr.bf16.mxu1 %v2531_v56  ;;  %v2522_v17 = vmul.f32 %v12193_v42, %v14555_v3  ;;  %v2532_v59 = vpack.c.bf16 %v2520_v43, %v2519_v28  ;;  %v3130_v56 = vmul.f32 0.17677669, %v14643_v54  ;;  %v18210_v42 = vld [vmem:[#allocation85_spill] sm:$0xff]  ;;  %v18212_v28 = vld [vmem:[#allocation80_spill] sm:$0xff] }
 0x71a   :  { %v2492_v13 = vpop.xlane.xlu0 %2491  ;;  %v2521_v61 = vmul.f32 %v12195_v0, %v14557_v25  ;;  %v3654_v38 = vsel %vm1725_vm7, %v3608_v45, 0  ;;  %v14739_v43 = vadd.f32 %v3129_v26, %v18210_v42  ;;  %v3132_v0 = vmul.f32 0.17677669, %v14640_v51  ;;  %v11920_v51 = vld [vmem:[#allocation7 + $0x10] sm:$0xff]  }
 0x71b   :  { %12202 = vrcp.f32 %v2492_v13  ;;  %3161 = vmax.xlane.f32.xlu0 %v14690_v53  ;;  %11102 = vmatprep.subr.bf16.mxu1 %v11920_v51 }
 0x71c   :  { %12204 = vrcp.f32 %v2496_v41  ;;  %v2533_v25 = vpack.c.bf16 %v2522_v17, %v2521_v61  ;;  %v14748_v61 = vadd.f32 %v3132_v0, %v18212_v28  ;;  %v14752_v17 = vadd.f32 %v3131_v18, %v18213_v63  ;;  %11103 = vmatpush3.bf16.msra.mxu1 %v11920_v51 }
 0x71d   :  { %v12197_v62 = vpop.eup %12196  ;;  %12206 = vrcp.f32 %v2494_v35  ;;  %3167 = vmax.xlane.f32.xlu1 %v14699_v22  ;;  %v3580_v57 = vpop.permute.xlu1 %3579  ;;  %v14716_v35 = vadd.f32 %v3127_v40, %v18206_v31  ;;  %v18215_v40 = vld [vmem:[#allocation67_spill] sm:$0xff] }
 0x71e   :  { %v3606_v3 = vpop.permute.xlu0 %3605  ;;  %11091 = vmatmul.mubr.bf16.gmra.mrb[52].mxu1 %v2532_v59  ;;  %v12199_v52 = vpop.eup %12198  ;;  %11242 = vmatprep.mubr.msk.bf16.mxu0 %vm1725_vm7, %v3580_v57  ;;  %v2524_v36 = vmul.f32 %v12197_v62, %v14564_v6  ;;  %v11921_v59 = vld [vmem:[#allocation7 + $0x18] sm:$0xff]  }
 0x71f   :  { %11827 = vmatprep.subr.msk.bf16.mxu0 %vm1725_vm7, %v3606_v3  ;;  %v3651_v34 = vsel %vm1725_vm7, %v3606_v3, 0  ;;  %3165 = vmax.xlane.f32.xlu0 %v14704_v44  ;;  %v2523_v4 = vmul.f32 %v12199_v52, %v14550_v21  ;;  %v18207_v21 = vld [vmem:[#allocation49_spill] sm:$0xff]  ;;  %v14760_v3 = vld [vmem:[#allocation7] sm:$0xff]  }
 0x720   :  { %11094 = vmatprep.mubr.bf16.mxu1 %v2533_v25  ;;  %11237 = vmatpush3.bf16.xpose.msra.mxu0 %v3651_v34  ;;  %v12201_v7 = vpop.eup %12200  ;;  %v18216_v25 = vld [vmem:[#allocation63_spill] sm:$0xff]  ;;  %v18217_v34 = vld [vmem:[#allocation66_spill] sm:$0xff] }
 0x721   :  { %11828 = vmatprep.subr.msk.bf16.mxu0 %vm1725_vm7, %v3608_v45  ;;  %3171 = vmax.xlane.f32.xlu1 %v14710_v20  ;;  %v2534_v15 = vpack.c.bf16 %v2524_v36, %v2523_v4  ;;  %v2525_v11 = vmul.f32 %v12201_v7, %v14570_v60  ;;  %v3584_v5 = vpop.permute.xlu1 %3583  ;;  %v18211_v45 = vld [vmem:[#allocation82_spill] sm:$0xff]  ;;  %v18218_v7 = vld [vmem:[#allocation65_spill] sm:$0xff]  ;;  %v18219_v4 = vld [vmem:[#allocation64_spill] sm:$0xff] }
 0x722   :  { %v3610_v9 = vpop.permute.xlu0 %3609  ;;  %v14744_v13 = vadd.f32 %v3130_v56, %v18211_v45  ;;  %11104 = vmatprep.subr.bf16.mxu1 %v11921_v59 }
 0x723   :  { %3169 = vmax.xlane.f32.xlu0 %v14716_v35  ;;  %v3657_v60 = vsel %vm1725_vm7, %v3610_v9, 0  ;;  %11105 = vmatpush3.bf16.msra.mxu1 %v11921_v59 }
 0x724   :  { %11122 = vmatprep.subr.bf16.mxu1 %v14760_v3 }
 0x725   :  { %v12203_v46 = vpop.eup %12202 }
 0x726   :  { %v12205_v2 = vpop.eup %12204  ;;  %v2526_v1 = vmul.f32 %v12203_v46, %v14574_v30  ;;  %11095 = vmatmul.mubr.bf16.gmra.mrb[56].mxu1 %v2534_v15  ;;  %v18208_v30 = vld [vmem:[#allocation55_spill] sm:$0xff]  ;;  %v3582_v58 = vpop.permute.xlu0 %3581  ;;  %v18220_v46 = vld [vmem:[#allocation69_spill] sm:$0xff] }
 0x727   :  { %v12207_v6 = vpop.eup %12206  ;;  %v2528_v37 = vmul.f32 %v12205_v2, %v14568_v10  ;;  %v18209_v10 = vld [vmem:[#allocation53_spill] sm:$0xff] }
 0x728   :  { %v2535_v8 = vpack.c.bf16 %v2526_v1, %v2525_v11  ;;  %11239 = vmatpush3.bf16.xpose.msra.mxu0 %v3654_v38  ;;  %v2527_v47 = vmul.f32 %v12207_v6, %v18207_v21  ;;  %v18221_v6 = vld [vmem:[#allocation45_spill] sm:$0xff] }
 0x729   :  { %11829 = vmatprep.subr.msk.bf16.mxu0 %vm1725_vm7, %v3610_v9 }
 0x72a   :  { %11098 = vmatprep.mubr.bf16.mxu1 %v2535_v8  ;;  %v2536_v41 = vpack.c.bf16 %v2528_v37, %v2527_v47  ;;  %v3586_v19 = vpop.permute.xlu0 %3585  ;;  %v18222_v8 = vld [vmem:[#allocation54_spill] sm:$0xff] }
 0x72e   :  { %11099 = vmatmul.mubr.bf16.gmra.mrb[60].mxu1 %v2536_v41 }
 0x730   :  { %11241 = vmatpush3.bf16.xpose.msra.mxu0 %v3657_v60 }
 0x732   :  { %3593 = vrot.lane.b32.xlu1 %v18208_v30, %s13037_s8 }
 0x737   :  { %11243 = vmatmul.mubr.msk.bf16.vlgmr.msra.gmra.mrb[96].mxu0 %vm1725_vm7, %v3582_v58 }
 0x738   :  { %11246 = vmatprep.mubr.msk.bf16.mxu0 %vm1725_vm7, %v3584_v5 }
 0x739   :  { %3591 = vrot.lane.b32.xlu0 %v18209_v10, %s13037_s8 }
 0x73f   :  { %11247 = vmatmul.mubr.msk.bf16.gmra.mrb[100].mxu0 %vm1725_vm7, %v3586_v19 }
 0x756   :  { %3173 = vmax.xlane.f32.xlu1 %v14739_v43 }
 0x758   :  { %3175 = vmax.xlane.f32.xlu0 %v14744_v13 }
 0x75a   :  { %3179 = vmax.xlane.f32.xlu1 %v14748_v61 }
 0x75c   :  { %3177 = vmax.xlane.f32.xlu0 %v14752_v17 }
 0x769   :  { %v3150_v54 = vpop.xlane.xlu1 %3149 }
 0x76a   :  { %v3181_v2 = vsub.f32 %v14592_v29, %v3150_v54 }
 0x76b   :  { %3303 = vrot.lane.b32.xlu1 %v18214_v39, %s13029_s12  ;;  %v3152_v24 = vpop.xlane.xlu0 %3151 }
 0x76c   :  { %v3197_v1 = vmul.f32 1.442695, %v3181_v2  ;;  %v3182_v9 = vsub.f32 %v18222_v8, %v3152_v24 }
 0x76d   :  { %v3156_v62 = vpop.xlane.xlu1 %3155 }
 0x76e   :  { %v3184_v38 = vsub.f32 %v18221_v6, %v3156_v62  ;;  %v3199_v21 = vmul.f32 1.442695, %v3182_v9 }
 0x76f   :  { %3309 = vrot.lane.b32.xlu1 %v18215_v40, %s13029_s12  ;;  %v3154_v57 = vpop.xlane.xlu0 %3153 }
 0x770   :  { %v3183_v15 = vsub.f32 %v14607_v12, %v3154_v57  ;;  %v3203_v37 = vmul.f32 1.442695, %v3184_v38 }
 0x771   :  { %v3590_v36 = vpop.permute.xlu1 %3589 }
 0x772   :  { %3301 = vrot.lane.b32.xlu0 %v18216_v25, %s13029_s12  ;;  %v3201_v11 = vmul.f32 1.442695, %v3183_v15 }
 0x773   :  { %3311 = vrot.lane.b32.xlu1 %v18217_v34, %s13029_s12  ;;  %v3588_v52 = vpop.permute.xlu0 %3587 }
 0x774   :  { %11250 = vmatprep.mubr.msk.bf16.mxu0 %vm1725_vm7, %v3588_v52  ;;  %12208 = vpow2.f32 %v3201_v11  ;;  %v18223_v11 = vmov 0  }
 0x775   :  { %11251 = vmatmul.mubr.msk.bf16.gmra.mrb[104].mxu0 %vm1725_vm7, %v3590_v36  ;;  %12210 = vpow2.f32 %v3197_v1 }
 0x776   :  { %3305 = vrot.lane.b32.xlu0 %v18218_v7, %s13029_s12  ;;  %12212 = vpow2.f32 %v3203_v37 }
 0x777   :  { %12214 = vpow2.f32 %v3199_v21 }
 0x77a   :  { %3307 = vrot.lane.b32.xlu0 %v18219_v4, %s13029_s12 }
 0x77e   :  { %3313 = vrot.lane.b32.xlu0 %v18220_v46, %s13029_s12  ;;  %v14779_v47 = vpop.eup %12208 }
 0x77f   :  { %v14782_v41 = vpop.eup %12210 }
 0x780   :  { %v14785_v29 = vpop.eup %12212 }
 0x781   :  { %v14788_v12 = vpop.eup %12214 }
 0x797   :  { %3233 = vadd.xlane.f32.xlu1 %v14779_v47 }
 0x79b   :  { %3229 = vadd.xlane.f32.xlu1 %v14782_v41 }
 0x79f   :  { %3235 = vadd.xlane.f32.xlu1 %v14785_v29 }
 0x7a2   :  { %v3158_v60 = vpop.xlane.xlu1 %3157 }
 0x7a3   :  { %3231 = vadd.xlane.f32.xlu1 %v14788_v12  ;;  %v3185_v26 = vsub.f32 %v14673_v49, %v3158_v60 }
 0x7a4   :  { %v3160_v30 = vpop.xlane.xlu0 %3159 }
 0x7a5   :  { %v3186_v58 = vsub.f32 %v14678_v48, %v3160_v30  ;;  %v3205_v24 = vmul.f32 1.442695, %v3185_v26 }
 0x7a6   :  { %v3164_v5 = vpop.xlane.xlu1 %3163 }
 0x7a7   :  { %v3207_v10 = vmul.f32 1.442695, %v3186_v58  ;;  %v3188_v59 = vsub.f32 %v14684_v16, %v3164_v5 }
 0x7a8   :  { %v3162_v19 = vpop.xlane.xlu0 %3161 }
 0x7a9   :  { %12216 = vpow2.f32 %v3207_v10  ;;  %v3187_v56 = vsub.f32 %v14690_v53, %v3162_v19  ;;  %v3211_v52 = vmul.f32 1.442695, %v3188_v59 }
 0x7aa   :  { %v3168_v0 = vpop.xlane.xlu1 %3167 }
 0x7ab   :  { %v3209_v18 = vmul.f32 1.442695, %v3187_v56  ;;  %v3190_v51 = vsub.f32 %v14699_v22, %v3168_v0 }
 0x7ac   :  { %v3166_v54 = vpop.xlane.xlu0 %3165 }
 0x7ad   :  { %12218 = vpow2.f32 %v3209_v18  ;;  %v3215_v62 = vmul.f32 1.442695, %v3190_v51  ;;  %v3189_v22 = vsub.f32 %v14704_v44, %v3166_v54 }
 0x7ae   :  { %v3172_v48 = vpop.xlane.xlu1 %3171 }
 0x7af   :  { %12220 = vpow2.f32 %v3215_v62  ;;  %v3213_v1 = vmul.f32 1.442695, %v3189_v22  ;;  %v3192_v6 = vsub.f32 %v14710_v20, %v3172_v48 }
 0x7b0   :  { %v3170_v57 = vpop.xlane.xlu0 %3169  ;;  %12222 = vpow2.f32 %v3205_v24 }
 0x7b1   :  { %v3191_v49 = vsub.f32 %v14716_v35, %v3170_v57  ;;  %12224 = vpow2.f32 %v3211_v52  ;;  %v3219_v37 = vmul.f32 1.442695, %v3192_v6 }
 0x7b2   :  { %v3594_v2 = vpop.permute.xlu1 %3593 }
 0x7b3   :  { %v14797_v36 = vpop.eup %12216  ;;  %v3217_v15 = vmul.f32 1.442695, %v3191_v49 }
 0x7b4   :  { %3239 = vadd.xlane.f32.xlu1 %v14797_v36  ;;  %v3592_v53 = vpop.permute.xlu0 %3591 }
 0x7b5   :  { %11254 = vmatprep.mubr.msk.bf16.mxu0 %vm1725_vm7, %v3592_v53  ;;  %12226 = vpow2.f32 %v3217_v15 }
 0x7b6   :  { %11255 = vmatmul.mubr.msk.bf16.gmra.mrb[108].mxu0 %vm1725_vm7, %v3594_v2  ;;  %12228 = vpow2.f32 %v3213_v1 }
 0x7b7   :  { %v14803_v16 = vpop.eup %12218  ;;  %4627 = vmatprep.mubr.bf16.mxu0 %v18223_v11  ;;  %12230 = vpow2.f32 %v3219_v37 }
 0x7b8   :  { %3241 = vadd.xlane.f32.xlu0 %v14803_v16 }
 0x7b9   :  { %v14807_v35 = vpop.eup %12220 }
 0x7ba   :  { %v14810_v38 = vpop.f32.mrb[32].mxu1  ;;  %3247 = vadd.xlane.f32.xlu1 %v14807_v35  ;;  %v14813_v44 = vpop.eup %12222 }
 0x7bb   :  { %v14815_v8 = vpop.f32.mrb[33].mxu1  ;;  %v14826_v30 = vpop.eup %12224 }
 0x7bc   :  { %v14817_v9 = vpop.f32.mrb[34].mxu1  ;;  %3237 = vadd.xlane.f32.xlu0 %v14813_v44 }
 0x7bd   :  { %v14822_v60 = vpop.f32.mrb[35].mxu1 }
 0x7bf   :  { %v14829_v58 = vpop.eup %12226 }
 0x7c0   :  { %3243 = vadd.xlane.f32.xlu0 %v14826_v30  ;;  %v14834_v10 = vpop.eup %12228 }
 0x7c1   :  { %v14847_v51 = vpop.eup %12230 }
 0x7c4   :  { %3249 = vadd.xlane.f32.xlu0 %v14829_v58 }
 0x7c6   :  { %v14832_v5 = vpop.f32.mrb[36].mxu1 }
 0x7c7   :  { %v14836_v19 = vpop.f32.mrb[37].mxu1 }
 0x7c8   :  { %v14838_v26 = vpop.f32.mrb[38].mxu1  ;;  %3245 = vadd.xlane.f32.xlu0 %v14834_v10 }
 0x7c9   :  { %v14843_v0 = vpop.f32.mrb[39].mxu1 }
 0x7cc   :  { %3251 = vadd.xlane.f32.xlu0 %v14847_v51 }
 0x7d2   :  { %v14850_v54 = vpop.f32.mrb[40].mxu1 }
 0x7d3   :  { %v14852_v24 = vpop.f32.mrb[41].mxu1 }
 0x7d4   :  { %v14854_v59 = vpop.f32.mrb[42].mxu1 }
 0x7d5   :  { %v14858_v48 = vpop.f32.mrb[43].mxu1 }
 0x7da   :  { %v14862_v52 = vpop.f32.mrb[44].mxu1 }
 0x7db   :  { %v14864_v49 = vpop.f32.mrb[45].mxu1 }
 0x7dc   :  { %v14866_v53 = vpop.f32.mrb[46].mxu1 }
 0x7dd   :  { %v14870_v15 = vpop.f32.mrb[47].mxu1 }
 0x7e3   :  { %v3174_v1 = vpop.xlane.xlu1 %3173 }
 0x7e4   :  { %v3193_v20 = vsub.f32 %v14739_v43, %v3174_v1 }
 0x7e5   :  { %v3176_v6 = vpop.xlane.xlu0 %3175 }
 0x7e6   :  { %v3194_v37 = vsub.f32 %v14744_v13, %v3176_v6  ;;  %v3221_v13 = vmul.f32 1.442695, %v3193_v20  ;;  %v11923_v6 = vld [vmem:[#allocation7 + $0x8] sm:$0xff]  }
 0x7e7   :  { %v3180_v62 = vpop.xlane.xlu1 %3179 }
 0x7e8   :  { %v3223_v57 = vmul.f32 1.442695, %v3194_v37  ;;  %v3196_v56 = vsub.f32 %v14748_v61, %v3180_v62 }
 0x7e9   :  { %v11088_v18 = vpop.f32.mrb[48].mxu1  ;;  %v3178_v21 = vpop.xlane.xlu0 %3177 }
 0x7ea   :  { %12232 = vpow2.f32 %v3223_v57  ;;  %v3227_v11 = vmul.f32 1.442695, %v3196_v56  ;;  %v3195_v22 = vsub.f32 %v14752_v17, %v3178_v21  ;;  %v2603_v34 = vpop.f32.mrb[49].mxu1 }
 0x7eb   :  { %v11089_v46 = vpop.f32.mrb[50].mxu1 }
 0x7ec   :  { %v3225_v39 = vmul.f32 1.442695, %v3195_v22  ;;  %v2667_v2 = vpack.c.bf16 %v11089_v46, %v11088_v18  ;;  %v2606_v40 = vpop.f32.mrb[51].mxu1  ;;  %12234 = vpow2.f32 %v3227_v11 }
 0x7ed   :  { %v2666_v4 = vpack.c.bf16 %v2606_v40, %v2603_v34  ;;  %v3302_v11 = vpop.permute.xlu0 %3301 }
 0x7ee   :  { %12236 = vpow2.f32 %v3225_v39 }
 0x7ef   :  { %11106 = vmatprep.mubr.msk.bf16.mxu1 %vm1725_vm7, %v2666_v4  ;;  %12238 = vpow2.f32 %v3221_v13 }
 0x7f0   :  { %11107 = vmatmul.mubr.msk.bf16.vlgmr.msra.gmra.mrb[64].mxu1 %vm1725_vm7, %v2667_v2 }
 0x7f1   :  { %11123 = vmatpush3.bf16.msra.mxu1 %v14760_v3  ;;  %v11092_v43 = vpop.f32.mrb[52].mxu1 }
 0x7f2   :  { %v2619_v61 = vpop.f32.mrb[53].mxu1  ;;  %11124 = vmatprep.subr.bf16.mxu1 %v11923_v6 }
 0x7f3   :  { %v11093_v17 = vpop.f32.mrb[54].mxu1 }
 0x7f4   :  { %v14881_v21 = vpop.eup %12232  ;;  %v2669_v46 = vpack.c.bf16 %v11093_v17, %v11092_v43  ;;  %v2622_v56 = vpop.f32.mrb[55].mxu1 }
 0x7f5   :  { %v2668_v40 = vpack.c.bf16 %v2622_v56, %v2619_v61  ;;  %11125 = vmatpush3.bf16.msra.mxu1 %v11923_v6  ;;  %3255 = vadd.xlane.f32.xlu0 %v14881_v21  ;;  %v18224_v61 = vpack.c.bf16 %v14822_v60, %v14815_v8  ;;  %v3304_v8 = vpop.permute.xlu1 %3303  ;;  %v18228_v60 = vpack.c.bf16 %v14843_v0, %v14836_v19 }
 0x7f6   :  { %11174 = vmatprep.subr.bf16.mxu1 %v3302_v11  ;;  %v14884_v39 = vpop.eup %12234  ;;  %v18231_v19 = vpack.c.bf16 %v14838_v26, %v14832_v5 }
 0x7f7   :  { %11110 = vmatprep.mubr.msk.bf16.mxu1 %vm1725_vm7, %v2668_v40 }
 0x7f8   :  { %v14887_v3 = vpop.eup %12236  ;;  %11111 = vmatmul.mubr.msk.bf16.gmra.mrb[68].mxu1 %vm1725_vm7, %v2669_v46 }
 0x7f9   :  { %v11096_v34 = vpop.f32.mrb[56].mxu1  ;;  %3259 = vadd.xlane.f32.xlu0 %v14884_v39  ;;  %3257 = vadd.xlane.f32.xlu1 %v14887_v3  ;;  %v14892_v18 = vpop.eup %12238 }
 0x7fa   :  { %v2635_v4 = vpop.f32.mrb[57].mxu1 }
 0x7fb   :  { %v11097_v20 = vpop.f32.mrb[58].mxu1 }
 0x7fc   :  { %v2671_v62 = vpack.c.bf16 %v11097_v20, %v11096_v34  ;;  %v2638_v57 = vpop.f32.mrb[59].mxu1 }
 0x7fd   :  { %v2670_v22 = vpack.c.bf16 %v2638_v57, %v2635_v4  ;;  %3253 = vadd.xlane.f32.xlu1 %v14892_v18  ;;  %v18225_v4 = vld [vmem:[#allocation71_spill] sm:$0xff]  ;;  %v18226_v57 = vld [vmem:[#allocation68_spill] sm:$0xff] }
 0x7ff   :  { %11114 = vmatprep.mubr.msk.bf16.mxu1 %vm1725_vm7, %v2670_v22  ;;  %v18227_v22 = vpack.c.bf16 %v14817_v9, %v14810_v38  ;;  %v18230_v9 = vld [vmem:[#allocation70_spill] sm:$0xff] }
 0x800   :  { %11115 = vmatmul.mubr.msk.bf16.gmra.mrb[72].mxu1 %vm1725_vm7, %v2671_v62 }
 0x801   :  { %v11100_v2 = vpop.f32.mrb[60].mxu1 }
 0x802   :  { %v2651_v1 = vpop.f32.mrb[61].mxu1 }
 0x803   :  { %v11101_v37 = vpop.f32.mrb[62].mxu1 }
 0x804   :  { %v2673_v13 = vpack.c.bf16 %v11101_v37, %v11100_v2  ;;  %v2654_v6 = vpop.f32.mrb[63].mxu1 }
 0x805   :  { %v2672_v43 = vpack.c.bf16 %v2654_v6, %v2651_v1  ;;  %v18229_v1 = vld [vmem:[#allocation74_spill] sm:$0xff]  ;;  %v3306_v6 = vpop.permute.xlu0 %3305 }
 0x807   :  { %11118 = vmatprep.mubr.msk.bf16.mxu1 %vm1725_vm7, %v2672_v43 }
 0x808   :  { %11119 = vmatmul.mubr.msk.bf16.gmra.mrb[76].mxu1 %vm1725_vm7, %v2673_v13 }
 0x809   :  { %11126 = vmatprep.mubr.msk.bf16.mxu1 %vm1725_vm7, %v18224_v61  ;;  %v3308_v0 = vpop.permute.xlu0 %3307 }
 0x80a   :  { %v11244_v17 = vpop.f32.mrb[96].mxu0 }
 0x80b   :  { %v3693_v46 = vpop.f32.mrb[97].mxu0  ;;  %v3758_v2 = vmul.f32 0.17677669, %v11244_v17  ;;  %v18232_v17 = vpack.c.bf16 %v14858_v48, %v14852_v24  ;;  %v18234_v24 = vpack.c.bf16 %v14854_v59, %v14850_v54  ;;  %v18235_v48 = vpack.c.bf16 %v14870_v15, %v14864_v49 }
 0x80c   :  { %v3756_v56 = vmul.f32 0.17677669, %v3693_v46  ;;  %v11245_v40 = vpop.f32.mrb[98].mxu0  ;;  %v18236_v59 = vpack.c.bf16 %v14866_v53, %v14862_v52 }
 0x80d   :  { %v3696_v34 = vpop.f32.mrb[99].mxu0  ;;  %v3759_v46 = vmul.f32 0.17677669, %v11245_v40 }
 0x80e   :  { %v14904_v20 = vadd.f32 %v3756_v56, %v18225_v4  ;;  %v3757_v62 = vmul.f32 0.17677669, %v3696_v34  ;;  %3315 = vrot.lane.b32.xlu1 %v18226_v57, %s13029_s12  ;;  %v3310_v56 = vpop.permute.xlu1 %3309  ;;  %v18233_v34 = vld [vmem:[#allocation72_spill] sm:$0xff] }
 0x810   :  { %3788 = vmax.xlane.f32.xlu0 %v14904_v20  ;;  %11127 = vmatmul.mubr.msk.bf16.vlgmr.msra.gmra.mrb[64].mxu1 %vm1725_vm7, %v18227_v22  ;;  %v14918_v37 = vadd.f32 %v3757_v62, %v18229_v1  ;;  %v14934_v62 = vadd.f32 %v3759_v46, %v18233_v34 }
 0x811   :  { %11175 = vmatpush3.bf16.msra.mxu1 %v3302_v11  ;;  %11130 = vmatprep.mubr.msk.bf16.mxu1 %vm1725_vm7, %v18228_v60  ;;  %v14922_v11 = vadd.f32 %v3758_v2, %v18230_v9 }
 0x812   :  { %11176 = vmatprep.subr.bf16.mxu1 %v3304_v8  ;;  %v11248_v13 = vpop.f32.mrb[100].mxu0  ;;  %v3312_v26 = vpop.permute.xlu1 %3311 }
 0x813   :  { %v3709_v43 = vpop.f32.mrb[101].mxu0  ;;  %v3762_v22 = vmul.f32 0.17677669, %v11248_v13  ;;  %v3314_v13 = vpop.permute.xlu0 %3313 }
 0x814   :  { %v11249_v61 = vpop.f32.mrb[102].mxu0  ;;  %3790 = vmax.xlane.f32.xlu0 %v14918_v37  ;;  %v3760_v15 = vmul.f32 0.17677669, %v3709_v43 }
 0x815   :  { %11177 = vmatpush3.bf16.msra.mxu1 %v3304_v8  ;;  %v3712_v38 = vpop.f32.mrb[103].mxu0  ;;  %v14950_v8 = vadd.f32 %v3762_v22, %v14205_v14  ;;  %v3763_v60 = vmul.f32 0.17677669, %v11249_v61 }
 0x816   :  { %11178 = vmatprep.subr.bf16.mxu1 %v3306_v6  ;;  %v3761_v40 = vmul.f32 0.17677669, %v3712_v38  ;;  %v14962_v61 = vadd.f32 %v3760_v15, %v14219_v32 }
 0x817   :  { %v14954_v54 = vadd.f32 %v3763_v60, %v14237_v33 }
 0x818   :  { %3792 = vmax.xlane.f32.xlu0 %v14922_v11  ;;  %11131 = vmatmul.mubr.msk.bf16.gmra.mrb[68].mxu1 %vm1725_vm7, %v18231_v19  ;;  %v14938_v5 = vadd.f32 %v3761_v40, %v14255_v27 }
 0x819   :  { %11179 = vmatpush3.bf16.msra.mxu1 %v3306_v6  ;;  %11134 = vmatprep.mubr.msk.bf16.mxu1 %vm1725_vm7, %v18232_v17 }
 0x81a   :  { %11180 = vmatprep.subr.bf16.mxu1 %v3308_v0 }
 0x81c   :  { %3794 = vmax.xlane.f32.xlu0 %v14934_v62 }
 0x81d   :  { %11181 = vmatpush3.bf16.msra.mxu1 %v3308_v0 }
 0x81e   :  { %11182 = vmatprep.subr.bf16.mxu1 %v3310_v56 }
 0x820   :  { %3798 = vmax.xlane.f32.xlu0 %v14938_v5  ;;  %11135 = vmatmul.mubr.msk.bf16.gmra.mrb[72].mxu1 %vm1725_vm7, %v18234_v24 }
 0x821   :  { %11183 = vmatpush3.bf16.msra.mxu1 %v3310_v56  ;;  %11138 = vmatprep.mubr.msk.bf16.mxu1 %vm1725_vm7, %v18235_v48 }
 0x822   :  { %11184 = vmatprep.subr.bf16.mxu1 %v3312_v26 }
 0x824   :  { %3800 = vmax.xlane.f32.xlu0 %v14950_v8  ;;  %v3234_v2 = vpop.xlane.xlu1 %3233 }
 0x825   :  { %11185 = vmatpush3.bf16.msra.mxu1 %v3312_v26 }
 0x826   :  { %11186 = vmatprep.subr.bf16.mxu1 %v3314_v13 }
 0x828   :  { %3802 = vmax.xlane.f32.xlu0 %v14954_v54  ;;  %11139 = vmatmul.mubr.msk.bf16.gmra.mrb[76].mxu1 %vm1725_vm7, %v18236_v59  ;;  %v3230_v49 = vpop.xlane.xlu1 %3229 }
 0x829   :  { %11187 = vmatpush3.bf16.msra.mxu1 %v3314_v13  ;;  %12240 = vrcp.f32 %v3230_v49 }
 0x82c   :  { %v3236_v6 = vpop.xlane.xlu1 %3235 }
 0x830   :  { %v3232_v38 = vpop.xlane.xlu1 %3231 }
 0x831   :  { %12242 = vrcp.f32 %v3232_v38 }
 0x832   :  { %3796 = vmax.xlane.f32.xlu1 %v14962_v61  ;;  %12244 = vrcp.f32 %v3236_v6 }
 0x833   :  { %v12241_v46 = vpop.eup %12240 }
 0x834   :  { %v3277_v0 = vmul.f32 %v12241_v46, %v14782_v41 }
 0x83b   :  { %v12243_v19 = vpop.eup %12242 }
 0x83c   :  { %v3278_v52 = vmul.f32 %v12243_v19, %v14788_v12 }
 0x83e   :  { %v3293_v53 = vpack.c.bf16 %v3278_v52, %v3277_v0 }
 0x840   :  { %11190 = vmatprep.mubr.bf16.mxu1 %v3293_v53 }
 0x841   :  { %v3240_v38 = vpop.xlane.xlu1 %3239 }
 0x845   :  { %v3242_v59 = vpop.xlane.xlu0 %3241 }
 0x847   :  { %v3248_v19 = vpop.xlane.xlu1 %3247 }
 0x848   :  { %v11252_v17 = vpop.f32.mrb[104].mxu0 }
 0x849   :  { %v3725_v56 = vpop.f32.mrb[105].mxu0  ;;  %v3766_v48 = vmul.f32 0.17677669, %v11252_v17  ;;  %v3238_v49 = vpop.xlane.xlu0 %3237 }
 0x84a   :  { %v3764_v43 = vmul.f32 0.17677669, %v3725_v56  ;;  %v11253_v40 = vpop.f32.mrb[106].mxu0  ;;  %12246 = vrcp.f32 %v3238_v49  ;;  %v12245_v17 = vpop.eup %12244 }
 0x84b   :  { %v3728_v22 = vpop.f32.mrb[107].mxu0  ;;  %v14976_v41 = vadd.f32 %v3766_v48, %v18206_v31  ;;  %v3767_v12 = vmul.f32 0.17677669, %v11253_v40  ;;  %12248 = vrcp.f32 %v3234_v2 }
 0x84c   :  { %v14968_v26 = vadd.f32 %v3764_v43, %v18204_v23  ;;  %v3765_v24 = vmul.f32 0.17677669, %v3728_v22  ;;  %12250 = vrcp.f32 %v3240_v38 }
 0x84d   :  { %v14980_v13 = vadd.f32 %v3767_v12, %v18205_v55  ;;  %v3244_v15 = vpop.xlane.xlu0 %3243 }
 0x84e   :  { %3804 = vmax.xlane.f32.xlu0 %v14968_v26  ;;  %v14972_v60 = vadd.f32 %v3765_v24, %v14227_v50  ;;  %12252 = vrcp.f32 %v3244_v15  ;;  %v3280_v15 = vmul.f32 %v12245_v17, %v14785_v29 }
 0x851   :  { %v3250_v46 = vpop.xlane.xlu0 %3249 }
 0x852   :  { %3806 = vmax.xlane.f32.xlu0 %v14972_v60 }
 0x854   :  { %v12247_v22 = vpop.eup %12246 }
 0x855   :  { %v3246_v0 = vpop.xlane.xlu0 %3245  ;;  %v12249_v6 = vpop.eup %12248 }
 0x856   :  { %3808 = vmax.xlane.f32.xlu0 %v14976_v41  ;;  %12254 = vrcp.f32 %v3246_v0  ;;  %v12251_v38 = vpop.eup %12250 }
 0x857   :  { %12256 = vrcp.f32 %v3242_v59 }
 0x858   :  { %12258 = vrcp.f32 %v3248_v19  ;;  %v3281_v19 = vmul.f32 %v12247_v22, %v14813_v44 }
 0x859   :  { %v3252_v24 = vpop.xlane.xlu0 %3251 }
 0x85a   :  { %3810 = vmax.xlane.f32.xlu0 %v14980_v13  ;;  %12260 = vrcp.f32 %v3252_v24 }
 0x882   :  { %v3256_v50 = vpop.xlane.xlu0 %3255 }
 0x886   :  { %v3258_v52 = vpop.xlane.xlu1 %3257  ;;  %v3260_v24 = vpop.xlane.xlu0 %3259 }
 0x889   :  { %v11256_v53 = vpop.f32.mrb[108].mxu0 }
 0x88a   :  { %v3770_v56 = vmul.f32 0.17677669, %v11256_v53  ;;  %v3741_v43 = vpop.f32.mrb[109].mxu0  ;;  %v3254_v40 = vpop.xlane.xlu1 %3253 }
 0x88b   :  { %v3768_v48 = vmul.f32 0.17677669, %v3741_v43  ;;  %v11257_v12 = vpop.f32.mrb[110].mxu0  ;;  %v3279_v43 = vmul.f32 %v12249_v6, %v14779_v47  ;;  %12262 = vrcp.f32 %v3254_v40 }
 0x88c   :  { %v14984_v2 = vadd.f32 %v3770_v56, %v18213_v63  ;;  %v3744_v49 = vpop.f32.mrb[111].mxu0  ;;  %v3282_v56 = vmul.f32 %v12251_v38, %v14797_v36  ;;  %v3771_v29 = vmul.f32 0.17677669, %v11257_v12  ;;  %12264 = vrcp.f32 %v3250_v46  ;;  %v11924_v38 = vld [vmem:[#allocation7 + $0x20] sm:$0xff]  }
 0x88d   :  { %v14988_v0 = vadd.f32 %v3768_v48, %v18210_v42  ;;  %v3769_v59 = vmul.f32 0.17677669, %v3744_v49  ;;  %v3294_v48 = vpack.c.bf16 %v3280_v15, %v3279_v43  ;;  %v12253_v49 = vpop.eup %12252  ;;  %12266 = vrcp.f32 %v3256_v50 }
 0x88e   :  { %3816 = vmax.xlane.f32.xlu1 %v14984_v2  ;;  %v3316_v53 = vpop.permute.xlu1 %3315  ;;  %v3295_v42 = vpack.c.bf16 %v3282_v56, %v3281_v19  ;;  %v12255_v44 = vpop.eup %12254  ;;  %v15000_v36 = vadd.f32 %v3771_v29, %v18212_v28  ;;  %v3284_v40 = vmul.f32 %v12253_v49, %v14826_v30  ;;  %12268 = vrcp.f32 %v3258_v52 }
 0x88f   :  { %3812 = vmax.xlane.f32.xlu0 %v14988_v0  ;;  %11188 = vmatprep.subr.bf16.mxu1 %v3316_v53  ;;  %v14996_v17 = vadd.f32 %v3769_v59, %v18211_v45  ;;  %v12257_v47 = vpop.eup %12256  ;;  %v3285_v12 = vmul.f32 %v12255_v44, %v14834_v10  ;;  %12270 = vrcp.f32 %v3260_v24  ;;  %v18239_v24 = vld [vmem:[#allocation62_spill] sm:$0xff] }
 0x890   :  { %11189 = vmatpush3.bf16.msra.mxu1 %v3316_v53  ;;  %v12259_v22 = vpop.eup %12258  ;;  %v3283_v46 = vmul.f32 %v12257_v47, %v14803_v16  ;;  %v11925_v16 = vld [vmem:[#allocation7 + $0x28] sm:$0xff]  }
 0x891   :  { %v3286_v50 = vmul.f32 %v12259_v22, %v14807_v35  ;;  %11206 = vmatprep.subr.bf16.mxu1 %v11924_v38  ;;  %v18238_v47 = vld [vmem:[#allocation67_spill] sm:$0xff] }
 0x892   :  { %v3296_v6 = vpack.c.bf16 %v3284_v40, %v3283_v46 }
 0x893   :  { %3814 = vmax.xlane.f32.xlu0 %v14996_v17  ;;  %11191 = vmatmul.mubr.bf16.vlgmr.msra.gmra.mrb[80].mxu1 %v3294_v48  ;;  %v3297_v15 = vpack.c.bf16 %v3286_v50, %v3285_v12 }
 0x894   :  { %11194 = vmatprep.mubr.bf16.mxu1 %v3295_v42  ;;  %v12261_v42 = vpop.eup %12260  ;;  %11207 = vmatpush3.bf16.msra.mxu1 %v11924_v38 }
 0x895   :  { %v12263_v59 = vpop.eup %12262  ;;  %v3288_v52 = vmul.f32 %v12261_v42, %v14847_v51  ;;  %11208 = vmatprep.subr.bf16.mxu1 %v11925_v16 }
 0x896   :  { %v12265_v53 = vpop.eup %12264  ;;  %v3289_v19 = vmul.f32 %v12263_v59, %v14892_v18 }
 0x897   :  { %3818 = vmax.xlane.f32.xlu0 %v15000_v36  ;;  %v12267_v30 = vpop.eup %12266  ;;  %v3287_v35 = vmul.f32 %v12265_v53, %v14829_v58  ;;  %v18237_v58 = vld [vmem:[#allocation64_spill] sm:$0xff] }
 0x898   :  { %v3290_v43 = vmul.f32 %v12267_v30, %v14881_v21  ;;  %v12269_v56 = vpop.eup %12268  ;;  %11209 = vmatpush3.bf16.msra.mxu1 %v11925_v16 }
 0x899   :  { %v3298_v48 = vpack.c.bf16 %v3288_v52, %v3287_v35  ;;  %v12271_v49 = vpop.eup %12270  ;;  %v3291_v51 = vmul.f32 %v12269_v56, %v14887_v3  ;;  %v18240_v56 = vld [vmem:[#allocation69_spill] sm:$0xff] }
 0x89a   :  { %v3299_v44 = vpack.c.bf16 %v3290_v43, %v3289_v19 }
 0x89b   :  { %11195 = vmatmul.mubr.bf16.gmra.mrb[84].mxu1 %v3296_v6 }
 0x89c   :  { %11198 = vmatprep.mubr.bf16.mxu1 %v3297_v15 }
 0x89d   :  { %v3789_v10 = vpop.xlane.xlu0 %3788 }
 0x89f   :  { %3940 = vrot.lane.b32.xlu1 %v18216_v25, %s13037_s8  ;;  %v3292_v25 = vmul.f32 %v12271_v49, %v14884_v39  ;;  %v3820_v39 = vsub.f32 %v14904_v20, %v3789_v10 }
 0x8a1   :  { %v3791_v29 = vpop.xlane.xlu0 %3790  ;;  %v3300_v21 = vpack.c.bf16 %v3292_v25, %v3291_v51  ;;  %v3836_v42 = vmul.f32 1.442695, %v3820_v39 }
 0x8a3   :  { %3944 = vrot.lane.b32.xlu1 %v18218_v7, %s13037_s8  ;;  %11199 = vmatmul.mubr.bf16.gmra.mrb[88].mxu1 %v3298_v48  ;;  %v18241_v48 = vld [vmem:[#allocation66_spill] sm:$0xff] }
 0x8a4   :  { %11202 = vmatprep.mubr.bf16.mxu1 %v3299_v44 }
 0x8a5   :  { %v3793_v18 = vpop.xlane.xlu0 %3792 }
 0x8a6   :  { %v3822_v40 = vsub.f32 %v14922_v11, %v3793_v18  ;;  %v3821_v11 = vsub.f32 %v14918_v37, %v3791_v29 }
 0x8a7   :  { %3946 = vrot.lane.b32.xlu1 %v18237_v58, %s13037_s8 }
 0x8a8   :  { %v3840_v46 = vmul.f32 1.442695, %v3822_v40  ;;  %v3838_v20 = vmul.f32 1.442695, %v3821_v11 }
 0x8a9   :  { %v3795_v22 = vpop.xlane.xlu0 %3794 }
 0x8aa   :  { %12272 = vpow2.f32 %v3840_v46  ;;  %v3823_v15 = vsub.f32 %v14934_v62, %v3795_v22 }
 0x8ab   :  { %3948 = vrot.lane.b32.xlu1 %v18238_v47, %s13037_s8  ;;  %11203 = vmatmul.mubr.bf16.gmra.mrb[92].mxu1 %v3300_v21 }
 0x8ad   :  { %3942 = vrot.lane.b32.xlu0 %v18239_v24, %s13037_s8  ;;  %v3799_v7 = vpop.xlane.xlu0 %3798 }
 0x8ae   :  { %v3825_v10 = vsub.f32 %v14938_v5, %v3799_v7 }
 0x8b0   :  { %v3846_v62 = vmul.f32 1.442695, %v3825_v10 }
 0x8b1   :  { %v3801_v12 = vpop.xlane.xlu0 %3800 }
 0x8b2   :  { %v3826_v3 = vsub.f32 %v14950_v8, %v3801_v12  ;;  %v3842_v8 = vmul.f32 1.442695, %v3823_v15 }
 0x8b4   :  { %v3848_v6 = vmul.f32 1.442695, %v3826_v3 }
 0x8b5   :  { %v3803_v59 = vpop.xlane.xlu0 %3802 }
 0x8b6   :  { %12274 = vpow2.f32 %v3848_v6  ;;  %v3827_v53 = vsub.f32 %v14954_v54, %v3803_v59 }
 0x8b7   :  { %12276 = vpow2.f32 %v3836_v42 }
 0x8b8   :  { %v3850_v52 = vmul.f32 1.442695, %v3827_v53 }
 0x8bf   :  { %v3797_v50 = vpop.xlane.xlu1 %3796 }
 0x8c0   :  { %v3824_v38 = vsub.f32 %v14962_v61, %v3797_v50  ;;  %v15031_v61 = vpop.eup %12272 }
 0x8c1   :  { %v15034_v19 = vpop.eup %12274 }
 0x8c2   :  { %v3844_v30 = vmul.f32 1.442695, %v3824_v38  ;;  %v15036_v54 = vpop.eup %12276 }
 0x8c4   :  { %12278 = vpow2.f32 %v3844_v30 }
 0x8c5   :  { %12280 = vpow2.f32 %v3842_v8 }
 0x8c6   :  { %12282 = vpow2.f32 %v3850_v52 }
 0x8c7   :  { %12284 = vpow2.f32 %v3838_v20 }
 0x8c8   :  { %12286 = vpow2.f32 %v3846_v62 }
 0x8cc   :  { %3872 = vadd.xlane.f32.xlu0 %v15031_v61 }
 0x8ce   :  { %v15040_v37 = vpop.eup %12278 }
 0x8cf   :  { %3880 = vadd.xlane.f32.xlu1 %v15034_v19  ;;  %v15042_v16 = vpop.eup %12280 }
 0x8d0   :  { %3868 = vadd.xlane.f32.xlu0 %v15036_v54  ;;  %v15046_v5 = vpop.eup %12282 }
 0x8d1   :  { %v15048_v35 = vpop.eup %12284 }
 0x8d2   :  { %v15052_v43 = vpop.eup %12286 }
 0x8d3   :  { %3876 = vadd.xlane.f32.xlu1 %v15040_v37 }
 0x8d4   :  { %3874 = vadd.xlane.f32.xlu0 %v15042_v16 }
 0x8d7   :  { %3882 = vadd.xlane.f32.xlu1 %v15046_v5 }
 0x8d8   :  { %3870 = vadd.xlane.f32.xlu0 %v15048_v35 }
 0x8db   :  { %v3805_v29 = vpop.xlane.xlu0 %3804 }
 0x8dc   :  { %3878 = vadd.xlane.f32.xlu0 %v15052_v43  ;;  %v3828_v25 = vsub.f32 %v14968_v26, %v3805_v29 }
 0x8de   :  { %v3852_v58 = vmul.f32 1.442695, %v3828_v25 }
 0x8df   :  { %v3807_v49 = vpop.xlane.xlu0 %3806 }
 0x8e0   :  { %v3829_v44 = vsub.f32 %v14972_v60, %v3807_v49 }
 0x8e2   :  { %v3854_v18 = vmul.f32 1.442695, %v3829_v44 }
 0x8e3   :  { %v3809_v51 = vpop.xlane.xlu0 %3808 }
 0x8e4   :  { %v3830_v21 = vsub.f32 %v14976_v41, %v3809_v51  ;;  %12288 = vpow2.f32 %v3854_v18 }
 0x8e5   :  { %12290 = vpow2.f32 %v3852_v58 }
 0x8e6   :  { %v3856_v22 = vmul.f32 1.442695, %v3830_v21 }
 0x8e7   :  { %v3811_v47 = vpop.xlane.xlu0 %3810 }
 0x8e8   :  { %3952 = vrot.lane.b32.xlu1 %v18240_v56, %s13037_s8  ;;  %12292 = vpow2.f32 %v3856_v22 }
 0x8ec   :  { %3954 = vrot.lane.b32.xlu1 %v18226_v57, %s13037_s8  ;;  %v3831_v57 = vsub.f32 %v14980_v13, %v3811_v47 }
 0x8ee   :  { %v3858_v24 = vmul.f32 1.442695, %v3831_v57  ;;  %v15065_v7 = vpop.eup %12288 }
 0x8ef   :  { %v15067_v40 = vpop.eup %12290 }
 0x8f0   :  { %12294 = vpow2.f32 %v3858_v24 }
 0x8f2   :  { %3950 = vrot.lane.b32.xlu0 %v18241_v48, %s13037_s8  ;;  %v15071_v26 = vpop.eup %12292 }
 0x8fa   :  { %v15074_v60 = vpop.eup %12294 }
 0x910   :  { %3886 = vadd.xlane.f32.xlu1 %v15065_v7 }
 0x911   :  { %3884 = vadd.xlane.f32.xlu0 %v15067_v40 }
 0x915   :  { %3888 = vadd.xlane.f32.xlu0 %v15071_v26 }
 0x919   :  { %3890 = vadd.xlane.f32.xlu0 %v15074_v60 }
 0x91b   :  { %v3817_v41 = vpop.xlane.xlu1 %3816 }
 0x91c   :  { %v3834_v13 = vsub.f32 %v14984_v2, %v3817_v41  ;;  %v3813_v12 = vpop.xlane.xlu0 %3812 }
 0x91d   :  { %v3832_v3 = vsub.f32 %v14988_v0, %v3813_v12 }
 0x91e   :  { %v3864_v50 = vmul.f32 1.442695, %v3834_v13 }
 0x91f   :  { %v3860_v39 = vmul.f32 1.442695, %v3832_v3  ;;  %v3941_v46 = vpop.permute.xlu1 %3940 }
 0x920   :  { %11258 = vmatprep.subr.bf16.mxu1 %v3941_v46  ;;  %v3815_v6 = vpop.xlane.xlu0 %3814 }
 0x921   :  { %12296 = vpow2.f32 %v3860_v39  ;;  %v3833_v38 = vsub.f32 %v14996_v17, %v3815_v6 }
 0x922   :  { %12298 = vpow2.f32 %v3864_v50 }
 0x923   :  { %v3862_v42 = vmul.f32 1.442695, %v3833_v38 }
 0x924   :  { %v3819_v15 = vpop.xlane.xlu0 %3818 }
 0x925   :  { %12300 = vpow2.f32 %v3862_v42  ;;  %v3835_v59 = vsub.f32 %v15000_v36, %v3819_v15  ;;  %v3945_v36 = vpop.permute.xlu1 %3944 }
 0x927   :  { %v3866_v53 = vmul.f32 1.442695, %v3835_v59 }
 0x928   :  { %v3943_v11 = vpop.permute.xlu0 %3942 }
 0x929   :  { %12302 = vpow2.f32 %v3866_v53  ;;  %v3947_v52 = vpop.permute.xlu1 %3946 }
 0x92b   :  { %v15081_v2 = vpop.eup %12296 }
 0x92c   :  { %3892 = vadd.xlane.f32.xlu1 %v15081_v2  ;;  %v15084_v0 = vpop.eup %12298 }
 0x92d   :  { %v3949_v49 = vpop.permute.xlu1 %3948 }
 0x92f   :  { %v15086_v30 = vpop.eup %12300 }
 0x930   :  { %3896 = vadd.xlane.f32.xlu1 %v15084_v0  ;;  %3894 = vadd.xlane.f32.xlu0 %v15086_v30 }
 0x933   :  { %v15090_v17 = vpop.eup %12302 }
 0x934   :  { %3898 = vadd.xlane.f32.xlu0 %v15090_v17 }
 0x959   :  { %v3873_v8 = vpop.xlane.xlu0 %3872 }
 0x95c   :  { %v3881_v25 = vpop.xlane.xlu1 %3880 }
 0x95d   :  { %v3869_v20 = vpop.xlane.xlu0 %3868 }
 0x960   :  { %v3877_v41 = vpop.xlane.xlu1 %3876 }
 0x961   :  { %v3875_v44 = vpop.xlane.xlu0 %3874 }
 0x964   :  { %v3883_v6 = vpop.xlane.xlu1 %3882 }
 0x965   :  { %v3871_v21 = vpop.xlane.xlu0 %3870 }
 0x966   :  { %v11192_v10 = vpop.f32.mrb[80].mxu1  ;;  %12304 = vrcp.f32 %v3871_v21 }
 0x967   :  { %v3359_v62 = vpop.f32.mrb[81].mxu1  ;;  %12306 = vrcp.f32 %v3869_v20 }
 0x968   :  { %v11193_v56 = vpop.f32.mrb[82].mxu1  ;;  %12308 = vrcp.f32 %v3875_v44 }
 0x969   :  { %v3423_v29 = vpack.c.bf16 %v11193_v56, %v11192_v10  ;;  %v3362_v48 = vpop.f32.mrb[83].mxu1  ;;  %v3879_v3 = vpop.xlane.xlu0 %3878 }
 0x96a   :  { %v3422_v51 = vpack.c.bf16 %v3362_v48, %v3359_v62  ;;  %12310 = vrcp.f32 %v3879_v3 }
 0x96b   :  { %12312 = vrcp.f32 %v3873_v8 }
 0x96c   :  { %11210 = vmatprep.mubr.msk.bf16.mxu1 %vm1725_vm7, %v3422_v51  ;;  %12314 = vrcp.f32 %v3877_v41 }
 0x96d   :  { %11211 = vmatmul.mubr.msk.bf16.vlgmr.msra.gmra.mrb[64].mxu1 %vm1725_vm7, %v3423_v29  ;;  %v3951_v15 = vpop.permute.xlu0 %3950  ;;  %12316 = vrcp.f32 %v3883_v6 }
 0x96e   :  { %11259 = vmatpush3.bf16.msra.mxu1 %v3941_v46  ;;  %v11196_v18 = vpop.f32.mrb[84].mxu1  ;;  %12318 = vrcp.f32 %v3881_v25 }
 0x96f   :  { %11260 = vmatprep.subr.bf16.mxu1 %v3943_v11  ;;  %v3375_v58 = vpop.f32.mrb[85].mxu1 }
 0x970   :  { %v11197_v47 = vpop.f32.mrb[86].mxu1  ;;  %v12305_v42 = vpop.eup %12304 }
 0x971   :  { %v3425_v22 = vpack.c.bf16 %v11197_v47, %v11196_v18  ;;  %v3378_v57 = vpop.f32.mrb[87].mxu1  ;;  %v12307_v53 = vpop.eup %12306  ;;  %v3917_v10 = vmul.f32 %v12305_v42, %v15048_v35 }
 0x972   :  { %v3424_v24 = vpack.c.bf16 %v3378_v57, %v3375_v58  ;;  %11261 = vmatpush3.bf16.msra.mxu1 %v3943_v11  ;;  %v3916_v56 = vmul.f32 %v12307_v53, %v15036_v54  ;;  %v12309_v29 = vpop.eup %12308  ;;  %v11926_v58 = vld [vmem:[#allocation7 + $0x30] sm:$0xff]  }
 0x973   :  { %11262 = vmatprep.subr.bf16.mxu1 %v3945_v36  ;;  %v3919_v18 = vmul.f32 %v12309_v29, %v15042_v16  ;;  %v11927_v29 = vld [vmem:[#allocation7 + $0x38] sm:$0xff]  }
 0x974   :  { %11214 = vmatprep.mubr.msk.bf16.mxu1 %vm1725_vm7, %v3424_v24  ;;  %v3932_v48 = vpack.c.bf16 %v3917_v10, %v3916_v56 }
 0x975   :  { %11215 = vmatmul.mubr.msk.bf16.gmra.mrb[68].mxu1 %vm1725_vm7, %v3425_v22 }
 0x976   :  { %11263 = vmatpush3.bf16.msra.mxu1 %v3945_v36  ;;  %v11200_v13 = vpop.f32.mrb[88].mxu1  ;;  %v3953_v36 = vpop.permute.xlu1 %3952 }
 0x977   :  { %11264 = vmatprep.subr.bf16.mxu1 %v3947_v52  ;;  %v3391_v12 = vpop.f32.mrb[89].mxu1 }
 0x978   :  { %v11201_v39 = vpop.f32.mrb[90].mxu1 }
 0x979   :  { %v3427_v46 = vpack.c.bf16 %v11201_v39, %v11200_v13  ;;  %v3394_v50 = vpop.f32.mrb[91].mxu1 }
 0x97a   :  { %v3426_v38 = vpack.c.bf16 %v3394_v50, %v3391_v12  ;;  %11265 = vmatpush3.bf16.msra.mxu1 %v3947_v52  ;;  %v3955_v51 = vpop.permute.xlu1 %3954 }
 0x97b   :  { %11266 = vmatprep.subr.bf16.mxu1 %v3949_v49 }
 0x97c   :  { %11218 = vmatprep.mubr.msk.bf16.mxu1 %vm1725_vm7, %v3426_v38 }
 0x97d   :  { %11219 = vmatmul.mubr.msk.bf16.gmra.mrb[72].mxu1 %vm1725_vm7, %v3427_v46 }
 0x97e   :  { %11267 = vmatpush3.bf16.msra.mxu1 %v3949_v49  ;;  %v11204_v59 = vpop.f32.mrb[92].mxu1  ;;  %v12311_v49 = vpop.eup %12310 }
 0x97f   :  { %11268 = vmatprep.subr.bf16.mxu1 %v3951_v15  ;;  %v3407_v11 = vpop.f32.mrb[93].mxu1  ;;  %v12313_v44 = vpop.eup %12312  ;;  %v3921_v54 = vmul.f32 %v12311_v49, %v15052_v43 }
 0x980   :  { %v11205_v20 = vpop.f32.mrb[94].mxu1  ;;  %v12315_v35 = vpop.eup %12314  ;;  %v3918_v21 = vmul.f32 %v12313_v44, %v15031_v61 }
 0x981   :  { %v3429_v52 = vpack.c.bf16 %v11205_v20, %v11204_v59  ;;  %v3410_v62 = vpop.f32.mrb[95].mxu1  ;;  %v3920_v25 = vmul.f32 %v12315_v35, %v15040_v37  ;;  %v12317_v22 = vpop.eup %12316 }
 0x982   :  { %v3428_v8 = vpack.c.bf16 %v3410_v62, %v3407_v11  ;;  %11269 = vmatpush3.bf16.msra.mxu1 %v3951_v15  ;;  %v3933_v47 = vpack.c.bf16 %v3919_v18, %v3918_v21  ;;  %v12319_v24 = vpop.eup %12318  ;;  %v3923_v41 = vmul.f32 %v12317_v22, %v15046_v5 }
 0x983   :  { %11270 = vmatprep.subr.bf16.mxu1 %v3953_v36  ;;  %v3934_v57 = vpack.c.bf16 %v3921_v54, %v3920_v25  ;;  %v3922_v16 = vmul.f32 %v12319_v24, %v15034_v19 }
 0x984   :  { %11222 = vmatprep.mubr.msk.bf16.mxu1 %vm1725_vm7, %v3428_v8 }
 0x985   :  { %11223 = vmatmul.mubr.msk.bf16.gmra.mrb[76].mxu1 %vm1725_vm7, %v3429_v52  ;;  %v3935_v13 = vpack.c.bf16 %v3923_v41, %v3922_v16 }
 0x986   :  { %11271 = vmatpush3.bf16.msra.mxu1 %v3953_v36  ;;  %11274 = vmatprep.mubr.bf16.mxu1 %v3932_v48 }
 0x987   :  { %11272 = vmatprep.subr.bf16.mxu1 %v3955_v51 }
 0x98a   :  { %11273 = vmatpush3.bf16.msra.mxu1 %v3955_v51 }
 0x98b   :  { %11290 = vmatprep.subr.bf16.mxu1 %v11926_v58 }
 0x98d   :  { %11275 = vmatmul.mubr.bf16.vlgmr.msra.gmra.mrb[96].mxu1 %v3933_v47 }
 0x98e   :  { %11278 = vmatprep.mubr.bf16.mxu1 %v3934_v57  ;;  %11291 = vmatpush3.bf16.msra.mxu1 %v11926_v58 }
 0x98f   :  { %11292 = vmatprep.subr.bf16.mxu1 %v11927_v29 }
 0x992   :  { %11293 = vmatpush3.bf16.msra.mxu1 %v11927_v29 }
 0x995   :  { %11279 = vmatmul.mubr.bf16.gmra.mrb[100].mxu1 %v3935_v13 }
 0x99d   :  { %v3887_v43 = vpop.xlane.xlu1 %3886 }
 0x99e   :  { %12320 = vrcp.f32 %v3887_v43  ;;  %v3885_v61 = vpop.xlane.xlu0 %3884 }
 0x99f   :  { %12322 = vrcp.f32 %v3885_v61 }
 0x9a2   :  { %v3889_v12 = vpop.xlane.xlu0 %3888 }
 0x9a3   :  { %12324 = vrcp.f32 %v3889_v12 }
 0x9a6   :  { %v3891_v37 = vpop.xlane.xlu0 %3890 }
 0x9a7   :  { %12326 = vrcp.f32 %v3891_v37  ;;  %v10130_v37 = vld [vmem:[%s17924_s9] ss:$0 sm:$0xff] }
 0x9a8   :  { %v12321_v3 = vpop.eup %12320 }
 0x9a9   :  { %v12323_v39 = vpop.eup %12322  ;;  %v3925_v46 = vmul.f32 %v12321_v3, %v15065_v7 }
 0x9aa   :  { %v3924_v50 = vmul.f32 %v12323_v39, %v15067_v40 }
 0x9ac   :  { %v3936_v6 = vpack.c.bf16 %v3925_v46, %v3924_v50 }
 0x9ad   :  { %v12325_v5 = vpop.eup %12324 }
 0x9ae   :  { %11282 = vmatprep.mubr.bf16.mxu1 %v3936_v6  ;;  %v3926_v38 = vmul.f32 %v12325_v5, %v15071_v26 }
 0x9b1   :  { %v12327_v19 = vpop.eup %12326 }
 0x9b2   :  { %v3927_v42 = vmul.f32 %v12327_v19, %v15074_v60  ;;  %v18242_v19 = vld [vmem:[#allocation19_spill] sm:$0xff] }
 0x9b4   :  { %v3937_v15 = vpack.c.bf16 %v3927_v42, %v3926_v38 }
 0x9b6   :  { %11283 = vmatmul.mubr.bf16.gmra.mrb[104].mxu1 %v3937_v15 }
 0x9b9   :  { %v3893_v59 = vpop.xlane.xlu1 %3892 }
 0x9ba   :  { %12328 = vrcp.f32 %v3893_v59  ;;  %v18243_v59 = vld [vmem:[#allocation20_spill] sm:$0xff] }
 0x9bd   :  { %v3897_v53 = vpop.xlane.xlu1 %3896  ;;  %v3895_v11 = vpop.xlane.xlu0 %3894 }
 0x9be   :  { %12330 = vrcp.f32 %v3895_v11  ;;  %v18244_v11 = vld [vmem:[#allocation22_spill] sm:$0xff] }
 0x9bf   :  { %12332 = vrcp.f32 %v3897_v53 }
 0x9c1   :  { %v3899_v36 = vpop.xlane.xlu0 %3898 }
 0x9c2   :  { %12334 = vrcp.f32 %v3899_v36 }
 0x9c4   :  { %v12329_v7 = vpop.eup %12328 }
 0x9c5   :  { %v3928_v10 = vmul.f32 %v12329_v7, %v15081_v2 }
 0x9c8   :  { %v12331_v40 = vpop.eup %12330 }
 0x9c9   :  { %v12333_v20 = vpop.eup %12332  ;;  %v3929_v52 = vmul.f32 %v12331_v40, %v15086_v30 }
 0x9ca   :  { %v3930_v60 = vmul.f32 %v12333_v20, %v15084_v0  ;;  %v18245_v20 = vld [vmem:[#allocation21_spill] sm:$0xff] }
 0x9cb   :  { %v3938_v62 = vpack.c.bf16 %v3929_v52, %v3928_v10 }
 0x9cc   :  { %v12335_v26 = vpop.eup %12334 }
 0x9cd   :  { %v3931_v8 = vmul.f32 %v12335_v26, %v15090_v17  ;;  %11286 = vmatprep.mubr.bf16.mxu1 %v3938_v62 }
 0x9cf   :  { %v3939_v56 = vpack.c.bf16 %v3931_v8, %v3930_v60  ;;  %v18246_v8 = vld [vmem:[#allocation24_spill] sm:$0xff] }
 0x9d1   :  { %11287 = vmatmul.mubr.bf16.gmra.mrb[108].mxu1 %v3939_v56 }
 0xa60   :  { %v11276_v48 = vpop.f32.mrb[96].mxu1 }
 0xa61   :  { %v3998_v49 = vpop.f32.mrb[97].mxu1 }
 0xa62   :  { %v11277_v44 = vpop.f32.mrb[98].mxu1 }
 0xa63   :  { %v4062_v51 = vpack.c.bf16 %v11277_v44, %v11276_v48  ;;  %v4001_v35 = vpop.f32.mrb[99].mxu1 }
 0xa64   :  { %v4061_v2 = vpack.c.bf16 %v4001_v35, %v3998_v49  ;;  %v18247_v49 = vld [vmem:[#allocation23_spill] sm:$0xff] }
 0xa66   :  { %11294 = vmatprep.mubr.msk.bf16.mxu1 %vm1725_vm7, %v4061_v2  ;;  %v18249_v2 = vld [vmem:[#allocation25_spill] sm:$0xff] }
 0xa67   :  { %11295 = vmatmul.mubr.msk.bf16.vlgmr.msra.gmra.mrb[64].mxu1 %vm1725_vm7, %v4062_v51  ;;  %v18248_v51 = vld [vmem:[#allocation26_spill] sm:$0xff] }
 0xa68   :  { %v11280_v30 = vpop.f32.mrb[100].mxu1 }
 0xa69   :  { %v4014_v0 = vpop.f32.mrb[101].mxu1 }
 0xa6a   :  { %v11281_v18 = vpop.f32.mrb[102].mxu1 }
 0xa6b   :  { %v4064_v17 = vpack.c.bf16 %v11281_v18, %v11280_v30  ;;  %v4017_v58 = vpop.f32.mrb[103].mxu1 }
 0xa6c   :  { %v4063_v54 = vpack.c.bf16 %v4017_v58, %v4014_v0 }
 0xa6e   :  { %11298 = vmatprep.mubr.msk.bf16.mxu1 %vm1725_vm7, %v4063_v54 }
 0xa6f   :  { %11299 = vmatmul.mubr.msk.bf16.gmra.mrb[68].mxu1 %vm1725_vm7, %v4064_v17 }
 0xa89   :  { %v11284_v21 = vpop.f32.mrb[104].mxu1 }
 0xa8a   :  { %v4030_v25 = vpop.f32.mrb[105].mxu1 }
 0xa8b   :  { %v11285_v47 = vpop.f32.mrb[106].mxu1 }
 0xa8c   :  { %v4066_v22 = vpack.c.bf16 %v11285_v47, %v11284_v21  ;;  %v4033_v57 = vpop.f32.mrb[107].mxu1 }
 0xa8d   :  { %v4065_v24 = vpack.c.bf16 %v4033_v57, %v4030_v25  ;;  %v18250_v25 = vld [vmem:[#allocation28_spill] sm:$0xff] }
 0xa8f   :  { %11302 = vmatprep.mubr.msk.bf16.mxu1 %vm1725_vm7, %v4065_v24  ;;  %v18251_v24 = vld [vmem:[#allocation27_spill] sm:$0xff] }
 0xa90   :  { %11303 = vmatmul.mubr.msk.bf16.gmra.mrb[72].mxu1 %vm1725_vm7, %v4066_v22 }
 0xaa4   :  { %v11288_v41 = vpop.f32.mrb[108].mxu1 }
 0xaa5   :  { %v4046_v16 = vpop.f32.mrb[109].mxu1 }
 0xaa6   :  { %v11289_v13 = vpop.f32.mrb[110].mxu1 }
 0xaa7   :  { %v4068_v43 = vpack.c.bf16 %v11289_v13, %v11288_v41  ;;  %v4049_v61 = vpop.f32.mrb[111].mxu1 }
 0xaa8   :  { %v4067_v12 = vpack.c.bf16 %v4049_v61, %v4046_v16  ;;  %v18252_v16 = vld [vmem:[#allocation30_spill] sm:$0xff] }
 0xaaa   :  { %11306 = vmatprep.mubr.msk.bf16.mxu1 %vm1725_vm7, %v4067_v12 }
 0xaab   :  { %11307 = vmatmul.mubr.msk.bf16.gmra.mrb[76].mxu1 %vm1725_vm7, %v4068_v43  ;;  %v18253_v43 = vld [vmem:[#allocation29_spill] sm:$0xff] }
 0xb3a   :  { %v11296_v3 = vpop.f32.mrb[64].mxu1 }
 0xb3b   :  { %v4139_v39 = vpop.f32.mrb[65].mxu1  ;;  %v4227_v5 = vadd.f32 %v11296_v3, %v10130_v37 }
 0xb3c   :  { %v4225_v46 = vadd.f32 %v10130_v37, %v4139_v39  ;;  %v11297_v50 = vpop.f32.mrb[66].mxu1 }
 0xb3d   :  { %v4142_v6 = vpop.f32.mrb[67].mxu1  ;;  %v4228_v15 = vadd.f32 %v11297_v50, %v10130_v37  ;;  %v15136_v36 = vadd.f32 %v4227_v5, %v18244_v11  ;;  %v18254_v5 = vld [vmem:[#allocation32_spill] sm:$0xff] }
 0xb3e   :  { %v15129_v38 = vadd.f32 %v4225_v46, %v18242_v19  ;;  %v4226_v42 = vadd.f32 %v10130_v37, %v4142_v6 }
 0xb3f   :  { %v15140_v10 = vadd.f32 %v4228_v15, %v18245_v20  ;;  %v18257_v20 = vld [vmem:[#allocation33_spill] sm:$0xff] }
 0xb40   :  { %v15132_v53 = vadd.f32 %v4226_v42, %v18243_v59  ;;  %4259 = vadd.xlane.f32.xlu1 %v15129_v38  ;;  %v18255_v59 = vld [vmem:[#allocation31_spill] sm:$0xff] }
 0xb42   :  { %4261 = vadd.xlane.f32.xlu0 %v15132_v53  ;;  %v11300_v7 = vpop.f32.mrb[68].mxu1 }
 0xb43   :  { %v4155_v40 = vpop.f32.mrb[69].mxu1  ;;  %v4231_v60 = vadd.f32 %v11300_v7, %v10130_v37  ;;  %v18256_v7 = vld [vmem:[#allocation34_spill] sm:$0xff] }
 0xb44   :  { %v4229_v52 = vadd.f32 %v10130_v37, %v4155_v40  ;;  %4263 = vadd.xlane.f32.xlu1 %v15136_v36  ;;  %v11301_v26 = vpop.f32.mrb[70].mxu1 }
 0xb45   :  { %v4158_v62 = vpop.f32.mrb[71].mxu1  ;;  %v4232_v48 = vadd.f32 %v11301_v26, %v10130_v37  ;;  %v15152_v35 = vadd.f32 %v4231_v60, %v18248_v51  ;;  %v11928_v26 = vld [vmem:[#allocation8] ss:$8 sps:$4 sm:$0xff]   ;;  %v11931_v60 = vld [vmem:[#allocation8 + $0x10] ss:$8 sps:$4 sm:$0xff]  }
 0xb46   :  { %v15144_v56 = vadd.f32 %v4229_v52, %v18246_v8  ;;  %v4230_v29 = vadd.f32 %v10130_v37, %v4158_v62  ;;  %4265 = vadd.xlane.f32.xlu0 %v15140_v10  ;;  %v11930_v62 = vld [vmem:[#allocation8 + $0x4] ss:$8 sps:$4 sm:$0xff]  }
 0xb47   :  { %v15156_v30 = vadd.f32 %v4232_v48, %v18249_v2  ;;  %4595 = vmatprep.subr.bf16.mxu0 %v11930_v62  ;;  %v11943_v62 = vld [vmem:[#allocation8 + $0x50] ss:$8 sps:$4 sm:$0xff]  }
 0xb48   :  { %v15148_v44 = vadd.f32 %v4230_v29, %v18247_v49  ;;  %4267 = vadd.xlane.f32.xlu1 %v15144_v56  ;;  %4596 = vmatpush1.bf16.msra.mxu0 %v11928_v26  ;;  %v11945_v26 = vld [vmem:[#allocation8 + $0x54] ss:$8 sps:$4 sm:$0xff]  }
 0xb4a   :  { %4269 = vadd.xlane.f32.xlu0 %v15148_v44 }
 0xb4c   :  { %4271 = vadd.xlane.f32.xlu1 %v15152_v35 }
 0xb4e   :  { %4273 = vadd.xlane.f32.xlu0 %v15156_v30 }
 0xb63   :  { %v11304_v0 = vpop.f32.mrb[72].mxu1 }
 0xb64   :  { %v4171_v18 = vpop.f32.mrb[73].mxu1  ;;  %v4235_v21 = vadd.f32 %v11304_v0, %v10130_v37 }
 0xb65   :  { %v4233_v17 = vadd.f32 %v10130_v37, %v4171_v18  ;;  %v11305_v58 = vpop.f32.mrb[74].mxu1 }
 0xb66   :  { %v4174_v54 = vpop.f32.mrb[75].mxu1  ;;  %v4236_v57 = vadd.f32 %v11305_v58, %v10130_v37  ;;  %v15168_v13 = vadd.f32 %v4235_v21, %v18252_v16 }
 0xb67   :  { %v15161_v47 = vadd.f32 %v4233_v17, %v18250_v25  ;;  %v4234_v22 = vadd.f32 %v10130_v37, %v4174_v54 }
 0xb68   :  { %v15172_v61 = vadd.f32 %v4236_v57, %v18253_v43 }
 0xb69   :  { %v15164_v41 = vadd.f32 %v4234_v22, %v18251_v24  ;;  %4275 = vadd.xlane.f32.xlu1 %v15161_v47 }
 0xb6b   :  { %4277 = vadd.xlane.f32.xlu0 %v15164_v41 }
 0xb6d   :  { %4279 = vadd.xlane.f32.xlu1 %v15168_v13 }
 0xb6f   :  { %4281 = vadd.xlane.f32.xlu0 %v15172_v61 }
 0xb7e   :  { %v11308_v12 = vpop.f32.mrb[76].mxu1 }
 0xb7f   :  { %v4187_v3 = vpop.f32.mrb[77].mxu1  ;;  %v4239_v6 = vadd.f32 %v11308_v12, %v10130_v37 }
 0xb80   :  { %v4237_v39 = vadd.f32 %v10130_v37, %v4187_v3  ;;  %v11309_v46 = vpop.f32.mrb[78].mxu1 }
 0xb81   :  { %v4190_v50 = vpop.f32.mrb[79].mxu1  ;;  %v4240_v15 = vadd.f32 %v11309_v46, %v10130_v37  ;;  %v15184_v40 = vadd.f32 %v4239_v6, %v18256_v7  ;;  %v11937_v7 = vld [vmem:[#allocation8 + $0x30] ss:$8 sps:$4 sm:$0xff]  }
 0xb82   :  { %v15177_v19 = vadd.f32 %v4237_v39, %v18254_v5  ;;  %v4238_v42 = vadd.f32 %v10130_v37, %v4190_v50  ;;  %v11933_v37 = vld [vmem:[#allocation8 + $0x14] ss:$8 sps:$4 sm:$0xff]  }
 0xb83   :  { %v15188_v52 = vadd.f32 %v4240_v15, %v18257_v20  ;;  %4597 = vmatprep.subr.bf16.mxu0 %v11933_v37  ;;  %v11936_v15 = vld [vmem:[#allocation8 + $0x24] ss:$8 sps:$4 sm:$0xff]  }
 0xb84   :  { %v15180_v11 = vadd.f32 %v4238_v42, %v18255_v59  ;;  %4283 = vadd.xlane.f32.xlu1 %v15177_v19  ;;  %4598 = vmatpush1.bf16.msra.mxu0 %v11931_v60  ;;  %v11939_v59 = vld [vmem:[#allocation8 + $0x34] ss:$8 sps:$4 sm:$0xff]   ;;  %v11942_v20 = vld [vmem:[#allocation8 + $0x44] ss:$8 sps:$4 sm:$0xff]   ;;  %v11946_v60 = vld [vmem:[#allocation8 + $0x60] ss:$8 sps:$4 sm:$0xff]  }
 0xb85   :  { %4599 = vmatprep.subr.bf16.mxu0 %v11936_v15  ;;  %v11948_v37 = vld [vmem:[#allocation8 + $0x64] ss:$8 sps:$4 sm:$0xff]  }
 0xb86   :  { %4285 = vadd.xlane.f32.xlu0 %v15180_v11 }
 0xb88   :  { %4287 = vadd.xlane.f32.xlu1 %v15184_v40 }
 0xb8a   :  { %4289 = vadd.xlane.f32.xlu0 %v15188_v52 }
 0xbcd   :  { %v4260_v8 = vpop.xlane.xlu1 %4259 }
 0xbce   :  { %v4291_v29 = vmul.f32 0.0078125, %v4260_v8  ;;  %v11951_v8 = vld [vmem:[#allocation8 + $0x74] ss:$8 sps:$4 sm:$0xff]  }
 0xbcf   :  { %v4262_v48 = vpop.xlane.xlu0 %4261 }
 0xbd0   :  { %v15193_v49 = vsub.f32 %v15129_v38, %v4291_v29  ;;  %v4292_v51 = vmul.f32 0.0078125, %v4262_v48  ;;  %v11949_v48 = vld [vmem:[#allocation8 + $0x70] ss:$8 sps:$4 sm:$0xff]  }
 0xbd1   :  { %v4264_v2 = vpop.xlane.xlu1 %4263 }
 0xbd2   :  { %v15196_v0 = vsub.f32 %v15132_v53, %v4292_v51  ;;  %v4293_v18 = vmul.f32 0.0078125, %v4264_v2  ;;  %v4323_v17 = vmul.f32 %v15193_v49, %v15193_v49 }
 0xbd3   :  { %v4266_v58 = vpop.xlane.xlu0 %4265 }
 0xbd4   :  { %v15201_v54 = vsub.f32 %v15136_v36, %v4293_v18  ;;  %v4294_v21 = vmul.f32 0.0078125, %v4266_v58  ;;  %4339 = vadd.xlane.f32.xlu1 %v4323_v17  ;;  %v4324_v25 = vmul.f32 %v15196_v0, %v15196_v0 }
 0xbd5   :  { %v4268_v38 = vpop.xlane.xlu1 %4267 }
 0xbd6   :  { %v15206_v22 = vsub.f32 %v15140_v10, %v4294_v21  ;;  %v4295_v57 = vmul.f32 0.0078125, %v4268_v38  ;;  %4341 = vadd.xlane.f32.xlu0 %v4324_v25  ;;  %v4325_v53 = vmul.f32 %v15201_v54, %v15201_v54 }
 0xbd7   :  { %v4270_v24 = vpop.xlane.xlu0 %4269 }
 0xbd8   :  { %v15211_v16 = vsub.f32 %v15144_v56, %v4295_v57  ;;  %v4296_v36 = vmul.f32 0.0078125, %v4270_v24  ;;  %4343 = vadd.xlane.f32.xlu1 %v4325_v53  ;;  %v4326_v43 = vmul.f32 %v15206_v22, %v15206_v22 }
 0xbd9   :  { %v4272_v12 = vpop.xlane.xlu1 %4271 }
 0xbda   :  { %v15216_v3 = vsub.f32 %v15148_v44, %v4296_v36  ;;  %v4297_v10 = vmul.f32 0.0078125, %v4272_v12  ;;  %4345 = vadd.xlane.f32.xlu0 %v4326_v43  ;;  %v4327_v39 = vmul.f32 %v15211_v16, %v15211_v16 }
 0xbdb   :  { %v4274_v46 = vpop.xlane.xlu0 %4273 }
 0xbdc   :  { %v15221_v50 = vsub.f32 %v15152_v35, %v4297_v10  ;;  %v4298_v56 = vmul.f32 0.0078125, %v4274_v46  ;;  %4347 = vadd.xlane.f32.xlu1 %v4327_v39  ;;  %v4328_v6 = vmul.f32 %v15216_v3, %v15216_v3  ;;  %v11934_v35 = vld [vmem:[#allocation8 + $0x20] ss:$8 sps:$4 sm:$0xff]  }
 0xbdd   :  { %4600 = vmatpush1.bf16.msra.mxu0 %v11934_v35 }
 0xbde   :  { %v15226_v5 = vsub.f32 %v15156_v30, %v4298_v56  ;;  %4349 = vadd.xlane.f32.xlu0 %v4328_v6  ;;  %v4329_v44 = vmul.f32 %v15221_v50, %v15221_v50  ;;  %4601 = vmatprep.subr.bf16.mxu0 %v11939_v59  ;;  %v11940_v30 = vld [vmem:[#allocation8 + $0x40] ss:$8 sps:$4 sm:$0xff]  }
 0xbe0   :  { %4351 = vadd.xlane.f32.xlu1 %v4329_v44  ;;  %v4330_v42 = vmul.f32 %v15226_v5, %v15226_v5 }
 0xbe1   :  { %4602 = vmatpush1.bf16.msra.mxu0 %v11937_v7 }
 0xbe2   :  { %4353 = vadd.xlane.f32.xlu0 %v4330_v42  ;;  %4603 = vmatprep.subr.bf16.mxu0 %v11942_v20 }
 0xbe5   :  { %4604 = vmatpush1.bf16.msra.mxu0 %v11940_v30 }
 0xbe6   :  { %4605 = vmatprep.subr.bf16.mxu0 %v11945_v26 }
 0xbe9   :  { %4606 = vmatpush1.bf16.msra.mxu0 %v11943_v62 }
 0xbea   :  { %4607 = vmatprep.subr.bf16.mxu0 %v11948_v37 }
 0xbed   :  { %4608 = vmatpush1.bf16.msra.mxu0 %v11946_v60 }
 0xbee   :  { %4609 = vmatprep.subr.bf16.mxu0 %v11951_v8 }
 0xbf1   :  { %4610 = vmatpush1.bf16.msra.mxu0 %v11949_v48 }
 0xbf6   :  { %v4276_v29 = vpop.xlane.xlu1 %4275 }
 0xbf7   :  { %v4299_v51 = vmul.f32 0.0078125, %v4276_v29 }
 0xbf8   :  { %v4278_v2 = vpop.xlane.xlu0 %4277 }
 0xbf9   :  { %v15233_v18 = vsub.f32 %v15161_v47, %v4299_v51  ;;  %v4300_v17 = vmul.f32 0.0078125, %v4278_v2 }
 0xbfa   :  { %v4280_v58 = vpop.xlane.xlu1 %4279 }
 0xbfb   :  { %v15236_v21 = vsub.f32 %v15164_v41, %v4300_v17  ;;  %v4301_v25 = vmul.f32 0.0078125, %v4280_v58  ;;  %v4331_v38 = vmul.f32 %v15233_v18, %v15233_v18 }
 0xbfc   :  { %v4282_v57 = vpop.xlane.xlu0 %4281 }
 0xbfd   :  { %v15241_v53 = vsub.f32 %v15168_v13, %v4301_v25  ;;  %v4302_v24 = vmul.f32 0.0078125, %v4282_v57  ;;  %4355 = vadd.xlane.f32.xlu1 %v4331_v38  ;;  %v4332_v47 = vmul.f32 %v15236_v21, %v15236_v21 }
 0xbff   :  { %v15246_v36 = vsub.f32 %v15172_v61, %v4302_v24  ;;  %4357 = vadd.xlane.f32.xlu0 %v4332_v47  ;;  %v4333_v41 = vmul.f32 %v15241_v53, %v15241_v53 }
 0xc01   :  { %4359 = vadd.xlane.f32.xlu1 %v4333_v41  ;;  %v4334_v43 = vmul.f32 %v15246_v36, %v15246_v36 }
 0xc03   :  { %4361 = vadd.xlane.f32.xlu0 %v4334_v43  ;;  %v15275_v43 = vld [vmem:[%s17925_s10] ss:$0 sm:$0xff] }
 0xc11   :  { %v4284_v12 = vpop.xlane.xlu1 %4283 }
 0xc12   :  { %v4303_v13 = vmul.f32 0.0078125, %v4284_v12 }
 0xc13   :  { %v4286_v10 = vpop.xlane.xlu0 %4285 }
 0xc14   :  { %v15253_v39 = vsub.f32 %v15177_v19, %v4303_v13  ;;  %v4304_v46 = vmul.f32 0.0078125, %v4286_v10 }
 0xc15   :  { %v4288_v56 = vpop.xlane.xlu1 %4287 }
 0xc16   :  { %v15256_v61 = vsub.f32 %v15180_v11, %v4304_v46  ;;  %v4305_v6 = vmul.f32 0.0078125, %v4288_v56  ;;  %v4335_v44 = vmul.f32 %v15253_v39, %v15253_v39 }
 0xc17   :  { %v4290_v42 = vpop.xlane.xlu0 %4289 }
 0xc18   :  { %v15261_v15 = vsub.f32 %v15184_v40, %v4305_v6  ;;  %v4306_v35 = vmul.f32 0.0078125, %v4290_v42  ;;  %4363 = vadd.xlane.f32.xlu1 %v4335_v44  ;;  %v4336_v59 = vmul.f32 %v15256_v61, %v15256_v61 }
 0xc1a   :  { %v15266_v19 = vsub.f32 %v15188_v52, %v4306_v35  ;;  %4365 = vadd.xlane.f32.xlu0 %v4336_v59  ;;  %v4337_v11 = vmul.f32 %v15261_v15, %v15261_v15  ;;  %v15283_v35 = vld [vmem:[%s17926_s11] ss:$0 sm:$0xff] }
 0xc1c   :  { %4367 = vadd.xlane.f32.xlu1 %v4337_v11  ;;  %v4338_v7 = vmul.f32 %v15266_v19, %v15266_v19 }
 0xc1e   :  { %4369 = vadd.xlane.f32.xlu0 %v4338_v7 }
 0xc61   :  { %v4340_v20 = vpop.xlane.xlu1 %4339 }
 0xc62   :  { %v4371_v40 = vmul.f32 0.0078125, %v4340_v20 }
 0xc63   :  { %v4342_v30 = vpop.xlane.xlu0 %4341 }
 0xc64   :  { %v4387_v26 = vadd.f32 1e-12, %v4371_v40  ;;  %v4372_v62 = vmul.f32 0.0078125, %v4342_v30 }
 0xc65   :  { %v4344_v37 = vpop.xlane.xlu1 %4343 }
 0xc66   :  { %12336 = vrsqrt.f32 %v4387_v26  ;;  %v4388_v60 = vadd.f32 1e-12, %v4372_v62  ;;  %v4373_v8 = vmul.f32 0.0078125, %v4344_v37 }
 0xc67   :  { %v4346_v52 = vpop.xlane.xlu0 %4345 }
 0xc68   :  { %12338 = vrsqrt.f32 %v4388_v60  ;;  %v4389_v29 = vadd.f32 1e-12, %v4373_v8  ;;  %v4374_v48 = vmul.f32 0.0078125, %v4346_v52  ;;  %v18258_v8 = vmov 0  }
 0xc69   :  { %v4348_v51 = vpop.xlane.xlu1 %4347 }
 0xc6a   :  { %12340 = vrsqrt.f32 %v4389_v29  ;;  %v4390_v2 = vadd.f32 1e-12, %v4374_v48  ;;  %v4375_v17 = vmul.f32 0.0078125, %v4348_v51 }
 0xc6b   :  { %v4350_v58 = vpop.xlane.xlu0 %4349 }
 0xc6c   :  { %12342 = vrsqrt.f32 %v4390_v2  ;;  %v4376_v25 = vmul.f32 0.0078125, %v4350_v58  ;;  %v4391_v38 = vadd.f32 1e-12, %v4375_v17 }
 0xc6d   :  { %v4352_v24 = vpop.xlane.xlu1 %4351 }
 0xc6e   :  { %v4392_v57 = vadd.f32 1e-12, %v4376_v25  ;;  %v4377_v46 = vmul.f32 0.0078125, %v4352_v24 }
 0xc6f   :  { %v4354_v47 = vpop.xlane.xlu0 %4353 }
 0xc70   :  { %v12337_v41 = vpop.eup %12336  ;;  %12344 = vrsqrt.f32 %v4392_v57  ;;  %v4378_v12 = vmul.f32 0.0078125, %v4354_v47  ;;  %v4393_v7 = vadd.f32 1e-12, %v4377_v46 }
 0xc71   :  { %v4419_v13 = vmul.f32 %v12337_v41, %v15193_v49  ;;  %12346 = vrsqrt.f32 %v4391_v38 }
 0xc72   :  { %v12339_v10 = vpop.eup %12338  ;;  %v4394_v42 = vadd.f32 1e-12, %v4378_v12 }
 0xc73   :  { %v4441_v56 = vmul.f32 %v15275_v43, %v4419_v13  ;;  %v4420_v6 = vmul.f32 %v12339_v10, %v15196_v0 }
 0xc74   :  { %v12341_v44 = vpop.eup %12340  ;;  %12348 = vrsqrt.f32 %v4394_v42 }
 0xc75   :  { %v4442_v59 = vmul.f32 %v15275_v43, %v4420_v6  ;;  %v15287_v49 = vadd.f32 %v15283_v35, %v4441_v56  ;;  %v4421_v40 = vmul.f32 %v12341_v44, %v15201_v54  ;;  %12350 = vrsqrt.f32 %v4393_v7 }
 0xc76   :  { %v12343_v11 = vpop.eup %12342 }
 0xc77   :  { %v15290_v20 = vadd.f32 %v15283_v35, %v4442_v59  ;;  %v4422_v0 = vmul.f32 %v12343_v11, %v15206_v22  ;;  %v4443_v37 = vmul.f32 %v15275_v43, %v4421_v40 }
 0xc79   :  { %v4479_v30 = vpack.c.bf16 %v15290_v20, %v15287_v49  ;;  %v4444_v26 = vmul.f32 %v15275_v43, %v4422_v0  ;;  %v15304_v22 = vadd.f32 %v15283_v35, %v4443_v37 }
 0xc7a   :  { %v12345_v62 = vpop.eup %12344 }
 0xc7b   :  { %4628 = vmatmul.mubr.bf16.vlgmr.msra.gmra.mrb[112].mxu0 %v4479_v30  ;;  %v12347_v60 = vpop.eup %12346  ;;  %v15300_v52 = vadd.f32 %v15283_v35, %v4444_v26  ;;  %v4424_v54 = vmul.f32 %v12345_v62, %v15216_v3 }
 0xc7c   :  { %4637 = vmatprep.mubr.bf16.mxu0 %v18258_v8  ;;  %v4423_v29 = vmul.f32 %v12347_v60, %v15211_v16 }
 0xc7d   :  { %v4480_v48 = vpack.c.bf16 %v15300_v52, %v15304_v22  ;;  %v4446_v51 = vmul.f32 %v15275_v43, %v4424_v54 }
 0xc7e   :  { %v12349_v2 = vpop.eup %12348  ;;  %v4445_v17 = vmul.f32 %v15275_v43, %v4423_v29 }
 0xc7f   :  { %v12351_v58 = vpop.eup %12350  ;;  %v15313_v25 = vadd.f32 %v15283_v35, %v4446_v51  ;;  %v4426_v3 = vmul.f32 %v12349_v2, %v15226_v5 }
 0xc80   :  { %v15317_v38 = vadd.f32 %v15283_v35, %v4445_v17  ;;  %v4425_v16 = vmul.f32 %v12351_v58, %v15221_v50 }
 0xc81   :  { %v4448_v24 = vmul.f32 %v15275_v43, %v4426_v3 }
 0xc82   :  { %v4481_v57 = vpack.c.bf16 %v15313_v25, %v15317_v38  ;;  %v4447_v12 = vmul.f32 %v15275_v43, %v4425_v16 }
 0xc83   :  { %4638 = vmatmul.mubr.bf16.gmra.mrb[116].mxu0 %v4480_v48  ;;  %v15326_v46 = vadd.f32 %v15283_v35, %v4448_v24 }
 0xc84   :  { %4647 = vmatprep.mubr.bf16.mxu0 %v18258_v8  ;;  %v15329_v44 = vadd.f32 %v15283_v35, %v4447_v12 }
 0xc86   :  { %v4482_v7 = vpack.c.bf16 %v15326_v46, %v15329_v44 }
 0xc8a   :  { %v4356_v47 = vpop.xlane.xlu1 %4355 }
 0xc8b   :  { %v4379_v41 = vmul.f32 0.0078125, %v4356_v47  ;;  %4648 = vmatmul.mubr.bf16.gmra.mrb[120].mxu0 %v4481_v57 }
 0xc8c   :  { %v4358_v13 = vpop.xlane.xlu0 %4357  ;;  %4657 = vmatprep.mubr.bf16.mxu0 %v18258_v8 }
 0xc8d   :  { %v4395_v10 = vadd.f32 1e-12, %v4379_v41  ;;  %v4380_v5 = vmul.f32 0.0078125, %v4358_v13 }
 0xc8e   :  { %v4360_v56 = vpop.xlane.xlu1 %4359 }
 0xc8f   :  { %12352 = vrsqrt.f32 %v4395_v10  ;;  %v4396_v50 = vadd.f32 1e-12, %v4380_v5  ;;  %v4381_v6 = vmul.f32 0.0078125, %v4360_v56 }
 0xc90   :  { %v4362_v42 = vpop.xlane.xlu0 %4361 }
 0xc91   :  { %12354 = vrsqrt.f32 %v4396_v50  ;;  %v4397_v59 = vadd.f32 1e-12, %v4381_v6  ;;  %v4382_v11 = vmul.f32 0.0078125, %v4362_v42 }
 0xc93   :  { %12356 = vrsqrt.f32 %v4397_v59  ;;  %v4398_v40 = vadd.f32 1e-12, %v4382_v11  ;;  %4658 = vmatmul.mubr.bf16.gmra.mrb[124].mxu0 %v4482_v7 }
 0xc94   :  { %4667 = vmatprep.mubr.bf16.mxu0 %v18258_v8 }
 0xc95   :  { %12358 = vrsqrt.f32 %v4398_v40 }
 0xc99   :  { %v12353_v0 = vpop.eup %12352 }
 0xc9a   :  { %v4427_v30 = vmul.f32 %v12353_v0, %v15233_v18 }
 0xc9b   :  { %v12355_v26 = vpop.eup %12354 }
 0xc9c   :  { %v4428_v62 = vmul.f32 %v12355_v26, %v15236_v21  ;;  %v4449_v37 = vmul.f32 %v15275_v43, %v4427_v30 }
 0xc9d   :  { %v12357_v60 = vpop.eup %12356 }
 0xc9e   :  { %v4450_v54 = vmul.f32 %v15275_v43, %v4428_v62  ;;  %v15339_v48 = vadd.f32 %v15283_v35, %v4449_v37  ;;  %v4429_v2 = vmul.f32 %v12357_v60, %v15241_v53 }
 0xc9f   :  { %v12359_v29 = vpop.eup %12358 }
 0xca0   :  { %v15342_v51 = vadd.f32 %v15283_v35, %v4450_v54  ;;  %v4430_v17 = vmul.f32 %v12359_v29, %v15246_v36  ;;  %v4451_v58 = vmul.f32 %v15275_v43, %v4429_v2 }
 0xca2   :  { %v4483_v18 = vpack.c.bf16 %v15342_v51, %v15339_v48  ;;  %v4452_v21 = vmul.f32 %v15275_v43, %v4430_v17  ;;  %v15355_v36 = vadd.f32 %v15283_v35, %v4451_v58  ;;  %v11956_v58 = vld [vmem:[#allocation10 + $0x50] sm:$0xff]  }
 0xca4   :  { %4668 = vmatmul.mubr.bf16.gmra.mrb[128].mxu0 %v4483_v18  ;;  %v15352_v57 = vadd.f32 %v15283_v35, %v4452_v21  ;;  %v11953_v18 = vld [vmem:[#allocation10] sm:$0xff]   ;;  %v11954_v21 = vld [vmem:[#allocation10 + $0x48] sm:$0xff]  }
 0xca5   :  { %v4364_v3 = vpop.xlane.xlu1 %4363  ;;  %4677 = vmatprep.mubr.bf16.mxu0 %v18258_v8 }
 0xca6   :  { %v4383_v16 = vmul.f32 0.0078125, %v4364_v3  ;;  %v4484_v10 = vpack.c.bf16 %v15352_v57, %v15355_v36  ;;  %v11957_v3 = vld [vmem:[#allocation10 + $0x10] sm:$0xff]  }
 0xca7   :  { %v4366_v24 = vpop.xlane.xlu0 %4365 }
 0xca8   :  { %v4399_v47 = vadd.f32 1e-12, %v4383_v16  ;;  %v4384_v53 = vmul.f32 0.0078125, %v4366_v24  ;;  %v11959_v16 = vld [vmem:[#allocation10 + $0x18] sm:$0xff]   ;;  %v11960_v24 = vld [vmem:[#allocation10 + $0x60] sm:$0xff]  }
 0xca9   :  { %v4368_v41 = vpop.xlane.xlu1 %4367 }
 0xcaa   :  { %12360 = vrsqrt.f32 %v4399_v47  ;;  %v4400_v12 = vadd.f32 1e-12, %v4384_v53  ;;  %v4385_v13 = vmul.f32 0.0078125, %v4368_v41  ;;  %v11961_v47 = vld [vmem:[#allocation10 + $0x20] sm:$0xff]   ;;  %v11962_v53 = vld [vmem:[#allocation10 + $0x68] sm:$0xff]  }
 0xcab   :  { %v4370_v5 = vpop.xlane.xlu0 %4369  ;;  %v11963_v41 = vld [vmem:[#allocation10 + $0x28] sm:$0xff]  }
 0xcac   :  { %12362 = vrsqrt.f32 %v4400_v12  ;;  %v4401_v56 = vadd.f32 1e-12, %v4385_v13  ;;  %v4386_v50 = vmul.f32 0.0078125, %v4370_v5  ;;  %4678 = vmatmul.mubr.bf16.gmra.mrb[132].mxu0 %v4484_v10  ;;  %v11964_v12 = vld [vmem:[#allocation10 + $0x70] sm:$0xff]   ;;  %v11966_v10 = vld [vmem:[#allocation10 + $0x78] sm:$0xff]  }
 0xcad   :  { %4687 = vmatprep.mubr.bf16.mxu0 %v18258_v8  ;;  %v11965_v13 = vld [vmem:[#allocation10 + $0x30] sm:$0xff]   ;;  %v11967_v5 = vld [vmem:[#allocation10 + $0x38] sm:$0xff]  }
 0xcae   :  { %12364 = vrsqrt.f32 %v4401_v56  ;;  %v4402_v6 = vadd.f32 1e-12, %v4386_v50  ;;  %v4503_v56 = vld [vmem:[%s17928_s13] sm:$0x3]  ;;  %v18259_v50 = vld [vmem:[#allocation17_spill] sm:$0xff] }
 0xcb0   :  { %12366 = vrsqrt.f32 %v4402_v6  ;;  %v15390_v6 = vrot.slane %v4503_v56, %v18259_v50 }
 0xcb4   :  { %v12361_v42 = vpop.eup %12360 }
 0xcb5   :  { %v4431_v59 = vmul.f32 %v12361_v42, %v15253_v39  ;;  %v18260_v42 = vld [vmem:[#allocation18_spill] sm:$0xff] }
 0xcb6   :  { %v12363_v11 = vpop.eup %12362 }
 0xcb7   :  { %v4432_v7 = vmul.f32 %v12363_v11, %v15256_v61  ;;  %v4453_v40 = vmul.f32 %v15275_v43, %v4431_v59  ;;  %v15393_v59 = vrot.slane %v4503_v56, %v18260_v42 }
 0xcb8   :  { %v12365_v0 = vpop.eup %12364 }
 0xcb9   :  { %v4454_v30 = vmul.f32 %v15275_v43, %v4432_v7  ;;  %v15365_v62 = vadd.f32 %v15283_v35, %v4453_v40  ;;  %v4433_v60 = vmul.f32 %v12365_v0, %v15261_v15 }
 0xcba   :  { %v12367_v26 = vpop.eup %12366 }
 0xcbb   :  { %v15368_v37 = vadd.f32 %v15283_v35, %v4454_v30  ;;  %v4434_v54 = vmul.f32 %v12367_v26, %v15266_v19  ;;  %v4455_v29 = vmul.f32 %v15275_v43, %v4433_v60  ;;  %v11952_v19 = vld [vmem:[#allocation10 + $0x40] sm:$0xff]  }
 0xcbc   :  { %10566 = vmatprep.subr.bf16.mxu1 %v11952_v19 }
 0xcbd   :  { %v4485_v39 = vpack.c.bf16 %v15368_v37, %v15365_v62  ;;  %v4456_v61 = vmul.f32 %v15275_v43, %v4434_v54  ;;  %v15381_v17 = vadd.f32 %v15283_v35, %v4455_v29  ;;  %10567 = vmatpush3.bf16.msra.mxu1 %v11953_v18  ;;  %v11955_v43 = vld [vmem:[#allocation10 + $0x8] sm:$0xff]  }
 0xcbe   :  { %10568 = vmatprep.subr.bf16.mxu1 %v11954_v21 }
 0xcbf   :  { %4688 = vmatmul.mubr.bf16.gmra.mrb[136].mxu0 %v4485_v39  ;;  %v15378_v2 = vadd.f32 %v15283_v35, %v4456_v61  ;;  %v11958_v35 = vld [vmem:[#allocation10 + $0x58] sm:$0xff]  }
 0xcc0   :  { %4697 = vmatprep.mubr.bf16.mxu0 %v18258_v8 }
 0xcc1   :  { %v4486_v15 = vpack.c.bf16 %v15378_v2, %v15381_v17  ;;  %10569 = vmatpush3.bf16.msra.mxu1 %v11955_v43 }
 0xcc2   :  { %10570 = vmatprep.subr.bf16.mxu1 %v11956_v58 }
 0xcc5   :  { %10571 = vmatpush3.bf16.msra.mxu1 %v11957_v3 }
 0xcc6   :  { %10572 = vmatprep.subr.bf16.mxu1 %v11958_v35 }
 0xcc7   :  { %4698 = vmatmul.mubr.bf16.gmra.mrb[140].mxu0 %v4486_v15 }
 0xcc8   :  { %5701 = vmatprep.mubr.bf16.mxu0 %v18258_v8 }
 0xcc9   :  { %10573 = vmatpush3.bf16.msra.mxu1 %v11959_v16 }
 0xcca   :  { %10574 = vmatprep.subr.bf16.mxu1 %v11960_v24 }
 0xccd   :  { %10575 = vmatpush3.bf16.msra.mxu1 %v11961_v47 }
 0xcce   :  { %10576 = vmatprep.subr.bf16.mxu1 %v11962_v53 }
 0xcd1   :  { %10577 = vmatpush3.bf16.msra.mxu1 %v11963_v41 }
 0xcd2   :  { %10578 = vmatprep.subr.bf16.mxu1 %v11964_v12 }
 0xcd5   :  { %10579 = vmatpush3.bf16.msra.mxu1 %v11965_v13 }
 0xcd6   :  { %10580 = vmatprep.subr.bf16.mxu1 %v11966_v10 }
 0xcd9   :  { %10581 = vmatpush3.bf16.msra.mxu1 %v11967_v5 }
 0xd4e   :  { %v4629_v11 = vpop.f32.mrb[112].mxu0 }
 0xd4f   :  { %v15396_v7 = vadd.f32 %v4629_v11, %v15390_v6  ;;  %v4631_v40 = vpop.f32.mrb[113].mxu0 }
 0xd50   :  { %v15399_v0 = vadd.f32 %v4631_v40, %v15393_v59  ;;  %v4633_v30 = vpop.f32.mrb[114].mxu0 }
 0xd51   :  { %v4708_v26 = vmul.f32 %v15396_v7, %v15396_v7  ;;  %v15404_v60 = vadd.f32 %v4633_v30, %v15390_v6  ;;  %v4635_v54 = vpop.f32.mrb[115].mxu0 }
 0xd52   :  { %v4709_v39 = vmul.f32 %v15399_v0, %v15399_v0  ;;  %v15409_v61 = vadd.f32 %v4635_v54, %v15393_v59 }
 0xd53   :  { %v4740_v29 = vmul.f32 %v4708_v26, %v15396_v7  ;;  %v4710_v15 = vmul.f32 %v15404_v60, %v15404_v60 }
 0xd54   :  { %v4741_v19 = vmul.f32 %v4709_v39, %v15399_v0  ;;  %v4711_v18 = vmul.f32 %v15409_v61, %v15409_v61 }
 0xd55   :  { %v4772_v21 = vmul.f32 0.044715, %v4740_v29  ;;  %v4742_v43 = vmul.f32 %v4710_v15, %v15404_v60 }
 0xd56   :  { %v4773_v58 = vmul.f32 0.044715, %v4741_v19  ;;  %v4743_v3 = vmul.f32 %v4711_v18, %v15409_v61  ;;  %v4639_v35 = vpop.f32.mrb[116].mxu0 }
 0xd57   :  { %v4804_v16 = vadd.f32 %v4772_v21, %v15396_v7  ;;  %v4774_v24 = vmul.f32 0.044715, %v4742_v43  ;;  %v15421_v47 = vadd.f32 %v4639_v35, %v15390_v6  ;;  %v4641_v53 = vpop.f32.mrb[117].mxu0 }
 0xd58   :  { %v4805_v41 = vadd.f32 %v4773_v58, %v15399_v0  ;;  %v4775_v12 = vmul.f32 0.044715, %v4743_v3  ;;  %v15425_v13 = vadd.f32 %v4641_v53, %v15393_v59  ;;  %v4643_v10 = vpop.f32.mrb[118].mxu0 }
 0xd59   :  { %v4836_v5 = vmul.f32 0.7978846, %v4804_v16  ;;  %v4806_v56 = vadd.f32 %v4774_v24, %v15404_v60  ;;  %v4712_v11 = vmul.f32 %v15421_v47, %v15421_v47  ;;  %v15431_v40 = vadd.f32 %v4643_v10, %v15390_v6  ;;  %v4645_v30 = vpop.f32.mrb[119].mxu0 }
 0xd5a   :  { %v4837_v26 = vmul.f32 0.7978846, %v4805_v41  ;;  %v4807_v54 = vadd.f32 %v4775_v12, %v15409_v61  ;;  %v4713_v39 = vmul.f32 %v15425_v13, %v15425_v13  ;;  %v15437_v29 = vadd.f32 %v4645_v30, %v15393_v59 }
 0xd5b   :  { %12368 = vtanh.f32 %v4836_v5  ;;  %v4838_v15 = vmul.f32 0.7978846, %v4806_v56  ;;  %v4744_v19 = vmul.f32 %v4712_v11, %v15421_v47  ;;  %v4714_v18 = vmul.f32 %v15431_v40, %v15431_v40 }
 0xd5c   :  { %12370 = vtanh.f32 %v4837_v26  ;;  %v4839_v21 = vmul.f32 0.7978846, %v4807_v54  ;;  %v4745_v43 = vmul.f32 %v4713_v39, %v15425_v13  ;;  %v4715_v58 = vmul.f32 %v15437_v29, %v15437_v29 }
 0xd5d   :  { %12372 = vtanh.f32 %v4838_v15  ;;  %v4776_v3 = vmul.f32 0.044715, %v4744_v19  ;;  %v4746_v35 = vmul.f32 %v4714_v18, %v15431_v40 }
 0xd5e   :  { %v4777_v16 = vmul.f32 0.044715, %v4745_v43  ;;  %v4747_v24 = vmul.f32 %v4715_v58, %v15437_v29  ;;  %v4649_v53 = vpop.f32.mrb[120].mxu0  ;;  %12374 = vtanh.f32 %v4839_v21 }
 0xd5f   :  { %v4808_v41 = vadd.f32 %v4776_v3, %v15421_v47  ;;  %v4778_v12 = vmul.f32 0.044715, %v4746_v35  ;;  %v15449_v10 = vadd.f32 %v4649_v53, %v15390_v6  ;;  %v4651_v5 = vpop.f32.mrb[121].mxu0 }
 0xd60   :  { %v4809_v56 = vadd.f32 %v4777_v16, %v15425_v13  ;;  %v4779_v11 = vmul.f32 0.044715, %v4747_v24  ;;  %v15453_v30 = vadd.f32 %v4651_v5, %v15393_v59  ;;  %v4653_v26 = vpop.f32.mrb[122].mxu0 }
 0xd61   :  { %v4840_v54 = vmul.f32 0.7978846, %v4808_v41  ;;  %v4810_v39 = vadd.f32 %v4778_v12, %v15431_v40  ;;  %v4716_v15 = vmul.f32 %v15449_v10, %v15449_v10  ;;  %v15459_v19 = vadd.f32 %v4653_v26, %v15390_v6  ;;  %v4655_v18 = vpop.f32.mrb[123].mxu0 }
 0xd62   :  { %v4841_v43 = vmul.f32 0.7978846, %v4809_v56  ;;  %v4811_v21 = vadd.f32 %v4779_v11, %v15437_v29  ;;  %v4717_v58 = vmul.f32 %v15453_v30, %v15453_v30  ;;  %v15465_v3 = vadd.f32 %v4655_v18, %v15393_v59 }
 0xd63   :  { %12376 = vtanh.f32 %v4840_v54  ;;  %v4842_v35 = vmul.f32 0.7978846, %v4810_v39  ;;  %v4748_v16 = vmul.f32 %v4716_v15, %v15449_v10  ;;  %v4718_v24 = vmul.f32 %v15459_v19, %v15459_v19 }
 0xd64   :  { %12378 = vtanh.f32 %v4841_v43  ;;  %v4843_v53 = vmul.f32 0.7978846, %v4811_v21  ;;  %v4749_v41 = vmul.f32 %v4717_v58, %v15453_v30  ;;  %v4719_v12 = vmul.f32 %v15465_v3, %v15465_v3 }
 0xd65   :  { %v12369_v5 = vpop.eup %12368  ;;  %12380 = vtanh.f32 %v4842_v35  ;;  %v4780_v56 = vmul.f32 0.044715, %v4748_v16  ;;  %v4750_v11 = vmul.f32 %v4718_v24, %v15459_v19 }
 0xd66   :  { %v12371_v26 = vpop.eup %12370  ;;  %v4900_v54 = vadd.f32 1.0, %v12369_v5  ;;  %12382 = vtanh.f32 %v4843_v53  ;;  %v4781_v39 = vmul.f32 0.044715, %v4749_v41  ;;  %v4751_v15 = vmul.f32 %v4719_v12, %v15465_v3  ;;  %v4659_v18 = vpop.f32.mrb[124].mxu0 }
 0xd67   :  { %v12373_v45 = vpop.eup %12372  ;;  %v4812_v43 = vadd.f32 %v4780_v56, %v15449_v10  ;;  %v4782_v21 = vmul.f32 0.044715, %v4750_v11  ;;  %v15477_v58 = vadd.f32 %v4659_v18, %v15390_v6  ;;  %v4661_v63 = vpop.f32.mrb[125].mxu0  ;;  %v4901_v28 = vadd.f32 1.0, %v12371_v26 }
 0xd68   :  { %v4932_v35 = vmul.f32 0.5, %v4900_v54  ;;  %v4902_v16 = vadd.f32 1.0, %v12373_v45  ;;  %v4813_v24 = vadd.f32 %v4781_v39, %v15453_v30  ;;  %v4783_v55 = vmul.f32 0.044715, %v4751_v15  ;;  %v4663_v5 = vpop.f32.mrb[126].mxu0  ;;  %v12375_v18 = vpop.eup %12374 }
 0xd69   :  { %v4844_v53 = vmul.f32 0.7978846, %v4812_v43  ;;  %v4814_v41 = vadd.f32 %v4782_v21, %v15459_v19  ;;  %v4720_v12 = vmul.f32 %v15477_v58, %v15477_v58  ;;  %v15484_v56 = vadd.f32 %v4661_v63, %v15393_v59  ;;  %v4665_v11 = vpop.f32.mrb[127].mxu0 }
 0xd6a   :  { %v4964_v27 = vmul.f32 %v4932_v35, %v15396_v7  ;;  %v4934_v26 = vmul.f32 0.5, %v4902_v16  ;;  %v4845_v54 = vmul.f32 0.7978846, %v4813_v24  ;;  %v4815_v45 = vadd.f32 %v4783_v55, %v15465_v3 }
 0xd6b   :  { %12384 = vtanh.f32 %v4844_v53  ;;  %v4846_v39 = vmul.f32 0.7978846, %v4814_v41  ;;  %v4752_v15 = vmul.f32 %v4720_v12, %v15477_v58  ;;  %v4721_v43 = vmul.f32 %v15484_v56, %v15484_v56 }
 0xd6c   :  { %v4966_v21 = vmul.f32 %v4934_v26, %v15404_v60  ;;  %12386 = vtanh.f32 %v4845_v54  ;;  %v4847_v63 = vmul.f32 0.7978846, %v4815_v45  ;;  %v15493_v23 = vadd.f32 %v4663_v5, %v15390_v6 }
 0xd6d   :  { %v12377_v33 = vpop.eup %12376  ;;  %12388 = vtanh.f32 %v4846_v39  ;;  %v4784_v7 = vmul.f32 0.044715, %v4752_v15  ;;  %v4753_v35 = vmul.f32 %v4721_v43, %v15484_v56  ;;  %v15497_v55 = vadd.f32 %v4665_v11, %v15393_v59 }
 0xd6e   :  { %v12379_v16 = vpop.eup %12378  ;;  %v4996_v24 = vpack.c.bf16 %v4966_v21, %v4964_v27  ;;  %12390 = vtanh.f32 %v4847_v63  ;;  %v4722_v53 = vmul.f32 %v15493_v23, %v15493_v23  ;;  %v4903_v60 = vadd.f32 1.0, %v12375_v18 }
 0xd6f   :  { %v12381_v41 = vpop.eup %12380  ;;  %v4816_v12 = vadd.f32 %v4784_v7, %v15477_v58  ;;  %v4785_v5 = vmul.f32 0.044715, %v4753_v35  ;;  %v4723_v26 = vmul.f32 %v15497_v55, %v15497_v55  ;;  %v4933_v54 = vmul.f32 0.5, %v4901_v28 }
 0xd70   :  { %v12383_v45 = vpop.eup %12382  ;;  %v4754_v39 = vmul.f32 %v4722_v53, %v15493_v23  ;;  %v4935_v11 = vmul.f32 0.5, %v4903_v60  ;;  %v4905_v15 = vadd.f32 1.0, %v12379_v16  ;;  %v4904_v43 = vadd.f32 1.0, %v12377_v33 }
 0xd71   :  { %v4848_v27 = vmul.f32 0.7978846, %v4816_v12  ;;  %v4817_v21 = vadd.f32 %v4785_v5, %v15484_v56  ;;  %v4755_v63 = vmul.f32 %v4723_v26, %v15497_v55  ;;  %v4965_v18 = vmul.f32 %v4933_v54, %v15399_v0 }
 0xd72   :  { %v4786_v31 = vmul.f32 0.044715, %v4754_v39  ;;  %v4967_v7 = vmul.f32 %v4935_v11, %v15409_v61  ;;  %v4907_v35 = vadd.f32 1.0, %v12383_v45  ;;  %v4937_v32 = vmul.f32 0.5, %v4905_v15 }
 0xd73   :  { %12392 = vtanh.f32 %v4848_v27  ;;  %v4849_v28 = vmul.f32 0.7978846, %v4817_v21  ;;  %v4787_v14 = vmul.f32 0.044715, %v4755_v63  ;;  %v4906_v34 = vadd.f32 1.0, %v12381_v41 }
 0xd74   :  { %v4818_v53 = vadd.f32 %v4786_v31, %v15493_v23  ;;  %v4997_v16 = vpack.c.bf16 %v4967_v7, %v4965_v18  ;;  %v4939_v33 = vmul.f32 0.5, %v4907_v35  ;;  %v4936_v5 = vmul.f32 0.5, %v4904_v43 }
 0xd75   :  { %v12385_v60 = vpop.eup %12384  ;;  %12394 = vtanh.f32 %v4849_v28  ;;  %v4819_v12 = vadd.f32 %v4787_v14, %v15497_v55  ;;  %v4938_v26 = vmul.f32 0.5, %v4906_v34  ;;  %v4969_v61 = vmul.f32 %v4937_v32, %v15425_v13 }
 0xd76   :  { %v12387_v0 = vpop.eup %12386  ;;  %v4850_v54 = vmul.f32 0.7978846, %v4818_v53  ;;  %5179 = vmatprep.mubr.bf16.mxu1 %v4997_v16  ;;  %v4971_v45 = vmul.f32 %v4939_v33, %v15437_v29  ;;  %v4908_v39 = vadd.f32 1.0, %v12385_v60  ;;  %v4968_v15 = vmul.f32 %v4936_v5, %v15421_v47 }
 0xd77   :  { %v12389_v11 = vpop.eup %12388  ;;  %v4851_v41 = vmul.f32 0.7978846, %v4819_v12  ;;  %5180 = vmatmul.mubr.bf16.vlgmr.msra.gmra.mrb[112].mxu1 %v4996_v24  ;;  %v4669_v31 = vpop.f32.mrb[128].mxu0  ;;  %v4970_v27 = vmul.f32 %v4938_v26, %v15431_v40  ;;  %v4909_v21 = vadd.f32 1.0, %v12387_v0 }
 0xd78   :  { %v12391_v14 = vpop.eup %12390  ;;  %12396 = vtanh.f32 %v4850_v54  ;;  %v15516_v34 = vadd.f32 %v4669_v31, %v15390_v6  ;;  %v4671_v43 = vpop.f32.mrb[129].mxu0  ;;  %v4999_v63 = vpack.c.bf16 %v4971_v45, %v4969_v61  ;;  %v4910_v32 = vadd.f32 1.0, %v12389_v11 }
 0xd79   :  { %12398 = vtanh.f32 %v4851_v41  ;;  %v15519_v13 = vadd.f32 %v4671_v43, %v15393_v59  ;;  %v4673_v29 = vpop.f32.mrb[130].mxu0  ;;  %v4998_v24 = vpack.c.bf16 %v4970_v27, %v4968_v15  ;;  %v4911_v18 = vadd.f32 1.0, %v12391_v14 }
 0xd7a   :  { %v4724_v47 = vmul.f32 %v15516_v34, %v15516_v34  ;;  %v15524_v40 = vadd.f32 %v4673_v29, %v15390_v6  ;;  %5187 = vmatprep.mubr.bf16.mxu1 %v4999_v63  ;;  %v4675_v7 = vpop.f32.mrb[131].mxu0  ;;  %v4941_v35 = vmul.f32 0.5, %v4909_v21  ;;  %v4940_v28 = vmul.f32 0.5, %v4908_v39 }
 0xd7b   :  { %v4725_v53 = vmul.f32 %v15519_v13, %v15519_v13  ;;  %v15529_v16 = vadd.f32 %v4675_v7, %v15393_v59  ;;  %v4943_v33 = vmul.f32 0.5, %v4911_v18  ;;  %v4942_v60 = vmul.f32 0.5, %v4910_v32 }
 0xd7c   :  { %v4756_v12 = vmul.f32 %v4724_v47, %v15516_v34  ;;  %v4726_v5 = vmul.f32 %v15524_v40, %v15524_v40  ;;  %v4973_v26 = vmul.f32 %v4941_v35, %v15453_v30  ;;  %v4972_v0 = vmul.f32 %v4940_v28, %v15449_v10 }
 0xd7d   :  { %v12393_v54 = vpop.eup %12392  ;;  %v4757_v61 = vmul.f32 %v4725_v53, %v15519_v13  ;;  %v4727_v45 = vmul.f32 %v15529_v16, %v15529_v16  ;;  %v4975_v39 = vmul.f32 %v4943_v33, %v15465_v3  ;;  %v4974_v11 = vmul.f32 %v4942_v60, %v15459_v19 }
 0xd7e   :  { %v4788_v41 = vmul.f32 0.044715, %v4756_v12  ;;  %v4758_v31 = vmul.f32 %v4726_v5, %v15524_v40  ;;  %v4912_v15 = vadd.f32 1.0, %v12393_v54 }
 0xd7f   :  { %v12395_v27 = vpop.eup %12394  ;;  %v4789_v21 = vmul.f32 0.044715, %v4757_v61  ;;  %v4759_v30 = vmul.f32 %v4727_v45, %v15529_v16  ;;  %5188 = vmatmul.mubr.bf16.gmra.mrb[116].mxu1 %v4998_v24  ;;  %v4679_v10 = vpop.f32.mrb[132].mxu0  ;;  %v5001_v14 = vpack.c.bf16 %v4975_v39, %v4973_v26  ;;  %v5000_v43 = vpack.c.bf16 %v4974_v11, %v4972_v0 }
 0xd80   :  { %v4820_v63 = vadd.f32 %v4788_v41, %v15516_v34  ;;  %v4790_v32 = vmul.f32 0.044715, %v4758_v31  ;;  %v15545_v29 = vadd.f32 %v4679_v10, %v15390_v6  ;;  %v4681_v3 = vpop.f32.mrb[133].mxu0  ;;  %v4913_v19 = vadd.f32 1.0, %v12395_v27 }
 0xd81   :  { %v4821_v18 = vadd.f32 %v4789_v21, %v15519_v13  ;;  %v4791_v47 = vmul.f32 0.044715, %v4759_v30  ;;  %v15549_v7 = vadd.f32 %v4681_v3, %v15393_v59  ;;  %v4683_v35 = vpop.f32.mrb[134].mxu0  ;;  %5195 = vmatprep.mubr.bf16.mxu1 %v5001_v14  ;;  %v4944_v24 = vmul.f32 0.5, %v4912_v15 }
 0xd82   :  { %v12397_v28 = vpop.eup %12396  ;;  %v4852_v53 = vmul.f32 0.7978846, %v4820_v63  ;;  %v4822_v33 = vadd.f32 %v4790_v32, %v15524_v40  ;;  %v4728_v60 = vmul.f32 %v15545_v29, %v15545_v29  ;;  %v15555_v12 = vadd.f32 %v4683_v35, %v15390_v6  ;;  %v4685_v5 = vpop.f32.mrb[135].mxu0 }
 0xd83   :  { %v12399_v26 = vpop.eup %12398  ;;  %v4853_v0 = vmul.f32 0.7978846, %v4821_v18  ;;  %v4823_v54 = vadd.f32 %v4791_v47, %v15529_v16  ;;  %v4729_v61 = vmul.f32 %v15549_v7, %v15549_v7  ;;  %v15561_v45 = vadd.f32 %v4685_v5, %v15393_v59 }
 0xd84   :  { %12400 = vtanh.f32 %v4852_v53  ;;  %v4854_v39 = vmul.f32 0.7978846, %v4822_v33  ;;  %v4760_v11 = vmul.f32 %v4728_v60, %v15545_v29  ;;  %v4730_v41 = vmul.f32 %v15555_v12, %v15555_v12 }
 0xd85   :  { %12402 = vtanh.f32 %v4853_v0  ;;  %v4855_v31 = vmul.f32 0.7978846, %v4823_v54  ;;  %v4761_v15 = vmul.f32 %v4729_v61, %v15549_v7  ;;  %v4731_v27 = vmul.f32 %v15561_v45, %v15561_v45 }
 0xd86   :  { %12404 = vtanh.f32 %v4854_v39  ;;  %v4792_v21 = vmul.f32 0.044715, %v4760_v11  ;;  %v4762_v30 = vmul.f32 %v4730_v41, %v15555_v12  ;;  %v4915_v10 = vadd.f32 1.0, %v12399_v26 }
 0xd87   :  { %12406 = vtanh.f32 %v4855_v31  ;;  %v4793_v14 = vmul.f32 0.044715, %v4761_v15  ;;  %v4763_v63 = vmul.f32 %v4731_v27, %v15561_v45  ;;  %5196 = vmatmul.mubr.bf16.gmra.mrb[120].mxu1 %v5000_v43  ;;  %v4945_v32 = vmul.f32 0.5, %v4913_v19 }
 0xd88   :  { %v4824_v3 = vadd.f32 %v4792_v21, %v15545_v29  ;;  %v4794_v18 = vmul.f32 0.044715, %v4762_v30  ;;  %v4947_v47 = vmul.f32 0.5, %v4915_v10  ;;  %v4914_v35 = vadd.f32 1.0, %v12397_v28 }
 0xd89   :  { %v4825_v53 = vadd.f32 %v4793_v14, %v15549_v7  ;;  %v4795_v33 = vmul.f32 0.044715, %v4763_v63  ;;  %v4977_v60 = vmul.f32 %v4945_v32, %v15484_v56  ;;  %v4976_v19 = vmul.f32 %v4944_v24, %v15477_v58 }
 0xd8a   :  { %v4856_v5 = vmul.f32 0.7978846, %v4824_v3  ;;  %v4826_v0 = vadd.f32 %v4794_v18, %v15555_v12  ;;  %v4979_v26 = vmul.f32 %v4947_v47, %v15497_v55  ;;  %v4946_v54 = vmul.f32 0.5, %v4914_v35 }
 0xd8b   :  { %v4857_v61 = vmul.f32 0.7978846, %v4825_v53  ;;  %v4827_v43 = vadd.f32 %v4795_v33, %v15561_v45 }
 0xd8c   :  { %12408 = vtanh.f32 %v4856_v5  ;;  %v4858_v39 = vmul.f32 0.7978846, %v4826_v0  ;;  %v5003_v11 = vpack.c.bf16 %v4979_v26, %v4977_v60  ;;  %v4978_v28 = vmul.f32 %v4946_v54, %v15493_v23 }
 0xd8d   :  { %12410 = vtanh.f32 %v4857_v61  ;;  %v4859_v41 = vmul.f32 0.7978846, %v4827_v43 }
 0xd8e   :  { %v12401_v31 = vpop.eup %12400  ;;  %12412 = vtanh.f32 %v4858_v39  ;;  %5203 = vmatprep.mubr.bf16.mxu1 %v5003_v11  ;;  %v5002_v56 = vpack.c.bf16 %v4978_v28, %v4976_v19 }
 0xd8f   :  { %v12403_v15 = vpop.eup %12402  ;;  %12414 = vtanh.f32 %v4859_v41  ;;  %v4916_v55 = vadd.f32 1.0, %v12401_v31 }
 0xd90   :  { %v12405_v27 = vpop.eup %12404  ;;  %5204 = vmatmul.mubr.bf16.gmra.mrb[124].mxu1 %v5002_v56  ;;  %v4917_v21 = vadd.f32 1.0, %v12403_v15 }
 0xd91   :  { %v12407_v30 = vpop.eup %12406  ;;  %v4918_v10 = vadd.f32 1.0, %v12405_v27  ;;  %v4948_v58 = vmul.f32 0.5, %v4916_v55 }
 0xd92   :  { %v4689_v24 = vpop.f32.mrb[136].mxu0  ;;  %v4919_v14 = vadd.f32 1.0, %v12407_v30  ;;  %v4949_v63 = vmul.f32 0.5, %v4917_v21 }
 0xd93   :  { %v15580_v23 = vadd.f32 %v4689_v24, %v15390_v6  ;;  %v4691_v32 = vpop.f32.mrb[137].mxu0  ;;  %v4950_v3 = vmul.f32 0.5, %v4918_v10  ;;  %v4980_v5 = vmul.f32 %v4948_v58, %v15516_v34 }
 0xd94   :  { %v15583_v18 = vadd.f32 %v4691_v32, %v15393_v59  ;;  %v4693_v47 = vpop.f32.mrb[138].mxu0  ;;  %v4951_v35 = vmul.f32 0.5, %v4919_v14  ;;  %v4981_v43 = vmul.f32 %v4949_v63, %v15519_v13 }
 0xd95   :  { %v4732_v53 = vmul.f32 %v15580_v23, %v15580_v23  ;;  %v15588_v33 = vadd.f32 %v4693_v47, %v15390_v6  ;;  %v4695_v60 = vpop.f32.mrb[139].mxu0  ;;  %v4982_v0 = vmul.f32 %v4950_v3, %v15524_v40 }
 0xd96   :  { %v12409_v26 = vpop.eup %12408  ;;  %v4733_v54 = vmul.f32 %v15583_v18, %v15583_v18  ;;  %v15595_v61 = vadd.f32 %v4695_v60, %v15393_v59  ;;  %v4983_v19 = vmul.f32 %v4951_v35, %v15529_v16 }
 0xd97   :  { %v12411_v39 = vpop.eup %12410  ;;  %v4764_v11 = vmul.f32 %v4732_v53, %v15580_v23  ;;  %v4734_v28 = vmul.f32 %v15588_v33, %v15588_v33  ;;  %v5004_v34 = vpack.c.bf16 %v4982_v0, %v4980_v5  ;;  %v4920_v41 = vadd.f32 1.0, %v12409_v26 }
 0xd98   :  { %v12413_v40 = vpop.eup %12412  ;;  %v4765_v31 = vmul.f32 %v4733_v54, %v15583_v18  ;;  %v4735_v56 = vmul.f32 %v15595_v61, %v15595_v61  ;;  %v5005_v15 = vpack.c.bf16 %v4983_v19, %v4981_v43  ;;  %v4921_v55 = vadd.f32 1.0, %v12411_v39 }
 0xd99   :  { %v12415_v27 = vpop.eup %12414  ;;  %v4796_v13 = vmul.f32 0.044715, %v4764_v11  ;;  %v4766_v16 = vmul.f32 %v4734_v28, %v15588_v33  ;;  %v4922_v21 = vadd.f32 1.0, %v12413_v40  ;;  %v4952_v30 = vmul.f32 0.5, %v4920_v41 }
 0xd9a   :  { %v4797_v10 = vmul.f32 0.044715, %v4765_v31  ;;  %v4767_v58 = vmul.f32 %v4735_v56, %v15595_v61  ;;  %v4699_v24 = vpop.f32.mrb[140].mxu0  ;;  %5211 = vmatprep.mubr.bf16.mxu1 %v5005_v15  ;;  %v4923_v14 = vadd.f32 1.0, %v12415_v27  ;;  %v4953_v63 = vmul.f32 0.5, %v4921_v55 }
 0xd9b   :  { %v4828_v32 = vadd.f32 %v4796_v13, %v15580_v23  ;;  %v4798_v3 = vmul.f32 0.044715, %v4766_v16  ;;  %v15609_v47 = vadd.f32 %v4699_v24, %v15390_v6  ;;  %v4701_v35 = vpop.f32.mrb[141].mxu0  ;;  %5212 = vmatmul.mubr.bf16.gmra.mrb[128].mxu1 %v5004_v34  ;;  %v4954_v53 = vmul.f32 0.5, %v4922_v21 }
 0xd9c   :  { %v4829_v60 = vadd.f32 %v4797_v10, %v15583_v18  ;;  %v4799_v5 = vmul.f32 0.044715, %v4767_v58  ;;  %v15613_v0 = vadd.f32 %v4701_v35, %v15393_v59  ;;  %v4703_v26 = vpop.f32.mrb[142].mxu0  ;;  %v4955_v54 = vmul.f32 0.5, %v4923_v14 }
 0xd9d   :  { %v4860_v43 = vmul.f32 0.7978846, %v4828_v32  ;;  %v4830_v19 = vadd.f32 %v4798_v3, %v15588_v33  ;;  %v4736_v39 = vmul.f32 %v15609_v47, %v15609_v47  ;;  %v15619_v11 = vadd.f32 %v4703_v26, %v15390_v6  ;;  %v4705_v28 = vpop.f32.mrb[143].mxu0 }
 0xd9e   :  { %v4861_v34 = vmul.f32 0.7978846, %v4829_v60  ;;  %v4831_v41 = vadd.f32 %v4799_v5, %v15595_v61  ;;  %v4737_v40 = vmul.f32 %v15613_v0, %v15613_v0  ;;  %v15625_v31 = vadd.f32 %v4705_v28, %v15393_v59 }
 0xd9f   :  { %12416 = vtanh.f32 %v4860_v43  ;;  %v4862_v56 = vmul.f32 0.7978846, %v4830_v19  ;;  %v4768_v15 = vmul.f32 %v4736_v39, %v15609_v47  ;;  %v4738_v55 = vmul.f32 %v15619_v11, %v15619_v11 }
 0xda0   :  { %12418 = vtanh.f32 %v4861_v34  ;;  %v4863_v6 = vmul.f32 0.7978846, %v4831_v41  ;;  %v4769_v27 = vmul.f32 %v4737_v40, %v15613_v0  ;;  %v4739_v13 = vmul.f32 %v15625_v31, %v15625_v31 }
 0xda1   :  { %12420 = vtanh.f32 %v4862_v56  ;;  %v4800_v16 = vmul.f32 0.044715, %v4768_v15  ;;  %v4770_v21 = vmul.f32 %v4738_v55, %v15619_v11  ;;  %v4985_v59 = vmul.f32 %v4953_v63, %v15549_v7 }
 0xda2   :  { %12422 = vtanh.f32 %v4863_v6  ;;  %v4801_v10 = vmul.f32 0.044715, %v4769_v27  ;;  %v4771_v58 = vmul.f32 %v4739_v13, %v15625_v31  ;;  %v4987_v24 = vmul.f32 %v4955_v54, %v15561_v45 }
 0xda3   :  { %v4832_v14 = vadd.f32 %v4800_v16, %v15609_v47  ;;  %v4802_v32 = vmul.f32 0.044715, %v4770_v21  ;;  %v4984_v3 = vmul.f32 %v4952_v30, %v15545_v29  ;;  %v4986_v35 = vmul.f32 %v4954_v53, %v15555_v12 }
 0xda4   :  { %v4833_v60 = vadd.f32 %v4801_v10, %v15613_v0  ;;  %v4803_v5 = vmul.f32 0.044715, %v4771_v58  ;;  %v5007_v26 = vpack.c.bf16 %v4987_v24, %v4985_v59 }
 0xda5   :  { %v4864_v43 = vmul.f32 0.7978846, %v4832_v14  ;;  %v4834_v7 = vadd.f32 %v4802_v32, %v15619_v11  ;;  %v5006_v63 = vpack.c.bf16 %v4986_v35, %v4984_v3 }
 0xda6   :  { %v4865_v19 = vmul.f32 0.7978846, %v4833_v60  ;;  %v4835_v39 = vadd.f32 %v4803_v5, %v15625_v31  ;;  %5219 = vmatprep.mubr.bf16.mxu1 %v5007_v26 }
 0xda7   :  { %12424 = vtanh.f32 %v4864_v43  ;;  %v4866_v45 = vmul.f32 0.7978846, %v4834_v7  ;;  %5220 = vmatmul.mubr.bf16.gmra.mrb[132].mxu1 %v5006_v63 }
 0xda8   :  { %12426 = vtanh.f32 %v4865_v19  ;;  %v4867_v54 = vmul.f32 0.7978846, %v4835_v39 }
 0xda9   :  { %v12417_v29 = vpop.eup %12416  ;;  %12428 = vtanh.f32 %v4866_v45 }
 0xdaa   :  { %v12419_v12 = vpop.eup %12418  ;;  %12430 = vtanh.f32 %v4867_v54  ;;  %v4924_v30 = vadd.f32 1.0, %v12417_v29  ;;  %v15654_v54 = vld [vmem:[%s17930_s15] ss:$0 sm:$0xff] }
 0xdab   :  { %v12421_v53 = vpop.eup %12420  ;;  %v4925_v28 = vadd.f32 1.0, %v12419_v12 }
 0xdac   :  { %v12423_v34 = vpop.eup %12422  ;;  %v4926_v41 = vadd.f32 1.0, %v12421_v53  ;;  %v4956_v40 = vmul.f32 0.5, %v4924_v30 }
 0xdad   :  { %v4927_v56 = vadd.f32 1.0, %v12423_v34  ;;  %v4957_v15 = vmul.f32 0.5, %v4925_v28 }
 0xdae   :  { %v4958_v55 = vmul.f32 0.5, %v4926_v41  ;;  %v4988_v27 = vmul.f32 %v4956_v40, %v15580_v23 }
 0xdaf   :  { %v4959_v6 = vmul.f32 0.5, %v4927_v56  ;;  %v4989_v21 = vmul.f32 %v4957_v15, %v15583_v18 }
 0xdb0   :  { %v4990_v13 = vmul.f32 %v4958_v55, %v15588_v33 }
 0xdb1   :  { %v12425_v16 = vpop.eup %12424  ;;  %v4991_v59 = vmul.f32 %v4959_v6, %v15595_v61 }
 0xdb2   :  { %v12427_v10 = vpop.eup %12426  ;;  %v5008_v58 = vpack.c.bf16 %v4990_v13, %v4988_v27  ;;  %v4928_v24 = vadd.f32 1.0, %v12425_v16 }
 0xdb3   :  { %v12429_v14 = vpop.eup %12428  ;;  %v5009_v32 = vpack.c.bf16 %v4991_v59, %v4989_v21  ;;  %v4929_v3 = vadd.f32 1.0, %v12427_v10 }
 0xdb4   :  { %v12431_v35 = vpop.eup %12430  ;;  %v4930_v60 = vadd.f32 1.0, %v12429_v14  ;;  %v4960_v5 = vmul.f32 0.5, %v4928_v24 }
 0xdb5   :  { %5227 = vmatprep.mubr.bf16.mxu1 %v5009_v32  ;;  %v4931_v26 = vadd.f32 1.0, %v12431_v35  ;;  %v4961_v43 = vmul.f32 0.5, %v4929_v3 }
 0xdb6   :  { %5228 = vmatmul.mubr.bf16.gmra.mrb[136].mxu1 %v5008_v58  ;;  %v4962_v23 = vmul.f32 0.5, %v4930_v60  ;;  %v4992_v7 = vmul.f32 %v4960_v5, %v15609_v47 }
 0xdb7   :  { %v4963_v33 = vmul.f32 0.5, %v4931_v26  ;;  %v4993_v61 = vmul.f32 %v4961_v43, %v15613_v0 }
 0xdb8   :  { %v4994_v18 = vmul.f32 %v4962_v23, %v15619_v11 }
 0xdb9   :  { %v4995_v63 = vmul.f32 %v4963_v33, %v15625_v31 }
 0xdba   :  { %v5010_v19 = vpack.c.bf16 %v4994_v18, %v4992_v7 }
 0xdbb   :  { %v5011_v39 = vpack.c.bf16 %v4995_v63, %v4993_v61 }
 0xdbd   :  { %5235 = vmatprep.mubr.bf16.mxu1 %v5011_v39 }
 0xdbe   :  { %5236 = vmatmul.mubr.bf16.gmra.mrb[140].mxu1 %v5010_v19 }
 0xe4a   :  { %v10582_v45 = vpop.f32.mrb[112].mxu1 }
 0xe4b   :  { %v10583_v29 = vpop.f32.mrb[113].mxu1 }
 0xe4c   :  { %v10584_v12 = vadd.f32 %v10583_v29, %v10582_v45  ;;  %v10585_v30 = vpop.f32.mrb[114].mxu1 }
 0xe4d   :  { %v10586_v47 = vpop.f32.mrb[115].mxu1 }
 0xe4e   :  { %v5182_v11 = vadd.f32 %v10584_v12, %v15654_v54  ;;  %v10587_v53 = vadd.f32 %v10586_v47, %v10585_v30 }
 0xe50   :  { %v5185_v0 = vadd.f32 %v10587_v53, %v15654_v54  ;;  %v15659_v31 = vadd.f32 %v5182_v11, %v15287_v49 }
 0xe52   :  { %5262 = vadd.xlane.f32.xlu1 %v15659_v31  ;;  %v10588_v28 = vpop.f32.mrb[116].mxu1  ;;  %v15663_v34 = vadd.f32 %v5185_v0, %v15290_v20 }
 0xe53   :  { %v10589_v41 = vpop.f32.mrb[117].mxu1 }
 0xe54   :  { %v10590_v40 = vadd.f32 %v10589_v41, %v10588_v28  ;;  %5264 = vadd.xlane.f32.xlu0 %v15663_v34  ;;  %v10591_v56 = vpop.f32.mrb[118].mxu1 }
 0xe55   :  { %v10592_v15 = vpop.f32.mrb[119].mxu1 }
 0xe56   :  { %v5190_v55 = vadd.f32 %v10590_v40, %v15654_v54  ;;  %v10593_v6 = vadd.f32 %v10592_v15, %v10591_v56 }
 0xe58   :  { %v5193_v27 = vadd.f32 %v10593_v6, %v15654_v54  ;;  %v15669_v49 = vadd.f32 %v5190_v55, %v15304_v22 }
 0xe5a   :  { %5266 = vadd.xlane.f32.xlu1 %v15669_v49  ;;  %v10594_v13 = vpop.f32.mrb[120].mxu1  ;;  %v15673_v20 = vadd.f32 %v5193_v27, %v15300_v52 }
 0xe5b   :  { %v10595_v16 = vpop.f32.mrb[121].mxu1 }
 0xe5c   :  { %v10596_v21 = vadd.f32 %v10595_v16, %v10594_v13  ;;  %5268 = vadd.xlane.f32.xlu0 %v15673_v20  ;;  %v10597_v59 = vpop.f32.mrb[122].mxu1 }
 0xe5d   :  { %v10598_v10 = vpop.f32.mrb[123].mxu1 }
 0xe5e   :  { %v5198_v58 = vadd.f32 %v10596_v21, %v15654_v54  ;;  %v10599_v24 = vadd.f32 %v10598_v10, %v10597_v59 }
 0xe60   :  { %v5201_v14 = vadd.f32 %v10599_v24, %v15654_v54  ;;  %v15679_v22 = vadd.f32 %v5198_v58, %v15317_v38 }
 0xe62   :  { %5270 = vadd.xlane.f32.xlu1 %v15679_v22  ;;  %v15683_v32 = vadd.f32 %v5201_v14, %v15313_v25 }
 0xe63   :  { %v10600_v52 = vpop.f32.mrb[124].mxu1 }
 0xe64   :  { %v10601_v3 = vpop.f32.mrb[125].mxu1  ;;  %5272 = vadd.xlane.f32.xlu0 %v15683_v32 }
 0xe65   :  { %v10602_v35 = vadd.f32 %v10601_v3, %v10600_v52  ;;  %v10603_v60 = vpop.f32.mrb[126].mxu1 }
 0xe66   :  { %v10604_v5 = vpop.f32.mrb[127].mxu1 }
 0xe67   :  { %v5206_v26 = vadd.f32 %v10602_v35, %v15654_v54  ;;  %v10605_v43 = vadd.f32 %v10604_v5, %v10603_v60  ;;  %v11970_v35 = vld [vmem:[#allocation5 + $0xc4] ss:$12 sps:$4 sm:$0xff]   ;;  %v11973_v60 = vld [vmem:[#allocation5 + $0xdc] ss:$12 sps:$4 sm:$0xff]  }
 0xe68   :  { %5669 = vmatprep.subr.bf16.mxu0 %v11970_v35  ;;  %v11971_v5 = vld [vmem:[#allocation5 + $0xd8] ss:$12 sps:$4 sm:$0xff]  }
 0xe69   :  { %v5209_v23 = vadd.f32 %v10605_v43, %v15654_v54  ;;  %v15689_v38 = vadd.f32 %v5206_v26, %v15329_v44  ;;  %v11976_v26 = vld [vmem:[#allocation5 + $0xf4] ss:$12 sps:$4 sm:$0xff]  }
 0xe6b   :  { %5274 = vadd.xlane.f32.xlu1 %v15689_v38  ;;  %v15693_v25 = vadd.f32 %v5209_v23, %v15326_v46 }
 0xe6d   :  { %5276 = vadd.xlane.f32.xlu0 %v15693_v25 }
 0xe6e   :  { %v10606_v33 = vpop.f32.mrb[128].mxu1 }
 0xe6f   :  { %v10607_v7 = vpop.f32.mrb[129].mxu1 }
 0xe70   :  { %v10608_v18 = vadd.f32 %v10607_v7, %v10606_v33  ;;  %v10609_v61 = vpop.f32.mrb[130].mxu1 }
 0xe71   :  { %v10610_v63 = vpop.f32.mrb[131].mxu1 }
 0xe72   :  { %v5214_v19 = vadd.f32 %v10608_v18, %v15654_v54  ;;  %v10611_v39 = vadd.f32 %v10610_v63, %v10609_v61 }
 0xe74   :  { %v5217_v45 = vadd.f32 %v10611_v39, %v15654_v54  ;;  %v15699_v44 = vadd.f32 %v5214_v19, %v15339_v48 }
 0xe76   :  { %5278 = vadd.xlane.f32.xlu1 %v15699_v44  ;;  %v15703_v46 = vadd.f32 %v5217_v45, %v15342_v51 }
 0xe78   :  { %5280 = vadd.xlane.f32.xlu0 %v15703_v46 }
 0xe7a   :  { %v10612_v29 = vpop.f32.mrb[132].mxu1 }
 0xe7b   :  { %v10613_v12 = vpop.f32.mrb[133].mxu1 }
 0xe7c   :  { %v10614_v30 = vadd.f32 %v10613_v12, %v10612_v29  ;;  %v10615_v47 = vpop.f32.mrb[134].mxu1 }
 0xe7d   :  { %v10616_v11 = vpop.f32.mrb[135].mxu1 }
 0xe7e   :  { %v5222_v53 = vadd.f32 %v10614_v30, %v15654_v54  ;;  %v10617_v0 = vadd.f32 %v10616_v11, %v10615_v47 }
 0xe80   :  { %v5225_v28 = vadd.f32 %v10617_v0, %v15654_v54  ;;  %v15709_v48 = vadd.f32 %v5222_v53, %v15355_v36 }
 0xe82   :  { %5282 = vadd.xlane.f32.xlu1 %v15709_v48  ;;  %v15713_v51 = vadd.f32 %v5225_v28, %v15352_v57 }
 0xe84   :  { %5284 = vadd.xlane.f32.xlu0 %v15713_v51 }
 0xe89   :  { %v10618_v41 = vpop.f32.mrb[136].mxu1 }
 0xe8a   :  { %v10619_v40 = vpop.f32.mrb[137].mxu1 }
 0xe8b   :  { %v10620_v56 = vadd.f32 %v10619_v40, %v10618_v41  ;;  %v10621_v15 = vpop.f32.mrb[138].mxu1  ;;  %v11977_v41 = vld [vmem:[#allocation5 + $0xc8] ss:$12 sps:$4 sm:$0xff]  }
 0xe8c   :  { %v10622_v55 = vpop.f32.mrb[139].mxu1  ;;  %11310 = vmatprep.subr.bf16.mxu1 %v11977_v41 }
 0xe8d   :  { %v5230_v6 = vadd.f32 %v10620_v56, %v15654_v54  ;;  %v10623_v27 = vadd.f32 %v10622_v55, %v10621_v15  ;;  %11311 = vmatpush3.bf16.msra.mxu1 %v11977_v41  ;;  %v11981_v55 = vld [vmem:[#allocation5 + $0xe0] ss:$12 sps:$4 sm:$0xff]  }
 0xe8e   :  { %11312 = vmatprep.subr.bf16.mxu1 %v11981_v55 }
 0xe8f   :  { %v5233_v13 = vadd.f32 %v10623_v27, %v15654_v54  ;;  %v15719_v36 = vadd.f32 %v5230_v6, %v15365_v62  ;;  %v11978_v27 = vld [vmem:[#allocation5 + $0x108] ss:$12 sps:$4 sm:$0xff]  }
 0xe91   :  { %5286 = vadd.xlane.f32.xlu1 %v15719_v36  ;;  %v10624_v16 = vpop.f32.mrb[140].mxu1  ;;  %v15723_v57 = vadd.f32 %v5233_v13, %v15368_v37  ;;  %v11968_v37 = vld [vmem:[#allocation5 + $0xc0] ss:$12 sps:$4 sm:$0xff]   ;;  %11313 = vmatpush3.bf16.msra.mxu1 %v11981_v55 }
 0xe92   :  { %v10625_v21 = vpop.f32.mrb[141].mxu1  ;;  %5670 = vmatpush1.bf16.msra.mxu0 %v11968_v37 }
 0xe93   :  { %v10626_v59 = vadd.f32 %v10625_v21, %v10624_v16  ;;  %5288 = vadd.xlane.f32.xlu0 %v15723_v57  ;;  %v10627_v10 = vpop.f32.mrb[142].mxu1  ;;  %5671 = vmatprep.subr.bf16.mxu0 %v11973_v60  ;;  %v11984_v21 = vld [vmem:[#allocation5 + $0x124] ss:$12 sps:$4 sm:$0xff]  }
 0xe94   :  { %v10628_v58 = vpop.f32.mrb[143].mxu1 }
 0xe95   :  { %v5238_v24 = vadd.f32 %v10626_v59, %v15654_v54  ;;  %v10629_v14 = vadd.f32 %v10628_v58, %v10627_v10  ;;  %v11985_v59 = vld [vmem:[#allocation5 + $0xf8] ss:$12 sps:$4 sm:$0xff]   ;;  %v11988_v58 = vld [vmem:[#allocation5 + $0x13c] ss:$12 sps:$4 sm:$0xff]  }
 0xe96   :  { %5672 = vmatpush1.bf16.msra.mxu0 %v11971_v5  ;;  %11314 = vmatprep.subr.bf16.mxu1 %v11985_v59  ;;  %v11992_v5 = vld [vmem:[#allocation5 + $0x154] ss:$12 sps:$4 sm:$0xff]  }
 0xe97   :  { %v5241_v52 = vadd.f32 %v10629_v14, %v15654_v54  ;;  %v15729_v62 = vadd.f32 %v5238_v24, %v15381_v17  ;;  %v11974_v54 = vld [vmem:[#allocation5 + $0xf0] ss:$12 sps:$4 sm:$0xff]   ;;  %5673 = vmatprep.subr.bf16.mxu0 %v11976_v26  ;;  %11315 = vmatpush3.bf16.msra.mxu1 %v11985_v59  ;;  %v11986_v14 = vld [vmem:[#allocation5 + $0x138] ss:$12 sps:$4 sm:$0xff]   ;;  %v11993_v26 = vld [vmem:[#allocation5 + $0x128] ss:$12 sps:$4 sm:$0xff]  }
 0xe99   :  { %5290 = vadd.xlane.f32.xlu1 %v15729_v62  ;;  %v15733_v3 = vadd.f32 %v5241_v52, %v15378_v2 }
 0xe9a   :  { %5674 = vmatpush1.bf16.msra.mxu0 %v11974_v54  ;;  %v11990_v54 = vld [vmem:[#allocation5 + $0x150] ss:$12 sps:$4 sm:$0xff]  }
 0xe9b   :  { %5292 = vadd.xlane.f32.xlu0 %v15733_v3 }
 0xedf   :  { %v5263_v17 = vpop.xlane.xlu1 %5262 }
 0xee0   :  { %v5294_v43 = vmul.f32 0.0078125, %v5263_v17 }
 0xee1   :  { %v5265_v23 = vpop.xlane.xlu0 %5264 }
 0xee2   :  { %v15737_v2 = vsub.f32 %v15659_v31, %v5294_v43  ;;  %v5295_v33 = vmul.f32 0.0078125, %v5265_v23 }
 0xee4   :  { %v15740_v7 = vsub.f32 %v15663_v34, %v5295_v33  ;;  %v5326_v18 = vmul.f32 %v15737_v2, %v15737_v2  ;;  %v11996_v33 = vld [vmem:[#allocation5 + $0x16c] ss:$12 sps:$4 sm:$0xff]  }
 0xee6   :  { %5342 = vadd.xlane.f32.xlu1 %v5326_v18  ;;  %v5327_v61 = vmul.f32 %v15740_v7, %v15740_v7  ;;  %v11997_v18 = vld [vmem:[#allocation5 + $0x140] ss:$12 sps:$4 sm:$0xff]  }
 0xee7   :  { %v5267_v63 = vpop.xlane.xlu1 %5266 }
 0xee8   :  { %v5296_v19 = vmul.f32 0.0078125, %v5267_v63  ;;  %5344 = vadd.xlane.f32.xlu0 %v5327_v61 }
 0xee9   :  { %v5269_v39 = vpop.xlane.xlu0 %5268 }
 0xeea   :  { %v15747_v45 = vsub.f32 %v15669_v49, %v5296_v19  ;;  %v5297_v31 = vmul.f32 0.0078125, %v5269_v39 }
 0xeec   :  { %v15750_v29 = vsub.f32 %v15673_v20, %v5297_v31  ;;  %v5328_v34 = vmul.f32 %v15747_v45, %v15747_v45 }
 0xeee   :  { %5346 = vadd.xlane.f32.xlu1 %v5328_v34  ;;  %v5329_v12 = vmul.f32 %v15750_v29, %v15750_v29  ;;  %v11999_v34 = vld [vmem:[#allocation5 + $0x170] ss:$12 sps:$4 sm:$0xff]  }
 0xeef   :  { %v5271_v30 = vpop.xlane.xlu1 %5270 }
 0xef0   :  { %v5298_v47 = vmul.f32 0.0078125, %v5271_v30  ;;  %5348 = vadd.xlane.f32.xlu0 %v5329_v12 }
 0xef1   :  { %v5273_v11 = vpop.xlane.xlu0 %5272 }
 0xef2   :  { %v15757_v53 = vsub.f32 %v15679_v22, %v5298_v47  ;;  %v5299_v49 = vmul.f32 0.0078125, %v5273_v11  ;;  %v11980_v22 = vld [vmem:[#allocation5 + $0x10c] ss:$12 sps:$4 sm:$0xff]  }
 0xef3   :  { %5675 = vmatprep.subr.bf16.mxu0 %v11980_v22 }
 0xef4   :  { %v15760_v0 = vsub.f32 %v15683_v32, %v5299_v49  ;;  %v5330_v20 = vmul.f32 %v15757_v53, %v15757_v53  ;;  %5676 = vmatpush1.bf16.msra.mxu0 %v11978_v27 }
 0xef5   :  { %5677 = vmatprep.subr.bf16.mxu0 %v11984_v21 }
 0xef6   :  { %5350 = vadd.xlane.f32.xlu1 %v5330_v20  ;;  %v5331_v28 = vmul.f32 %v15760_v0, %v15760_v0 }
 0xef8   :  { %v5275_v40 = vpop.xlane.xlu1 %5274  ;;  %5352 = vadd.xlane.f32.xlu0 %v5331_v28 }
 0xef9   :  { %v5300_v56 = vmul.f32 0.0078125, %v5275_v40 }
 0xefa   :  { %v5277_v15 = vpop.xlane.xlu0 %5276 }
 0xefb   :  { %v15767_v6 = vsub.f32 %v15689_v38, %v5300_v56  ;;  %v5301_v32 = vmul.f32 0.0078125, %v5277_v15  ;;  %v11982_v38 = vld [vmem:[#allocation5 + $0x120] ss:$12 sps:$4 sm:$0xff]  }
 0xefc   :  { %5678 = vmatpush1.bf16.msra.mxu0 %v11982_v38 }
 0xefd   :  { %v15770_v13 = vsub.f32 %v15693_v25, %v5301_v32  ;;  %v5332_v16 = vmul.f32 %v15767_v6, %v15767_v6  ;;  %v11989_v25 = vld [vmem:[#allocation5 + $0x110] ss:$12 sps:$4 sm:$0xff]   ;;  %5679 = vmatprep.subr.bf16.mxu0 %v11988_v58 }
 0xefe   :  { %11316 = vmatprep.subr.bf16.mxu1 %v11989_v25 }
 0xeff   :  { %5354 = vadd.xlane.f32.xlu1 %v5332_v16  ;;  %v5333_v10 = vmul.f32 %v15770_v13, %v15770_v13  ;;  %11317 = vmatpush3.bf16.msra.mxu1 %v11989_v25 }
 0xf00   :  { %5680 = vmatpush1.bf16.msra.mxu0 %v11986_v14  ;;  %11318 = vmatprep.subr.bf16.mxu1 %v11993_v26 }
 0xf01   :  { %5356 = vadd.xlane.f32.xlu0 %v5333_v10  ;;  %5681 = vmatprep.subr.bf16.mxu0 %v11992_v5 }
 0xf03   :  { %v5279_v24 = vpop.xlane.xlu1 %5278  ;;  %11319 = vmatpush3.bf16.msra.mxu1 %v11993_v26 }
 0xf04   :  { %v5302_v52 = vmul.f32 0.0078125, %v5279_v24  ;;  %5682 = vmatpush1.bf16.msra.mxu0 %v11990_v54  ;;  %11320 = vmatprep.subr.bf16.mxu1 %v11997_v18 }
 0xf05   :  { %v5281_v37 = vpop.xlane.xlu0 %5280  ;;  %5683 = vmatprep.subr.bf16.mxu0 %v11996_v33 }
 0xf06   :  { %v15777_v35 = vsub.f32 %v15699_v44, %v5302_v52  ;;  %v5303_v60 = vmul.f32 0.0078125, %v5281_v37  ;;  %v11994_v44 = vld [vmem:[#allocation5 + $0x168] ss:$12 sps:$4 sm:$0xff]  }
 0xf07   :  { %11321 = vmatpush3.bf16.msra.mxu1 %v11997_v18 }
 0xf08   :  { %v15780_v17 = vsub.f32 %v15703_v46, %v5303_v60  ;;  %v5334_v43 = vmul.f32 %v15777_v35, %v15777_v35  ;;  %5684 = vmatpush1.bf16.msra.mxu0 %v11994_v44  ;;  %v11998_v46 = vld [vmem:[#allocation5 + $0x158] ss:$12 sps:$4 sm:$0xff]   ;;  %v15819_v60 = vld [vmem:[%s17931_s16] ss:$0 sm:$0xff] }
 0xf09   :  { %11322 = vmatprep.subr.bf16.mxu1 %v11998_v46 }
 0xf0a   :  { %5358 = vadd.xlane.f32.xlu1 %v5334_v43  ;;  %v5335_v23 = vmul.f32 %v15780_v17, %v15780_v17 }
 0xf0b   :  { %11323 = vmatpush3.bf16.msra.mxu1 %v11998_v46 }
 0xf0c   :  { %5360 = vadd.xlane.f32.xlu0 %v5335_v23  ;;  %11324 = vmatprep.subr.bf16.mxu1 %v11999_v34 }
 0xf0f   :  { %v5283_v61 = vpop.xlane.xlu1 %5282  ;;  %11325 = vmatpush3.bf16.msra.mxu1 %v11999_v34 }
 0xf10   :  { %v5304_v63 = vmul.f32 0.0078125, %v5283_v61  ;;  %v15827_v61 = vld [vmem:[%s17932_s17] ss:$0 sm:$0xff] }
 0xf11   :  { %v5285_v19 = vpop.xlane.xlu0 %5284 }
 0xf12   :  { %v15787_v39 = vsub.f32 %v15709_v48, %v5304_v63  ;;  %v5305_v31 = vmul.f32 0.0078125, %v5285_v19 }
 0xf14   :  { %v15790_v12 = vsub.f32 %v15713_v51, %v5305_v31  ;;  %v5336_v30 = vmul.f32 %v15787_v39, %v15787_v39 }
 0xf16   :  { %5362 = vadd.xlane.f32.xlu1 %v5336_v30  ;;  %v5337_v47 = vmul.f32 %v15790_v12, %v15790_v12 }
 0xf18   :  { %5364 = vadd.xlane.f32.xlu0 %v5337_v47 }
 0xf1e   :  { %v5287_v11 = vpop.xlane.xlu1 %5286 }
 0xf1f   :  { %v5306_v49 = vmul.f32 0.0078125, %v5287_v11 }
 0xf20   :  { %v5289_v48 = vpop.xlane.xlu0 %5288 }
 0xf21   :  { %v15797_v20 = vsub.f32 %v15719_v36, %v5306_v49  ;;  %v5307_v28 = vmul.f32 0.0078125, %v5289_v48 }
 0xf23   :  { %v15800_v51 = vsub.f32 %v15723_v57, %v5307_v28  ;;  %v5338_v41 = vmul.f32 %v15797_v20, %v15797_v20 }
 0xf25   :  { %5366 = vadd.xlane.f32.xlu1 %v5338_v41  ;;  %v5339_v40 = vmul.f32 %v15800_v51, %v15800_v51 }
 0xf26   :  { %v5291_v56 = vpop.xlane.xlu1 %5290 }
 0xf27   :  { %v5308_v15 = vmul.f32 0.0078125, %v5291_v56  ;;  %5368 = vadd.xlane.f32.xlu0 %v5339_v40 }
 0xf28   :  { %v5293_v22 = vpop.xlane.xlu0 %5292 }
 0xf29   :  { %v15807_v55 = vsub.f32 %v15729_v62, %v5308_v15  ;;  %v5309_v36 = vmul.f32 0.0078125, %v5293_v22 }
 0xf2b   :  { %v15810_v32 = vsub.f32 %v15733_v3, %v5309_v36  ;;  %v5340_v57 = vmul.f32 %v15807_v55, %v15807_v55 }
 0xf2d   :  { %5370 = vadd.xlane.f32.xlu1 %v5340_v57  ;;  %v5341_v27 = vmul.f32 %v15810_v32, %v15810_v32 }
 0xf2f   :  { %5372 = vadd.xlane.f32.xlu0 %v5341_v27 }
 0xf73   :  { %v5343_v16 = vpop.xlane.xlu1 %5342 }
 0xf74   :  { %v5374_v21 = vmul.f32 0.0078125, %v5343_v16 }
 0xf75   :  { %v5345_v59 = vpop.xlane.xlu0 %5344 }
 0xf76   :  { %v5390_v10 = vadd.f32 1e-12, %v5374_v21  ;;  %v5375_v38 = vmul.f32 0.0078125, %v5345_v59 }
 0xf78   :  { %12432 = vrsqrt.f32 %v5390_v10  ;;  %v5391_v62 = vadd.f32 1e-12, %v5375_v38 }
 0xf7a   :  { %12434 = vrsqrt.f32 %v5391_v62 }
 0xf7b   :  { %v5347_v58 = vpop.xlane.xlu1 %5346 }
 0xf7c   :  { %v5376_v25 = vmul.f32 0.0078125, %v5347_v58 }
 0xf7d   :  { %v5349_v3 = vpop.xlane.xlu0 %5348 }
 0xf7e   :  { %v5392_v24 = vadd.f32 1e-12, %v5376_v25  ;;  %v5377_v14 = vmul.f32 0.0078125, %v5349_v3 }
 0xf80   :  { %12436 = vrsqrt.f32 %v5392_v24  ;;  %v5393_v52 = vadd.f32 1e-12, %v5377_v14 }
 0xf82   :  { %v12433_v37 = vpop.eup %12432  ;;  %12438 = vrsqrt.f32 %v5393_v52 }
 0xf83   :  { %v5422_v5 = vmul.f32 %v12433_v37, %v15737_v2  ;;  %v5351_v26 = vpop.xlane.xlu1 %5350 }
 0xf84   :  { %v12435_v54 = vpop.eup %12434  ;;  %v5378_v43 = vmul.f32 0.0078125, %v5351_v26 }
 0xf85   :  { %v5444_v23 = vmul.f32 %v15819_v60, %v5422_v5  ;;  %v5423_v44 = vmul.f32 %v12435_v54, %v15740_v7  ;;  %v5353_v33 = vpop.xlane.xlu0 %5352 }
 0xf86   :  { %v5394_v18 = vadd.f32 1e-12, %v5378_v43  ;;  %v5379_v46 = vmul.f32 0.0078125, %v5353_v33 }
 0xf87   :  { %v5445_v63 = vmul.f32 %v15819_v60, %v5423_v44  ;;  %v15831_v2 = vadd.f32 %v15827_v61, %v5444_v23 }
 0xf88   :  { %12440 = vrsqrt.f32 %v5394_v18  ;;  %v5395_v19 = vadd.f32 1e-12, %v5379_v46 }
 0xf89   :  { %18261 = vst [vmem:[#allocation47_spill] sm:$0xff] %v15831_v2  ;;  %v15834_v31 = vadd.f32 %v15827_v61, %v5445_v63 }
 0xf8a   :  { %v12437_v34 = vpop.eup %12436  ;;  %12442 = vrsqrt.f32 %v5395_v19 }
 0xf8b   :  { %18262 = vst [vmem:[#allocation52_spill] sm:$0xff] %v15834_v31  ;;  %v5482_v7 = vpack.c.bf16 %v15834_v31, %v15831_v2  ;;  %v5424_v30 = vmul.f32 %v12437_v34, %v15747_v45 }
 0xf8c   :  { %v12439_v47 = vpop.eup %12438  ;;  %v5355_v11 = vpop.xlane.xlu1 %5354 }
 0xf8d   :  { %v5380_v49 = vmul.f32 0.0078125, %v5355_v11  ;;  %5702 = vmatmul.mubr.bf16.vlgmr.msra.gmra.mrb[144].mxu0 %v5482_v7  ;;  %11326 = vmatprep.mubr.bf16.mxu1 %v5482_v7  ;;  %v5425_v48 = vmul.f32 %v12439_v47, %v15750_v29  ;;  %v5446_v28 = vmul.f32 %v15819_v60, %v5424_v30 }
 0xf8e   :  { %v5357_v41 = vpop.xlane.xlu0 %5356  ;;  %5711 = vmatprep.mubr.bf16.mxu0 %v18258_v8 }
 0xf8f   :  { %v5396_v40 = vadd.f32 1e-12, %v5380_v49  ;;  %v5381_v56 = vmul.f32 0.0078125, %v5357_v41  ;;  %v5447_v15 = vmul.f32 %v15819_v60, %v5425_v48  ;;  %v15844_v45 = vadd.f32 %v15827_v61, %v5446_v28 }
 0xf91   :  { %12444 = vrsqrt.f32 %v5396_v40  ;;  %v5397_v22 = vadd.f32 1e-12, %v5381_v56  ;;  %18263 = vst [vmem:[#allocation46_spill] sm:$0xff] %v15844_v45  ;;  %v15847_v36 = vadd.f32 %v15827_v61, %v5447_v15 }
 0xf92   :  { %v12441_v57 = vpop.eup %12440 }
 0xf93   :  { %18264 = vst [vmem:[#allocation48_spill] sm:$0xff] %v15847_v36  ;;  %12446 = vrsqrt.f32 %v5397_v22  ;;  %v5483_v29 = vpack.c.bf16 %v15847_v36, %v15844_v45  ;;  %v5426_v27 = vmul.f32 %v12441_v57, %v15757_v53  ;;  %v18303_v45 = vld [vmem:[#allocation84_spill] sm:$0xff] }
 0xf94   :  { %v12443_v16 = vpop.eup %12442 }
 0xf95   :  { %5712 = vmatmul.mubr.bf16.gmra.mrb[148].mxu0 %v5483_v29  ;;  %11327 = vmatmul.mubr.bf16.vlgmr.msra.gmra.mrb[144].mxu1 %v5483_v29  ;;  %v5427_v21 = vmul.f32 %v12443_v16, %v15760_v0  ;;  %v5448_v59 = vmul.f32 %v15819_v60, %v5426_v27 }
 0xf96   :  { %5721 = vmatprep.mubr.bf16.mxu0 %v18258_v8 }
 0xf97   :  { %v5359_v10 = vpop.xlane.xlu1 %5358  ;;  %v5449_v38 = vmul.f32 %v15819_v60, %v5427_v21  ;;  %v15857_v58 = vadd.f32 %v15827_v61, %v5448_v59 }
 0xf98   :  { %v5382_v62 = vmul.f32 0.0078125, %v5359_v10 }
 0xf99   :  { %18265 = vst [vmem:[#allocation51_spill] sm:$0xff] %v15857_v58  ;;  %v15860_v25 = vadd.f32 %v15827_v61, %v5449_v38  ;;  %v5361_v53 = vpop.xlane.xlu0 %5360 }
 0xf9a   :  { %v5398_v3 = vadd.f32 1e-12, %v5382_v62  ;;  %v5383_v24 = vmul.f32 0.0078125, %v5361_v53 }
 0xf9b   :  { %18266 = vst [vmem:[#allocation50_spill] sm:$0xff] %v15860_v25  ;;  %v12445_v14 = vpop.eup %12444  ;;  %v5484_v0 = vpack.c.bf16 %v15860_v25, %v15857_v58 }
 0xf9c   :  { %12448 = vrsqrt.f32 %v5398_v3  ;;  %v5399_v52 = vadd.f32 1e-12, %v5383_v24  ;;  %v5428_v37 = vmul.f32 %v12445_v14, %v15767_v6 }
 0xf9d   :  { %v12447_v5 = vpop.eup %12446  ;;  %5722 = vmatmul.mubr.bf16.gmra.mrb[152].mxu0 %v5484_v0  ;;  %11330 = vmatprep.mubr.bf16.mxu1 %v5484_v0 }
 0xf9e   :  { %12450 = vrsqrt.f32 %v5399_v52  ;;  %5731 = vmatprep.mubr.bf16.mxu0 %v18258_v8  ;;  %v5429_v26 = vmul.f32 %v12447_v5, %v15770_v13  ;;  %v5450_v54 = vmul.f32 %v15819_v60, %v5428_v37 }
 0xfa0   :  { %v5451_v43 = vmul.f32 %v15819_v60, %v5429_v26  ;;  %v15870_v23 = vadd.f32 %v15827_v61, %v5450_v54 }
 0xfa2   :  { %18267 = vst [vmem:[#allocation49_spill] sm:$0xff] %v15870_v23  ;;  %v15873_v44 = vadd.f32 %v15827_v61, %v5451_v43 }
 0xfa3   :  { %v5363_v33 = vpop.xlane.xlu1 %5362 }
 0xfa4   :  { %18268 = vst [vmem:[#allocation55_spill] sm:$0xff] %v15873_v44  ;;  %v5384_v6 = vmul.f32 0.0078125, %v5363_v33  ;;  %v5485_v18 = vpack.c.bf16 %v15873_v44, %v15870_v23  ;;  %v18301_v23 = vld [vmem:[#allocation83_spill] sm:$0xff] }
 0xfa5   :  { %v5365_v46 = vpop.xlane.xlu0 %5364 }
 0xfa6   :  { %v12449_v63 = vpop.eup %12448  ;;  %v5400_v19 = vadd.f32 1e-12, %v5384_v6  ;;  %5732 = vmatmul.mubr.bf16.gmra.mrb[156].mxu0 %v5485_v18  ;;  %11331 = vmatmul.mubr.bf16.gmra.mrb[148].mxu1 %v5485_v18  ;;  %v5385_v13 = vmul.f32 0.0078125, %v5365_v46 }
 0xfa7   :  { %5741 = vmatprep.mubr.bf16.mxu0 %v18258_v8  ;;  %v5430_v34 = vmul.f32 %v12449_v63, %v15777_v35 }
 0xfa8   :  { %v12451_v7 = vpop.eup %12450  ;;  %12452 = vrsqrt.f32 %v5400_v19  ;;  %v5401_v30 = vadd.f32 1e-12, %v5385_v13 }
 0xfa9   :  { %v5431_v47 = vmul.f32 %v12451_v7, %v15780_v17  ;;  %v5452_v11 = vmul.f32 %v15819_v60, %v5430_v34 }
 0xfaa   :  { %12454 = vrsqrt.f32 %v5401_v30 }
 0xfab   :  { %v5453_v49 = vmul.f32 %v15819_v60, %v5431_v47  ;;  %v15883_v48 = vadd.f32 %v15827_v61, %v5452_v11 }
 0xfad   :  { %18269 = vst [vmem:[#allocation53_spill] sm:$0xff] %v15883_v48  ;;  %v15886_v28 = vadd.f32 %v15827_v61, %v5453_v49 }
 0xfaf   :  { %18270 = vst [vmem:[#allocation63_spill] sm:$0xff] %v15886_v28  ;;  %v5486_v41 = vpack.c.bf16 %v15886_v28, %v15883_v48 }
 0xfb1   :  { %5742 = vmatmul.mubr.bf16.gmra.mrb[160].mxu0 %v5486_v41  ;;  %11334 = vmatprep.mubr.bf16.mxu1 %v5486_v41 }
 0xfb2   :  { %v12453_v35 = vpop.eup %12452  ;;  %v5367_v40 = vpop.xlane.xlu1 %5366  ;;  %5751 = vmatprep.mubr.bf16.mxu0 %v18258_v8 }
 0xfb3   :  { %v5386_v17 = vmul.f32 0.0078125, %v5367_v40  ;;  %v5432_v56 = vmul.f32 %v12453_v35, %v15787_v39 }
 0xfb4   :  { %v12455_v15 = vpop.eup %12454  ;;  %v5369_v22 = vpop.xlane.xlu0 %5368 }
 0xfb5   :  { %v5402_v57 = vadd.f32 1e-12, %v5386_v17  ;;  %v5387_v29 = vmul.f32 0.0078125, %v5369_v22  ;;  %v5433_v27 = vmul.f32 %v12455_v15, %v15790_v12  ;;  %v5454_v16 = vmul.f32 %v15819_v60, %v5432_v56  ;;  %v18277_v15 = vld [vmem:[#allocation16_spill] sm:$0xff] }
 0xfb7   :  { %12456 = vrsqrt.f32 %v5402_v57  ;;  %v5403_v21 = vadd.f32 1e-12, %v5387_v29  ;;  %v5455_v59 = vmul.f32 %v15819_v60, %v5433_v27  ;;  %v15896_v10 = vadd.f32 %v15827_v61, %v5454_v16 }
 0xfb9   :  { %12458 = vrsqrt.f32 %v5403_v21  ;;  %18271 = vst [vmem:[#allocation65_spill] sm:$0xff] %v15896_v10  ;;  %v15899_v38 = vadd.f32 %v15827_v61, %v5455_v59 }
 0xfba   :  { %v5371_v39 = vpop.xlane.xlu1 %5370 }
 0xfbb   :  { %18272 = vst [vmem:[#allocation45_spill] sm:$0xff] %v15899_v38  ;;  %v5487_v62 = vpack.c.bf16 %v15899_v38, %v15896_v10  ;;  %v5388_v53 = vmul.f32 0.0078125, %v5371_v39  ;;  %v18298_v38 = vld [vmem:[#allocation75_spill] sm:$0xff] }
 0xfbc   :  { %v5373_v3 = vpop.xlane.xlu0 %5372 }
 0xfbd   :  { %5752 = vmatmul.mubr.bf16.gmra.mrb[164].mxu0 %v5487_v62  ;;  %11335 = vmatmul.mubr.bf16.gmra.mrb[152].mxu1 %v5487_v62  ;;  %v5404_v12 = vadd.f32 1e-12, %v5388_v53  ;;  %v5389_v24 = vmul.f32 0.0078125, %v5373_v3 }
 0xfbe   :  { %5761 = vmatprep.mubr.bf16.mxu0 %v18258_v8 }
 0xfbf   :  { %12460 = vrsqrt.f32 %v5404_v12  ;;  %v5405_v14 = vadd.f32 1e-12, %v5389_v24 }
 0xfc1   :  { %v12457_v0 = vpop.eup %12456  ;;  %12462 = vrsqrt.f32 %v5405_v14 }
 0xfc2   :  { %v5434_v52 = vmul.f32 %v12457_v0, %v15797_v20 }
 0xfc3   :  { %v12459_v37 = vpop.eup %12458 }
 0xfc4   :  { %v5435_v5 = vmul.f32 %v12459_v37, %v15800_v51  ;;  %v5456_v26 = vmul.f32 %v15819_v60, %v5434_v52 }
 0xfc6   :  { %v5457_v54 = vmul.f32 %v15819_v60, %v5435_v5  ;;  %v15909_v43 = vadd.f32 %v15827_v61, %v5456_v26 }
 0xfc8   :  { %18273 = vst [vmem:[#allocation54_spill] sm:$0xff] %v15909_v43  ;;  %v15912_v33 = vadd.f32 %v15827_v61, %v5457_v54 }
 0xfc9   :  { %v12461_v6 = vpop.eup %12460 }
 0xfca   :  { %18274 = vst [vmem:[#allocation68_spill] sm:$0xff] %v15912_v33  ;;  %v5488_v18 = vpack.c.bf16 %v15912_v33, %v15909_v43  ;;  %v5436_v46 = vmul.f32 %v12461_v6, %v15807_v55 }
 0xfcb   :  { %v12463_v20 = vpop.eup %12462 }
 0xfcc   :  { %5762 = vmatmul.mubr.bf16.gmra.mrb[168].mxu0 %v5488_v18  ;;  %11338 = vmatprep.mubr.bf16.mxu1 %v5488_v18  ;;  %v5437_v51 = vmul.f32 %v12463_v20, %v15810_v32  ;;  %v5458_v63 = vmul.f32 %v15819_v60, %v5436_v46  ;;  %v10168_v32 = vld [vmem:[%s17922_s7 + $0x3] sm:$0x7] }
 0xfcd   :  { %5771 = vmatprep.mubr.bf16.mxu0 %v18258_v8  ;;  %v15933_v7 = vrot.slane %v10168_v32, %v18259_v50  ;;  %v15947_v22 = vrot.slane %v10168_v32, %v18277_v15  ;;  %v18305_v8 = vld [vmem:[#allocation80_spill] sm:$0xff] }
 0xfce   :  { %v5459_v19 = vmul.f32 %v15819_v60, %v5437_v51  ;;  %v15922_v13 = vadd.f32 %v15827_v61, %v5458_v63  ;;  %v15936_v60 = vrot.slane %v10168_v32, %v18260_v42 }
 0xfd0   :  { %18275 = vst [vmem:[#allocation64_spill] sm:$0xff] %v15922_v13  ;;  %v15925_v34 = vadd.f32 %v15827_v61, %v5459_v19 }
 0xfd2   :  { %18276 = vst [vmem:[#allocation67_spill] sm:$0xff] %v15925_v34  ;;  %v5489_v55 = vpack.c.bf16 %v15925_v34, %v15922_v13 }
 0xfd4   :  { %5772 = vmatmul.mubr.bf16.gmra.mrb[172].mxu0 %v5489_v55  ;;  %11339 = vmatmul.mubr.bf16.gmra.mrb[156].mxu1 %v5489_v55 }
0x1060   :  { %v5703_v30 = vpop.f32.mrb[144].mxu0 }
0x1061   :  { %v5705_v47 = vpop.f32.mrb[145].mxu0  ;;  %v5704_v61 = vadd.f32 %v5703_v30, %v15933_v7 }
0x1062   :  { %v5707_v11 = vpop.f32.mrb[146].mxu0  ;;  %v5706_v35 = vadd.f32 %v5705_v47, %v15936_v60 }
0x1063   :  { %v5708_v49 = vadd.f32 %v5707_v11, %v15933_v7  ;;  %v5709_v41 = vpop.f32.mrb[147].mxu0 }
0x1064   :  { %v5710_v40 = vadd.f32 %v5709_v41, %v15936_v60 }
0x1065   :  { %v15942_v17 = vpack.c.bf16 %v5708_v49, %v5704_v61 }
0x1066   :  { %v15944_v56 = vpack.c.bf16 %v5710_v40, %v5706_v35 }
0x1067   :  { %11358 = vmatprep.mubr.msk.bf16.mxu0 %vm1725_vm7, %v15942_v17 }
0x1068   :  { %6386 = vrot.lane.b32.xlu1 %v15944_v56, %s13036_s20  ;;  %v5713_v57 = vpop.f32.mrb[148].mxu0  ;;  %v11328_v29 = vpop.f32.mrb[144].mxu1  ;;  %11830 = vmatprep.subr.msk.bf16.mxu0 %vm1725_vm7, %v15944_v56  ;;  %v5945_v27 = vsel %vm1725_vm7, %v15944_v56, 0 }
0x1069   :  { %v5715_v16 = vpop.f32.mrb[149].mxu0  ;;  %v5816_v21 = vpop.f32.mrb[145].mxu1  ;;  %11343 = vmatpush3.bf16.xpose.msra.mxu0 %v5945_v27  ;;  %v5714_v62 = vadd.f32 %v5713_v57, %v15933_v7  ;;  %v5825_v53 = vadd.f32 %v11328_v29, %v15947_v22 }
0x106a   :  { %v5717_v59 = vpop.f32.mrb[150].mxu0  ;;  %v11329_v39 = vpop.f32.mrb[146].mxu1  ;;  %v5716_v0 = vadd.f32 %v5715_v16, %v15936_v60  ;;  %v5817_v52 = vadd.f32 %v5816_v21, %v15947_v22 }
0x106b   :  { %v5718_v3 = vadd.f32 %v5717_v59, %v15933_v7  ;;  %v5828_v12 = vadd.f32 %v11329_v39, %v15947_v22  ;;  %v5719_v24 = vpop.f32.mrb[151].mxu0  ;;  %v5819_v14 = vpop.f32.mrb[147].mxu1 }
0x106c   :  { %v5720_v37 = vadd.f32 %v5719_v24, %v15936_v60  ;;  %v5820_v5 = vadd.f32 %v5819_v14, %v15947_v22 }
0x106d   :  { %v15965_v26 = vpack.c.bf16 %v5718_v3, %v5714_v62  ;;  %v15967_v54 = vpack.c.bf16 %v5828_v12, %v5825_v53 }
0x106e   :  { %v15969_v6 = vpack.c.bf16 %v5720_v37, %v5716_v0  ;;  %v15971_v18 = vpack.c.bf16 %v5820_v5, %v5817_v52 }
0x106f   :  { %18278 = vst [vmem:[#allocation62_spill] sm:$0xff] %v15965_v26  ;;  %18279 = vst [vmem:[#allocation69_spill] sm:$0xff] %v15967_v54 }
0x1070   :  { %18280 = vst [vmem:[#allocation66_spill] sm:$0xff] %v15971_v18  ;;  %11374 = vmatprep.subr.bf16.mxu1 %v15971_v18  ;;  %6388 = vrot.lane.b32.xlu0 %v15969_v6, %s13036_s20  ;;  %v5723_v46 = vpop.f32.mrb[152].mxu0  ;;  %v5948_v20 = vsel %vm1725_vm7, %v15969_v6, 0 }
0x1071   :  { %11831 = vmatprep.subr.msk.bf16.mxu0 %vm1725_vm7, %v15969_v6  ;;  %v5725_v51 = vpop.f32.mrb[153].mxu0  ;;  %11375 = vmatpush3.bf16.msra.mxu1 %v15971_v18  ;;  %v5724_v19 = vadd.f32 %v5723_v46, %v15933_v7 }
0x1072   :  { %11345 = vmatpush3.bf16.xpose.msra.mxu0 %v5948_v20  ;;  %v5727_v63 = vpop.f32.mrb[154].mxu0  ;;  %11376 = vmatprep.subr.bf16.mxu1 %v15967_v54  ;;  %v5726_v30 = vadd.f32 %v5725_v51, %v15936_v60 }
0x1073   :  { %v5728_v55 = vadd.f32 %v5727_v63, %v15933_v7  ;;  %v5729_v32 = vpop.f32.mrb[155].mxu0 }
0x1074   :  { %v5730_v47 = vadd.f32 %v5729_v32, %v15936_v60 }
0x1075   :  { %v15986_v11 = vpack.c.bf16 %v5728_v55, %v5724_v19  ;;  %11377 = vmatpush3.bf16.msra.mxu1 %v15967_v54 }
0x1076   :  { %v15989_v61 = vpack.c.bf16 %v5730_v47, %v5726_v30 }
0x1077   :  { %18281 = vst [vmem:[#allocation19_spill] sm:$0xff] %v15986_v11 }
0x1078   :  { %6390 = vrot.lane.b32.xlu1 %v15989_v61, %s13036_s20  ;;  %11832 = vmatprep.subr.msk.bf16.mxu0 %vm1725_vm7, %v15989_v61  ;;  %v5951_v49 = vsel %vm1725_vm7, %v15989_v61, 0 }
0x1079   :  { %v5733_v41 = vpop.f32.mrb[156].mxu0  ;;  %v11332_v35 = vpop.f32.mrb[148].mxu1 }
0x107a   :  { %v5735_v40 = vpop.f32.mrb[157].mxu0  ;;  %v5832_v15 = vpop.f32.mrb[149].mxu1  ;;  %11347 = vmatpush3.bf16.xpose.msra.mxu0 %v5951_v49  ;;  %v5734_v27 = vadd.f32 %v5733_v41, %v15933_v7  ;;  %v5841_v16 = vadd.f32 %v11332_v35, %v15947_v22 }
0x107b   :  { %v5737_v57 = vpop.f32.mrb[158].mxu0  ;;  %v11333_v29 = vpop.f32.mrb[150].mxu1  ;;  %v5736_v53 = vadd.f32 %v5735_v40, %v15936_v60  ;;  %v5833_v3 = vadd.f32 %v5832_v15, %v15947_v22 }
0x107c   :  { %v5738_v21 = vadd.f32 %v5737_v57, %v15933_v7  ;;  %v5844_v59 = vadd.f32 %v11333_v29, %v15947_v22  ;;  %v5739_v39 = vpop.f32.mrb[159].mxu0  ;;  %v5835_v62 = vpop.f32.mrb[151].mxu1 }
0x107d   :  { %v5740_v12 = vadd.f32 %v5739_v39, %v15936_v60  ;;  %v5836_v24 = vadd.f32 %v5835_v62, %v15947_v22 }
0x107e   :  { %v16005_v14 = vpack.c.bf16 %v5738_v21, %v5734_v27  ;;  %v16007_v0 = vpack.c.bf16 %v5844_v59, %v5841_v16 }
0x107f   :  { %v16009_v52 = vpack.c.bf16 %v5740_v12, %v5736_v53  ;;  %v16011_v37 = vpack.c.bf16 %v5836_v24, %v5833_v3 }
0x1080   :  { %18282 = vst [vmem:[#allocation20_spill] sm:$0xff] %v16005_v14  ;;  %18283 = vst [vmem:[#allocation22_spill] sm:$0xff] %v16007_v0 }
0x1081   :  { %18284 = vst [vmem:[#allocation21_spill] sm:$0xff] %v16011_v37  ;;  %11378 = vmatprep.subr.bf16.mxu1 %v16011_v37  ;;  %6392 = vrot.lane.b32.xlu1 %v16009_v52, %s13036_s20  ;;  %v5954_v5 = vsel %vm1725_vm7, %v16009_v52, 0 }
0x1082   :  { %11833 = vmatprep.subr.msk.bf16.mxu0 %vm1725_vm7, %v16009_v52  ;;  %11379 = vmatpush3.bf16.msra.mxu1 %v16011_v37 }
0x1083   :  { %11349 = vmatpush3.bf16.xpose.msra.mxu0 %v5954_v5  ;;  %11380 = vmatprep.subr.bf16.mxu1 %v16007_v0 }
0x1084   :  { %v5743_v46 = vpop.f32.mrb[160].mxu0 }
0x1085   :  { %v5745_v20 = vpop.f32.mrb[161].mxu0  ;;  %v5744_v63 = vadd.f32 %v5743_v46, %v15933_v7 }
0x1086   :  { %11381 = vmatpush3.bf16.msra.mxu1 %v16007_v0  ;;  %v5747_v51 = vpop.f32.mrb[162].mxu0  ;;  %v5746_v32 = vadd.f32 %v5745_v20, %v15936_v60 }
0x1087   :  { %v5748_v19 = vadd.f32 %v5747_v51, %v15933_v7  ;;  %v5749_v55 = vpop.f32.mrb[163].mxu0 }
0x1088   :  { %v5750_v30 = vadd.f32 %v5749_v55, %v15936_v60 }
0x1089   :  { %v16027_v47 = vpack.c.bf16 %v5748_v19, %v5744_v63 }
0x108a   :  { %v16029_v49 = vpack.c.bf16 %v5750_v30, %v5746_v32 }
0x108b   :  { %18285 = vst [vmem:[#allocation24_spill] sm:$0xff] %v16027_v47 }
0x108c   :  { %6394 = vrot.lane.b32.xlu0 %v16029_v49, %s13036_s20  ;;  %11834 = vmatprep.subr.msk.bf16.mxu0 %vm1725_vm7, %v16029_v49  ;;  %v5957_v41 = vsel %vm1725_vm7, %v16029_v49, 0 }
0x108d   :  { %11351 = vmatpush3.bf16.xpose.msra.mxu0 %v5957_v41 }
0x1090   :  { %v5753_v35 = vpop.f32.mrb[164].mxu0  ;;  %v11336_v40 = vpop.f32.mrb[152].mxu1 }
0x1091   :  { %v5755_v15 = vpop.f32.mrb[165].mxu0  ;;  %v5848_v57 = vpop.f32.mrb[153].mxu1  ;;  %v5754_v16 = vadd.f32 %v5753_v35, %v15933_v7  ;;  %v5857_v21 = vadd.f32 %v11336_v40, %v15947_v22 }
0x1092   :  { %v5757_v29 = vpop.f32.mrb[166].mxu0  ;;  %v11337_v27 = vpop.f32.mrb[154].mxu1  ;;  %v5756_v3 = vadd.f32 %v5755_v15, %v15936_v60  ;;  %v5849_v12 = vadd.f32 %v5848_v57, %v15947_v22 }
0x1093   :  { %v5758_v59 = vadd.f32 %v5757_v29, %v15933_v7  ;;  %v5860_v39 = vadd.f32 %v11337_v27, %v15947_v22  ;;  %v5759_v62 = vpop.f32.mrb[167].mxu0  ;;  %v5851_v53 = vpop.f32.mrb[155].mxu1 }
0x1094   :  { %v5760_v24 = vadd.f32 %v5759_v62, %v15936_v60  ;;  %v5852_v5 = vadd.f32 %v5851_v53, %v15947_v22 }
0x1095   :  { %v16045_v46 = vpack.c.bf16 %v5758_v59, %v5754_v16  ;;  %v16047_v20 = vpack.c.bf16 %v5860_v39, %v5857_v21 }
0x1096   :  { %v16049_v51 = vpack.c.bf16 %v5760_v24, %v5756_v3  ;;  %v16051_v63 = vpack.c.bf16 %v5852_v5, %v5849_v12 }
0x1097   :  { %18286 = vst [vmem:[#allocation23_spill] sm:$0xff] %v16045_v46  ;;  %18287 = vst [vmem:[#allocation26_spill] sm:$0xff] %v16047_v20 }
0x1098   :  { %18288 = vst [vmem:[#allocation25_spill] sm:$0xff] %v16051_v63  ;;  %11382 = vmatprep.subr.bf16.mxu1 %v16051_v63  ;;  %6396 = vrot.lane.b32.xlu1 %v16049_v51, %s13036_s20  ;;  %v5960_v19 = vsel %vm1725_vm7, %v16049_v51, 0 }
0x1099   :  { %11835 = vmatprep.subr.msk.bf16.mxu0 %vm1725_vm7, %v16049_v51  ;;  %11383 = vmatpush3.bf16.msra.mxu1 %v16051_v63 }
0x109a   :  { %11353 = vmatpush3.bf16.xpose.msra.mxu0 %v5960_v19  ;;  %11384 = vmatprep.subr.bf16.mxu1 %v16047_v20 }
0x109d   :  { %11385 = vmatpush3.bf16.msra.mxu1 %v16047_v20 }
0x109f   :  { %v5763_v55 = vpop.f32.mrb[168].mxu0 }
0x10a0   :  { %v5765_v32 = vpop.f32.mrb[169].mxu0  ;;  %v5764_v41 = vadd.f32 %v5763_v55, %v15933_v7 }
0x10a1   :  { %v5767_v30 = vpop.f32.mrb[170].mxu0  ;;  %v5766_v15 = vadd.f32 %v5765_v32, %v15936_v60 }
0x10a2   :  { %v5768_v35 = vadd.f32 %v5767_v30, %v15933_v7  ;;  %v5769_v40 = vpop.f32.mrb[171].mxu0 }
0x10a3   :  { %v5770_v57 = vadd.f32 %v5769_v40, %v15936_v60 }
0x10a4   :  { %v16067_v29 = vpack.c.bf16 %v5768_v35, %v5764_v41 }
0x10a5   :  { %v16069_v27 = vpack.c.bf16 %v5770_v57, %v5766_v15 }
0x10a6   :  { %18289 = vst [vmem:[#allocation28_spill] sm:$0xff] %v16067_v29 }
0x10a7   :  { %6398 = vrot.lane.b32.xlu0 %v16069_v27, %s13036_s20  ;;  %v5773_v16 = vpop.f32.mrb[172].mxu0  ;;  %v11340_v21 = vpop.f32.mrb[156].mxu1  ;;  %11836 = vmatprep.subr.msk.bf16.mxu0 %vm1725_vm7, %v16069_v27  ;;  %v5963_v59 = vsel %vm1725_vm7, %v16069_v27, 0 }
0x10a8   :  { %v5775_v39 = vpop.f32.mrb[173].mxu0  ;;  %v5864_v62 = vpop.f32.mrb[157].mxu1  ;;  %11355 = vmatpush3.bf16.xpose.msra.mxu0 %v5963_v59  ;;  %v5774_v12 = vadd.f32 %v5773_v16, %v15933_v7  ;;  %v5873_v24 = vadd.f32 %v11340_v21, %v15947_v22 }
0x10a9   :  { %v5777_v53 = vpop.f32.mrb[174].mxu0  ;;  %v11341_v3 = vpop.f32.mrb[158].mxu1  ;;  %v5776_v30 = vadd.f32 %v5775_v39, %v15936_v60  ;;  %v5865_v41 = vadd.f32 %v5864_v62, %v15947_v22 }
0x10aa   :  { %v5778_v5 = vadd.f32 %v5777_v53, %v15933_v7  ;;  %v5876_v19 = vadd.f32 %v11341_v3, %v15947_v22  ;;  %v5779_v55 = vpop.f32.mrb[175].mxu0  ;;  %v5867_v32 = vpop.f32.mrb[159].mxu1 }
0x10ab   :  { %v5780_v35 = vadd.f32 %v5779_v55, %v15936_v60  ;;  %v5868_v40 = vadd.f32 %v5867_v32, %v15947_v22  ;;  %6362 = vrot.lane.b32.xlu0 %v15942_v17, %s13036_s20 }
0x10ac   :  { %v16087_v15 = vpack.c.bf16 %v5778_v5, %v5774_v12  ;;  %v16089_v57 = vpack.c.bf16 %v5876_v19, %v5873_v24 }
0x10ad   :  { %v16091_v7 = vpack.c.bf16 %v5780_v35, %v5776_v30  ;;  %v16093_v16 = vpack.c.bf16 %v5868_v40, %v5865_v41 }
0x10ae   :  { %18290 = vst [vmem:[#allocation27_spill] sm:$0xff] %v16087_v15  ;;  %18291 = vst [vmem:[#allocation30_spill] sm:$0xff] %v16089_v57 }
0x10af   :  { %18292 = vst [vmem:[#allocation29_spill] sm:$0xff] %v16093_v16  ;;  %6366 = vrot.lane.b32.xlu0 %v15986_v11, %s13036_s20  ;;  %11386 = vmatprep.subr.bf16.mxu1 %v16093_v16  ;;  %v5966_v60 = vsel %vm1725_vm7, %v16091_v7, 0 }
0x10b0   :  { %6400 = vrot.lane.b32.xlu1 %v16091_v7, %s13036_s20  ;;  %11837 = vmatprep.subr.msk.bf16.mxu0 %vm1725_vm7, %v16091_v7 }
0x10b1   :  { %11357 = vmatpush3.bf16.xpose.msra.mxu0 %v5966_v60  ;;  %11387 = vmatpush3.bf16.msra.mxu1 %v16093_v16 }
0x10b2   :  { %11388 = vmatprep.subr.bf16.mxu1 %v16089_v57 }
0x10b3   :  { %6370 = vrot.lane.b32.xlu0 %v16027_v47, %s13036_s20 }
0x10b4   :  { %6364 = vrot.lane.b32.xlu1 %v15965_v26, %s13036_s20 }
0x10b5   :  { %11389 = vmatpush3.bf16.msra.mxu1 %v16089_v57 }
0x10b7   :  { %6374 = vrot.lane.b32.xlu0 %v16067_v29, %s13036_s20 }
0x10b8   :  { %6368 = vrot.lane.b32.xlu1 %v16005_v14, %s13036_s20  ;;  %11359 = vmatmul.mubr.msk.bf16.vlgmr.msra.gmra.mrb[176].mxu0 %vm1725_vm7, %v15965_v26 }
0x10b9   :  { %11362 = vmatprep.mubr.msk.bf16.mxu0 %vm1725_vm7, %v15986_v11 }
0x10bb   :  { %7150 = vrot.lane.b32.xlu0 %v15944_v56, %s13029_s12 }
0x10bc   :  { %6372 = vrot.lane.b32.xlu1 %v16045_v46, %s13036_s20 }
0x10bf   :  { %7154 = vrot.lane.b32.xlu0 %v15989_v61, %s13029_s12 }
0x10c0   :  { %11363 = vmatmul.mubr.msk.bf16.gmra.mrb[180].mxu0 %vm1725_vm7, %v16005_v14  ;;  %6376 = vrot.lane.b32.xlu1 %v16087_v15, %s13036_s20 }
0x10c1   :  { %11366 = vmatprep.mubr.msk.bf16.mxu0 %vm1725_vm7, %v16027_v47 }
0x10c3   :  { %7160 = vrot.lane.b32.xlu0 %v16049_v51, %s13029_s12 }
0x10c4   :  { %7152 = vrot.lane.b32.xlu1 %v15969_v6, %s13029_s12 }
0x10c7   :  { %7136 = vrot.lane.b32.xlu0 %v15965_v26, %s13029_s12 }
0x10c8   :  { %11367 = vmatmul.mubr.msk.bf16.gmra.mrb[184].mxu0 %vm1725_vm7, %v16045_v46  ;;  %7156 = vrot.lane.b32.xlu1 %v16009_v52, %s13029_s12 }
0x10c9   :  { %11370 = vmatprep.mubr.msk.bf16.mxu0 %vm1725_vm7, %v16067_v29 }
0x10cb   :  { %7140 = vrot.lane.b32.xlu0 %v16005_v14, %s13029_s12 }
0x10cc   :  { %7158 = vrot.lane.b32.xlu1 %v16029_v49, %s13029_s12 }
0x10cf   :  { %7144 = vrot.lane.b32.xlu0 %v16045_v46, %s13029_s12 }
0x10d0   :  { %7162 = vrot.lane.b32.xlu1 %v16069_v27, %s13029_s12  ;;  %11371 = vmatmul.mubr.msk.bf16.gmra.mrb[188].mxu0 %vm1725_vm7, %v16087_v15 }
0x10d3   :  { %7148 = vrot.lane.b32.xlu0 %v16087_v15, %s13029_s12 }
0x10d4   :  { %7134 = vrot.lane.b32.xlu1 %v15942_v17, %s13029_s12 }
0x10d7   :  { %6741 = vrot.lane.b32.xlu0 %v15967_v54, %s13036_s20 }
0x10d8   :  { %7138 = vrot.lane.b32.xlu1 %v15986_v11, %s13029_s12 }
0x10da   :  { %v6387_v22 = vpop.permute.xlu1 %6386 }
0x10db   :  { %11838 = vmatprep.subr.msk.bf16.mxu0 %vm1725_vm7, %v6387_v22  ;;  %v6427_v21 = vsel %vm1725_vm7, %v6387_v22, 0  ;;  %6747 = vrot.lane.b32.xlu0 %v16051_v63, %s13036_s20 }
0x10dc   :  { %11407 = vmatpush3.bf16.xpose.msra.mxu0 %v6427_v21  ;;  %7142 = vrot.lane.b32.xlu1 %v16027_v47, %s13029_s12 }
0x10df   :  { %6749 = vrot.lane.b32.xlu0 %v16047_v20, %s13036_s20 }
0x10e0   :  { %7146 = vrot.lane.b32.xlu1 %v16067_v29, %s13029_s12 }
0x10e2   :  { %v6389_v59 = vpop.permute.xlu0 %6388 }
0x10e3   :  { %11839 = vmatprep.subr.msk.bf16.mxu0 %vm1725_vm7, %v6389_v59  ;;  %v6430_v39 = vsel %vm1725_vm7, %v6389_v59, 0  ;;  %6753 = vrot.lane.b32.xlu0 %v16089_v57, %s13036_s20 }
0x10e4   :  { %11409 = vmatpush3.bf16.xpose.msra.mxu0 %v6430_v39  ;;  %6739 = vrot.lane.b32.xlu1 %v15971_v18, %s13036_s20 }
0x10e7   :  { %7164 = vrot.lane.b32.xlu0 %v16091_v7, %s13029_s12 }
0x10e8   :  { %6743 = vrot.lane.b32.xlu1 %v16011_v37, %s13036_s20 }
0x10ea   :  { %v6391_v62 = vpop.permute.xlu1 %6390 }
0x10eb   :  { %11840 = vmatprep.subr.msk.bf16.mxu0 %vm1725_vm7, %v6391_v62  ;;  %v6433_v53 = vsel %vm1725_vm7, %v6391_v62, 0 }
0x10ec   :  { %11411 = vmatpush3.bf16.xpose.msra.mxu0 %v6433_v53  ;;  %6745 = vrot.lane.b32.xlu1 %v16007_v0, %s13036_s20 }
0x10f0   :  { %7789 = vrot.lane.b32.xlu1 %v15944_v56, %s13037_s8 }
0x10f3   :  { %v6393_v3 = vpop.permute.xlu1 %6392 }
0x10f4   :  { %11841 = vmatprep.subr.msk.bf16.mxu0 %vm1725_vm7, %v6393_v3  ;;  %v6436_v12 = vsel %vm1725_vm7, %v6393_v3, 0  ;;  %6751 = vrot.lane.b32.xlu1 %v16093_v16, %s13036_s20 }
0x10f5   :  { %11413 = vmatpush3.bf16.xpose.msra.mxu0 %v6436_v12 }
0x10fe   :  { %v6395_v24 = vpop.permute.xlu0 %6394 }
0x10ff   :  { %11842 = vmatprep.subr.msk.bf16.mxu0 %vm1725_vm7, %v6395_v24  ;;  %v6439_v5 = vsel %vm1725_vm7, %v6395_v24, 0 }
0x1100   :  { %11415 = vmatpush3.bf16.xpose.msra.mxu0 %v6439_v5 }
0x110a   :  { %v6397_v19 = vpop.permute.xlu1 %6396 }
0x110b   :  { %11843 = vmatprep.subr.msk.bf16.mxu0 %vm1725_vm7, %v6397_v19  ;;  %v6442_v56 = vsel %vm1725_vm7, %v6397_v19, 0 }
0x110c   :  { %11417 = vmatpush3.bf16.xpose.msra.mxu0 %v6442_v56 }
0x1119   :  { %v6399_v55 = vpop.permute.xlu0 %6398 }
0x111a   :  { %11844 = vmatprep.subr.msk.bf16.mxu0 %vm1725_vm7, %v6399_v55  ;;  %v6445_v32 = vsel %vm1725_vm7, %v6399_v55, 0 }
0x111b   :  { %11419 = vmatpush3.bf16.xpose.msra.mxu0 %v6445_v32 }
0x111d   :  { %v6363_v30 = vpop.permute.xlu0 %6362 }
0x111e   :  { %11422 = vmatprep.mubr.msk.bf16.mxu0 %vm1725_vm7, %v6363_v30 }
0x1121   :  { %v6367_v41 = vpop.permute.xlu0 %6366 }
0x1122   :  { %v6401_v35 = vpop.permute.xlu1 %6400 }
0x1123   :  { %11845 = vmatprep.subr.msk.bf16.mxu0 %vm1725_vm7, %v6401_v35  ;;  %v6448_v40 = vsel %vm1725_vm7, %v6401_v35, 0 }
0x1124   :  { %11421 = vmatpush3.bf16.xpose.msra.mxu0 %v6448_v40 }
0x1125   :  { %v6371_v60 = vpop.permute.xlu0 %6370 }
0x1126   :  { %v6365_v22 = vpop.permute.xlu1 %6364 }
0x1129   :  { %v6375_v21 = vpop.permute.xlu0 %6374 }
0x112a   :  { %v6369_v59 = vpop.permute.xlu1 %6368 }
0x112b   :  { %11423 = vmatmul.mubr.msk.bf16.vlgmr.msra.gmra.mrb[192].mxu0 %vm1725_vm7, %v6365_v22 }
0x112c   :  { %11426 = vmatprep.mubr.msk.bf16.mxu0 %vm1725_vm7, %v6367_v41 }
0x112d   :  { %v7151_v39 = vpop.permute.xlu0 %7150 }
0x112e   :  { %v6373_v62 = vpop.permute.xlu1 %6372  ;;  %11846 = vmatprep.subr.msk.bf16.mxu0 %vm1725_vm7, %v7151_v39  ;;  %v7191_v53 = vsel %vm1725_vm7, %v7151_v39, 0 }
0x112f   :  { %11511 = vmatpush3.bf16.xpose.msra.mxu0 %v7191_v53 }
0x1131   :  { %v7155_v3 = vpop.permute.xlu0 %7154 }
0x1132   :  { %v6377_v12 = vpop.permute.xlu1 %6376  ;;  %v7197_v41 = vsel %vm1725_vm7, %v7155_v3, 0 }
0x1133   :  { %11427 = vmatmul.mubr.msk.bf16.gmra.mrb[196].mxu0 %vm1725_vm7, %v6369_v59 }
0x1134   :  { %11430 = vmatprep.mubr.msk.bf16.mxu0 %vm1725_vm7, %v6371_v60 }
0x1135   :  { %v7161_v24 = vpop.permute.xlu0 %7160 }
0x1136   :  { %v7153_v5 = vpop.permute.xlu1 %7152 }
0x1137   :  { %11847 = vmatprep.subr.msk.bf16.mxu0 %vm1725_vm7, %v7153_v5  ;;  %v7194_v19 = vsel %vm1725_vm7, %v7153_v5, 0 }
0x1138   :  { %11513 = vmatpush3.bf16.xpose.msra.mxu0 %v7194_v19 }
0x1139   :  { %11848 = vmatprep.subr.msk.bf16.mxu0 %vm1725_vm7, %v7155_v3  ;;  %v7137_v56 = vpop.permute.xlu0 %7136 }
0x113a   :  { %v7157_v55 = vpop.permute.xlu1 %7156 }
0x113b   :  { %11431 = vmatmul.mubr.msk.bf16.gmra.mrb[200].mxu0 %vm1725_vm7, %v6373_v62  ;;  %v7200_v59 = vsel %vm1725_vm7, %v7157_v55, 0 }
0x113c   :  { %11434 = vmatprep.mubr.msk.bf16.mxu0 %vm1725_vm7, %v6375_v21 }
0x113d   :  { %v7141_v32 = vpop.permute.xlu0 %7140 }
0x113e   :  { %v7159_v30 = vpop.permute.xlu1 %7158 }
0x113f   :  { %v7203_v3 = vsel %vm1725_vm7, %v7159_v30, 0 }
0x1140   :  { %11515 = vmatpush3.bf16.xpose.msra.mxu0 %v7197_v41 }
0x1141   :  { %11849 = vmatprep.subr.msk.bf16.mxu0 %vm1725_vm7, %v7157_v55  ;;  %v7145_v35 = vpop.permute.xlu0 %7144  ;;  %v7206_v55 = vsel %vm1725_vm7, %v7161_v24, 0 }
0x1142   :  { %v7163_v40 = vpop.permute.xlu1 %7162 }
0x1143   :  { %11435 = vmatmul.mubr.msk.bf16.gmra.mrb[204].mxu0 %vm1725_vm7, %v6377_v12 }
0x1145   :  { %v7149_v60 = vpop.permute.xlu0 %7148 }
0x1146   :  { %v7135_v22 = vpop.permute.xlu1 %7134 }
0x1147   :  { %11526 = vmatprep.mubr.msk.bf16.mxu0 %vm1725_vm7, %v7135_v22 }
0x1148   :  { %11517 = vmatpush3.bf16.xpose.msra.mxu0 %v7200_v59 }
0x1149   :  { %11850 = vmatprep.subr.msk.bf16.mxu0 %vm1725_vm7, %v7159_v30  ;;  %v16217_v21 = vpop.permute.xlu0 %6741  ;;  %v7209_v30 = vsel %vm1725_vm7, %v7163_v40, 0 }
0x114a   :  { %v7139_v39 = vpop.permute.xlu1 %7138 }
0x114d   :  { %v16219_v53 = vpop.permute.xlu0 %6747 }
0x114e   :  { %v7143_v62 = vpop.permute.xlu1 %7142  ;;  %18293 = vst [vmem:[#allocation32_spill] sm:$0xff] %v16219_v53 }
0x1150   :  { %11519 = vmatpush3.bf16.xpose.msra.mxu0 %v7203_v3 }
0x1151   :  { %11851 = vmatprep.subr.msk.bf16.mxu0 %vm1725_vm7, %v7161_v24  ;;  %v16223_v5 = vpop.permute.xlu0 %6749 }
0x1152   :  { %v7147_v12 = vpop.permute.xlu1 %7146  ;;  %18294 = vst [vmem:[#allocation31_spill] sm:$0xff] %v16223_v5 }
0x1155   :  { %v16230_v41 = vpop.permute.xlu0 %6753 }
0x1156   :  { %v16225_v19 = vpop.permute.xlu1 %6739  ;;  %18295 = vst [vmem:[#allocation34_spill] sm:$0xff] %v16230_v41 }
0x1157   :  { %11438 = vmatprep.subr.bf16.mxu1 %v16225_v19 }
0x1158   :  { %11521 = vmatpush3.bf16.xpose.msra.mxu0 %v7206_v55 }
0x1159   :  { %11852 = vmatprep.subr.msk.bf16.mxu0 %vm1725_vm7, %v7163_v40  ;;  %v7165_v59 = vpop.permute.xlu0 %7164 }
0x115a   :  { %v16232_v22 = vpop.permute.xlu1 %6743  ;;  %v7212_v42 = vsel %vm1725_vm7, %v7165_v59, 0 }
0x115e   :  { %v16236_v3 = vpop.permute.xlu1 %6745 }
0x1160   :  { %11523 = vmatpush3.bf16.xpose.msra.mxu0 %v7209_v30 }
0x1161   :  { %11853 = vmatprep.subr.msk.bf16.mxu0 %vm1725_vm7, %v7165_v59 }
0x1162   :  { %v7790_v50 = vpop.permute.xlu1 %7789 }
0x1163   :  { %v7830_v24 = vsel %vm1725_vm7, %v7790_v50, 0 }
0x1168   :  { %11525 = vmatpush3.bf16.xpose.msra.mxu0 %v7212_v42 }
0x1169   :  { %11854 = vmatprep.subr.msk.bf16.mxu0 %vm1725_vm7, %v7790_v50 }
0x116f   :  { %11527 = vmatmul.mubr.msk.bf16.vlgmr.msra.gmra.mrb[208].mxu0 %vm1725_vm7, %v7137_v56 }
0x1170   :  { %11530 = vmatprep.mubr.msk.bf16.mxu0 %vm1725_vm7, %v7139_v39  ;;  %11595 = vmatpush3.bf16.xpose.msra.mxu0 %v7830_v24 }
0x1177   :  { %11531 = vmatmul.mubr.msk.bf16.gmra.mrb[212].mxu0 %vm1725_vm7, %v7141_v32 }
0x1178   :  { %11534 = vmatprep.mubr.msk.bf16.mxu0 %vm1725_vm7, %v7143_v62 }
0x117f   :  { %11535 = vmatmul.mubr.msk.bf16.gmra.mrb[216].mxu0 %vm1725_vm7, %v7145_v35 }
0x1180   :  { %11538 = vmatprep.mubr.msk.bf16.mxu0 %vm1725_vm7, %v7147_v12 }
0x1187   :  { %11539 = vmatmul.mubr.msk.bf16.gmra.mrb[220].mxu0 %vm1725_vm7, %v7149_v60 }
0x118b   :  { %v11360_v42 = vpop.f32.mrb[176].mxu0 }
0x118c   :  { %v6067_v40 = vmul.f32 0.17677669, %v11360_v42  ;;  %v6002_v55 = vpop.f32.mrb[177].mxu0  ;;  %v18296_v42 = vld [vmem:[#allocation72_spill] sm:$0xff] }
0x118d   :  { %v11361_v30 = vpop.f32.mrb[178].mxu0  ;;  %v6065_v50 = vmul.f32 0.17677669, %v6002_v55 }
0x118e   :  { %v16249_v56 = vadd.f32 %v6067_v40, %v18230_v9  ;;  %v6005_v39 = vpop.f32.mrb[179].mxu0  ;;  %v6068_v62 = vmul.f32 0.17677669, %v11361_v30 }
0x118f   :  { %v6066_v59 = vmul.f32 0.17677669, %v6005_v39  ;;  %v16256_v35 = vadd.f32 %v6065_v50, %v18225_v4 }
0x1190   :  { %6101 = vmax.xlane.f32.xlu0 %v16249_v56  ;;  %v16261_v40 = vadd.f32 %v6068_v62, %v18296_v42  ;;  %v18299_v62 = vld [vmem:[#allocation81_spill] sm:$0xff] }
0x1191   :  { %v16253_v32 = vadd.f32 %v6066_v59, %v18229_v1  ;;  %v18297_v59 = vld [vmem:[#allocation73_spill] sm:$0xff] }
0x1193   :  { %v11364_v60 = vpop.f32.mrb[180].mxu0  ;;  %6099 = vmax.xlane.f32.xlu1 %v16253_v32 }
0x1194   :  { %v6018_v12 = vpop.f32.mrb[181].mxu0  ;;  %6097 = vmax.xlane.f32.xlu0 %v16256_v35  ;;  %v6071_v55 = vmul.f32 0.17677669, %v11364_v60 }
0x1195   :  { %v11365_v24 = vpop.f32.mrb[182].mxu0  ;;  %v6069_v50 = vmul.f32 0.17677669, %v6018_v12  ;;  %v18300_v12 = vld [vmem:[#allocation77_spill] sm:$0xff] }
0x1196   :  { %v6021_v39 = vpop.f32.mrb[183].mxu0  ;;  %v16265_v34 = vadd.f32 %v6071_v55, %v18297_v59  ;;  %v6072_v28 = vmul.f32 0.17677669, %v11365_v24 }
0x1197   :  { %v16269_v10 = vadd.f32 %v6069_v50, %v18298_v38 }
0x1198   :  { %6103 = vmax.xlane.f32.xlu0 %v16261_v40  ;;  %v16277_v55 = vadd.f32 %v6072_v28, %v18300_v12 }
0x119b   :  { %v11368_v13 = vpop.f32.mrb[184].mxu0 }
0x119c   :  { %v6075_v30 = vmul.f32 0.17677669, %v11368_v13  ;;  %v6034_v33 = vpop.f32.mrb[185].mxu0  ;;  %6109 = vmax.xlane.f32.xlu0 %v16265_v34  ;;  %v6070_v13 = vmul.f32 0.17677669, %v6021_v39 }
0x119d   :  { %v11369_v43 = vpop.f32.mrb[186].mxu0  ;;  %v6073_v60 = vmul.f32 0.17677669, %v6034_v33 }
0x119e   :  { %v16272_v48 = vadd.f32 %v6075_v30, %v18299_v62  ;;  %v6037_v44 = vpop.f32.mrb[187].mxu0  ;;  %v6076_v58 = vmul.f32 0.17677669, %v11369_v43  ;;  %v18302_v30 = vld [vmem:[#allocation79_spill] sm:$0xff]  ;;  %v18304_v43 = vld [vmem:[#allocation76_spill] sm:$0xff] }
0x119f   :  { %v16280_v25 = vadd.f32 %v6073_v60, %v18301_v23  ;;  %v16285_v36 = vadd.f32 %v6070_v13, %v18302_v30  ;;  %v6074_v28 = vmul.f32 0.17677669, %v6037_v44 }
0x11a0   :  { %6105 = vmax.xlane.f32.xlu0 %v16269_v10  ;;  %6117 = vmax.xlane.f32.xlu1 %v16272_v48  ;;  %v16288_v31 = vadd.f32 %v6076_v58, %v18303_v45  ;;  %v18306_v58 = vld [vmem:[#allocation78_spill] sm:$0xff] }
0x11a1   :  { %v16293_v60 = vadd.f32 %v6074_v28, %v18304_v43 }
0x11a3   :  { %v11372_v50 = vpop.f32.mrb[188].mxu0 }
0x11a4   :  { %6111 = vmax.xlane.f32.xlu0 %v16277_v55  ;;  %6113 = vmax.xlane.f32.xlu1 %v16280_v25  ;;  %v6050_v24 = vpop.f32.mrb[189].mxu0  ;;  %v6079_v57 = vmul.f32 0.17677669, %v11372_v50  ;;  %v18308_v50 = vld [vmem:[#allocation82_spill] sm:$0xff] }
0x11a5   :  { %v11373_v33 = vpop.f32.mrb[190].mxu0  ;;  %v6077_v44 = vmul.f32 0.17677669, %v6050_v24 }
0x11a6   :  { %v6080_v2 = vmul.f32 0.17677669, %v11373_v33  ;;  %v6053_v39 = vpop.f32.mrb[191].mxu0  ;;  %v16301_v13 = vadd.f32 %v6079_v57, %v18306_v58  ;;  %v18307_v33 = vld [vmem:[#allocation85_spill] sm:$0xff] }
0x11a7   :  { %v16305_v63 = vadd.f32 %v6077_v44, %v18307_v33  ;;  %v6078_v54 = vmul.f32 0.17677669, %v6053_v39 }
0x11a8   :  { %6107 = vmax.xlane.f32.xlu0 %v16285_v36  ;;  %6119 = vmax.xlane.f32.xlu1 %v16288_v31  ;;  %v16296_v20 = vadd.f32 %v6080_v2, %v18305_v8 }
0x11a9   :  { %v16309_v28 = vadd.f32 %v6078_v54, %v18308_v50 }
0x11ac   :  { %6115 = vmax.xlane.f32.xlu0 %v16293_v60  ;;  %6127 = vmax.xlane.f32.xlu1 %v16296_v20 }
0x11b0   :  { %6125 = vmax.xlane.f32.xlu0 %v16301_v13 }
0x11b4   :  { %6121 = vmax.xlane.f32.xlu0 %v16305_v63 }
0x11b8   :  { %6123 = vmax.xlane.f32.xlu0 %v16309_v28 }
0x11fe   :  { %v11424_v2 = vpop.f32.mrb[192].mxu0 }
0x11ff   :  { %v6549_v16 = vmul.f32 0.17677669, %v11424_v2  ;;  %v6484_v0 = vpop.f32.mrb[193].mxu0 }
0x1200   :  { %v6547_v37 = vmul.f32 0.17677669, %v6484_v0  ;;  %v11425_v57 = vpop.f32.mrb[194].mxu0 }
0x1201   :  { %v16313_v24 = vadd.f32 %v6549_v16, %v18230_v9  ;;  %v6550_v18 = vmul.f32 0.17677669, %v11425_v57  ;;  %v6487_v15 = vpop.f32.mrb[195].mxu0 }
0x1202   :  { %v16316_v44 = vadd.f32 %v6547_v37, %v18225_v4  ;;  %v6548_v39 = vmul.f32 0.17677669, %v6487_v15 }
0x1203   :  { %6583 = vmax.xlane.f32.xlu1 %v16313_v24  ;;  %v16321_v54 = vadd.f32 %v6550_v18, %v18296_v42 }
0x1204   :  { %6579 = vmax.xlane.f32.xlu0 %v16316_v44  ;;  %v16325_v16 = vadd.f32 %v6548_v39, %v18229_v1 }
0x1206   :  { %v11428_v2 = vpop.f32.mrb[196].mxu0 }
0x1207   :  { %6585 = vmax.xlane.f32.xlu1 %v16321_v54  ;;  %v6500_v0 = vpop.f32.mrb[197].mxu0  ;;  %v6553_v57 = vmul.f32 0.17677669, %v11428_v2 }
0x1208   :  { %v11429_v29 = vpop.f32.mrb[198].mxu0  ;;  %v6551_v15 = vmul.f32 0.17677669, %v6500_v0 }
0x1209   :  { %v6503_v46 = vpop.f32.mrb[199].mxu0  ;;  %v16332_v18 = vadd.f32 %v6553_v57, %v18297_v59 }
0x120a   :  { %v6552_v37 = vmul.f32 0.17677669, %v6503_v46  ;;  %v16337_v2 = vadd.f32 %v6551_v15, %v18298_v38  ;;  %v6554_v46 = vmul.f32 0.17677669, %v11429_v29 }
0x120b   :  { %6581 = vmax.xlane.f32.xlu1 %v16325_v16 }
0x120c   :  { %v16329_v47 = vadd.f32 %v6552_v37, %v18302_v30  ;;  %v16344_v0 = vadd.f32 %v6554_v46, %v18300_v12 }
0x120e   :  { %6589 = vmax.xlane.f32.xlu0 %v16329_v47  ;;  %v11432_v42 = vpop.f32.mrb[200].mxu0 }
0x120f   :  { %6591 = vmax.xlane.f32.xlu1 %v16332_v18  ;;  %v6516_v9 = vpop.f32.mrb[201].mxu0  ;;  %v6557_v57 = vmul.f32 0.17677669, %v11432_v42 }
0x1210   :  { %v11433_v39 = vpop.f32.mrb[202].mxu0 }
0x1211   :  { %v6558_v4 = vmul.f32 0.17677669, %v11433_v39  ;;  %v6519_v1 = vpop.f32.mrb[203].mxu0 }
0x1212   :  { %v6556_v30 = vmul.f32 0.17677669, %v6519_v1  ;;  %v6555_v1 = vmul.f32 0.17677669, %v6516_v9 }
0x1213   :  { %v16340_v37 = vadd.f32 %v6558_v4, %v18303_v45  ;;  %6587 = vmax.xlane.f32.xlu1 %v16337_v2  ;;  %v16352_v4 = vadd.f32 %v6557_v57, %v18299_v62 }
0x1214   :  { %v16348_v41 = vadd.f32 %v6556_v30, %v18304_v43  ;;  %v16357_v42 = vadd.f32 %v6555_v1, %v18301_v23 }
0x1215   :  { %6601 = vmax.xlane.f32.xlu0 %v16340_v37 }
0x1216   :  { %v11436_v59 = vpop.f32.mrb[204].mxu0 }
0x1217   :  { %6593 = vmax.xlane.f32.xlu1 %v16344_v0  ;;  %v6532_v29 = vpop.f32.mrb[205].mxu0  ;;  %v6561_v46 = vmul.f32 0.17677669, %v11436_v59 }
0x1218   :  { %v11437_v15 = vpop.f32.mrb[206].mxu0  ;;  %v6559_v43 = vmul.f32 0.17677669, %v6532_v29 }
0x1219   :  { %6597 = vmax.xlane.f32.xlu0 %v16348_v41  ;;  %v6535_v39 = vpop.f32.mrb[207].mxu0  ;;  %v16361_v45 = vadd.f32 %v6561_v46, %v18306_v58  ;;  %v16372_v46 = vpop.permute.xlu1 %6751  ;;  %v6562_v14 = vmul.f32 0.17677669, %v11437_v15 }
0x121a   :  { %v16365_v9 = vadd.f32 %v6559_v43, %v18307_v33  ;;  %18309 = vst [vmem:[#allocation33_spill] sm:$0xff] %v16372_v46 }
0x121b   :  { %6599 = vmax.xlane.f32.xlu1 %v16352_v4 }
0x121d   :  { %v6102_v30 = vpop.xlane.xlu0 %6101 }
0x121e   :  { %v6131_v46 = vsub.f32 %v16249_v56, %v6102_v30 }
0x121f   :  { %6595 = vmax.xlane.f32.xlu1 %v16357_v42 }
0x1220   :  { %v6100_v58 = vpop.xlane.xlu1 %6099 }
0x1221   :  { %v6098_v57 = vpop.xlane.xlu0 %6097  ;;  %v6130_v5 = vsub.f32 %v16253_v32, %v6100_v58  ;;  %v6149_v58 = vmul.f32 1.442695, %v6131_v46 }
0x1222   :  { %v6129_v56 = vsub.f32 %v16256_v35, %v6098_v57 }
0x1223   :  { %6607 = vmax.xlane.f32.xlu1 %v16361_v45 }
0x1225   :  { %v6104_v12 = vpop.xlane.xlu0 %6103 }
0x1226   :  { %v6132_v43 = vsub.f32 %v16261_v40, %v6104_v12  ;;  %v6147_v40 = vmul.f32 1.442695, %v6130_v5 }
0x1227   :  { %6603 = vmax.xlane.f32.xlu1 %v16365_v9 }
0x1229   :  { %v6110_v59 = vpop.xlane.xlu0 %6109 }
0x122d   :  { %v6106_v1 = vpop.xlane.xlu0 %6105  ;;  %v16377_v33 = vpop.xlane.xlu1 %6117 }
0x122f   :  { %7793 = vrot.lane.b32.xlu0 %v15989_v61, %s13037_s8 }
0x1231   :  { %v6112_v29 = vpop.xlane.xlu0 %6111  ;;  %v16387_v53 = vpop.xlane.xlu1 %6113 }
0x1232   :  { %v6136_v12 = vsub.f32 %v16277_v55, %v6112_v29 }
0x1234   :  { %v6159_v5 = vmul.f32 1.442695, %v6136_v12 }
0x1235   :  { %v6108_v38 = vpop.xlane.xlu0 %6107  ;;  %v6120_v29 = vpop.xlane.xlu1 %6119 }
0x1236   :  { %v6134_v30 = vsub.f32 %v16285_v36, %v6108_v38  ;;  %v6140_v57 = vsub.f32 %v16288_v31, %v6120_v29 }
0x1238   :  { %7791 = vrot.lane.b32.xlu1 %v15969_v6, %s13037_s8  ;;  %v6151_v6 = vmul.f32 1.442695, %v6132_v43  ;;  %v6135_v43 = vsub.f32 %v16265_v34, %v6110_v59  ;;  %v6155_v46 = vmul.f32 1.442695, %v6134_v30  ;;  %v6167_v59 = vmul.f32 1.442695, %v6140_v57 }
0x123a   :  { %12464 = vpow2.f32 %v6151_v6 }
0x123b   :  { %12466 = vpow2.f32 %v6147_v40  ;;  %v6133_v40 = vsub.f32 %v16269_v10, %v6106_v1 }
0x123c   :  { %12468 = vpow2.f32 %v6149_v58  ;;  %v6128_v58 = vpop.xlane.xlu1 %6127 }
0x123d   :  { %12470 = vpow2.f32 %v6159_v5  ;;  %v6139_v5 = vsub.f32 %v16272_v48, %v16377_v33  ;;  %v6153_v30 = vmul.f32 1.442695, %v6133_v40  ;;  %v6144_v1 = vsub.f32 %v16296_v20, %v6128_v58 }
0x123e   :  { %v6137_v33 = vsub.f32 %v16280_v25, %v16387_v53 }
0x123f   :  { %v6165_v48 = vmul.f32 1.442695, %v6139_v5 }
0x1242   :  { %v16374_v62 = vpop.f32.mrb[208].mxu0 }
0x1243   :  { %18310 = vst [vmem:[#allocation16_spill] sm:$0xff] %v16374_v62  ;;  %v16379_v23 = vpop.f32.mrb[209].mxu0  ;;  %v6116_v62 = vpop.xlane.xlu0 %6115 }
0x1244   :  { %18311 = vst [vmem:[#allocation86_spill] sm:$0xff] %v16379_v23  ;;  %v16381_v11 = vpop.f32.mrb[210].mxu0  ;;  %v16416_v38 = vpop.eup %12464  ;;  %v6138_v31 = vsub.f32 %v16293_v60, %v6116_v62 }
0x1245   :  { %18312 = vst [vmem:[#allocation87_spill] sm:$0xff] %v16381_v11  ;;  %v16383_v61 = vpop.f32.mrb[211].mxu0  ;;  %v16395_v11 = vadd.f32 %v6562_v14, %v18305_v8 }
0x1246   :  { %18313 = vst [vmem:[#allocation88_spill] sm:$0xff] %v16383_v61  ;;  %v6560_v61 = vmul.f32 0.17677669, %v6535_v39  ;;  %v6145_v39 = vmul.f32 1.442695, %v6129_v56  ;;  %v16423_v56 = vpop.eup %12466 }
0x1247   :  { %v6126_v14 = vpop.xlane.xlu0 %6125  ;;  %v16430_v10 = vpop.eup %12468 }
0x1248   :  { %v16405_v55 = vadd.f32 %v6560_v61, %v18308_v50  ;;  %12472 = vpow2.f32 %v6145_v39  ;;  %v6157_v61 = vmul.f32 1.442695, %v6135_v43  ;;  %v6163_v39 = vmul.f32 1.442695, %v6138_v31  ;;  %v16438_v57 = vpop.eup %12470 }
0x1249   :  { %12474 = vpow2.f32 %v6155_v46  ;;  %v6161_v31 = vmul.f32 1.442695, %v6137_v33  ;;  %v6143_v58 = vsub.f32 %v16301_v13, %v6126_v14 }
0x124a   :  { %v16389_v26 = vpop.f32.mrb[212].mxu0  ;;  %12476 = vpow2.f32 %v6157_v61  ;;  %v6175_v61 = vmul.f32 1.442695, %v6144_v1 }
0x124b   :  { %v16392_v23 = vpop.f32.mrb[213].mxu0  ;;  %v6122_v34 = vpop.xlane.xlu0 %6121  ;;  %12478 = vpow2.f32 %v6167_v59 }
0x124c   :  { %v16397_v32 = vpop.f32.mrb[214].mxu0  ;;  %12480 = vpow2.f32 %v6153_v30  ;;  %v6141_v30 = vsub.f32 %v16305_v63, %v6122_v34 }
0x124d   :  { %v16400_v15 = vpop.f32.mrb[215].mxu0  ;;  %12482 = vpow2.f32 %v6163_v39 }
0x124e   :  { %6609 = vmax.xlane.f32.xlu0 %v16395_v11  ;;  %12484 = vpow2.f32 %v6165_v48  ;;  %v6169_v14 = vmul.f32 1.442695, %v6141_v30 }
0x124f   :  { %v6124_v62 = vpop.xlane.xlu0 %6123  ;;  %12486 = vpow2.f32 %v6175_v61 }
0x1250   :  { %v6142_v40 = vsub.f32 %v16309_v28, %v6124_v62  ;;  %12488 = vpow2.f32 %v6161_v31  ;;  %v6173_v28 = vmul.f32 1.442695, %v6143_v58 }
0x1252   :  { %6605 = vmax.xlane.f32.xlu0 %v16405_v55  ;;  %v16409_v35 = vpop.f32.mrb[216].mxu0  ;;  %v16445_v20 = vpop.eup %12472  ;;  %v6171_v53 = vmul.f32 1.442695, %v6142_v40 }
0x1253   :  { %v16412_v6 = vpop.f32.mrb[217].mxu0  ;;  %v16449_v59 = vpop.eup %12474 }
0x1254   :  { %v16414_v36 = vpop.f32.mrb[218].mxu0  ;;  %v16453_v25 = vpop.eup %12476  ;;  %12490 = vpow2.f32 %v6171_v53 }
0x1255   :  { %18314 = vst [vmem:[#allocation89_spill] sm:$0xff] %v16414_v36  ;;  %v16419_v12 = vpop.f32.mrb[219].mxu0  ;;  %v16456_v5 = vpop.eup %12478  ;;  %12492 = vpow2.f32 %v6173_v28 }
0x1256   :  { %6183 = vadd.xlane.f32.xlu0 %v16416_v38  ;;  %v16460_v1 = vpop.eup %12480  ;;  %12494 = vpow2.f32 %v6169_v14 }
0x1257   :  { %v16463_v13 = vpop.eup %12482 }
0x1258   :  { %v16466_v39 = vpop.eup %12484 }
0x1259   :  { %v16469_v62 = vpop.eup %12486 }
0x125a   :  { %v16427_v29 = vpop.f32.mrb[220].mxu0  ;;  %6179 = vadd.xlane.f32.xlu0 %v16423_v56  ;;  %v16472_v63 = vpop.eup %12488 }
0x125b   :  { %18315 = vst [vmem:[#allocation90_spill] sm:$0xff] %v16427_v29  ;;  %v16433_v43 = vpop.f32.mrb[221].mxu0 }
0x125c   :  { %18316 = vst [vmem:[#allocation91_spill] sm:$0xff] %v16433_v43  ;;  %v16435_v60 = vpop.f32.mrb[222].mxu0  ;;  %6181 = vadd.xlane.f32.xlu1 %v16430_v10 }
0x125d   :  { %18317 = vst [vmem:[#allocation92_spill] sm:$0xff] %v16435_v60  ;;  %v16442_v46 = vpop.f32.mrb[223].mxu0 }
0x125e   :  { %18318 = vst [vmem:[#allocation93_spill] sm:$0xff] %v16442_v46  ;;  %6191 = vadd.xlane.f32.xlu0 %v16438_v57  ;;  %v16475_v34 = vpop.eup %12490 }
0x125f   :  { %v16478_v48 = vpop.eup %12492 }
0x1260   :  { %6177 = vadd.xlane.f32.xlu1 %v16445_v20  ;;  %v16481_v33 = vpop.eup %12494 }
0x1262   :  { %6187 = vadd.xlane.f32.xlu0 %v16449_v59 }
0x1264   :  { %6189 = vadd.xlane.f32.xlu1 %v16453_v25 }
0x1266   :  { %6199 = vadd.xlane.f32.xlu0 %v16456_v5 }
0x1268   :  { %6185 = vadd.xlane.f32.xlu1 %v16460_v1 }
0x126a   :  { %6195 = vadd.xlane.f32.xlu0 %v16463_v13 }
0x126c   :  { %6197 = vadd.xlane.f32.xlu1 %v16466_v39 }
0x126e   :  { %6207 = vadd.xlane.f32.xlu0 %v16469_v62 }
0x1270   :  { %6193 = vadd.xlane.f32.xlu1 %v16472_v63 }
0x1272   :  { %6203 = vadd.xlane.f32.xlu0 %v16475_v34 }
0x1274   :  { %6205 = vadd.xlane.f32.xlu1 %v16478_v48 }
0x1278   :  { %6201 = vadd.xlane.f32.xlu1 %v16481_v33 }
0x1290   :  { %v6584_v61 = vpop.xlane.xlu1 %6583 }
0x1291   :  { %v6613_v40 = vsub.f32 %v16313_v24, %v6584_v61  ;;  %v6580_v31 = vpop.xlane.xlu0 %6579 }
0x1292   :  { %v6611_v58 = vsub.f32 %v16316_v44, %v6580_v31 }
0x1293   :  { %v6631_v53 = vmul.f32 1.442695, %v6613_v40 }
0x1294   :  { %v6586_v28 = vpop.xlane.xlu1 %6585  ;;  %v6627_v30 = vmul.f32 1.442695, %v6611_v58 }
0x1295   :  { %12496 = vpow2.f32 %v6631_v53  ;;  %v6614_v14 = vsub.f32 %v16321_v54, %v6586_v28 }
0x1296   :  { %12498 = vpow2.f32 %v6627_v30 }
0x1297   :  { %v6633_v50 = vmul.f32 1.442695, %v6614_v14 }
0x1298   :  { %v6582_v8 = vpop.xlane.xlu1 %6581 }
0x1299   :  { %v6612_v60 = vsub.f32 %v16325_v16, %v6582_v8  ;;  %12500 = vpow2.f32 %v6633_v50 }
0x129b   :  { %v6590_v46 = vpop.xlane.xlu0 %6589  ;;  %v6629_v29 = vmul.f32 1.442695, %v6612_v60 }
0x129c   :  { %v6616_v43 = vsub.f32 %v16329_v47, %v6590_v46  ;;  %v6592_v36 = vpop.xlane.xlu1 %6591 }
0x129d   :  { %v6617_v24 = vsub.f32 %v16332_v18, %v6592_v36  ;;  %12502 = vpow2.f32 %v6629_v29 }
0x129e   :  { %v6637_v40 = vmul.f32 1.442695, %v6616_v43 }
0x129f   :  { %v16490_v44 = vpop.eup %12496  ;;  %v6639_v61 = vmul.f32 1.442695, %v6617_v24 }
0x12a0   :  { %v6588_v31 = vpop.xlane.xlu1 %6587  ;;  %6663 = vadd.xlane.f32.xlu0 %v16490_v44  ;;  %v16494_v16 = vpop.eup %12498 }
0x12a1   :  { %12504 = vpow2.f32 %v6639_v61  ;;  %v6615_v54 = vsub.f32 %v16337_v2, %v6588_v31 }
0x12a2   :  { %v6602_v8 = vpop.xlane.xlu0 %6601  ;;  %12506 = vpow2.f32 %v6637_v40 }
0x12a3   :  { %v6635_v60 = vmul.f32 1.442695, %v6615_v54  ;;  %v16498_v36 = vpop.eup %12500 }
0x12a4   :  { %v6594_v47 = vpop.xlane.xlu1 %6593  ;;  %6659 = vadd.xlane.f32.xlu0 %v16494_v16 }
0x12a5   :  { %12508 = vpow2.f32 %v6635_v60  ;;  %v6618_v50 = vsub.f32 %v16344_v0, %v6594_v47  ;;  %v6622_v0 = vsub.f32 %v16340_v37, %v6602_v8 }
0x12a6   :  { %v6598_v18 = vpop.xlane.xlu0 %6597 }
0x12a7   :  { %v6641_v29 = vmul.f32 1.442695, %v6618_v50  ;;  %v6620_v43 = vsub.f32 %v16348_v41, %v6598_v18  ;;  %v16503_v53 = vpop.eup %12502  ;;  %v6649_v40 = vmul.f32 1.442695, %v6622_v0 }
0x12a8   :  { %v6600_v46 = vpop.xlane.xlu1 %6599  ;;  %6665 = vadd.xlane.f32.xlu0 %v16498_v36 }
0x12a9   :  { %12510 = vpow2.f32 %v6641_v29  ;;  %v6645_v2 = vmul.f32 1.442695, %v6620_v43  ;;  %v6621_v58 = vsub.f32 %v16352_v4, %v6600_v46 }
0x12aa   :  { %v7794_v43 = vpop.permute.xlu0 %7793 }
0x12ab   :  { %v16505_v28 = vpop.eup %12504  ;;  %12512 = vpow2.f32 %v6645_v2  ;;  %v6647_v30 = vmul.f32 1.442695, %v6621_v58  ;;  %v7836_v58 = vsel %vm1725_vm7, %v7794_v43, 0 }
0x12ac   :  { %v6596_v14 = vpop.xlane.xlu1 %6595  ;;  %6671 = vadd.xlane.f32.xlu1 %v16505_v28  ;;  %6661 = vadd.xlane.f32.xlu0 %v16503_v53  ;;  %v16511_v24 = vpop.eup %12506 }
0x12ad   :  { %12514 = vpow2.f32 %v6647_v30  ;;  %v6619_v41 = vsub.f32 %v16357_v42, %v6596_v14 }
0x12af   :  { %v16513_v61 = vpop.eup %12508  ;;  %v6643_v4 = vmul.f32 1.442695, %v6619_v41 }
0x12b0   :  { %v6608_v31 = vpop.xlane.xlu1 %6607  ;;  %6667 = vadd.xlane.f32.xlu1 %v16513_v61  ;;  %6669 = vadd.xlane.f32.xlu0 %v16511_v24 }
0x12b1   :  { %12516 = vpow2.f32 %v6643_v4  ;;  %v6625_v37 = vsub.f32 %v16361_v45, %v6608_v31 }
0x12b2   :  { %12518 = vpow2.f32 %v6649_v40 }
0x12b3   :  { %v16518_v54 = vpop.eup %12510  ;;  %v6655_v8 = vmul.f32 1.442695, %v6625_v37 }
0x12b4   :  { %v6604_v60 = vpop.xlane.xlu1 %6603  ;;  %6673 = vadd.xlane.f32.xlu1 %v16518_v54 }
0x12b5   :  { %v16521_v42 = vpop.eup %12512  ;;  %12520 = vpow2.f32 %v6655_v8  ;;  %v6623_v47 = vsub.f32 %v16365_v9, %v6604_v60 }
0x12b6   :  { %6677 = vadd.xlane.f32.xlu0 %v16521_v42 }
0x12b7   :  { %v16525_v50 = vpop.eup %12514  ;;  %v6651_v18 = vmul.f32 1.442695, %v6623_v47 }
0x12b8   :  { %v7792_v29 = vpop.permute.xlu1 %7791  ;;  %6679 = vadd.xlane.f32.xlu1 %v16525_v50 }
0x12b9   :  { %12522 = vpow2.f32 %v6651_v18  ;;  %11855 = vmatprep.subr.msk.bf16.mxu0 %vm1725_vm7, %v7792_v29  ;;  %v7833_v45 = vsel %vm1725_vm7, %v7792_v29, 0 }
0x12ba   :  { %11597 = vmatpush3.bf16.xpose.msra.mxu0 %v7833_v45 }
0x12bb   :  { %v16530_v46 = vpop.eup %12516  ;;  %11856 = vmatprep.subr.msk.bf16.mxu0 %vm1725_vm7, %v7794_v43 }
0x12bc   :  { %6675 = vadd.xlane.f32.xlu1 %v16530_v46  ;;  %v16534_v9 = vpop.eup %12518 }
0x12bf   :  { %v16536_v2 = vpop.eup %12520 }
0x12c0   :  { %6681 = vadd.xlane.f32.xlu1 %v16534_v9  ;;  %6687 = vadd.xlane.f32.xlu0 %v16536_v2 }
0x12c2   :  { %11599 = vmatpush3.bf16.xpose.msra.mxu0 %v7836_v58 }
0x12c3   :  { %v16541_v30 = vpop.eup %12522 }
0x12c4   :  { %6683 = vadd.xlane.f32.xlu1 %v16541_v30 }
0x12d6   :  { %7797 = vrot.lane.b32.xlu0 %v16029_v49, %s13037_s8 }
0x12da   :  { %7801 = vrot.lane.b32.xlu0 %v16069_v27, %s13037_s8 }
0x12db   :  { %v6610_v0 = vpop.xlane.xlu0 %6609 }
0x12dc   :  { %v6626_v14 = vsub.f32 %v16395_v11, %v6610_v0 }
0x12de   :  { %v6657_v41 = vmul.f32 1.442695, %v6626_v14  ;;  %7773 = vrot.lane.b32.xlu0 %v15942_v17, %s13037_s8 }
0x12df   :  { %v6606_v4 = vpop.xlane.xlu0 %6605 }
0x12e0   :  { %12524 = vpow2.f32 %v6657_v41  ;;  %v6624_v60 = vsub.f32 %v16405_v55, %v6606_v4 }
0x12e2   :  { %v6653_v27 = vmul.f32 1.442695, %v6624_v60 }
0x12e3   :  { %v6184_v40 = vpop.xlane.xlu0 %6183 }
0x12e7   :  { %v6180_v31 = vpop.xlane.xlu0 %6179 }
0x12e9   :  { %v6182_v37 = vpop.xlane.xlu1 %6181 }
0x12ea   :  { %v16551_v8 = vpop.eup %12524  ;;  %12526 = vrcp.f32 %v6182_v37 }
0x12eb   :  { %6689 = vadd.xlane.f32.xlu1 %v16551_v8  ;;  %v6192_v49 = vpop.xlane.xlu0 %6191  ;;  %12528 = vrcp.f32 %v6180_v31 }
0x12ec   :  { %12530 = vrcp.f32 %v6184_v40 }
0x12ed   :  { %v6178_v11 = vpop.xlane.xlu1 %6177 }
0x12ee   :  { %12532 = vrcp.f32 %v6178_v11 }
0x12ef   :  { %v6188_v47 = vpop.xlane.xlu0 %6187  ;;  %12534 = vpow2.f32 %v6653_v27 }
0x12f1   :  { %v6190_v17 = vpop.xlane.xlu1 %6189 }
0x12f2   :  { %12536 = vrcp.f32 %v6190_v17 }
0x12f3   :  { %v6200_v18 = vpop.xlane.xlu0 %6199  ;;  %12538 = vrcp.f32 %v6188_v47 }
0x12f4   :  { %v12527_v29 = vpop.eup %12526  ;;  %12540 = vrcp.f32 %v6192_v49 }
0x12f5   :  { %v6186_v45 = vpop.xlane.xlu1 %6185  ;;  %v12529_v43 = vpop.eup %12528  ;;  %v6227_v14 = vmul.f32 %v12527_v29, %v16430_v10 }
0x12f6   :  { %12542 = vrcp.f32 %v6186_v45  ;;  %v12531_v55 = vpop.eup %12530  ;;  %v6226_v40 = vmul.f32 %v12529_v43, %v16423_v56 }
0x12f7   :  { %v6196_v58 = vpop.xlane.xlu0 %6195  ;;  %v6228_v31 = vmul.f32 %v12531_v55, %v16416_v38 }
0x12f8   :  { %v12533_v0 = vpop.eup %12532 }
0x12f9   :  { %v6198_v41 = vpop.xlane.xlu1 %6197  ;;  %v6225_v4 = vmul.f32 %v12533_v0, %v16445_v20  ;;  %v16559_v11 = vpop.eup %12534  ;;  %v6242_v49 = vpack.c.bf16 %v6228_v31, %v6227_v14 }
0x12fa   :  { %12544 = vrcp.f32 %v6198_v41  ;;  %v18320_v41 = vld [vmem:[#allocation32_spill] sm:$0xff] }
0x12fb   :  { %v6208_v37 = vpop.xlane.xlu0 %6207  ;;  %v6241_v60 = vpack.c.bf16 %v6226_v40, %v6225_v4  ;;  %12546 = vrcp.f32 %v6196_v58 }
0x12fc   :  { %7795 = vrot.lane.b32.xlu1 %v16009_v52, %s13037_s8  ;;  %v12537_v27 = vpop.eup %12536  ;;  %12548 = vrcp.f32 %v6200_v18 }
0x12fd   :  { %v6194_v10 = vpop.xlane.xlu1 %6193  ;;  %6685 = vadd.xlane.f32.xlu0 %v16559_v11  ;;  %11390 = vmatprep.mubr.bf16.mxu1 %v6241_v60  ;;  %v12539_v20 = vpop.eup %12538  ;;  %v6231_v52 = vmul.f32 %v12537_v27, %v16453_v25 }
0x12fe   :  { %12550 = vrcp.f32 %v6194_v10  ;;  %11391 = vmatmul.mubr.bf16.vlgmr.msra.gmra.mrb[160].mxu1 %v6242_v49  ;;  %v12541_v38 = vpop.eup %12540  ;;  %v6230_v29 = vmul.f32 %v12539_v20, %v16449_v59  ;;  %v18323_v49 = vld [vmem:[#allocation19_spill] sm:$0xff]  ;;  %v18324_v10 = vld [vmem:[#allocation33_spill] sm:$0xff] }
0x12ff   :  { %11439 = vmatpush3.bf16.msra.mxu1 %v16225_v19  ;;  %v6204_v47 = vpop.xlane.xlu0 %6203  ;;  %v6232_v45 = vmul.f32 %v12541_v38, %v16438_v57 }
0x1300   :  { %v12543_v56 = vpop.eup %12542  ;;  %11440 = vmatprep.subr.bf16.mxu1 %v16217_v21  ;;  %7799 = vrot.lane.b32.xlu1 %v16049_v51, %s13037_s8 }
0x1301   :  { %v6206_v17 = vpop.xlane.xlu1 %6205  ;;  %v6229_v18 = vmul.f32 %v12543_v56, %v16460_v1  ;;  %v6244_v51 = vpack.c.bf16 %v6232_v45, %v6231_v52  ;;  %v18328_v52 = vld [vmem:[#allocation74_spill] sm:$0xff] }
0x1302   :  { %12552 = vrcp.f32 %v6206_v17  ;;  %v18329_v17 = vld [vmem:[#allocation16_spill] sm:$0xff] }
0x1303   :  { %11441 = vmatpush3.bf16.msra.mxu1 %v16217_v21  ;;  %v6243_v19 = vpack.c.bf16 %v6230_v29, %v6229_v18  ;;  %12554 = vrcp.f32 %v6204_v47  ;;  %v18319_v21 = vld [vmem:[#allocation62_spill] sm:$0xff]  ;;  %v7313_v18 = vmul.f32 0.17677669, %v18329_v17  ;;  %v18330_v29 = vld [vmem:[#allocation71_spill] sm:$0xff] }
0x1304   :  { %11442 = vmatprep.subr.bf16.mxu1 %v16232_v22  ;;  %7803 = vrot.lane.b32.xlu1 %v16091_v7, %s13037_s8  ;;  %v12545_v25 = vpop.eup %12544  ;;  %12556 = vrcp.f32 %v6208_v37 }
0x1305   :  { %v6202_v43 = vpop.xlane.xlu1 %6201  ;;  %11394 = vmatprep.mubr.bf16.mxu1 %v6243_v19  ;;  %v12547_v1 = vpop.eup %12546  ;;  %v6235_v55 = vmul.f32 %v12545_v25, %v16466_v39 }
0x1306   :  { %12558 = vrcp.f32 %v6202_v43  ;;  %11395 = vmatmul.mubr.bf16.gmra.mrb[164].mxu1 %v6244_v51  ;;  %v12549_v59 = vpop.eup %12548  ;;  %v6234_v58 = vmul.f32 %v12547_v1, %v16463_v13  ;;  %v18322_v13 = vld [vmem:[#allocation31_spill] sm:$0xff]  ;;  %v18331_v51 = vld [vmem:[#allocation70_spill] sm:$0xff] }
0x1307   :  { %11443 = vmatpush3.bf16.msra.mxu1 %v16232_v22  ;;  %v6236_v0 = vmul.f32 %v12549_v59, %v16456_v5  ;;  %v18321_v22 = vld [vmem:[#allocation20_spill] sm:$0xff]  ;;  %v16613_v25 = vadd.f32 %v7313_v18, %v18331_v51  ;;  %v18332_v43 = vld [vmem:[#allocation87_spill] sm:$0xff] }
0x1308   :  { %v12551_v57 = vpop.eup %12550  ;;  %11444 = vmatprep.subr.bf16.mxu1 %v16236_v3  ;;  %7775 = vrot.lane.b32.xlu1 %v18319_v21, %s13037_s8  ;;  %v7314_v1 = vmul.f32 0.17677669, %v18332_v43 }
0x1309   :  { %v6233_v7 = vmul.f32 %v12551_v57, %v16472_v63  ;;  %v6246_v4 = vpack.c.bf16 %v6236_v0, %v6235_v55  ;;  %v18333_v57 = vld [vmem:[#allocation72_spill] sm:$0xff] }
0x130a   :  { %v16618_v21 = vadd.f32 %v7314_v1, %v18333_v57 }
0x130b   :  { %11445 = vmatpush3.bf16.msra.mxu1 %v16236_v3  ;;  %v6245_v14 = vpack.c.bf16 %v6234_v58, %v6233_v7 }
0x130c   :  { %11446 = vmatprep.subr.bf16.mxu1 %v18320_v41  ;;  %7779 = vrot.lane.b32.xlu1 %v18321_v22, %s13037_s8  ;;  %v12553_v40 = vpop.eup %12552 }
0x130d   :  { %11398 = vmatprep.mubr.bf16.mxu1 %v6245_v14  ;;  %v12555_v31 = vpop.eup %12554  ;;  %v6239_v5 = vmul.f32 %v12553_v40, %v16478_v48  ;;  %v18325_v48 = vld [vmem:[#allocation34_spill] sm:$0xff] }
0x130e   :  { %11399 = vmatmul.mubr.bf16.gmra.mrb[168].mxu1 %v6246_v4  ;;  %v12557_v39 = vpop.eup %12556  ;;  %v6238_v37 = vmul.f32 %v12555_v31, %v16475_v34  ;;  %v18326_v34 = vld [vmem:[#allocation88_spill] sm:$0xff] }
0x130f   :  { %11447 = vmatpush3.bf16.msra.mxu1 %v18320_v41  ;;  %v6240_v60 = vmul.f32 %v12557_v39, %v16469_v62  ;;  %v18327_v62 = vld [vmem:[#allocation86_spill] sm:$0xff]  ;;  %v18334_v41 = vld [vmem:[#allocation24_spill] sm:$0xff] }
0x1310   :  { %v12559_v63 = vpop.eup %12558  ;;  %11448 = vmatprep.subr.bf16.mxu1 %v18322_v13  ;;  %v7311_v38 = vmul.f32 0.17677669, %v18327_v62 }
0x1311   :  { %v6237_v3 = vmul.f32 %v12559_v63, %v16481_v33  ;;  %v6248_v20 = vpack.c.bf16 %v6240_v60, %v6239_v5  ;;  %v7312_v33 = vmul.f32 0.17677669, %v18326_v34 }
0x1312   :  { %v16608_v45 = vadd.f32 %v7311_v38, %v18330_v29 }
0x1313   :  { %11449 = vmatpush3.bf16.msra.mxu1 %v18322_v13  ;;  %7777 = vrot.lane.b32.xlu0 %v18323_v49, %s13037_s8  ;;  %v6247_v27 = vpack.c.bf16 %v6238_v37, %v6237_v3  ;;  %v16604_v47 = vadd.f32 %v7312_v33, %v18328_v52 }
0x1314   :  { %11450 = vmatprep.subr.bf16.mxu1 %v18324_v10 }
0x1315   :  { %11402 = vmatprep.mubr.bf16.mxu1 %v6247_v27 }
0x1316   :  { %11403 = vmatmul.mubr.bf16.gmra.mrb[172].mxu1 %v6248_v20 }
0x1317   :  { %11451 = vmatpush3.bf16.msra.mxu1 %v18324_v10 }
0x1318   :  { %11452 = vmatprep.subr.bf16.mxu1 %v18325_v48 }
0x131b   :  { %11453 = vmatpush3.bf16.msra.mxu1 %v18325_v48 }
0x132d   :  { %v6664_v56 = vpop.xlane.xlu0 %6663 }
0x1330   :  { %7345 = vmax.xlane.f32.xlu1 %v16604_v47 }
0x1331   :  { %v6660_v19 = vpop.xlane.xlu0 %6659 }
0x1332   :  { %7343 = vmax.xlane.f32.xlu0 %v16608_v45 }
0x1335   :  { %v6666_v59 = vpop.xlane.xlu0 %6665 }
0x1336   :  { %7347 = vmax.xlane.f32.xlu0 %v16613_v25  ;;  %12560 = vrcp.f32 %v6666_v59 }
0x1337   :  { %12562 = vrcp.f32 %v6660_v19 }
0x1338   :  { %12564 = vrcp.f32 %v6664_v56 }
0x1339   :  { %v6672_v55 = vpop.xlane.xlu1 %6671  ;;  %v6662_v7 = vpop.xlane.xlu0 %6661 }
0x133a   :  { %7349 = vmax.xlane.f32.xlu0 %v16618_v21  ;;  %12566 = vrcp.f32 %v6662_v7 }
0x133d   :  { %v6668_v58 = vpop.xlane.xlu1 %6667  ;;  %v6670_v0 = vpop.xlane.xlu0 %6669 }
0x133e   :  { %12568 = vrcp.f32 %v6668_v58 }
0x133f   :  { %12570 = vrcp.f32 %v6670_v0 }
0x1340   :  { %12572 = vrcp.f32 %v6672_v55  ;;  %v12561_v22 = vpop.eup %12560 }
0x1341   :  { %v6674_v14 = vpop.xlane.xlu1 %6673  ;;  %7781 = vrot.lane.b32.xlu1 %v18334_v41, %s13037_s8  ;;  %v12563_v4 = vpop.eup %12562  ;;  %v6710_v39 = vmul.f32 %v12561_v22, %v16498_v36  ;;  %v7317_v41 = vmul.f32 0.17677669, %v16389_v26  ;;  %v7318_v26 = vmul.f32 0.17677669, %v16397_v32 }
0x1342   :  { %12574 = vrcp.f32 %v6674_v14  ;;  %v12565_v40 = vpop.eup %12564  ;;  %v6707_v5 = vmul.f32 %v12563_v4, %v16494_v16  ;;  %v7315_v14 = vmul.f32 0.17677669, %v16392_v23 }
0x1343   :  { %v6678_v63 = vpop.xlane.xlu0 %6677  ;;  %v6709_v37 = vmul.f32 %v12565_v40, %v16490_v44  ;;  %v7321_v40 = vmul.f32 0.17677669, %v16409_v35  ;;  %v7320_v35 = vmul.f32 0.17677669, %v16419_v12 }
0x1344   :  { %v12567_v31 = vpop.eup %12566  ;;  %12576 = vrcp.f32 %v6678_v63 }
0x1345   :  { %v6680_v13 = vpop.xlane.xlu1 %6679  ;;  %v6708_v3 = vmul.f32 %v12567_v31, %v16503_v53  ;;  %v6724_v20 = vpack.c.bf16 %v6710_v39, %v6709_v37  ;;  %v18338_v31 = vld [vmem:[#allocation83_spill] sm:$0xff] }
0x1346   :  { %v18339_v39 = vld [vmem:[#allocation79_spill] sm:$0xff] }
0x1347   :  { %v6723_v49 = vpack.c.bf16 %v6708_v3, %v6707_v5  ;;  %v18342_v3 = vld [vmem:[#allocation89_spill] sm:$0xff] }
0x1348   :  { %v12569_v60 = vpop.eup %12568  ;;  %v7322_v37 = vmul.f32 0.17677669, %v18342_v3 }
0x1349   :  { %v12571_v27 = vpop.eup %12570  ;;  %v6676_v10 = vpop.xlane.xlu1 %6675  ;;  %v6711_v48 = vmul.f32 %v12569_v60, %v16513_v61  ;;  %11454 = vmatprep.mubr.bf16.mxu1 %v6723_v49  ;;  %v18335_v61 = vld [vmem:[#allocation23_spill] sm:$0xff]  ;;  %v18343_v60 = vld [vmem:[#allocation76_spill] sm:$0xff] }
0x134a   :  { %v12573_v34 = vpop.eup %12572  ;;  %12578 = vrcp.f32 %v6676_v10  ;;  %v6712_v36 = vmul.f32 %v12571_v27, %v16511_v24  ;;  %11455 = vmatmul.mubr.bf16.vlgmr.msra.gmra.mrb[176].mxu1 %v6724_v20  ;;  %v16671_v49 = vadd.f32 %v7320_v35, %v18343_v60  ;;  %v18344_v10 = vld [vmem:[#allocation84_spill] sm:$0xff] }
0x134b   :  { %12580 = vrcp.f32 %v6680_v13  ;;  %v6713_v44 = vmul.f32 %v12573_v34, %v16505_v28  ;;  %v18340_v13 = vld [vmem:[#allocation81_spill] sm:$0xff]  ;;  %v16675_v20 = vadd.f32 %v7322_v37, %v18344_v10  ;;  %v18345_v34 = vld [vmem:[#allocation28_spill] sm:$0xff]  ;;  %v18353_v37 = vld [vmem:[#allocation82_spill] sm:$0xff] }
0x134c   :  { %v12575_v33 = vpop.eup %12574  ;;  %v6725_v16 = vpack.c.bf16 %v6712_v36, %v6711_v48  ;;  %v16660_v5 = vadd.f32 %v7321_v40, %v18340_v13  ;;  %v18351_v40 = vld [vmem:[#allocation93_spill] sm:$0xff] }
0x134d   :  { %v6682_v53 = vpop.xlane.xlu1 %6681  ;;  %v6688_v62 = vpop.xlane.xlu0 %6687  ;;  %v6714_v38 = vmul.f32 %v12575_v33, %v16518_v54 }
0x134e   :  { %12582 = vrcp.f32 %v6682_v53  ;;  %11458 = vmatprep.mubr.bf16.mxu1 %v6725_v16  ;;  %v12577_v18 = vpop.eup %12576 }
0x134f   :  { %v6726_v56 = vpack.c.bf16 %v6714_v38, %v6713_v44  ;;  %v6716_v1 = vmul.f32 %v12577_v18, %v16521_v42  ;;  %v18337_v42 = vld [vmem:[#allocation73_spill] sm:$0xff]  ;;  %v18346_v44 = vld [vmem:[#allocation27_spill] sm:$0xff] }
0x1350   :  { %7783 = vrot.lane.b32.xlu0 %v18335_v61, %s13037_s8  ;;  %v16645_v4 = vadd.f32 %v7317_v41, %v18337_v42 }
0x1351   :  { %v7798_v17 = vpop.permute.xlu0 %7797  ;;  %v6684_v32 = vpop.xlane.xlu1 %6683 }
0x1352   :  { %11459 = vmatmul.mubr.bf16.gmra.mrb[180].mxu1 %v6726_v56  ;;  %v7842_v36 = vsel %vm1725_vm7, %v7798_v17, 0 }
0x1354   :  { %v12579_v24 = vpop.eup %12578 }
0x1355   :  { %v7802_v19 = vpop.permute.xlu0 %7801  ;;  %v6715_v43 = vmul.f32 %v12579_v24, %v16530_v46  ;;  %v12581_v59 = vpop.eup %12580  ;;  %v18336_v46 = vld [vmem:[#allocation75_spill] sm:$0xff] }
0x1356   :  { %v6717_v7 = vmul.f32 %v12581_v59, %v16525_v50  ;;  %v16641_v22 = vadd.f32 %v7315_v14, %v18336_v46  ;;  %v7319_v50 = vmul.f32 0.17677669, %v16412_v6  ;;  %v7848_v18 = vsel %vm1725_vm7, %v7802_v19, 0 }
0x1357   :  { %v6727_v55 = vpack.c.bf16 %v6716_v1, %v6715_v43 }
0x1358   :  { %v12583_v28 = vpop.eup %12582  ;;  %v16652_v23 = vadd.f32 %v7319_v50, %v18338_v31  ;;  %v18350_v50 = vld [vmem:[#allocation78_spill] sm:$0xff] }
0x1359   :  { %11462 = vmatprep.mubr.bf16.mxu1 %v6727_v55  ;;  %v7774_v54 = vpop.permute.xlu0 %7773  ;;  %v6718_v58 = vmul.f32 %v12583_v28, %v16534_v9  ;;  %v7316_v9 = vmul.f32 0.17677669, %v16400_v15  ;;  %v18341_v15 = vld [vmem:[#allocation77_spill] sm:$0xff]  ;;  %v12000_v28 = vld [vmem:[#allocation7 + $0x50] sm:$0xff]  }
0x135a   :  { %11610 = vmatprep.mubr.msk.bf16.mxu0 %vm1725_vm7, %v7774_v54  ;;  %v16664_v6 = vadd.f32 %v7318_v26, %v18341_v15  ;;  %11470 = vmatprep.subr.bf16.mxu1 %v12000_v28  ;;  %v7324_v26 = vmul.f32 0.17677669, %v18351_v40 }
0x135b   :  { %v6728_v0 = vpack.c.bf16 %v6718_v58, %v6717_v7  ;;  %v16656_v63 = vadd.f32 %v7316_v9, %v18339_v39  ;;  %11471 = vmatpush3.bf16.msra.mxu1 %v12000_v28  ;;  %v12001_v58 = vld [vmem:[#allocation7 + $0x58] sm:$0xff]  }
0x135c   :  { %11472 = vmatprep.subr.bf16.mxu1 %v12001_v58 }
0x135d   :  { %11463 = vmatmul.mubr.bf16.gmra.mrb[184].mxu1 %v6728_v0 }
0x135f   :  { %11473 = vmatpush3.bf16.msra.mxu1 %v12001_v58 }
0x1365   :  { %7351 = vmax.xlane.f32.xlu1 %v16641_v22 }
0x1369   :  { %7355 = vmax.xlane.f32.xlu1 %v16645_v4 }
0x136d   :  { %7359 = vmax.xlane.f32.xlu1 %v16652_v23 }
0x136f   :  { %7353 = vmax.xlane.f32.xlu0 %v16656_v63 }
0x1371   :  { %7363 = vmax.xlane.f32.xlu1 %v16660_v5 }
0x1373   :  { %7357 = vmax.xlane.f32.xlu0 %v16664_v6 }
0x1377   :  { %7361 = vmax.xlane.f32.xlu0 %v16671_v49 }
0x1378   :  { %v6690_v27 = vpop.xlane.xlu1 %6689 }
0x1379   :  { %12584 = vrcp.f32 %v6690_v27  ;;  %v16712_v27 = vadd.f32 %v7324_v26, %v18353_v37 }
0x137a   :  { %12586 = vrcp.f32 %v6684_v32  ;;  %v18352_v32 = vld [vmem:[#allocation92_spill] sm:$0xff] }
0x137b   :  { %7365 = vmax.xlane.f32.xlu0 %v16675_v20  ;;  %12588 = vrcp.f32 %v6688_v62  ;;  %v7326_v3 = vmul.f32 0.17677669, %v18352_v32 }
0x137c   :  { %v7796_v48 = vpop.permute.xlu1 %7795 }
0x137d   :  { %11857 = vmatprep.subr.msk.bf16.mxu0 %vm1725_vm7, %v7796_v48  ;;  %v7839_v12 = vsel %vm1725_vm7, %v7796_v48, 0  ;;  %v18354_v48 = vld [vmem:[#allocation80_spill] sm:$0xff] }
0x137e   :  { %11601 = vmatpush3.bf16.xpose.msra.mxu0 %v7839_v12  ;;  %v16716_v12 = vadd.f32 %v7326_v3, %v18354_v48 }
0x137f   :  { %11858 = vmatprep.subr.msk.bf16.mxu0 %vm1725_vm7, %v7798_v17 }
0x1380   :  { %v7800_v33 = vpop.permute.xlu1 %7799 }
0x1381   :  { %v7845_v53 = vsel %vm1725_vm7, %v7800_v33, 0 }
0x1382   :  { %7785 = vrot.lane.b32.xlu1 %v18345_v34, %s13037_s8  ;;  %v16719_v34 = vld [vmem:[#allocation7 + $0x40] sm:$0xff]  }
0x1383   :  { %v12585_v38 = vpop.eup %12584  ;;  %11490 = vmatprep.subr.bf16.mxu1 %v16719_v34 }
0x1384   :  { %v12587_v56 = vpop.eup %12586  ;;  %v6722_v24 = vmul.f32 %v12585_v38, %v16551_v8  ;;  %v7804_v43 = vpop.permute.xlu1 %7803  ;;  %v18347_v8 = vld [vmem:[#allocation91_spill] sm:$0xff]  ;;  %v18357_v38 = vld [vmem:[#allocation22_spill] sm:$0xff] }
0x1385   :  { %v12589_v61 = vpop.eup %12588  ;;  %v6719_v62 = vmul.f32 %v12587_v56, %v16541_v30  ;;  %v7323_v7 = vmul.f32 0.17677669, %v18347_v8  ;;  %v18348_v30 = vld [vmem:[#allocation90_spill] sm:$0xff] }
0x1386   :  { %11603 = vmatpush3.bf16.xpose.msra.mxu0 %v7842_v36  ;;  %v6721_v59 = vmul.f32 %v12589_v61, %v16536_v2  ;;  %v7325_v0 = vmul.f32 0.17677669, %v18348_v30  ;;  %v18355_v36 = vld [vmem:[#allocation66_spill] sm:$0xff]  ;;  %v18358_v61 = vld [vmem:[#allocation29_spill] sm:$0xff] }
0x1387   :  { %11859 = vmatprep.subr.msk.bf16.mxu0 %vm1725_vm7, %v7800_v33 }
0x1388   :  { %v6730_v54 = vpack.c.bf16 %v6722_v24, %v6721_v59  ;;  %v7776_v41 = vpop.permute.xlu1 %7775  ;;  %v16705_v9 = vadd.f32 %v7325_v0, %v18350_v50 }
0x138a   :  { %v6686_v16 = vpop.xlane.xlu0 %6685 }
0x138b   :  { %12590 = vrcp.f32 %v6686_v16  ;;  %v18356_v16 = vld [vmem:[#allocation21_spill] sm:$0xff] }
0x138c   :  { %v7780_v35 = vpop.permute.xlu1 %7779 }
0x138e   :  { %11605 = vmatpush3.bf16.xpose.msra.mxu0 %v7845_v53  ;;  %v7778_v2 = vpop.permute.xlu0 %7777 }
0x138f   :  { %11860 = vmatprep.subr.msk.bf16.mxu0 %vm1725_vm7, %v7802_v19  ;;  %v7851_v19 = vsel %vm1725_vm7, %v7804_v43, 0 }
0x1391   :  { %7787 = vrot.lane.b32.xlu0 %v18346_v44, %s13037_s8 }
0x1395   :  { %v12591_v17 = vpop.eup %12590 }
0x1396   :  { %11607 = vmatpush3.bf16.xpose.msra.mxu0 %v7848_v18  ;;  %v6720_v1 = vmul.f32 %v12591_v17, %v16559_v11  ;;  %v18349_v11 = vld [vmem:[#allocation85_spill] sm:$0xff] }
0x1397   :  { %11861 = vmatprep.subr.msk.bf16.mxu0 %vm1725_vm7, %v7804_v43  ;;  %v16699_v14 = vadd.f32 %v7323_v7, %v18349_v11  ;;  %v18359_v18 = vld [vmem:[#allocation69_spill] sm:$0xff] }
0x1398   :  { %v6729_v55 = vpack.c.bf16 %v6720_v1, %v6719_v62  ;;  %v18360_v43 = vld [vmem:[#allocation25_spill] sm:$0xff]  ;;  %v18361_v1 = vld [vmem:[#allocation26_spill] sm:$0xff] }
0x139a   :  { %11466 = vmatprep.mubr.bf16.mxu1 %v6729_v55 }
0x139b   :  { %11467 = vmatmul.mubr.bf16.gmra.mrb[188].mxu1 %v6730_v54 }
0x139e   :  { %11609 = vmatpush3.bf16.xpose.msra.mxu0 %v7851_v19 }
0x13a5   :  { %11611 = vmatmul.mubr.msk.bf16.vlgmr.msra.gmra.mrb[224].mxu0 %vm1725_vm7, %v7776_v41 }
0x13a6   :  { %7367 = vmax.xlane.f32.xlu1 %v16699_v14  ;;  %11614 = vmatprep.mubr.msk.bf16.mxu0 %vm1725_vm7, %v7778_v2 }
0x13aa   :  { %7371 = vmax.xlane.f32.xlu1 %v16705_v9 }
0x13ad   :  { %11615 = vmatmul.mubr.msk.bf16.gmra.mrb[228].mxu0 %vm1725_vm7, %v7780_v35 }
0x13b0   :  { %7369 = vmax.xlane.f32.xlu0 %v16712_v27 }
0x13b4   :  { %7373 = vmax.xlane.f32.xlu0 %v16716_v12 }
0x13bb   :  { %7495 = vrot.lane.b32.xlu1 %v18355_v36, %s13029_s12 }
0x13bd   :  { %v7346_v33 = vpop.xlane.xlu1 %7345 }
0x13bf   :  { %7499 = vrot.lane.b32.xlu1 %v18356_v16, %s13029_s12  ;;  %v7344_v53 = vpop.xlane.xlu0 %7343 }
0x13c0   :  { %v7375_v26 = vsub.f32 %v16608_v45, %v7344_v53  ;;  %v7376_v45 = vsub.f32 %v16604_v47, %v7346_v33 }
0x13c1   :  { %v7782_v44 = vpop.permute.xlu1 %7781 }
0x13c2   :  { %11618 = vmatprep.mubr.msk.bf16.mxu0 %vm1725_vm7, %v7782_v44  ;;  %v7391_v41 = vmul.f32 1.442695, %v7375_v26 }
0x13c3   :  { %7501 = vrot.lane.b32.xlu1 %v18357_v38, %s13029_s12  ;;  %v7348_v56 = vpop.xlane.xlu0 %7347 }
0x13c4   :  { %v7377_v2 = vsub.f32 %v16613_v25, %v7348_v56 }
0x13c6   :  { %v7395_v35 = vmul.f32 1.442695, %v7377_v2 }
0x13c7   :  { %7507 = vrot.lane.b32.xlu1 %v18358_v61, %s13029_s12  ;;  %v7350_v17 = vpop.xlane.xlu0 %7349 }
0x13c8   :  { %12592 = vpow2.f32 %v7395_v35  ;;  %v7378_v25 = vsub.f32 %v16618_v21, %v7350_v17  ;;  %v7393_v35 = vmul.f32 1.442695, %v7376_v45 }
0x13c9   :  { %12594 = vpow2.f32 %v7391_v41 }
0x13ca   :  { %7497 = vrot.lane.b32.xlu0 %v18359_v18, %s13029_s12  ;;  %v7397_v53 = vmul.f32 1.442695, %v7378_v25 }
0x13cb   :  { %v7784_v24 = vpop.permute.xlu0 %7783 }
0x13cc   :  { %11619 = vmatmul.mubr.msk.bf16.gmra.mrb[232].mxu0 %vm1725_vm7, %v7784_v24  ;;  %12596 = vpow2.f32 %v7397_v53 }
0x13cd   :  { %12598 = vpow2.f32 %v7393_v35 }
0x13ce   :  { %7503 = vrot.lane.b32.xlu0 %v18360_v43, %s13029_s12 }
0x13d1   :  { %v16736_v62 = vpop.f32.mrb[160].mxu1 }
0x13d2   :  { %7505 = vrot.lane.b32.xlu0 %v18361_v1, %s13029_s12  ;;  %v16740_v59 = vpop.f32.mrb[161].mxu1  ;;  %v16790_v21 = vpop.eup %12592 }
0x13d3   :  { %v16742_v55 = vpop.f32.mrb[162].mxu1  ;;  %v16793_v33 = vpop.eup %12594 }
0x13d4   :  { %v16746_v54 = vpop.f32.mrb[163].mxu1 }
0x13d6   :  { %v16798_v44 = vpop.eup %12596 }
0x13d7   :  { %v16801_v30 = vpop.eup %12598 }
0x13d9   :  { %v16750_v8 = vpop.f32.mrb[164].mxu1 }
0x13da   :  { %v16752_v7 = vpop.f32.mrb[165].mxu1 }
0x13db   :  { %v16754_v58 = vpop.f32.mrb[166].mxu1 }
0x13dc   :  { %v16758_v0 = vpop.f32.mrb[167].mxu1 }
0x13e1   :  { %v16763_v40 = vpop.f32.mrb[168].mxu1 }
0x13e2   :  { %v16766_v32 = vpop.f32.mrb[169].mxu1 }
0x13e3   :  { %v16768_v3 = vpop.f32.mrb[170].mxu1 }
0x13e4   :  { %v16772_v24 = vpop.f32.mrb[171].mxu1 }
0x13e9   :  { %v16777_v56 = vpop.f32.mrb[172].mxu1 }
0x13ea   :  { %v16780_v2 = vpop.f32.mrb[173].mxu1 }
0x13eb   :  { %v16782_v28 = vpop.f32.mrb[174].mxu1 }
0x13ec   :  { %v16786_v19 = vpop.f32.mrb[175].mxu1 }
0x13f1   :  { %7427 = vadd.xlane.f32.xlu0 %v16790_v21 }
0x13f2   :  { %v7352_v47 = vpop.xlane.xlu1 %7351 }
0x13f3   :  { %v7379_v41 = vsub.f32 %v16641_v22, %v7352_v47 }
0x13f5   :  { %7423 = vadd.xlane.f32.xlu0 %v16793_v33  ;;  %v7399_v53 = vmul.f32 1.442695, %v7379_v41 }
0x13f6   :  { %v7356_v17 = vpop.xlane.xlu1 %7355 }
0x13f7   :  { %v7381_v25 = vsub.f32 %v16645_v4, %v7356_v17 }
0x13f9   :  { %v7403_v26 = vmul.f32 1.442695, %v7381_v25  ;;  %7429 = vadd.xlane.f32.xlu0 %v16798_v44 }
0x13fa   :  { %v7360_v45 = vpop.xlane.xlu1 %7359 }
0x13fb   :  { %12600 = vpow2.f32 %v7403_v26 }
0x13fc   :  { %v7354_v35 = vpop.xlane.xlu0 %7353  ;;  %12602 = vpow2.f32 %v7399_v53 }
0x13fd   :  { %v7380_v61 = vsub.f32 %v16656_v63, %v7354_v35  ;;  %7425 = vadd.xlane.f32.xlu0 %v16801_v30  ;;  %v7383_v63 = vsub.f32 %v16652_v23, %v7360_v45 }
0x13fe   :  { %v7364_v43 = vpop.xlane.xlu1 %7363 }
0x13ff   :  { %v7401_v22 = vmul.f32 1.442695, %v7380_v61  ;;  %v7385_v4 = vsub.f32 %v16660_v5, %v7364_v43 }
0x1400   :  { %v7358_v47 = vpop.xlane.xlu0 %7357 }
0x1401   :  { %12604 = vpow2.f32 %v7401_v22  ;;  %v7382_v17 = vsub.f32 %v16664_v6, %v7358_v47  ;;  %v7411_v26 = vmul.f32 1.442695, %v7385_v4  ;;  %v7407_v6 = vmul.f32 1.442695, %v7383_v63 }
0x1402   :  { %v7786_v25 = vpop.permute.xlu1 %7785 }
0x1403   :  { %v7405_v1 = vmul.f32 1.442695, %v7382_v17  ;;  %11622 = vmatprep.mubr.msk.bf16.mxu0 %vm1725_vm7, %v7786_v25 }
0x1404   :  { %v7362_v41 = vpop.xlane.xlu0 %7361 }
0x1405   :  { %v16808_v38 = vpop.eup %12600  ;;  %12606 = vpow2.f32 %v7405_v1  ;;  %v7384_v53 = vsub.f32 %v16671_v49, %v7362_v41  ;;  %v18362_v1 = vmov 0  }
0x1406   :  { %7435 = vadd.xlane.f32.xlu1 %v16808_v38  ;;  %12608 = vpow2.f32 %v7411_v26  ;;  %v16813_v43 = vpop.eup %12602 }
0x1407   :  { %v7409_v5 = vmul.f32 1.442695, %v7384_v53 }
0x1408   :  { %v7366_v61 = vpop.xlane.xlu0 %7365 }
0x1409   :  { %12610 = vpow2.f32 %v7409_v5  ;;  %v7386_v35 = vsub.f32 %v16675_v20, %v7366_v61  ;;  %v12003_v61 = vld [vmem:[#allocation7 + $0x48] sm:$0xff]  }
0x140a   :  { %7431 = vadd.xlane.f32.xlu1 %v16813_v43  ;;  %12612 = vpow2.f32 %v7407_v6 }
0x140b   :  { %v16817_v22 = vpop.eup %12604  ;;  %v7413_v49 = vmul.f32 1.442695, %v7386_v35 }
0x140c   :  { %7433 = vadd.xlane.f32.xlu0 %v16817_v22  ;;  %v7788_v23 = vpop.permute.xlu0 %7787 }
0x140d   :  { %11623 = vmatmul.mubr.msk.bf16.gmra.mrb[236].mxu0 %vm1725_vm7, %v7788_v23  ;;  %12614 = vpow2.f32 %v7413_v49 }
0x140e   :  { %8826 = vmatprep.mubr.bf16.mxu0 %v18362_v1 }
0x140f   :  { %v16822_v45 = vpop.eup %12606 }
0x1410   :  { %7437 = vadd.xlane.f32.xlu1 %v16822_v45  ;;  %v16825_v4 = vpop.eup %12608 }
0x1413   :  { %v16827_v20 = vpop.eup %12610 }
0x1414   :  { %7443 = vadd.xlane.f32.xlu1 %v16825_v4  ;;  %7441 = vadd.xlane.f32.xlu0 %v16827_v20  ;;  %v16831_v47 = vpop.eup %12612 }
0x1417   :  { %v16834_v17 = vpop.eup %12614 }
0x1418   :  { %7439 = vadd.xlane.f32.xlu1 %v16831_v47 }
0x141c   :  { %7445 = vadd.xlane.f32.xlu1 %v16834_v17 }
0x141d   :  { %v11456_v25 = vpop.f32.mrb[176].mxu1 }
0x141e   :  { %v6797_v26 = vpop.f32.mrb[177].mxu1 }
0x141f   :  { %v11457_v41 = vpop.f32.mrb[178].mxu1 }
0x1420   :  { %v6861_v63 = vpack.c.bf16 %v11457_v41, %v11456_v25  ;;  %v6800_v53 = vpop.f32.mrb[179].mxu1 }
0x1421   :  { %v6860_v5 = vpack.c.bf16 %v6800_v53, %v6797_v26 }
0x1423   :  { %11474 = vmatprep.mubr.msk.bf16.mxu1 %vm1725_vm7, %v6860_v5 }
0x1424   :  { %11475 = vmatmul.mubr.msk.bf16.vlgmr.msra.gmra.mrb[192].mxu1 %vm1725_vm7, %v6861_v63 }
0x1425   :  { %v11460_v6 = vpop.f32.mrb[180].mxu1  ;;  %11491 = vmatpush3.bf16.msra.mxu1 %v16719_v34 }
0x1426   :  { %v6813_v35 = vpop.f32.mrb[181].mxu1  ;;  %11492 = vmatprep.subr.bf16.mxu1 %v12003_v61 }
0x1427   :  { %v11461_v23 = vpop.f32.mrb[182].mxu1 }
0x1428   :  { %v6863_v49 = vpack.c.bf16 %v11461_v23, %v11460_v6  ;;  %v6816_v1 = vpop.f32.mrb[183].mxu1 }
0x1429   :  { %v6862_v18 = vpack.c.bf16 %v6816_v1, %v6813_v35  ;;  %11493 = vmatpush3.bf16.msra.mxu1 %v12003_v61 }
0x142b   :  { %11478 = vmatprep.mubr.msk.bf16.mxu1 %vm1725_vm7, %v6862_v18 }
0x142c   :  { %11479 = vmatmul.mubr.msk.bf16.gmra.mrb[196].mxu1 %vm1725_vm7, %v6863_v49 }
0x1430   :  { %v11464_v25 = vpop.f32.mrb[184].mxu1 }
0x1431   :  { %v6829_v26 = vpop.f32.mrb[185].mxu1 }
0x1432   :  { %v11465_v41 = vpop.f32.mrb[186].mxu1 }
0x1433   :  { %v6865_v53 = vpack.c.bf16 %v11465_v41, %v11464_v25  ;;  %v7368_v5 = vpop.xlane.xlu1 %7367  ;;  %v6832_v63 = vpop.f32.mrb[187].mxu1  ;;  %v18363_v41 = vld [vmem:[#allocation30_spill] sm:$0xff] }
0x1434   :  { %v7387_v16 = vsub.f32 %v16699_v14, %v7368_v5  ;;  %v6864_v34 = vpack.c.bf16 %v6832_v63, %v6829_v26 }
0x1436   :  { %v7415_v36 = vmul.f32 1.442695, %v7387_v16  ;;  %11482 = vmatprep.mubr.msk.bf16.mxu1 %vm1725_vm7, %v6864_v34 }
0x1437   :  { %v7372_v6 = vpop.xlane.xlu1 %7371  ;;  %11483 = vmatmul.mubr.msk.bf16.gmra.mrb[200].mxu1 %vm1725_vm7, %v6865_v53 }
0x1438   :  { %12616 = vpow2.f32 %v7415_v36  ;;  %v7389_v18 = vsub.f32 %v16705_v9, %v7372_v6 }
0x143a   :  { %v7419_v1 = vmul.f32 1.442695, %v7389_v18 }
0x143b   :  { %v7496_v61 = vpop.permute.xlu1 %7495 }
0x143c   :  { %12618 = vpow2.f32 %v7419_v1  ;;  %11542 = vmatprep.subr.bf16.mxu1 %v7496_v61 }
0x143d   :  { %v7370_v35 = vpop.xlane.xlu0 %7369 }
0x143e   :  { %v7388_v23 = vsub.f32 %v16712_v27, %v7370_v35  ;;  %v18364_v35 = vpack.c.bf16 %v16746_v54, %v16740_v59  ;;  %v18366_v59 = vpack.c.bf16 %v16758_v0, %v16752_v7 }
0x1440   :  { %v7417_v49 = vmul.f32 1.442695, %v7388_v23 }
0x1441   :  { %v7374_v25 = vpop.xlane.xlu0 %7373 }
0x1442   :  { %v16847_v14 = vpop.eup %12616  ;;  %12620 = vpow2.f32 %v7417_v49  ;;  %v7390_v16 = vsub.f32 %v16716_v12, %v7374_v25 }
0x1443   :  { %7447 = vadd.xlane.f32.xlu1 %v16847_v14 }
0x1444   :  { %v7421_v26 = vmul.f32 1.442695, %v7390_v16 }
0x1445   :  { %v7498_v12 = vpop.permute.xlu0 %7497 }
0x1446   :  { %v16851_v36 = vpop.eup %12618  ;;  %12622 = vpow2.f32 %v7421_v26 }
0x1447   :  { %7451 = vadd.xlane.f32.xlu0 %v16851_v36 }
0x1449   :  { %v7504_v1 = vpop.permute.xlu0 %7503 }
0x144c   :  { %v16854_v9 = vpop.eup %12620 }
0x144d   :  { %7449 = vadd.xlane.f32.xlu0 %v16854_v9  ;;  %v7506_v25 = vpop.permute.xlu0 %7505 }
0x1450   :  { %v16857_v27 = vpop.eup %12622 }
0x1451   :  { %7453 = vadd.xlane.f32.xlu1 %v16857_v27 }
0x1463   :  { %7509 = vrot.lane.b32.xlu0 %v18363_v41, %s13029_s12 }
0x146e   :  { %v11468_v53 = vpop.f32.mrb[188].mxu1 }
0x146f   :  { %v6845_v5 = vpop.f32.mrb[189].mxu1 }
0x1470   :  { %v11469_v63 = vpop.f32.mrb[190].mxu1 }
0x1471   :  { %v6867_v34 = vpack.c.bf16 %v11469_v63, %v11468_v53  ;;  %v6848_v6 = vpop.f32.mrb[191].mxu1  ;;  %v18365_v63 = vpack.c.bf16 %v16742_v55, %v16736_v62 }
0x1472   :  { %v6866_v18 = vpack.c.bf16 %v6848_v6, %v6845_v5 }
0x1474   :  { %11486 = vmatprep.mubr.msk.bf16.mxu1 %vm1725_vm7, %v6866_v18 }
0x1475   :  { %11487 = vmatmul.mubr.msk.bf16.gmra.mrb[204].mxu1 %vm1725_vm7, %v6867_v34  ;;  %v7500_v34 = vpop.permute.xlu1 %7499 }
0x1476   :  { %11494 = vmatprep.mubr.msk.bf16.mxu1 %vm1725_vm7, %v18364_v35 }
0x1478   :  { %v11612_v23 = vpop.f32.mrb[224].mxu0 }
0x1479   :  { %v7887_v49 = vpop.f32.mrb[225].mxu0  ;;  %v7952_v6 = vmul.f32 0.17677669, %v11612_v23 }
0x147a   :  { %v7950_v16 = vmul.f32 0.17677669, %v7887_v49  ;;  %v11613_v26 = vpop.f32.mrb[226].mxu0  ;;  %v18367_v49 = vpack.c.bf16 %v16754_v58, %v16750_v8 }
0x147b   :  { %v7890_v41 = vpop.f32.mrb[227].mxu0  ;;  %v16887_v18 = vadd.f32 %v7952_v6, %v18331_v51  ;;  %v7953_v35 = vmul.f32 0.17677669, %v11613_v26 }
0x147c   :  { %v16869_v53 = vadd.f32 %v7950_v16, %v18330_v29  ;;  %v7951_v5 = vmul.f32 0.17677669, %v7890_v41 }
0x147d   :  { %11495 = vmatmul.mubr.msk.bf16.vlgmr.msra.gmra.mrb[192].mxu1 %vm1725_vm7, %v18365_v63  ;;  %v16903_v51 = vadd.f32 %v7953_v35, %v18333_v57  ;;  %v18370_v57 = vpack.c.bf16 %v16786_v19, %v16780_v2  ;;  %v18371_v19 = vpack.c.bf16 %v16782_v28, %v16777_v56 }
0x147e   :  { %11543 = vmatpush3.bf16.msra.mxu1 %v7496_v61  ;;  %11498 = vmatprep.mubr.msk.bf16.mxu1 %vm1725_vm7, %v18366_v59  ;;  %v16879_v54 = vpop.xlane.xlu0 %7427  ;;  %v16883_v41 = vadd.f32 %v7951_v5, %v18328_v52  ;;  %v7502_v52 = vpop.permute.xlu1 %7501 }
0x147f   :  { %7982 = vmax.xlane.f32.xlu1 %v16869_v53  ;;  %11544 = vmatprep.subr.bf16.mxu1 %v7498_v12 }
0x1480   :  { %v11616_v29 = vpop.f32.mrb[228].mxu0 }
0x1481   :  { %v7903_v62 = vpop.f32.mrb[229].mxu0  ;;  %v7956_v58 = vmul.f32 0.17677669, %v11616_v29 }
0x1482   :  { %11545 = vmatpush3.bf16.msra.mxu1 %v7498_v12  ;;  %v11617_v55 = vpop.f32.mrb[230].mxu0  ;;  %v7424_v61 = vpop.xlane.xlu0 %7423  ;;  %v18368_v12 = vpack.c.bf16 %v16772_v24, %v16766_v32  ;;  %v7954_v8 = vmul.f32 0.17677669, %v7903_v62  ;;  %v18369_v24 = vpack.c.bf16 %v16768_v3, %v16763_v40 }
0x1483   :  { %7984 = vmax.xlane.f32.xlu1 %v16883_v41  ;;  %11546 = vmatprep.subr.bf16.mxu1 %v7500_v34  ;;  %v7906_v7 = vpop.f32.mrb[231].mxu0  ;;  %12624 = vrcp.f32 %v7424_v61  ;;  %v16919_v26 = vadd.f32 %v7956_v58, %v18337_v42  ;;  %v7957_v5 = vmul.f32 0.17677669, %v11617_v55 }
0x1484   :  { %v7955_v0 = vmul.f32 0.17677669, %v7906_v7  ;;  %v16907_v32 = vadd.f32 %v7954_v8, %v18336_v46  ;;  %v7508_v46 = vpop.permute.xlu1 %7507 }
0x1485   :  { %11499 = vmatmul.mubr.msk.bf16.gmra.mrb[196].mxu1 %vm1725_vm7, %v18367_v49  ;;  %v16923_v3 = vadd.f32 %v7957_v5, %v18341_v15 }
0x1486   :  { %v16894_v23 = vadd.f32 %v7955_v0, %v18339_v39  ;;  %11547 = vmatpush3.bf16.msra.mxu1 %v7500_v34  ;;  %11502 = vmatprep.mubr.msk.bf16.mxu1 %vm1725_vm7, %v18368_v12  ;;  %v7430_v16 = vpop.xlane.xlu0 %7429 }
0x1487   :  { %7986 = vmax.xlane.f32.xlu1 %v16887_v18  ;;  %11548 = vmatprep.subr.bf16.mxu1 %v7502_v52 }
0x1488   :  { %7992 = vmax.xlane.f32.xlu0 %v16894_v23 }
0x148a   :  { %11549 = vmatpush3.bf16.msra.mxu1 %v7502_v52  ;;  %v7426_v39 = vpop.xlane.xlu0 %7425 }
0x148b   :  { %7988 = vmax.xlane.f32.xlu1 %v16903_v51  ;;  %11550 = vmatprep.subr.bf16.mxu1 %v7504_v1  ;;  %12626 = vrcp.f32 %v7426_v39 }
0x148c   :  { %12628 = vrcp.f32 %v7430_v16 }
0x148d   :  { %11503 = vmatmul.mubr.msk.bf16.gmra.mrb[200].mxu1 %vm1725_vm7, %v18369_v24  ;;  %v12625_v63 = vpop.eup %12624 }
0x148e   :  { %11551 = vmatpush3.bf16.msra.mxu1 %v7504_v1  ;;  %11506 = vmatprep.mubr.msk.bf16.mxu1 %vm1725_vm7, %v18370_v57  ;;  %v7471_v42 = vmul.f32 %v12625_v63, %v16793_v33 }
0x148f   :  { %7990 = vmax.xlane.f32.xlu1 %v16907_v32  ;;  %11552 = vmatprep.subr.bf16.mxu1 %v7506_v25 }
0x1492   :  { %11553 = vmatpush3.bf16.msra.mxu1 %v7506_v25 }
0x1493   :  { %7994 = vmax.xlane.f32.xlu1 %v16919_v26  ;;  %11554 = vmatprep.subr.bf16.mxu1 %v7508_v46 }
0x1495   :  { %v12627_v40 = vpop.eup %12626  ;;  %11507 = vmatmul.mubr.msk.bf16.gmra.mrb[204].mxu1 %vm1725_vm7, %v18371_v19 }
0x1496   :  { %11555 = vmatpush3.bf16.msra.mxu1 %v7508_v46  ;;  %v7472_v2 = vmul.f32 %v12627_v40, %v16801_v30  ;;  %v12629_v52 = vpop.eup %12628 }
0x1497   :  { %7996 = vmax.xlane.f32.xlu1 %v16923_v3  ;;  %v7474_v16 = vmul.f32 %v12629_v52, %v16798_v44 }
0x1498   :  { %v7487_v1 = vpack.c.bf16 %v7472_v2, %v7471_v42 }
0x1499   :  { %v7434_v0 = vpop.xlane.xlu0 %7433 }
0x149a   :  { %11558 = vmatprep.mubr.bf16.mxu1 %v7487_v1  ;;  %12630 = vrcp.f32 %v7434_v0 }
0x149b   :  { %12632 = vrcp.f32 %v16879_v54 }
0x149f   :  { %v11620_v25 = vpop.f32.mrb[232].mxu0 }
0x14a0   :  { %v7919_v59 = vpop.f32.mrb[233].mxu0  ;;  %v7960_v56 = vmul.f32 0.17677669, %v11620_v25 }
0x14a1   :  { %v7958_v34 = vmul.f32 0.17677669, %v7919_v59  ;;  %v11621_v29 = vpop.f32.mrb[234].mxu0  ;;  %v7442_v35 = vpop.xlane.xlu0 %7441 }
0x14a2   :  { %v7922_v15 = vpop.f32.mrb[235].mxu0  ;;  %v16941_v30 = vadd.f32 %v7960_v56, %v18340_v13  ;;  %v7961_v62 = vmul.f32 0.17677669, %v11621_v29 }
0x14a3   :  { %v16933_v6 = vadd.f32 %v7958_v34, %v18338_v31  ;;  %v7959_v28 = vmul.f32 0.17677669, %v7922_v15  ;;  %v7436_v31 = vpop.xlane.xlu1 %7435 }
0x14a4   :  { %v16945_v55 = vadd.f32 %v7961_v62, %v18344_v10  ;;  %v12631_v12 = vpop.eup %12630 }
0x14a5   :  { %7998 = vmax.xlane.f32.xlu1 %v16933_v6  ;;  %v16937_v33 = vadd.f32 %v7959_v28, %v18343_v60  ;;  %v12633_v8 = vpop.eup %12632  ;;  %v7476_v57 = vmul.f32 %v12631_v12, %v16817_v22 }
0x14a6   :  { %v7473_v54 = vmul.f32 %v12633_v8, %v16790_v21 }
0x14a7   :  { %v7432_v61 = vpop.xlane.xlu1 %7431 }
0x14a8   :  { %12634 = vrcp.f32 %v7432_v61  ;;  %v7488_v42 = vpack.c.bf16 %v7474_v16, %v7473_v54 }
0x14a9   :  { %8000 = vmax.xlane.f32.xlu1 %v16937_v33 }
0x14ab   :  { %v7438_v7 = vpop.xlane.xlu1 %7437 }
0x14ac   :  { %12636 = vrcp.f32 %v7438_v7 }
0x14ad   :  { %8002 = vmax.xlane.f32.xlu1 %v16941_v30 }
0x14af   :  { %v7444_v60 = vpop.xlane.xlu1 %7443 }
0x14b1   :  { %8004 = vmax.xlane.f32.xlu1 %v16945_v55 }
0x14b2   :  { %v12635_v58 = vpop.eup %12634 }
0x14b3   :  { %v7440_v13 = vpop.xlane.xlu1 %7439  ;;  %v7475_v63 = vmul.f32 %v12635_v58, %v16813_v43  ;;  %v12005_v58 = vld [vmem:[#allocation7 + $0x68] sm:$0xff]  }
0x14b4   :  { %12638 = vrcp.f32 %v7440_v13 }
0x14b5   :  { %12640 = vrcp.f32 %v7436_v31  ;;  %v7489_v25 = vpack.c.bf16 %v7476_v57, %v7475_v63 }
0x14b6   :  { %12642 = vrcp.f32 %v7442_v35  ;;  %v12637_v2 = vpop.eup %12636 }
0x14b7   :  { %v7446_v39 = vpop.xlane.xlu1 %7445  ;;  %v7478_v56 = vmul.f32 %v12637_v2, %v16822_v45 }
0x14b8   :  { %12644 = vrcp.f32 %v7446_v39 }
0x14be   :  { %v12639_v59 = vpop.eup %12638 }
0x14bf   :  { %v12641_v34 = vpop.eup %12640  ;;  %v7479_v62 = vmul.f32 %v12639_v59, %v16831_v47 }
0x14c0   :  { %v12643_v15 = vpop.eup %12642 }
0x14c2   :  { %v12645_v0 = vpop.eup %12644 }
0x14c3   :  { %v7482_v13 = vmul.f32 %v12645_v0, %v16834_v17 }
0x14d0   :  { %v7448_v5 = vpop.xlane.xlu1 %7447 }
0x14d4   :  { %v7452_v49 = vpop.xlane.xlu0 %7451 }
0x14da   :  { %v7450_v10 = vpop.xlane.xlu0 %7449 }
0x14db   :  { %12646 = vrcp.f32 %v7450_v10  ;;  %v12004_v10 = vld [vmem:[#allocation7 + $0x60] sm:$0xff]  }
0x14dc   :  { %12648 = vrcp.f32 %v7444_v60 }
0x14dd   :  { %12650 = vrcp.f32 %v7448_v5 }
0x14de   :  { %v7510_v24 = vpop.permute.xlu0 %7509  ;;  %v7454_v28 = vpop.xlane.xlu1 %7453 }
0x14df   :  { %11556 = vmatprep.subr.bf16.mxu1 %v7510_v24  ;;  %12652 = vrcp.f32 %v7454_v28 }
0x14e0   :  { %11557 = vmatpush3.bf16.msra.mxu1 %v7510_v24  ;;  %v11624_v46 = vpop.f32.mrb[236].mxu0  ;;  %12654 = vrcp.f32 %v7452_v49  ;;  %v18375_v24 = vld [vmem:[#allocation22_spill] sm:$0xff] }
0x14e1   :  { %v7964_v40 = vmul.f32 0.17677669, %v11624_v46  ;;  %v7935_v19 = vpop.f32.mrb[237].mxu0  ;;  %11574 = vmatprep.subr.bf16.mxu1 %v12004_v10 }
0x14e2   :  { %v7962_v1 = vmul.f32 0.17677669, %v7935_v19  ;;  %v11625_v44 = vpop.f32.mrb[238].mxu0 }
0x14e3   :  { %v16954_v21 = vadd.f32 %v7964_v40, %v18350_v50  ;;  %11559 = vmatmul.mubr.bf16.vlgmr.msra.gmra.mrb[208].mxu1 %v7488_v42  ;;  %v7938_v22 = vpop.f32.mrb[239].mxu0  ;;  %v7477_v50 = vmul.f32 %v12641_v34, %v16808_v38  ;;  %v7965_v31 = vmul.f32 0.17677669, %v11625_v44 }
0x14e4   :  { %v16957_v29 = vadd.f32 %v7962_v1, %v18349_v11  ;;  %v7963_v43 = vmul.f32 0.17677669, %v7938_v22  ;;  %11562 = vmatprep.mubr.bf16.mxu1 %v7489_v25  ;;  %v7480_v11 = vmul.f32 %v12643_v15, %v16827_v20  ;;  %11575 = vmatpush3.bf16.msra.mxu1 %v12004_v10 }
0x14e5   :  { %8010 = vmax.xlane.f32.xlu0 %v16954_v21  ;;  %v7490_v7 = vpack.c.bf16 %v7478_v56, %v7477_v50  ;;  %v12647_v45 = vpop.eup %12646  ;;  %v16970_v47 = vadd.f32 %v7965_v31, %v18354_v48  ;;  %11576 = vmatprep.subr.bf16.mxu1 %v12005_v58 }
0x14e6   :  { %8006 = vmax.xlane.f32.xlu1 %v16957_v29  ;;  %v16965_v61 = vadd.f32 %v7963_v43, %v18353_v37  ;;  %v7491_v60 = vpack.c.bf16 %v7480_v11, %v7479_v62  ;;  %v12649_v35 = vpop.eup %12648  ;;  %v7484_v37 = vmul.f32 %v12647_v45, %v16854_v9  ;;  %v18374_v9 = vld [vmem:[#allocation69_spill] sm:$0xff] }
0x14e7   :  { %v12651_v38 = vpop.eup %12650  ;;  %v7481_v20 = vmul.f32 %v12649_v35, %v16825_v4  ;;  %v18372_v4 = vld [vmem:[#allocation66_spill] sm:$0xff]  ;;  %v18379_v35 = vld [vmem:[#allocation29_spill] sm:$0xff] }
0x14e8   :  { %v7483_v49 = vmul.f32 %v12651_v38, %v16847_v14  ;;  %11577 = vmatpush3.bf16.msra.mxu1 %v12005_v58  ;;  %v18373_v14 = vld [vmem:[#allocation21_spill] sm:$0xff] }
0x14e9   :  { %v7492_v52 = vpack.c.bf16 %v7482_v13, %v7481_v20  ;;  %v12653_v12 = vpop.eup %12652 }
0x14ea   :  { %8008 = vmax.xlane.f32.xlu1 %v16965_v61  ;;  %v7493_v8 = vpack.c.bf16 %v7484_v37, %v7483_v49  ;;  %v12655_v48 = vpop.eup %12654  ;;  %v7486_v39 = vmul.f32 %v12653_v12, %v16857_v27  ;;  %v18376_v27 = vld [vmem:[#allocation26_spill] sm:$0xff] }
0x14eb   :  { %11563 = vmatmul.mubr.bf16.gmra.mrb[212].mxu1 %v7490_v7  ;;  %v7485_v17 = vmul.f32 %v12655_v48, %v16851_v36  ;;  %v18377_v36 = vld [vmem:[#allocation25_spill] sm:$0xff] }
0x14ec   :  { %11566 = vmatprep.mubr.bf16.mxu1 %v7491_v60  ;;  %v18378_v60 = vld [vmem:[#allocation30_spill] sm:$0xff] }
0x14ed   :  { %v7494_v16 = vpack.c.bf16 %v7486_v39, %v7485_v17 }
0x14ee   :  { %8012 = vmax.xlane.f32.xlu1 %v16970_v47 }
0x14f3   :  { %11567 = vmatmul.mubr.bf16.gmra.mrb[216].mxu1 %v7492_v52 }
0x14f4   :  { %11570 = vmatprep.mubr.bf16.mxu1 %v7493_v8 }
0x14fb   :  { %8134 = vrot.lane.b32.xlu0 %v18372_v4, %s13037_s8  ;;  %11571 = vmatmul.mubr.bf16.gmra.mrb[220].mxu1 %v7494_v16 }
0x14ff   :  { %8138 = vrot.lane.b32.xlu0 %v18373_v14, %s13037_s8  ;;  %8136 = vrot.lane.b32.xlu1 %v18374_v9, %s13037_s8 }
0x1503   :  { %8140 = vrot.lane.b32.xlu0 %v18375_v24, %s13037_s8  ;;  %8144 = vrot.lane.b32.xlu1 %v18376_v27, %s13037_s8 }
0x1507   :  { %8142 = vrot.lane.b32.xlu0 %v18377_v36, %s13037_s8 }
0x150c   :  { %v7983_v57 = vpop.xlane.xlu1 %7982 }
0x150d   :  { %v8014_v63 = vsub.f32 %v16869_v53, %v7983_v57 }
0x150f   :  { %v8030_v42 = vmul.f32 1.442695, %v8014_v63 }
0x1510   :  { %v7985_v54 = vpop.xlane.xlu1 %7984 }
0x1511   :  { %v8015_v44 = vsub.f32 %v16883_v41, %v7985_v54 }
0x1513   :  { %v8032_v15 = vmul.f32 1.442695, %v8015_v44 }
0x1514   :  { %v7987_v5 = vpop.xlane.xlu1 %7986 }
0x1515   :  { %v8016_v46 = vsub.f32 %v16887_v18, %v7987_v5  ;;  %v7993_v22 = vpop.xlane.xlu0 %7992 }
0x1516   :  { %v8019_v53 = vsub.f32 %v16894_v23, %v7993_v22 }
0x1517   :  { %v8034_v40 = vmul.f32 1.442695, %v8016_v46 }
0x1518   :  { %v7989_v19 = vpop.xlane.xlu1 %7988  ;;  %v8040_v41 = vmul.f32 1.442695, %v8019_v53 }
0x1519   :  { %12656 = vpow2.f32 %v8034_v40  ;;  %v8017_v2 = vsub.f32 %v16903_v51, %v7989_v19 }
0x151a   :  { %12658 = vpow2.f32 %v8030_v42 }
0x151b   :  { %v8036_v25 = vmul.f32 1.442695, %v8017_v2 }
0x151c   :  { %v7991_v1 = vpop.xlane.xlu1 %7990 }
0x151d   :  { %v8018_v34 = vsub.f32 %v16907_v32, %v7991_v1  ;;  %12660 = vpow2.f32 %v8036_v25 }
0x151f   :  { %v8038_v56 = vmul.f32 1.442695, %v8018_v34 }
0x1520   :  { %v7995_v59 = vpop.xlane.xlu1 %7994 }
0x1521   :  { %v8020_v43 = vsub.f32 %v16919_v26, %v7995_v59 }
0x1523   :  { %v8042_v18 = vmul.f32 1.442695, %v8020_v43  ;;  %v16999_v62 = vpop.eup %12656 }
0x1524   :  { %v7997_v28 = vpop.xlane.xlu1 %7996  ;;  %v17002_v50 = vpop.eup %12658 }
0x1525   :  { %12662 = vpow2.f32 %v8042_v18  ;;  %v8021_v51 = vsub.f32 %v16923_v3, %v7997_v28 }
0x1526   :  { %12664 = vpow2.f32 %v8032_v15 }
0x1527   :  { %8066 = vadd.xlane.f32.xlu1 %v16999_v62  ;;  %12666 = vpow2.f32 %v8038_v56  ;;  %v8044_v32 = vmul.f32 1.442695, %v8021_v51  ;;  %v17005_v23 = vpop.eup %12660 }
0x1528   :  { %12668 = vpow2.f32 %v8040_v41 }
0x1529   :  { %12670 = vpow2.f32 %v8044_v32 }
0x152b   :  { %8062 = vadd.xlane.f32.xlu1 %v17002_v50 }
0x152f   :  { %v17007_v26 = vpop.eup %12662  ;;  %8068 = vadd.xlane.f32.xlu1 %v17005_v23 }
0x1530   :  { %8074 = vadd.xlane.f32.xlu0 %v17007_v26  ;;  %v17011_v3 = vpop.eup %12664 }
0x1531   :  { %v17013_v31 = vpop.eup %12666 }
0x1532   :  { %v17017_v11 = vpop.eup %12668  ;;  %v7999_v0 = vpop.xlane.xlu1 %7998 }
0x1533   :  { %8064 = vadd.xlane.f32.xlu1 %v17011_v3  ;;  %v17019_v7 = vpop.eup %12670  ;;  %v8022_v13 = vsub.f32 %v16933_v6, %v7999_v0 }
0x1534   :  { %8070 = vadd.xlane.f32.xlu0 %v17013_v31 }
0x1535   :  { %v8046_v49 = vmul.f32 1.442695, %v8022_v13 }
0x1536   :  { %v8001_v45 = vpop.xlane.xlu1 %8000 }
0x1537   :  { %8072 = vadd.xlane.f32.xlu1 %v17017_v11  ;;  %v8023_v37 = vsub.f32 %v16937_v33, %v8001_v45  ;;  %12672 = vpow2.f32 %v8046_v49 }
0x1538   :  { %8076 = vadd.xlane.f32.xlu0 %v17019_v7 }
0x1539   :  { %v8048_v10 = vmul.f32 1.442695, %v8023_v37 }
0x153a   :  { %v8003_v38 = vpop.xlane.xlu1 %8002 }
0x153b   :  { %v8024_v12 = vsub.f32 %v16941_v30, %v8003_v38  ;;  %12674 = vpow2.f32 %v8048_v10 }
0x153d   :  { %v8050_v48 = vmul.f32 1.442695, %v8024_v12 }
0x153e   :  { %v8005_v20 = vpop.xlane.xlu1 %8004 }
0x153f   :  { %v8025_v52 = vsub.f32 %v16945_v55, %v8005_v20 }
0x1541   :  { %v8052_v8 = vmul.f32 1.442695, %v8025_v52  ;;  %v17031_v39 = vpop.eup %12672 }
0x1543   :  { %12676 = vpow2.f32 %v8052_v8 }
0x1544   :  { %12678 = vpow2.f32 %v8050_v48 }
0x1545   :  { %v17033_v17 = vpop.eup %12674 }
0x1548   :  { %8148 = vrot.lane.b32.xlu1 %v18378_v60, %s13037_s8 }
0x154d   :  { %v17037_v6 = vpop.eup %12676 }
0x154e   :  { %8146 = vrot.lane.b32.xlu0 %v18379_v35, %s13037_s8  ;;  %v17039_v33 = vpop.eup %12678 }
0x156c   :  { %8078 = vadd.xlane.f32.xlu1 %v17031_v39 }
0x156d   :  { %8080 = vadd.xlane.f32.xlu0 %v17033_v17 }
0x1570   :  { %8084 = vadd.xlane.f32.xlu1 %v17037_v6 }
0x1571   :  { %8082 = vadd.xlane.f32.xlu0 %v17039_v33 }
0x1572   :  { %v8011_v30 = vpop.xlane.xlu0 %8010 }
0x1573   :  { %v8028_v55 = vsub.f32 %v16954_v21, %v8011_v30  ;;  %v8007_v58 = vpop.xlane.xlu1 %8006 }
0x1574   :  { %v8026_v16 = vsub.f32 %v16957_v29, %v8007_v58 }
0x1575   :  { %v8058_v9 = vmul.f32 1.442695, %v8028_v55 }
0x1576   :  { %v8054_v4 = vmul.f32 1.442695, %v8026_v16  ;;  %v8135_v14 = vpop.permute.xlu0 %8134 }
0x1577   :  { %v8009_v24 = vpop.xlane.xlu1 %8008  ;;  %11626 = vmatprep.subr.bf16.mxu1 %v8135_v14 }
0x1578   :  { %12680 = vpow2.f32 %v8054_v4  ;;  %v8027_v27 = vsub.f32 %v16965_v61, %v8009_v24 }
0x1579   :  { %12682 = vpow2.f32 %v8058_v9 }
0x157a   :  { %v8056_v36 = vmul.f32 1.442695, %v8027_v27 }
0x157b   :  { %v8013_v57 = vpop.xlane.xlu1 %8012 }
0x157c   :  { %12684 = vpow2.f32 %v8056_v36  ;;  %v8029_v54 = vsub.f32 %v16970_v47, %v8013_v57  ;;  %v8139_v47 = vpop.permute.xlu0 %8138 }
0x157e   :  { %v8060_v5 = vmul.f32 1.442695, %v8029_v54 }
0x157f   :  { %v8137_v63 = vpop.permute.xlu1 %8136 }
0x1580   :  { %12686 = vpow2.f32 %v8060_v5  ;;  %v8141_v42 = vpop.permute.xlu0 %8140 }
0x1582   :  { %v17047_v21 = vpop.eup %12680 }
0x1583   :  { %8086 = vadd.xlane.f32.xlu0 %v17047_v21  ;;  %v17050_v29 = vpop.eup %12682  ;;  %v8145_v40 = vpop.permute.xlu1 %8144 }
0x1584   :  { %v8143_v43 = vpop.permute.xlu0 %8142 }
0x1586   :  { %v17052_v46 = vpop.eup %12684 }
0x1587   :  { %8088 = vadd.xlane.f32.xlu1 %v17052_v46  ;;  %8090 = vadd.xlane.f32.xlu0 %v17050_v29 }
0x158a   :  { %v17056_v61 = vpop.eup %12686 }
0x158b   :  { %8092 = vadd.xlane.f32.xlu1 %v17056_v61 }
0x15b4   :  { %v8067_v19 = vpop.xlane.xlu1 %8066 }
0x15b6   :  { %v11560_v2 = vpop.f32.mrb[208].mxu1 }
0x15b7   :  { %v7553_v1 = vpop.f32.mrb[209].mxu1 }
0x15b8   :  { %v8063_v44 = vpop.xlane.xlu1 %8062  ;;  %v11561_v25 = vpop.f32.mrb[210].mxu1 }
0x15b9   :  { %v7617_v59 = vpack.c.bf16 %v11561_v25, %v11560_v2  ;;  %v7556_v22 = vpop.f32.mrb[211].mxu1 }
0x15ba   :  { %v7616_v34 = vpack.c.bf16 %v7556_v22, %v7553_v1 }
0x15bc   :  { %v8069_v18 = vpop.xlane.xlu1 %8068  ;;  %11578 = vmatprep.mubr.msk.bf16.mxu1 %vm1725_vm7, %v7616_v34 }
0x15bd   :  { %11579 = vmatmul.mubr.msk.bf16.vlgmr.msra.gmra.mrb[192].mxu1 %vm1725_vm7, %v7617_v59  ;;  %v8075_v53 = vpop.xlane.xlu0 %8074 }
0x15be   :  { %11627 = vmatpush3.bf16.msra.mxu1 %v8135_v14  ;;  %v11564_v15 = vpop.f32.mrb[212].mxu1 }
0x15bf   :  { %11628 = vmatprep.subr.bf16.mxu1 %v8137_v63  ;;  %v7569_v28 = vpop.f32.mrb[213].mxu1 }
0x15c0   :  { %v8065_v56 = vpop.xlane.xlu1 %8064  ;;  %v11565_v51 = vpop.f32.mrb[214].mxu1 }
0x15c1   :  { %v7619_v41 = vpack.c.bf16 %v11565_v51, %v11564_v15  ;;  %v7572_v32 = vpop.f32.mrb[215].mxu1  ;;  %12688 = vrcp.f32 %v8065_v56  ;;  %v8071_v60 = vpop.xlane.xlu0 %8070 }
0x15c2   :  { %v7618_v0 = vpack.c.bf16 %v7572_v32, %v7569_v28  ;;  %11629 = vmatpush3.bf16.msra.mxu1 %v8137_v63  ;;  %12690 = vrcp.f32 %v8063_v44  ;;  %v12006_v63 = vld [vmem:[#allocation7 + $0x70] sm:$0xff]  }
0x15c3   :  { %11630 = vmatprep.subr.bf16.mxu1 %v8139_v47  ;;  %12692 = vrcp.f32 %v8069_v18 }
0x15c4   :  { %11582 = vmatprep.mubr.msk.bf16.mxu1 %vm1725_vm7, %v7618_v0  ;;  %v8073_v38 = vpop.xlane.xlu1 %8072 }
0x15c5   :  { %11583 = vmatmul.mubr.msk.bf16.gmra.mrb[196].mxu1 %vm1725_vm7, %v7619_v41  ;;  %12694 = vrcp.f32 %v8073_v38  ;;  %v8077_v52 = vpop.xlane.xlu0 %8076 }
0x15c6   :  { %11631 = vmatpush3.bf16.msra.mxu1 %v8139_v47  ;;  %v11568_v45 = vpop.f32.mrb[216].mxu1  ;;  %12696 = vrcp.f32 %v8067_v19 }
0x15c7   :  { %11632 = vmatprep.subr.bf16.mxu1 %v8141_v42  ;;  %v7585_v35 = vpop.f32.mrb[217].mxu1  ;;  %12698 = vrcp.f32 %v8071_v60 }
0x15c8   :  { %v11569_v13 = vpop.f32.mrb[218].mxu1  ;;  %12700 = vrcp.f32 %v8077_v52  ;;  %v8149_v54 = vpop.permute.xlu1 %8148 }
0x15c9   :  { %v7621_v37 = vpack.c.bf16 %v11569_v13, %v11568_v45  ;;  %v7588_v20 = vpop.f32.mrb[219].mxu1  ;;  %v8147_v4 = vpop.permute.xlu0 %8146  ;;  %12702 = vrcp.f32 %v8075_v53 }
0x15ca   :  { %v7620_v49 = vpack.c.bf16 %v7588_v20, %v7585_v35  ;;  %11633 = vmatpush3.bf16.msra.mxu1 %v8141_v42  ;;  %v12007_v20 = vld [vmem:[#allocation7 + $0x78] sm:$0xff]  }
0x15cb   :  { %11634 = vmatprep.subr.bf16.mxu1 %v8143_v43  ;;  %v12689_v10 = vpop.eup %12688 }
0x15cc   :  { %11586 = vmatprep.mubr.msk.bf16.mxu1 %vm1725_vm7, %v7620_v49  ;;  %v12691_v8 = vpop.eup %12690  ;;  %v8111_v55 = vmul.f32 %v12689_v10, %v17011_v3 }
0x15cd   :  { %11587 = vmatmul.mubr.msk.bf16.gmra.mrb[200].mxu1 %vm1725_vm7, %v7621_v37  ;;  %v8110_v9 = vmul.f32 %v12691_v8, %v17002_v50  ;;  %v12693_v24 = vpop.eup %12692 }
0x15ce   :  { %11635 = vmatpush3.bf16.msra.mxu1 %v8143_v43  ;;  %v11572_v12 = vpop.f32.mrb[220].mxu1  ;;  %v8113_v5 = vmul.f32 %v12693_v24, %v17005_v23 }
0x15cf   :  { %11636 = vmatprep.subr.bf16.mxu1 %v8145_v40  ;;  %v7601_v48 = vpop.f32.mrb[221].mxu1  ;;  %v8126_v27 = vpack.c.bf16 %v8111_v55, %v8110_v9  ;;  %v12695_v36 = vpop.eup %12694 }
0x15d0   :  { %v11573_v30 = vpop.f32.mrb[222].mxu1  ;;  %v12697_v57 = vpop.eup %12696  ;;  %v8115_v50 = vmul.f32 %v12695_v36, %v17017_v11 }
0x15d1   :  { %v7623_v58 = vpack.c.bf16 %v11573_v30, %v11572_v12  ;;  %v7604_v16 = vpop.f32.mrb[223].mxu1  ;;  %v12699_v3 = vpop.eup %12698  ;;  %v8112_v47 = vmul.f32 %v12697_v57, %v16999_v62 }
0x15d2   :  { %v7622_v14 = vpack.c.bf16 %v7604_v16, %v7601_v48  ;;  %11637 = vmatpush3.bf16.msra.mxu1 %v8145_v40  ;;  %v8114_v40 = vmul.f32 %v12699_v3, %v17013_v31  ;;  %v12701_v42 = vpop.eup %12700 }
0x15d3   :  { %11638 = vmatprep.subr.bf16.mxu1 %v8147_v4  ;;  %v8127_v19 = vpack.c.bf16 %v8113_v5, %v8112_v47  ;;  %v12703_v1 = vpop.eup %12702  ;;  %v8117_v44 = vmul.f32 %v12701_v42, %v17019_v7 }
0x15d4   :  { %11590 = vmatprep.mubr.msk.bf16.mxu1 %vm1725_vm7, %v7622_v14  ;;  %v8128_v2 = vpack.c.bf16 %v8115_v50, %v8114_v40  ;;  %v8116_v23 = vmul.f32 %v12703_v1, %v17007_v26  ;;  %v18380_v1 = vld [vmem:[#allocation47_spill] sm:$0xff] }
0x15d5   :  { %11591 = vmatmul.mubr.msk.bf16.gmra.mrb[204].mxu1 %vm1725_vm7, %v7623_v58 }
0x15d6   :  { %11639 = vmatpush3.bf16.msra.mxu1 %v8147_v4  ;;  %11642 = vmatprep.mubr.bf16.mxu1 %v8126_v27  ;;  %v8129_v25 = vpack.c.bf16 %v8117_v44, %v8116_v23 }
0x15d7   :  { %11640 = vmatprep.subr.bf16.mxu1 %v8149_v54 }
0x15da   :  { %11641 = vmatpush3.bf16.msra.mxu1 %v8149_v54 }
0x15db   :  { %11658 = vmatprep.subr.bf16.mxu1 %v12006_v63 }
0x15dd   :  { %11643 = vmatmul.mubr.bf16.vlgmr.msra.gmra.mrb[224].mxu1 %v8127_v19 }
0x15de   :  { %11646 = vmatprep.mubr.bf16.mxu1 %v8128_v2  ;;  %11659 = vmatpush3.bf16.msra.mxu1 %v12006_v63  ;;  %v10266_v63 = vld [vmem:[%s17924_s9 + $0x1] ss:$0 sm:$0xff] }
0x15df   :  { %11660 = vmatprep.subr.bf16.mxu1 %v12007_v20 }
0x15e2   :  { %11661 = vmatpush3.bf16.msra.mxu1 %v12007_v20  ;;  %v18388_v20 = vld [vmem:[#allocation53_spill] sm:$0xff] }
0x15e5   :  { %11647 = vmatmul.mubr.bf16.gmra.mrb[228].mxu1 %v8129_v25 }
0x15f9   :  { %v8079_v11 = vpop.xlane.xlu1 %8078 }
0x15fa   :  { %12704 = vrcp.f32 %v8079_v11  ;;  %v8081_v62 = vpop.xlane.xlu0 %8080  ;;  %v18381_v11 = vld [vmem:[#allocation52_spill] sm:$0xff] }
0x15fb   :  { %12706 = vrcp.f32 %v8081_v62 }
0x15fd   :  { %v8085_v59 = vpop.xlane.xlu1 %8084 }
0x15fe   :  { %12708 = vrcp.f32 %v8085_v59  ;;  %v8083_v31 = vpop.xlane.xlu0 %8082  ;;  %v18382_v59 = vld [vmem:[#allocation46_spill] sm:$0xff] }
0x15ff   :  { %12710 = vrcp.f32 %v8083_v31 }
0x1604   :  { %v12705_v22 = vpop.eup %12704 }
0x1605   :  { %v12707_v34 = vpop.eup %12706  ;;  %v8118_v43 = vmul.f32 %v12705_v22, %v17031_v39 }
0x1606   :  { %v8119_v18 = vmul.f32 %v12707_v34, %v17033_v17 }
0x1608   :  { %v12709_v15 = vpop.eup %12708  ;;  %v8130_v7 = vpack.c.bf16 %v8119_v18, %v8118_v43  ;;  %v18383_v43 = vld [vmem:[#allocation48_spill] sm:$0xff] }
0x1609   :  { %v12711_v53 = vpop.eup %12710  ;;  %v8121_v26 = vmul.f32 %v12709_v15, %v17037_v6 }
0x160a   :  { %11650 = vmatprep.mubr.bf16.mxu1 %v8130_v7  ;;  %v8120_v28 = vmul.f32 %v12711_v53, %v17039_v33 }
0x160c   :  { %v8131_v56 = vpack.c.bf16 %v8121_v26, %v8120_v28  ;;  %v18384_v28 = vld [vmem:[#allocation51_spill] sm:$0xff] }
0x160e   :  { %11651 = vmatmul.mubr.bf16.gmra.mrb[232].mxu1 %v8131_v56 }
0x1610   :  { %v8087_v51 = vpop.xlane.xlu0 %8086 }
0x1611   :  { %12712 = vrcp.f32 %v8087_v51 }
0x1614   :  { %v8089_v41 = vpop.xlane.xlu1 %8088  ;;  %v8091_v32 = vpop.xlane.xlu0 %8090 }
0x1615   :  { %12714 = vrcp.f32 %v8089_v41 }
0x1616   :  { %12716 = vrcp.f32 %v8091_v32  ;;  %v18385_v32 = vld [vmem:[#allocation50_spill] sm:$0xff] }
0x1618   :  { %v8093_v0 = vpop.xlane.xlu1 %8092 }
0x1619   :  { %12718 = vrcp.f32 %v8093_v0 }
0x161b   :  { %v12713_v39 = vpop.eup %12712 }
0x161c   :  { %v8122_v60 = vmul.f32 %v12713_v39, %v17047_v21  ;;  %v18386_v39 = vld [vmem:[#allocation49_spill] sm:$0xff] }
0x161f   :  { %v12715_v17 = vpop.eup %12714 }
0x1620   :  { %v8123_v45 = vmul.f32 %v12715_v17, %v17052_v46  ;;  %v12717_v6 = vpop.eup %12716 }
0x1621   :  { %v8124_v33 = vmul.f32 %v12717_v6, %v17050_v29 }
0x1622   :  { %v8132_v35 = vpack.c.bf16 %v8123_v45, %v8122_v60  ;;  %v18387_v60 = vld [vmem:[#allocation55_spill] sm:$0xff] }
0x1623   :  { %v12719_v38 = vpop.eup %12718 }
0x1624   :  { %11654 = vmatprep.mubr.bf16.mxu1 %v8132_v35  ;;  %v8125_v13 = vmul.f32 %v12719_v38, %v17056_v61 }
0x1626   :  { %v8133_v37 = vpack.c.bf16 %v8125_v13, %v8124_v33 }
0x1628   :  { %11655 = vmatmul.mubr.bf16.gmra.mrb[236].mxu1 %v8133_v37 }
0x16b0   :  { %v11644_v49 = vpop.f32.mrb[224].mxu1 }
0x16b1   :  { %v8192_v52 = vpop.f32.mrb[225].mxu1 }
0x16b2   :  { %v11645_v10 = vpop.f32.mrb[226].mxu1 }
0x16b3   :  { %v8256_v12 = vpack.c.bf16 %v11645_v10, %v11644_v49  ;;  %v8195_v21 = vpop.f32.mrb[227].mxu1 }
0x16b4   :  { %v8255_v8 = vpack.c.bf16 %v8195_v21, %v8192_v52 }
0x16b6   :  { %11662 = vmatprep.mubr.msk.bf16.mxu1 %vm1725_vm7, %v8255_v8  ;;  %v18390_v8 = vld [vmem:[#allocation65_spill] sm:$0xff] }
0x16b7   :  { %11663 = vmatmul.mubr.msk.bf16.vlgmr.msra.gmra.mrb[192].mxu1 %vm1725_vm7, %v8256_v12  ;;  %v18389_v12 = vld [vmem:[#allocation63_spill] sm:$0xff] }
0x16b8   :  { %v11648_v46 = vpop.f32.mrb[228].mxu1 }
0x16b9   :  { %v8208_v48 = vpop.f32.mrb[229].mxu1 }
0x16ba   :  { %v11649_v29 = vpop.f32.mrb[230].mxu1 }
0x16bb   :  { %v8258_v30 = vpack.c.bf16 %v11649_v29, %v11648_v46  ;;  %v8211_v61 = vpop.f32.mrb[231].mxu1 }
0x16bc   :  { %v8257_v55 = vpack.c.bf16 %v8211_v61, %v8208_v48  ;;  %v18391_v48 = vld [vmem:[#allocation45_spill] sm:$0xff] }
0x16be   :  { %11666 = vmatprep.mubr.msk.bf16.mxu1 %vm1725_vm7, %v8257_v55 }
0x16bf   :  { %11667 = vmatmul.mubr.msk.bf16.gmra.mrb[196].mxu1 %vm1725_vm7, %v8258_v30 }
0x16e1   :  { %v11652_v58 = vpop.f32.mrb[232].mxu1 }
0x16e2   :  { %v8224_v16 = vpop.f32.mrb[233].mxu1 }
0x16e3   :  { %v11653_v4 = vpop.f32.mrb[234].mxu1 }
0x16e4   :  { %v8260_v14 = vpack.c.bf16 %v11653_v4, %v11652_v58  ;;  %v8227_v9 = vpop.f32.mrb[235].mxu1 }
0x16e5   :  { %v8259_v24 = vpack.c.bf16 %v8227_v9, %v8224_v16 }
0x16e7   :  { %11670 = vmatprep.mubr.msk.bf16.mxu1 %vm1725_vm7, %v8259_v24 }
0x16e8   :  { %11671 = vmatmul.mubr.msk.bf16.gmra.mrb[200].mxu1 %vm1725_vm7, %v8260_v14  ;;  %v18392_v14 = vld [vmem:[#allocation54_spill] sm:$0xff] }
0x16fb   :  { %v11656_v27 = vpop.f32.mrb[236].mxu1 }
0x16fc   :  { %v8240_v36 = vpop.f32.mrb[237].mxu1 }
0x16fd   :  { %v11657_v57 = vpop.f32.mrb[238].mxu1 }
0x16fe   :  { %v8262_v54 = vpack.c.bf16 %v11657_v57, %v11656_v27  ;;  %v8243_v3 = vpop.f32.mrb[239].mxu1 }
0x16ff   :  { %v8261_v5 = vpack.c.bf16 %v8243_v3, %v8240_v36  ;;  %v18393_v36 = vld [vmem:[#allocation68_spill] sm:$0xff] }
0x1701   :  { %11674 = vmatprep.mubr.msk.bf16.mxu1 %vm1725_vm7, %v8261_v5  ;;  %v18395_v5 = vld [vmem:[#allocation67_spill] sm:$0xff] }
0x1702   :  { %11675 = vmatmul.mubr.msk.bf16.gmra.mrb[204].mxu1 %vm1725_vm7, %v8262_v54  ;;  %v18394_v54 = vld [vmem:[#allocation64_spill] sm:$0xff]  ;;  %vm9797_vm7 = vcmask 64512  }
0x178a   :  { %v11664_v50 = vpop.f32.mrb[192].mxu1 }
0x178b   :  { %v8333_v47 = vpop.f32.mrb[193].mxu1  ;;  %v8422_v2 = vadd.f32 %v11664_v50, %v10266_v63 }
0x178c   :  { %v8420_v40 = vadd.f32 %v10266_v63, %v8333_v47  ;;  %v11665_v19 = vpop.f32.mrb[194].mxu1  ;;  %v12008_v47 = vld [vmem:[#allocation8 + $0x80] ss:$8 sps:$4 sm:$0xff]  }
0x178d   :  { %v8336_v42 = vpop.f32.mrb[195].mxu1  ;;  %v8423_v25 = vadd.f32 %v11665_v19, %v10266_v63  ;;  %v17102_v31 = vadd.f32 %v8422_v2, %v18382_v59  ;;  %v12011_v19 = vld [vmem:[#allocation8 + $0x90] ss:$8 sps:$4 sm:$0xff]  }
0x178e   :  { %v17095_v44 = vadd.f32 %v8420_v40, %v18380_v1  ;;  %v8421_v23 = vadd.f32 %v10266_v63, %v8336_v42  ;;  %v12010_v40 = vld [vmem:[#allocation8 + $0x84] ss:$8 sps:$4 sm:$0xff]  }
0x178f   :  { %v17106_v18 = vadd.f32 %v8423_v25, %v18383_v43  ;;  %8794 = vmatprep.subr.bf16.mxu0 %v12010_v40 }
0x1790   :  { %v17098_v62 = vadd.f32 %v8421_v23, %v18381_v11  ;;  %8456 = vadd.xlane.f32.xlu0 %v17095_v44  ;;  %8795 = vmatpush1.bf16.msra.mxu0 %v12008_v47 }
0x1792   :  { %8458 = vadd.xlane.f32.xlu1 %v17098_v62  ;;  %v11668_v22 = vpop.f32.mrb[196].mxu1 }
0x1793   :  { %v8349_v34 = vpop.f32.mrb[197].mxu1  ;;  %v8426_v26 = vadd.f32 %v11668_v22, %v10266_v63 }
0x1794   :  { %v8424_v15 = vadd.f32 %v10266_v63, %v8349_v34  ;;  %8460 = vadd.xlane.f32.xlu0 %v17102_v31  ;;  %v11669_v7 = vpop.f32.mrb[198].mxu1 }
0x1795   :  { %v8352_v53 = vpop.f32.mrb[199].mxu1  ;;  %v8427_v41 = vadd.f32 %v11669_v7, %v10266_v63  ;;  %v17118_v17 = vadd.f32 %v8426_v26, %v18386_v39 }
0x1796   :  { %v17110_v56 = vadd.f32 %v8424_v15, %v18384_v28  ;;  %v8425_v51 = vadd.f32 %v10266_v63, %v8352_v53  ;;  %8462 = vadd.xlane.f32.xlu1 %v17106_v18 }
0x1797   :  { %v17122_v45 = vadd.f32 %v8427_v41, %v18387_v60 }
0x1798   :  { %v17114_v0 = vadd.f32 %v8425_v51, %v18385_v32  ;;  %8464 = vadd.xlane.f32.xlu0 %v17110_v56 }
0x179a   :  { %8466 = vadd.xlane.f32.xlu1 %v17114_v0 }
0x179c   :  { %8468 = vadd.xlane.f32.xlu0 %v17118_v17 }
0x179e   :  { %8470 = vadd.xlane.f32.xlu1 %v17122_v45 }
0x17bb   :  { %v11672_v6 = vpop.f32.mrb[200].mxu1 }
0x17bc   :  { %v8365_v35 = vpop.f32.mrb[201].mxu1  ;;  %v8430_v37 = vadd.f32 %v11672_v6, %v10266_v63 }
0x17bd   :  { %v8428_v38 = vadd.f32 %v10266_v63, %v8365_v35  ;;  %v11673_v33 = vpop.f32.mrb[202].mxu1 }
0x17be   :  { %v8368_v13 = vpop.f32.mrb[203].mxu1  ;;  %v8431_v10 = vadd.f32 %v11673_v33, %v10266_v63  ;;  %v17134_v46 = vadd.f32 %v8430_v37, %v18390_v8  ;;  %v12025_v8 = vld [vmem:[#allocation8 + $0xd4] ss:$8 sps:$4 sm:$0xff]  }
0x17bf   :  { %v17127_v49 = vadd.f32 %v8428_v38, %v18388_v20  ;;  %v8429_v52 = vadd.f32 %v10266_v63, %v8368_v13  ;;  %v12016_v20 = vld [vmem:[#allocation8 + $0xa4] ss:$8 sps:$4 sm:$0xff]  }
0x17c0   :  { %v17138_v29 = vadd.f32 %v8431_v10, %v18391_v48  ;;  %v12017_v10 = vld [vmem:[#allocation8 + $0xb0] ss:$8 sps:$4 sm:$0xff]  }
0x17c1   :  { %v17130_v21 = vadd.f32 %v8429_v52, %v18389_v12  ;;  %8472 = vadd.xlane.f32.xlu0 %v17127_v49  ;;  %v12019_v52 = vld [vmem:[#allocation8 + $0xb4] ss:$8 sps:$4 sm:$0xff]   ;;  %v12022_v12 = vld [vmem:[#allocation8 + $0xc4] ss:$8 sps:$4 sm:$0xff]   ;;  %v12023_v48 = vld [vmem:[#allocation8 + $0xd0] ss:$8 sps:$4 sm:$0xff]  }
0x17c3   :  { %8474 = vadd.xlane.f32.xlu1 %v17130_v21 }
0x17c5   :  { %8476 = vadd.xlane.f32.xlu0 %v17134_v46 }
0x17c7   :  { %8478 = vadd.xlane.f32.xlu1 %v17138_v29 }
0x17d5   :  { %v11676_v30 = vpop.f32.mrb[204].mxu1 }
0x17d6   :  { %v8381_v61 = vpop.f32.mrb[205].mxu1  ;;  %v8434_v4 = vadd.f32 %v11676_v30, %v10266_v63  ;;  %v12028_v30 = vld [vmem:[#allocation8 + $0xe4] ss:$8 sps:$4 sm:$0xff]  }
0x17d7   :  { %v8432_v55 = vadd.f32 %v10266_v63, %v8381_v61  ;;  %v11677_v58 = vpop.f32.mrb[206].mxu1  ;;  %v12026_v61 = vld [vmem:[#allocation8 + $0xe0] ss:$8 sps:$4 sm:$0xff]  }
0x17d8   :  { %v8384_v16 = vpop.f32.mrb[207].mxu1  ;;  %v8435_v27 = vadd.f32 %v11677_v58, %v10266_v63  ;;  %v17150_v3 = vadd.f32 %v8434_v4, %v18394_v54  ;;  %v12029_v58 = vld [vmem:[#allocation8 + $0xf0] ss:$8 sps:$4 sm:$0xff]  }
0x17d9   :  { %v17143_v9 = vadd.f32 %v8432_v55, %v18392_v14  ;;  %v8433_v24 = vadd.f32 %v10266_v63, %v8384_v16  ;;  %v12013_v63 = vld [vmem:[#allocation8 + $0x94] ss:$8 sps:$4 sm:$0xff]  }
0x17da   :  { %v17154_v50 = vadd.f32 %v8435_v27, %v18395_v5  ;;  %8796 = vmatprep.subr.bf16.mxu0 %v12013_v63  ;;  %v12031_v55 = vld [vmem:[#allocation8 + $0xf4] ss:$8 sps:$4 sm:$0xff]  }
0x17db   :  { %v17146_v57 = vadd.f32 %v8433_v24, %v18393_v36  ;;  %8480 = vadd.xlane.f32.xlu0 %v17143_v9  ;;  %8797 = vmatpush1.bf16.msra.mxu0 %v12011_v19 }
0x17dc   :  { %8798 = vmatprep.subr.bf16.mxu0 %v12016_v20 }
0x17dd   :  { %8482 = vadd.xlane.f32.xlu1 %v17146_v57 }
0x17df   :  { %8484 = vadd.xlane.f32.xlu0 %v17150_v3 }
0x17e1   :  { %8486 = vadd.xlane.f32.xlu1 %v17154_v50 }
0x181d   :  { %v8457_v42 = vpop.xlane.xlu0 %8456 }
0x181e   :  { %v8488_v2 = vmul.f32 0.0078125, %v8457_v42 }
0x181f   :  { %v8459_v1 = vpop.xlane.xlu1 %8458 }
0x1820   :  { %v17159_v23 = vsub.f32 %v17095_v44, %v8488_v2  ;;  %v8489_v25 = vmul.f32 0.0078125, %v8459_v1 }
0x1821   :  { %v8461_v11 = vpop.xlane.xlu0 %8460 }
0x1822   :  { %v17162_v59 = vsub.f32 %v17098_v62, %v8489_v25  ;;  %v8490_v22 = vmul.f32 0.0078125, %v8461_v11  ;;  %v8520_v34 = vmul.f32 %v17159_v23, %v17159_v23 }
0x1823   :  { %v8463_v43 = vpop.xlane.xlu1 %8462 }
0x1824   :  { %v17167_v15 = vsub.f32 %v17102_v31, %v8490_v22  ;;  %v8491_v7 = vmul.f32 0.0078125, %v8463_v43  ;;  %8536 = vadd.xlane.f32.xlu0 %v8520_v34  ;;  %v8521_v53 = vmul.f32 %v17162_v59, %v17162_v59 }
0x1825   :  { %v8465_v44 = vpop.xlane.xlu0 %8464 }
0x1826   :  { %v17172_v26 = vsub.f32 %v17106_v18, %v8491_v7  ;;  %v8492_v28 = vmul.f32 0.0078125, %v8465_v44  ;;  %8538 = vadd.xlane.f32.xlu1 %v8521_v53  ;;  %v8522_v62 = vmul.f32 %v17167_v15, %v17167_v15 }
0x1827   :  { %v8467_v51 = vpop.xlane.xlu1 %8466 }
0x1828   :  { %v17177_v41 = vsub.f32 %v17110_v56, %v8492_v28  ;;  %v8493_v31 = vmul.f32 0.0078125, %v8467_v51  ;;  %8540 = vadd.xlane.f32.xlu0 %v8522_v62  ;;  %v8523_v32 = vmul.f32 %v17172_v26, %v17172_v26 }
0x1829   :  { %v8469_v39 = vpop.xlane.xlu0 %8468 }
0x182a   :  { %v17182_v60 = vsub.f32 %v17114_v0, %v8493_v31  ;;  %v8494_v18 = vmul.f32 0.0078125, %v8469_v39  ;;  %8542 = vadd.xlane.f32.xlu1 %v8523_v32  ;;  %v8524_v6 = vmul.f32 %v17177_v41, %v17177_v41 }
0x182b   :  { %v8471_v35 = vpop.xlane.xlu1 %8470 }
0x182c   :  { %v17187_v38 = vsub.f32 %v17118_v17, %v8494_v18  ;;  %v8495_v56 = vmul.f32 0.0078125, %v8471_v35  ;;  %8544 = vadd.xlane.f32.xlu0 %v8524_v6  ;;  %v8525_v33 = vmul.f32 %v17182_v60, %v17182_v60  ;;  %v12014_v17 = vld [vmem:[#allocation8 + $0xa0] ss:$8 sps:$4 sm:$0xff]  }
0x182d   :  { %8799 = vmatpush1.bf16.msra.mxu0 %v12014_v17 }
0x182e   :  { %v17192_v13 = vsub.f32 %v17122_v45, %v8495_v56  ;;  %8546 = vadd.xlane.f32.xlu1 %v8525_v33  ;;  %v8526_v0 = vmul.f32 %v17187_v38, %v17187_v38  ;;  %8800 = vmatprep.subr.bf16.mxu0 %v12019_v52  ;;  %v12020_v45 = vld [vmem:[#allocation8 + $0xc0] ss:$8 sps:$4 sm:$0xff]  }
0x1830   :  { %8548 = vadd.xlane.f32.xlu0 %v8526_v0  ;;  %v8527_v37 = vmul.f32 %v17192_v13, %v17192_v13 }
0x1831   :  { %8801 = vmatpush1.bf16.msra.mxu0 %v12017_v10 }
0x1832   :  { %8550 = vadd.xlane.f32.xlu1 %v8527_v37  ;;  %8802 = vmatprep.subr.bf16.mxu0 %v12022_v12 }
0x1835   :  { %8803 = vmatpush1.bf16.msra.mxu0 %v12020_v45 }
0x1836   :  { %8804 = vmatprep.subr.bf16.mxu0 %v12025_v8 }
0x1839   :  { %8805 = vmatpush1.bf16.msra.mxu0 %v12023_v48 }
0x183a   :  { %8806 = vmatprep.subr.bf16.mxu0 %v12028_v30 }
0x183d   :  { %8807 = vmatpush1.bf16.msra.mxu0 %v12026_v61  ;;  %v17241_v61 = vld [vmem:[%s17925_s10 + $0x1] ss:$0 sm:$0xff] }
0x183e   :  { %8808 = vmatprep.subr.bf16.mxu0 %v12031_v55 }
0x1841   :  { %8809 = vmatpush1.bf16.msra.mxu0 %v12029_v58 }
0x184e   :  { %v8473_v16 = vpop.xlane.xlu0 %8472 }
0x184f   :  { %v8496_v4 = vmul.f32 0.0078125, %v8473_v16 }
0x1850   :  { %v8475_v14 = vpop.xlane.xlu1 %8474 }
0x1851   :  { %v17199_v24 = vsub.f32 %v17127_v49, %v8496_v4  ;;  %v8497_v27 = vmul.f32 0.0078125, %v8475_v14 }
0x1852   :  { %v8477_v36 = vpop.xlane.xlu0 %8476 }
0x1853   :  { %v17202_v54 = vsub.f32 %v17130_v21, %v8497_v27  ;;  %v8498_v5 = vmul.f32 0.0078125, %v8477_v36  ;;  %v8528_v47 = vmul.f32 %v17199_v24, %v17199_v24 }
0x1854   :  { %v8479_v40 = vpop.xlane.xlu1 %8478 }
0x1855   :  { %v17207_v63 = vsub.f32 %v17134_v46, %v8498_v5  ;;  %v8499_v19 = vmul.f32 0.0078125, %v8479_v40  ;;  %8552 = vadd.xlane.f32.xlu0 %v8528_v47  ;;  %v8529_v42 = vmul.f32 %v17202_v54, %v17202_v54  ;;  %v17249_v47 = vld [vmem:[%s17926_s11 + $0x1] ss:$0 sm:$0xff] }
0x1857   :  { %v17212_v49 = vsub.f32 %v17138_v29, %v8499_v19  ;;  %8554 = vadd.xlane.f32.xlu1 %v8529_v42  ;;  %v8530_v21 = vmul.f32 %v17207_v63, %v17207_v63 }
0x1859   :  { %8556 = vadd.xlane.f32.xlu0 %v8530_v21  ;;  %v8531_v2 = vmul.f32 %v17212_v49, %v17212_v49 }
0x185b   :  { %8558 = vadd.xlane.f32.xlu1 %v8531_v2 }
0x1868   :  { %v8481_v1 = vpop.xlane.xlu0 %8480 }
0x1869   :  { %v8500_v46 = vmul.f32 0.0078125, %v8481_v1 }
0x186a   :  { %v8483_v25 = vpop.xlane.xlu1 %8482 }
0x186b   :  { %v17219_v11 = vsub.f32 %v17143_v9, %v8500_v46  ;;  %v8501_v22 = vmul.f32 0.0078125, %v8483_v25 }
0x186c   :  { %v8485_v34 = vpop.xlane.xlu0 %8484 }
0x186d   :  { %v17222_v29 = vsub.f32 %v17146_v57, %v8501_v22  ;;  %v8502_v43 = vmul.f32 0.0078125, %v8485_v34  ;;  %v8532_v7 = vmul.f32 %v17219_v11, %v17219_v11 }
0x186e   :  { %v8487_v53 = vpop.xlane.xlu1 %8486 }
0x186f   :  { %v17227_v44 = vsub.f32 %v17150_v3, %v8502_v43  ;;  %v8503_v28 = vmul.f32 0.0078125, %v8487_v53  ;;  %8560 = vadd.xlane.f32.xlu0 %v8532_v7  ;;  %v8533_v62 = vmul.f32 %v17222_v29, %v17222_v29  ;;  %v18396_v43 = vmov 0  }
0x1871   :  { %v17232_v9 = vsub.f32 %v17154_v50, %v8503_v28  ;;  %8562 = vadd.xlane.f32.xlu1 %v8533_v62  ;;  %v8534_v57 = vmul.f32 %v17227_v44, %v17227_v44 }
0x1873   :  { %8564 = vadd.xlane.f32.xlu0 %v8534_v57  ;;  %v8535_v51 = vmul.f32 %v17232_v9, %v17232_v9 }
0x1875   :  { %8566 = vadd.xlane.f32.xlu1 %v8535_v51 }
0x18b1   :  { %v8537_v31 = vpop.xlane.xlu0 %8536 }
0x18b2   :  { %v8568_v3 = vmul.f32 0.0078125, %v8537_v31 }
0x18b3   :  { %v8539_v32 = vpop.xlane.xlu1 %8538 }
0x18b4   :  { %v8584_v39 = vadd.f32 1e-12, %v8568_v3  ;;  %v8569_v18 = vmul.f32 0.0078125, %v8539_v32 }
0x18b5   :  { %v8541_v6 = vpop.xlane.xlu0 %8540 }
0x18b6   :  { %12720 = vrsqrt.f32 %v8584_v39  ;;  %v8585_v35 = vadd.f32 1e-12, %v8569_v18  ;;  %v8570_v56 = vmul.f32 0.0078125, %v8541_v6 }
0x18b7   :  { %v8543_v50 = vpop.xlane.xlu1 %8542 }
0x18b8   :  { %12722 = vrsqrt.f32 %v8585_v35  ;;  %v8586_v33 = vadd.f32 1e-12, %v8570_v56  ;;  %v8571_v0 = vmul.f32 0.0078125, %v8543_v50 }
0x18b9   :  { %v8545_v37 = vpop.xlane.xlu0 %8544 }
0x18ba   :  { %12724 = vrsqrt.f32 %v8586_v33  ;;  %v8587_v20 = vadd.f32 1e-12, %v8571_v0  ;;  %v8572_v17 = vmul.f32 0.0078125, %v8545_v37 }
0x18bb   :  { %v8547_v52 = vpop.xlane.xlu1 %8546 }
0x18bc   :  { %12726 = vrsqrt.f32 %v8587_v20  ;;  %v8573_v10 = vmul.f32 0.0078125, %v8547_v52  ;;  %v8588_v12 = vadd.f32 1e-12, %v8572_v17 }
0x18bd   :  { %v8549_v8 = vpop.xlane.xlu0 %8548 }
0x18be   :  { %v8589_v45 = vadd.f32 1e-12, %v8573_v10  ;;  %v8574_v4 = vmul.f32 0.0078125, %v8549_v8 }
0x18bf   :  { %v8551_v48 = vpop.xlane.xlu1 %8550 }
0x18c0   :  { %v12721_v30 = vpop.eup %12720  ;;  %12728 = vrsqrt.f32 %v8589_v45  ;;  %v8575_v55 = vmul.f32 0.0078125, %v8551_v48  ;;  %v8590_v42 = vadd.f32 1e-12, %v8574_v4 }
0x18c1   :  { %v8616_v58 = vmul.f32 %v12721_v30, %v17159_v23  ;;  %12730 = vrsqrt.f32 %v8588_v12 }
0x18c2   :  { %v12723_v16 = vpop.eup %12722  ;;  %v8591_v5 = vadd.f32 1e-12, %v8575_v55 }
0x18c3   :  { %v8638_v14 = vmul.f32 %v17241_v61, %v8616_v58  ;;  %v8617_v27 = vmul.f32 %v12723_v16, %v17162_v59 }
0x18c4   :  { %v12725_v36 = vpop.eup %12724  ;;  %12732 = vrsqrt.f32 %v8591_v5 }
0x18c5   :  { %v8639_v40 = vmul.f32 %v17241_v61, %v8617_v27  ;;  %v17253_v23 = vadd.f32 %v17249_v47, %v8638_v14  ;;  %v8618_v2 = vmul.f32 %v12725_v36, %v17167_v15  ;;  %12734 = vrsqrt.f32 %v8590_v42 }
0x18c6   :  { %v12727_v19 = vpop.eup %12726 }
0x18c7   :  { %v17256_v21 = vadd.f32 %v17249_v47, %v8639_v40  ;;  %v8619_v59 = vmul.f32 %v12727_v19, %v17172_v26  ;;  %v8640_v22 = vmul.f32 %v17241_v61, %v8618_v2 }
0x18c9   :  { %v8676_v1 = vpack.c.bf16 %v17256_v21, %v17253_v23  ;;  %v8641_v46 = vmul.f32 %v17241_v61, %v8619_v59  ;;  %v17270_v26 = vadd.f32 %v17249_v47, %v8640_v22 }
0x18ca   :  { %v12729_v25 = vpop.eup %12728 }
0x18cb   :  { %8827 = vmatmul.mubr.bf16.vlgmr.msra.gmra.mrb[240].mxu0 %v8676_v1  ;;  %v12731_v34 = vpop.eup %12730  ;;  %v17266_v7 = vadd.f32 %v17249_v47, %v8641_v46  ;;  %v8621_v15 = vmul.f32 %v12729_v25, %v17182_v60 }
0x18cc   :  { %8836 = vmatprep.mubr.bf16.mxu0 %v18396_v43  ;;  %v8620_v53 = vmul.f32 %v12731_v34, %v17177_v41 }
0x18cd   :  { %v8677_v28 = vpack.c.bf16 %v17266_v7, %v17270_v26  ;;  %v8643_v62 = vmul.f32 %v17241_v61, %v8621_v15 }
0x18ce   :  { %v12733_v57 = vpop.eup %12732  ;;  %v8642_v51 = vmul.f32 %v17241_v61, %v8620_v53 }
0x18cf   :  { %v12735_v31 = vpop.eup %12734  ;;  %v17279_v3 = vadd.f32 %v17249_v47, %v8643_v62  ;;  %v8623_v60 = vmul.f32 %v12733_v57, %v17192_v13 }
0x18d0   :  { %v17283_v32 = vadd.f32 %v17249_v47, %v8642_v51  ;;  %v8622_v41 = vmul.f32 %v12735_v31, %v17187_v38 }
0x18d1   :  { %v8645_v18 = vmul.f32 %v17241_v61, %v8623_v60 }
0x18d2   :  { %v8678_v39 = vpack.c.bf16 %v17279_v3, %v17283_v32  ;;  %v8644_v6 = vmul.f32 %v17241_v61, %v8622_v41 }
0x18d3   :  { %8837 = vmatmul.mubr.bf16.gmra.mrb[244].mxu0 %v8677_v28  ;;  %v17292_v35 = vadd.f32 %v17249_v47, %v8645_v18 }
0x18d4   :  { %8846 = vmatprep.mubr.bf16.mxu0 %v18396_v43  ;;  %v17295_v13 = vadd.f32 %v17249_v47, %v8644_v6 }
0x18d6   :  { %v8679_v56 = vpack.c.bf16 %v17292_v35, %v17295_v13 }
0x18db   :  { %8847 = vmatmul.mubr.bf16.gmra.mrb[248].mxu0 %v8678_v39 }
0x18dc   :  { %8856 = vmatprep.mubr.bf16.mxu0 %v18396_v43 }
0x18e2   :  { %v8553_v38 = vpop.xlane.xlu0 %8552 }
0x18e3   :  { %v8576_v50 = vmul.f32 0.0078125, %v8553_v38  ;;  %8857 = vmatmul.mubr.bf16.gmra.mrb[252].mxu0 %v8679_v56 }
0x18e4   :  { %v8555_v33 = vpop.xlane.xlu1 %8554  ;;  %8866 = vmatprep.mubr.bf16.mxu0 %v18396_v43 }
0x18e5   :  { %v8592_v0 = vadd.f32 1e-12, %v8576_v50  ;;  %v8577_v37 = vmul.f32 0.0078125, %v8555_v33 }
0x18e6   :  { %v8557_v20 = vpop.xlane.xlu0 %8556 }
0x18e7   :  { %12736 = vrsqrt.f32 %v8592_v0  ;;  %v8593_v17 = vadd.f32 1e-12, %v8577_v37  ;;  %v8578_v52 = vmul.f32 0.0078125, %v8557_v20 }
0x18e8   :  { %v8559_v10 = vpop.xlane.xlu1 %8558 }
0x18e9   :  { %12738 = vrsqrt.f32 %v8593_v17  ;;  %v8594_v12 = vadd.f32 1e-12, %v8578_v52  ;;  %v8579_v45 = vmul.f32 0.0078125, %v8559_v10  ;;  %v12033_v10 = vld [vmem:[#allocation10 + $0x80] sm:$0xff]  }
0x18eb   :  { %12740 = vrsqrt.f32 %v8594_v12  ;;  %v8595_v8 = vadd.f32 1e-12, %v8579_v45  ;;  %v12035_v12 = vld [vmem:[#allocation10 + $0x88] sm:$0xff]   ;;  %v12037_v45 = vld [vmem:[#allocation10 + $0x90] sm:$0xff]  }
0x18ed   :  { %12742 = vrsqrt.f32 %v8595_v8  ;;  %v12039_v8 = vld [vmem:[#allocation10 + $0x98] sm:$0xff]  }
0x18f1   :  { %v12737_v48 = vpop.eup %12736 }
0x18f2   :  { %v8624_v30 = vmul.f32 %v12737_v48, %v17199_v24  ;;  %v12040_v48 = vld [vmem:[#allocation10 + $0xe0] sm:$0xff]  }
0x18f3   :  { %v12739_v55 = vpop.eup %12738 }
0x18f4   :  { %v8646_v58 = vmul.f32 %v17241_v61, %v8624_v30  ;;  %v8625_v16 = vmul.f32 %v12739_v55, %v17202_v54  ;;  %v12041_v30 = vld [vmem:[#allocation10 + $0xa0] sm:$0xff]   ;;  %v12042_v55 = vld [vmem:[#allocation10 + $0xe8] sm:$0xff]  }
0x18f5   :  { %v12741_v4 = vpop.eup %12740 }
0x18f6   :  { %v8647_v14 = vmul.f32 %v17241_v61, %v8625_v16  ;;  %v17305_v36 = vadd.f32 %v17249_v47, %v8646_v58  ;;  %v8626_v40 = vmul.f32 %v12741_v4, %v17207_v63  ;;  %v12043_v58 = vld [vmem:[#allocation10 + $0xa8] sm:$0xff]   ;;  %v12044_v16 = vld [vmem:[#allocation10 + $0xf0] sm:$0xff]  }
0x18f7   :  { %v12743_v27 = vpop.eup %12742  ;;  %v12045_v4 = vld [vmem:[#allocation10 + $0xb0] sm:$0xff]  }
0x18f8   :  { %v17308_v5 = vadd.f32 %v17249_v47, %v8647_v14  ;;  %v8627_v19 = vmul.f32 %v12743_v27, %v17212_v49  ;;  %v8648_v54 = vmul.f32 %v17241_v61, %v8626_v40  ;;  %v12046_v14 = vld [vmem:[#allocation10 + $0xf8] sm:$0xff]   ;;  %v10271_v40 = vld [vmem:[%s17928_s13 + $0x2] sm:$0x3] }
0x18f9   :  { %v12047_v27 = vld [vmem:[#allocation10 + $0xb8] sm:$0xff]  }
0x18fa   :  { %v8680_v24 = vpack.c.bf16 %v17308_v5, %v17305_v36  ;;  %v8649_v42 = vmul.f32 %v17241_v61, %v8627_v19  ;;  %v17321_v49 = vadd.f32 %v17249_v47, %v8648_v54  ;;  %v18397_v19 = vld [vmem:[#allocation17_spill] sm:$0xff] }
0x18fc   :  { %8867 = vmatmul.mubr.bf16.gmra.mrb[0].mxu0 %v8680_v24  ;;  %v8561_v2 = vpop.xlane.xlu0 %8560  ;;  %v17318_v1 = vadd.f32 %v17249_v47, %v8649_v42  ;;  %v17355_v24 = vrot.slane %v10271_v40, %v18397_v19  ;;  %v18398_v42 = vld [vmem:[#allocation18_spill] sm:$0xff] }
0x18fd   :  { %v8580_v59 = vmul.f32 0.0078125, %v8561_v2  ;;  %8876 = vmatprep.mubr.bf16.mxu0 %v18396_v43  ;;  %v17358_v54 = vrot.slane %v10271_v40, %v18398_v42 }
0x18fe   :  { %v8563_v46 = vpop.xlane.xlu1 %8562  ;;  %v8681_v53 = vpack.c.bf16 %v17318_v1, %v17321_v49 }
0x18ff   :  { %v8596_v25 = vadd.f32 1e-12, %v8580_v59  ;;  %v8581_v63 = vmul.f32 0.0078125, %v8563_v46 }
0x1900   :  { %v8565_v22 = vpop.xlane.xlu0 %8564 }
0x1901   :  { %12744 = vrsqrt.f32 %v8596_v25  ;;  %v8597_v34 = vadd.f32 1e-12, %v8581_v63  ;;  %v8582_v15 = vmul.f32 0.0078125, %v8565_v22 }
0x1902   :  { %v8567_v28 = vpop.xlane.xlu1 %8566 }
0x1903   :  { %12746 = vrsqrt.f32 %v8597_v34  ;;  %v8598_v62 = vadd.f32 1e-12, %v8582_v15  ;;  %v8583_v57 = vmul.f32 0.0078125, %v8567_v28 }
0x1904   :  { %8877 = vmatmul.mubr.bf16.gmra.mrb[4].mxu0 %v8681_v53 }
0x1905   :  { %12748 = vrsqrt.f32 %v8598_v62  ;;  %v8599_v51 = vadd.f32 1e-12, %v8583_v57  ;;  %8886 = vmatprep.mubr.bf16.mxu0 %v18396_v43 }
0x1907   :  { %12750 = vrsqrt.f32 %v8599_v51 }
0x190b   :  { %v12745_v31 = vpop.eup %12744 }
0x190c   :  { %v8628_v60 = vmul.f32 %v12745_v31, %v17219_v11 }
0x190d   :  { %v12747_v41 = vpop.eup %12746 }
0x190e   :  { %v8650_v39 = vmul.f32 %v17241_v61, %v8628_v60  ;;  %v8629_v18 = vmul.f32 %v12747_v41, %v17222_v29 }
0x190f   :  { %v12749_v6 = vpop.eup %12748 }
0x1910   :  { %v8651_v56 = vmul.f32 %v17241_v61, %v8629_v18  ;;  %v17331_v50 = vadd.f32 %v17249_v47, %v8650_v39  ;;  %v8630_v0 = vmul.f32 %v12749_v6, %v17227_v44 }
0x1911   :  { %v12751_v38 = vpop.eup %12750 }
0x1912   :  { %v17334_v33 = vadd.f32 %v17249_v47, %v8651_v56  ;;  %v8631_v37 = vmul.f32 %v12751_v38, %v17232_v9  ;;  %v8652_v29 = vmul.f32 %v17241_v61, %v8630_v0  ;;  %v12032_v9 = vld [vmem:[#allocation10 + $0xc0] sm:$0xff]  }
0x1913   :  { %10814 = vmatprep.subr.bf16.mxu0 %v12032_v9  ;;  %11678 = vmatprep.subr.bf16.mxu1 %v12032_v9 }
0x1914   :  { %v8682_v11 = vpack.c.bf16 %v17334_v33, %v17331_v50  ;;  %v8653_v20 = vmul.f32 %v17241_v61, %v8631_v37  ;;  %v17347_v52 = vadd.f32 %v17249_v47, %v8652_v29  ;;  %10815 = vmatpush3.bf16.msra.mxu0 %v12033_v10  ;;  %11686 = vmatpush3.bf16.msra.mxu1 %v12033_v10  ;;  %v12034_v61 = vld [vmem:[#allocation10 + $0xc8] sm:$0xff]  }
0x1915   :  { %10816 = vmatprep.subr.bf16.mxu0 %v12034_v61  ;;  %11679 = vmatprep.subr.bf16.mxu1 %v12034_v61 }
0x1916   :  { %8887 = vmatmul.mubr.bf16.gmra.mrb[8].mxu0 %v8682_v11  ;;  %v17344_v17 = vadd.f32 %v17249_v47, %v8653_v20  ;;  %v12038_v47 = vld [vmem:[#allocation10 + $0xd8] sm:$0xff]  }
0x1917   :  { %8896 = vmatprep.mubr.bf16.mxu0 %v18396_v43  ;;  %v12036_v43 = vld [vmem:[#allocation10 + $0xd0] sm:$0xff]  }
0x1918   :  { %v8683_v44 = vpack.c.bf16 %v17344_v17, %v17347_v52  ;;  %10817 = vmatpush3.bf16.msra.mxu0 %v12035_v12  ;;  %11687 = vmatpush3.bf16.msra.mxu1 %v12035_v12 }
0x1919   :  { %10818 = vmatprep.subr.bf16.mxu0 %v12036_v43  ;;  %11680 = vmatprep.subr.bf16.mxu1 %v12036_v43 }
0x191c   :  { %10819 = vmatpush3.bf16.msra.mxu0 %v12037_v45  ;;  %11688 = vmatpush3.bf16.msra.mxu1 %v12037_v45 }
0x191d   :  { %10820 = vmatprep.subr.bf16.mxu0 %v12038_v47  ;;  %11681 = vmatprep.subr.bf16.mxu1 %v12038_v47 }
0x191e   :  { %8897 = vmatmul.mubr.bf16.gmra.mrb[12].mxu0 %v8683_v44 }
0x1920   :  { %10821 = vmatpush3.bf16.msra.mxu0 %v12039_v8  ;;  %11689 = vmatpush3.bf16.msra.mxu1 %v12039_v8 }
0x1921   :  { %10822 = vmatprep.subr.bf16.mxu0 %v12040_v48  ;;  %11682 = vmatprep.subr.bf16.mxu1 %v12040_v48 }
0x1924   :  { %10823 = vmatpush3.bf16.msra.mxu0 %v12041_v30  ;;  %11690 = vmatpush3.bf16.msra.mxu1 %v12041_v30 }
0x1925   :  { %10824 = vmatprep.subr.bf16.mxu0 %v12042_v55  ;;  %11683 = vmatprep.subr.bf16.mxu1 %v12042_v55 }
0x1928   :  { %10825 = vmatpush3.bf16.msra.mxu0 %v12043_v58  ;;  %11691 = vmatpush3.bf16.msra.mxu1 %v12043_v58 }
0x1929   :  { %10826 = vmatprep.subr.bf16.mxu0 %v12044_v16  ;;  %11684 = vmatprep.subr.bf16.mxu1 %v12044_v16 }
0x192c   :  { %10827 = vmatpush3.bf16.msra.mxu0 %v12045_v4  ;;  %11692 = vmatpush3.bf16.msra.mxu1 %v12045_v4 }
0x192d   :  { %10828 = vmatprep.subr.bf16.mxu0 %v12046_v14  ;;  %11685 = vmatprep.subr.bf16.mxu1 %v12046_v14 }
0x1930   :  { %10829 = vmatpush3.bf16.msra.mxu0 %v12047_v27  ;;  %11693 = vmatpush3.bf16.msra.mxu1 %v12047_v27 }
0x199e   :  { %v8828_v2 = vpop.f32.mrb[240].mxu0 }
0x199f   :  { %v17361_v59 = vadd.f32 %v8828_v2, %v17355_v24  ;;  %v8830_v46 = vpop.f32.mrb[241].mxu0 }
0x19a0   :  { %v17364_v25 = vadd.f32 %v8830_v46, %v17358_v54  ;;  %v8832_v63 = vpop.f32.mrb[242].mxu0 }
0x19a1   :  { %v8907_v22 = vmul.f32 %v17361_v59, %v17361_v59  ;;  %v17369_v34 = vadd.f32 %v8832_v63, %v17355_v24  ;;  %v8834_v15 = vpop.f32.mrb[243].mxu0 }
0x19a2   :  { %v8908_v53 = vmul.f32 %v17364_v25, %v17364_v25  ;;  %v17374_v28 = vadd.f32 %v8834_v15, %v17358_v54 }
0x19a3   :  { %v8939_v62 = vmul.f32 %v8907_v22, %v17361_v59  ;;  %v8909_v57 = vmul.f32 %v17369_v34, %v17369_v34 }
0x19a4   :  { %v8940_v51 = vmul.f32 %v8908_v53, %v17364_v25  ;;  %v8910_v31 = vmul.f32 %v17374_v28, %v17374_v28 }
0x19a5   :  { %v8971_v60 = vmul.f32 0.044715, %v8939_v62  ;;  %v8941_v41 = vmul.f32 %v8909_v57, %v17369_v34 }
0x19a6   :  { %v8972_v39 = vmul.f32 0.044715, %v8940_v51  ;;  %v8942_v18 = vmul.f32 %v8910_v31, %v17374_v28  ;;  %v8838_v6 = vpop.f32.mrb[244].mxu0 }
0x19a7   :  { %v9003_v56 = vadd.f32 %v8971_v60, %v17361_v59  ;;  %v8973_v38 = vmul.f32 0.044715, %v8941_v41  ;;  %v17386_v0 = vadd.f32 %v8838_v6, %v17355_v24  ;;  %v8840_v37 = vpop.f32.mrb[245].mxu0 }
0x19a8   :  { %v9004_v11 = vadd.f32 %v8972_v39, %v17364_v25  ;;  %v8974_v20 = vmul.f32 0.044715, %v8942_v18  ;;  %v17390_v29 = vadd.f32 %v8840_v37, %v17358_v54  ;;  %v8842_v44 = vpop.f32.mrb[246].mxu0 }
0x19a9   :  { %v9035_v9 = vmul.f32 0.7978846, %v9003_v56  ;;  %v9005_v10 = vadd.f32 %v8973_v38, %v17369_v34  ;;  %v8911_v61 = vmul.f32 %v17386_v0, %v17386_v0  ;;  %v17396_v12 = vadd.f32 %v8842_v44, %v17355_v24  ;;  %v8844_v43 = vpop.f32.mrb[247].mxu0 }
0x19aa   :  { %v9036_v45 = vmul.f32 0.7978846, %v9004_v11  ;;  %v9006_v47 = vadd.f32 %v8974_v20, %v17374_v28  ;;  %v8912_v8 = vmul.f32 %v17390_v29, %v17390_v29  ;;  %v17402_v48 = vadd.f32 %v8844_v43, %v17358_v54 }
0x19ab   :  { %12752 = vtanh.f32 %v9035_v9  ;;  %v9037_v30 = vmul.f32 0.7978846, %v9005_v10  ;;  %v8943_v55 = vmul.f32 %v8911_v61, %v17386_v0  ;;  %v8913_v58 = vmul.f32 %v17396_v12, %v17396_v12 }
0x19ac   :  { %12754 = vtanh.f32 %v9036_v45  ;;  %v9038_v16 = vmul.f32 0.7978846, %v9006_v47  ;;  %v8944_v4 = vmul.f32 %v8912_v8, %v17390_v29  ;;  %v8914_v14 = vmul.f32 %v17402_v48, %v17402_v48 }
0x19ad   :  { %12756 = vtanh.f32 %v9037_v30  ;;  %v8975_v27 = vmul.f32 0.044715, %v8943_v55  ;;  %v8945_v40 = vmul.f32 %v8913_v58, %v17396_v12 }
0x19ae   :  { %v8976_v19 = vmul.f32 0.044715, %v8944_v4  ;;  %v8946_v42 = vmul.f32 %v8914_v14, %v17402_v48  ;;  %v8848_v2 = vpop.f32.mrb[248].mxu0  ;;  %12758 = vtanh.f32 %v9038_v16 }
0x19af   :  { %v9007_v46 = vadd.f32 %v8975_v27, %v17386_v0  ;;  %v8977_v63 = vmul.f32 0.044715, %v8945_v40  ;;  %v17414_v22 = vadd.f32 %v8848_v2, %v17355_v24  ;;  %v8850_v15 = vpop.f32.mrb[249].mxu0 }
0x19b0   :  { %v9008_v53 = vadd.f32 %v8976_v19, %v17390_v29  ;;  %v8978_v62 = vmul.f32 0.044715, %v8946_v42  ;;  %v17418_v57 = vadd.f32 %v8850_v15, %v17358_v54  ;;  %v8852_v51 = vpop.f32.mrb[250].mxu0 }
0x19b1   :  { %v9039_v31 = vmul.f32 0.7978846, %v9007_v46  ;;  %v9009_v60 = vadd.f32 %v8977_v63, %v17396_v12  ;;  %v8915_v41 = vmul.f32 %v17414_v22, %v17414_v22  ;;  %v17424_v39 = vadd.f32 %v8852_v51, %v17355_v24  ;;  %v8854_v18 = vpop.f32.mrb[251].mxu0 }
0x19b2   :  { %v9040_v6 = vmul.f32 0.7978846, %v9008_v53  ;;  %v9010_v56 = vadd.f32 %v8978_v62, %v17402_v48  ;;  %v8916_v38 = vmul.f32 %v17418_v57, %v17418_v57  ;;  %v17430_v37 = vadd.f32 %v8854_v18, %v17358_v54 }
0x19b3   :  { %12760 = vtanh.f32 %v9039_v31  ;;  %v9041_v11 = vmul.f32 0.7978846, %v9009_v60  ;;  %v8947_v20 = vmul.f32 %v8915_v41, %v17414_v22  ;;  %v8917_v44 = vmul.f32 %v17424_v39, %v17424_v39 }
0x19b4   :  { %12762 = vtanh.f32 %v9040_v6  ;;  %v9042_v9 = vmul.f32 0.7978846, %v9010_v56  ;;  %v8948_v10 = vmul.f32 %v8916_v38, %v17418_v57  ;;  %v8918_v61 = vmul.f32 %v17430_v37, %v17430_v37 }
0x19b5   :  { %v12753_v43 = vpop.eup %12752  ;;  %12764 = vtanh.f32 %v9041_v11  ;;  %v8979_v45 = vmul.f32 0.044715, %v8947_v20  ;;  %v8949_v47 = vmul.f32 %v8917_v44, %v17424_v39 }
0x19b6   :  { %v12755_v8 = vpop.eup %12754  ;;  %v9099_v30 = vadd.f32 1.0, %v12753_v43  ;;  %12766 = vtanh.f32 %v9042_v9  ;;  %v8980_v55 = vmul.f32 0.044715, %v8948_v10  ;;  %v8950_v58 = vmul.f32 %v8918_v61, %v17430_v37  ;;  %v8858_v16 = vpop.f32.mrb[252].mxu0 }
0x19b7   :  { %v12757_v4 = vpop.eup %12756  ;;  %v9011_v14 = vadd.f32 %v8979_v45, %v17414_v22  ;;  %v8981_v27 = vmul.f32 0.044715, %v8949_v47  ;;  %v17442_v40 = vadd.f32 %v8858_v16, %v17355_v24  ;;  %v8860_v19 = vpop.f32.mrb[253].mxu0  ;;  %v9100_v42 = vadd.f32 1.0, %v12755_v8 }
0x19b8   :  { %v9131_v2 = vmul.f32 0.5, %v9099_v30  ;;  %v9101_v46 = vadd.f32 1.0, %v12757_v4  ;;  %v9012_v63 = vadd.f32 %v8980_v55, %v17418_v57  ;;  %v8982_v15 = vmul.f32 0.044715, %v8950_v58  ;;  %v8862_v53 = vpop.f32.mrb[254].mxu0  ;;  %v12759_v18 = vpop.eup %12758 }
0x19b9   :  { %v9043_v62 = vmul.f32 0.7978846, %v9011_v14  ;;  %v9013_v51 = vadd.f32 %v8981_v27, %v17424_v39  ;;  %v8919_v31 = vmul.f32 %v17442_v40, %v17442_v40  ;;  %v17449_v60 = vadd.f32 %v8860_v19, %v17358_v54  ;;  %v8864_v41 = vpop.f32.mrb[255].mxu0 }
0x19ba   :  { %v17452_v6 = vmul.f32 %v9131_v2, %v17361_v59  ;;  %v9133_v56 = vmul.f32 0.5, %v9101_v46  ;;  %v9044_v38 = vmul.f32 0.7978846, %v9012_v63  ;;  %v9014_v11 = vadd.f32 %v8982_v15, %v17430_v37 }
0x19bb   :  { %12768 = vtanh.f32 %v9043_v62  ;;  %v9045_v20 = vmul.f32 0.7978846, %v9013_v51  ;;  %v8951_v44 = vmul.f32 %v8919_v31, %v17442_v40  ;;  %v8920_v9 = vmul.f32 %v17449_v60, %v17449_v60 }
0x19bc   :  { %v9165_v10 = vmul.f32 %v9133_v56, %v17369_v34  ;;  %12770 = vtanh.f32 %v9044_v38  ;;  %v9046_v61 = vmul.f32 0.7978846, %v9014_v11  ;;  %v17460_v43 = vadd.f32 %v8862_v53, %v17355_v24 }
0x19bd   :  { %v12761_v59 = vpop.eup %12760  ;;  %12772 = vtanh.f32 %v9045_v20  ;;  %v8983_v45 = vmul.f32 0.044715, %v8951_v44  ;;  %v8952_v47 = vmul.f32 %v8920_v9, %v17449_v60  ;;  %v17464_v8 = vadd.f32 %v8864_v41, %v17358_v54 }
0x19be   :  { %v12763_v30 = vpop.eup %12762  ;;  %v9195_v55 = vpack.c.bf16 %v9165_v10, %v17452_v6  ;;  %v9103_v58 = vadd.f32 1.0, %v12761_v59  ;;  %12774 = vtanh.f32 %v9046_v61  ;;  %v8921_v34 = vmul.f32 %v17460_v43, %v17460_v43 }
0x19bf   :  { %v12765_v16 = vpop.eup %12764  ;;  %v9015_v4 = vadd.f32 %v8983_v45, %v17442_v40  ;;  %v8984_v14 = vmul.f32 0.044715, %v8952_v47  ;;  %v8922_v27 = vmul.f32 %v17464_v8, %v17464_v8  ;;  %v9102_v19 = vadd.f32 1.0, %v12759_v18 }
0x19c0   :  { %v12767_v2 = vpop.eup %12766  ;;  %v9135_v46 = vmul.f32 0.5, %v9103_v58  ;;  %v9105_v63 = vadd.f32 1.0, %v12765_v16  ;;  %v8953_v15 = vmul.f32 %v8921_v34, %v17460_v43  ;;  %v9132_v53 = vmul.f32 0.5, %v9100_v42 }
0x19c1   :  { %v9047_v62 = vmul.f32 0.7978846, %v9015_v4  ;;  %v9016_v51 = vadd.f32 %v8984_v14, %v17449_v60  ;;  %v8954_v31 = vmul.f32 %v8922_v27, %v17464_v8  ;;  %v9134_v41 = vmul.f32 0.5, %v9102_v19 }
0x19c2   :  { %v9167_v6 = vmul.f32 %v9135_v46, %v17386_v0  ;;  %v9137_v56 = vmul.f32 0.5, %v9105_v63  ;;  %v8985_v38 = vmul.f32 0.044715, %v8953_v15  ;;  %v9164_v11 = vmul.f32 %v9132_v53, %v17364_v25 }
0x19c3   :  { %12776 = vtanh.f32 %v9047_v62  ;;  %v9048_v18 = vmul.f32 0.7978846, %v9016_v51  ;;  %v8986_v20 = vmul.f32 0.044715, %v8954_v31  ;;  %v9166_v44 = vmul.f32 %v9134_v41, %v17374_v28 }
0x19c4   :  { %v9169_v9 = vmul.f32 %v9137_v56, %v17396_v12  ;;  %v9017_v42 = vadd.f32 %v8985_v38, %v17460_v43  ;;  %v9104_v10 = vadd.f32 1.0, %v12763_v30  ;;  %v9106_v61 = vadd.f32 1.0, %v12767_v2 }
0x19c5   :  { %v12769_v59 = vpop.eup %12768  ;;  %12778 = vtanh.f32 %v9048_v18  ;;  %v9018_v45 = vadd.f32 %v8986_v20, %v17464_v8  ;;  %v9196_v0 = vpack.c.bf16 %v9166_v44, %v9164_v11 }
0x19c6   :  { %v12771_v47 = vpop.eup %12770  ;;  %v9197_v58 = vpack.c.bf16 %v9169_v9, %v9167_v6  ;;  %v9107_v34 = vadd.f32 1.0, %v12769_v59  ;;  %v9049_v25 = vmul.f32 0.7978846, %v9017_v42  ;;  %v9136_v16 = vmul.f32 0.5, %v9104_v10 }
0x19c7   :  { %v12773_v4 = vpop.eup %12772  ;;  %v9050_v14 = vmul.f32 0.7978846, %v9018_v45  ;;  %9380 = vmatprep.mubr.bf16.mxu0 %v9196_v0  ;;  %v9138_v28 = vmul.f32 0.5, %v9106_v61  ;;  %v9108_v27 = vadd.f32 1.0, %v12771_v47 }
0x19c8   :  { %v12775_v12 = vpop.eup %12774  ;;  %v9139_v19 = vmul.f32 0.5, %v9107_v34  ;;  %v9109_v46 = vadd.f32 1.0, %v12773_v4  ;;  %12780 = vtanh.f32 %v9049_v25  ;;  %9381 = vmatmul.mubr.bf16.vlgmr.msra.gmra.mrb[16].mxu0 %v9195_v55  ;;  %v9168_v30 = vmul.f32 %v9136_v16, %v17390_v29 }
0x19c9   :  { %12782 = vtanh.f32 %v9050_v14  ;;  %v9170_v2 = vmul.f32 %v9138_v28, %v17402_v48  ;;  %v9110_v63 = vadd.f32 1.0, %v12775_v12  ;;  %v9140_v15 = vmul.f32 0.5, %v9108_v27 }
0x19ca   :  { %v9141_v53 = vmul.f32 0.5, %v9109_v46  ;;  %v9171_v31 = vmul.f32 %v9139_v19, %v17414_v22 }
0x19cb   :  { %v9198_v62 = vpack.c.bf16 %v9170_v2, %v9168_v30  ;;  %v9142_v51 = vmul.f32 0.5, %v9110_v63  ;;  %v9172_v56 = vmul.f32 %v9140_v15, %v17418_v57 }
0x19cc   :  { %v9173_v41 = vmul.f32 %v9141_v53, %v17424_v39 }
0x19cd   :  { %v12777_v6 = vpop.eup %12776  ;;  %9388 = vmatprep.mubr.bf16.mxu0 %v9198_v62  ;;  %v9174_v55 = vmul.f32 %v9142_v51, %v17430_v37 }
0x19ce   :  { %v9199_v38 = vpack.c.bf16 %v9173_v41, %v9171_v31  ;;  %v9111_v29 = vadd.f32 1.0, %v12777_v6 }
0x19cf   :  { %v12779_v11 = vpop.eup %12778  ;;  %v8868_v18 = vpop.f32.mrb[0].mxu0  ;;  %v9200_v48 = vpack.c.bf16 %v9174_v55, %v9172_v56 }
0x19d0   :  { %9389 = vmatmul.mubr.bf16.gmra.mrb[20].mxu0 %v9197_v58  ;;  %v17488_v20 = vadd.f32 %v8868_v18, %v17355_v24  ;;  %v8870_v44 = vpop.f32.mrb[1].mxu0  ;;  %v9112_v9 = vadd.f32 1.0, %v12779_v11  ;;  %v9143_v61 = vmul.f32 0.5, %v9111_v29 }
0x19d1   :  { %v17491_v22 = vadd.f32 %v8870_v44, %v17358_v54  ;;  %v8872_v39 = vpop.f32.mrb[2].mxu0  ;;  %9396 = vmatprep.mubr.bf16.mxu1 %v9200_v48 }
0x19d2   :  { %v12781_v42 = vpop.eup %12780  ;;  %v8923_v57 = vmul.f32 %v17488_v20, %v17488_v20  ;;  %v17496_v37 = vadd.f32 %v8872_v39, %v17355_v24  ;;  %v8874_v10 = vpop.f32.mrb[3].mxu0  ;;  %9397 = vmatmul.mubr.bf16.vlgmr.msra.gmra.mrb[240].mxu1 %v9199_v38  ;;  %v9144_v47 = vmul.f32 0.5, %v9112_v9  ;;  %v9175_v46 = vmul.f32 %v9143_v61, %v17442_v40 }
0x19d3   :  { %v12783_v59 = vpop.eup %12782  ;;  %v8924_v45 = vmul.f32 %v17491_v22, %v17491_v22  ;;  %v17501_v0 = vadd.f32 %v8874_v10, %v17358_v54  ;;  %v9113_v58 = vadd.f32 1.0, %v12781_v42 }
0x19d4   :  { %v8955_v34 = vmul.f32 %v8923_v57, %v17488_v20  ;;  %v8925_v25 = vmul.f32 %v17496_v37, %v17496_v37  ;;  %v9114_v16 = vadd.f32 1.0, %v12783_v59  ;;  %v9176_v15 = vmul.f32 %v9144_v47, %v17449_v60 }
0x19d5   :  { %v8956_v4 = vmul.f32 %v8924_v45, %v17491_v22  ;;  %v8926_v14 = vmul.f32 %v17501_v0, %v17501_v0  ;;  %v9145_v28 = vmul.f32 0.5, %v9113_v58 }
0x19d6   :  { %v8987_v27 = vmul.f32 0.044715, %v8955_v34  ;;  %v8957_v12 = vmul.f32 %v8925_v25, %v17496_v37  ;;  %v9146_v19 = vmul.f32 0.5, %v9114_v16 }
0x19d7   :  { %v8988_v30 = vmul.f32 0.044715, %v8956_v4  ;;  %v8958_v2 = vmul.f32 %v8926_v14, %v17501_v0  ;;  %v8878_v63 = vpop.f32.mrb[4].mxu0  ;;  %v9177_v53 = vmul.f32 %v9145_v28, %v17460_v43 }
0x19d8   :  { %v9019_v62 = vadd.f32 %v8987_v27, %v17488_v20  ;;  %v8989_v51 = vmul.f32 0.044715, %v8957_v12  ;;  %v17516_v31 = vadd.f32 %v8878_v63, %v17355_v24  ;;  %v8880_v41 = vpop.f32.mrb[5].mxu0  ;;  %v9178_v6 = vmul.f32 %v9146_v19, %v17464_v8 }
0x19d9   :  { %v9020_v56 = vadd.f32 %v8988_v30, %v17491_v22  ;;  %v8990_v40 = vmul.f32 0.044715, %v8958_v2  ;;  %v17521_v55 = vadd.f32 %v8880_v41, %v17358_v54  ;;  %v8882_v38 = vpop.f32.mrb[6].mxu0  ;;  %v9201_v29 = vpack.c.bf16 %v9177_v53, %v9175_v46 }
0x19da   :  { %v9051_v60 = vmul.f32 0.7978846, %v9019_v62  ;;  %v9021_v43 = vadd.f32 %v8989_v51, %v17496_v37  ;;  %v8927_v11 = vmul.f32 %v17516_v31, %v17516_v31  ;;  %v17527_v18 = vadd.f32 %v8882_v38, %v17355_v24  ;;  %v8884_v48 = vpop.f32.mrb[7].mxu0 }
0x19db   :  { %v9052_v44 = vmul.f32 0.7978846, %v9020_v56  ;;  %v9022_v8 = vadd.f32 %v8990_v40, %v17501_v0  ;;  %v8928_v9 = vmul.f32 %v17521_v55, %v17521_v55  ;;  %v17533_v39 = vadd.f32 %v8884_v48, %v17358_v54 }
0x19dc   :  { %12784 = vtanh.f32 %v9051_v60  ;;  %v9053_v42 = vmul.f32 0.7978846, %v9021_v43  ;;  %v8959_v57 = vmul.f32 %v8927_v11, %v17516_v31  ;;  %v8929_v10 = vmul.f32 %v17527_v18, %v17527_v18 }
0x19dd   :  { %12786 = vtanh.f32 %v9052_v44  ;;  %v9054_v61 = vmul.f32 0.7978846, %v9022_v8  ;;  %v8960_v59 = vmul.f32 %v8928_v9, %v17521_v55  ;;  %v8930_v45 = vmul.f32 %v17533_v39, %v17533_v39 }
0x19de   :  { %12788 = vtanh.f32 %v9053_v42  ;;  %v8991_v47 = vmul.f32 0.044715, %v8959_v57  ;;  %v8961_v58 = vmul.f32 %v8929_v10, %v17527_v18  ;;  %v9202_v34 = vpack.c.bf16 %v9178_v6, %v9176_v15 }
0x19df   :  { %12790 = vtanh.f32 %v9054_v61  ;;  %v8992_v25 = vmul.f32 0.044715, %v8960_v59  ;;  %v8962_v16 = vmul.f32 %v8930_v45, %v17533_v39 }
0x19e0   :  { %v9023_v4 = vadd.f32 %v8991_v47, %v17516_v31  ;;  %v8993_v14 = vmul.f32 0.044715, %v8961_v58  ;;  %9404 = vmatprep.mubr.bf16.mxu1 %v9202_v34 }
0x19e1   :  { %v9024_v28 = vadd.f32 %v8992_v25, %v17521_v55  ;;  %v8994_v27 = vmul.f32 0.044715, %v8962_v16  ;;  %9405 = vmatmul.mubr.bf16.gmra.mrb[244].mxu1 %v9201_v29 }
0x19e2   :  { %v9055_v12 = vmul.f32 0.7978846, %v9023_v4  ;;  %v9025_v19 = vadd.f32 %v8993_v14, %v17527_v18 }
0x19e3   :  { %v9056_v46 = vmul.f32 0.7978846, %v9024_v28  ;;  %v9026_v30 = vadd.f32 %v8994_v27, %v17533_v39 }
0x19e4   :  { %12792 = vtanh.f32 %v9055_v12  ;;  %v9057_v2 = vmul.f32 0.7978846, %v9025_v19 }
0x19e5   :  { %12794 = vtanh.f32 %v9056_v46  ;;  %v9058_v63 = vmul.f32 0.7978846, %v9026_v30 }
0x19e6   :  { %v12785_v15 = vpop.eup %12784  ;;  %12796 = vtanh.f32 %v9057_v2 }
0x19e7   :  { %v12787_v53 = vpop.eup %12786  ;;  %12798 = vtanh.f32 %v9058_v63  ;;  %v9115_v62 = vadd.f32 1.0, %v12785_v15 }
0x19e8   :  { %v12789_v51 = vpop.eup %12788  ;;  %v9116_v41 = vadd.f32 1.0, %v12787_v53 }
0x19e9   :  { %v12791_v6 = vpop.eup %12790  ;;  %v8888_v56 = vpop.f32.mrb[8].mxu0  ;;  %v9117_v40 = vadd.f32 1.0, %v12789_v51  ;;  %v9147_v38 = vmul.f32 0.5, %v9115_v62 }
0x19ea   :  { %v17548_v29 = vadd.f32 %v8888_v56, %v17355_v24  ;;  %v8890_v60 = vpop.f32.mrb[9].mxu0  ;;  %v9118_v43 = vadd.f32 1.0, %v12791_v6  ;;  %v9148_v11 = vmul.f32 0.5, %v9116_v41 }
0x19eb   :  { %v17551_v48 = vadd.f32 %v8890_v60, %v17358_v54  ;;  %v8892_v44 = vpop.f32.mrb[10].mxu0  ;;  %v9149_v8 = vmul.f32 0.5, %v9117_v40  ;;  %v9179_v45 = vmul.f32 %v9147_v38, %v17488_v20 }
0x19ec   :  { %v8931_v9 = vmul.f32 %v17548_v29, %v17548_v29  ;;  %v17556_v42 = vadd.f32 %v8892_v44, %v17355_v24  ;;  %v8894_v57 = vpop.f32.mrb[11].mxu0  ;;  %v9150_v10 = vmul.f32 0.5, %v9118_v43  ;;  %v9180_v16 = vmul.f32 %v9148_v11, %v17491_v22 }
0x19ed   :  { %v8932_v61 = vmul.f32 %v17551_v48, %v17551_v48  ;;  %v17561_v59 = vadd.f32 %v8894_v57, %v17358_v54  ;;  %v9181_v47 = vmul.f32 %v9149_v8, %v17496_v37 }
0x19ee   :  { %v12793_v58 = vpop.eup %12792  ;;  %v8963_v34 = vmul.f32 %v8931_v9, %v17548_v29  ;;  %v8933_v25 = vmul.f32 %v17556_v42, %v17556_v42  ;;  %v9182_v4 = vmul.f32 %v9150_v10, %v17501_v0 }
0x19ef   :  { %v12795_v14 = vpop.eup %12794  ;;  %v8964_v28 = vmul.f32 %v8932_v61, %v17551_v48  ;;  %v8934_v27 = vmul.f32 %v17561_v59, %v17561_v59  ;;  %v9203_v12 = vpack.c.bf16 %v9181_v47, %v9179_v45  ;;  %v9119_v20 = vadd.f32 1.0, %v12793_v58 }
0x19f0   :  { %v12797_v19 = vpop.eup %12796  ;;  %v8995_v37 = vmul.f32 0.044715, %v8963_v34  ;;  %v8965_v46 = vmul.f32 %v8933_v25, %v17556_v42  ;;  %v9204_v30 = vpack.c.bf16 %v9182_v4, %v9180_v16  ;;  %v9120_v2 = vadd.f32 1.0, %v12795_v14 }
0x19f1   :  { %v12799_v63 = vpop.eup %12798  ;;  %v8996_v15 = vmul.f32 0.044715, %v8964_v28  ;;  %v8966_v22 = vmul.f32 %v8934_v27, %v17561_v59  ;;  %v8898_v53 = vpop.f32.mrb[12].mxu0  ;;  %v9121_v0 = vadd.f32 1.0, %v12797_v19  ;;  %v9151_v62 = vmul.f32 0.5, %v9119_v20 }
0x19f2   :  { %v9027_v51 = vadd.f32 %v8995_v37, %v17548_v29  ;;  %v8997_v41 = vmul.f32 0.044715, %v8965_v46  ;;  %v17577_v6 = vadd.f32 %v8898_v53, %v17355_v24  ;;  %9412 = vmatprep.mubr.bf16.mxu1 %v9204_v30  ;;  %v8900_v56 = vpop.f32.mrb[13].mxu0  ;;  %v9122_v40 = vadd.f32 1.0, %v12799_v63 }
0x19f3   :  { %v9028_v38 = vadd.f32 %v8996_v15, %v17551_v48  ;;  %v8998_v60 = vmul.f32 0.044715, %v8966_v22  ;;  %v17581_v43 = vadd.f32 %v8900_v56, %v17358_v54  ;;  %9413 = vmatmul.mubr.bf16.gmra.mrb[248].mxu1 %v9203_v12  ;;  %v8902_v11 = vpop.f32.mrb[14].mxu0  ;;  %v9152_v44 = vmul.f32 0.5, %v9120_v2 }
0x19f4   :  { %v9059_v8 = vmul.f32 0.7978846, %v9027_v51  ;;  %v9029_v9 = vadd.f32 %v8997_v41, %v17556_v42  ;;  %v8935_v57 = vmul.f32 %v17577_v6, %v17577_v6  ;;  %v17587_v10 = vadd.f32 %v8902_v11, %v17355_v24  ;;  %v8904_v61 = vpop.f32.mrb[15].mxu0 }
0x19f5   :  { %v9060_v45 = vmul.f32 0.7978846, %v9028_v38  ;;  %v9030_v47 = vadd.f32 %v8998_v60, %v17561_v59  ;;  %v8936_v58 = vmul.f32 %v17581_v43, %v17581_v43  ;;  %v17593_v34 = vadd.f32 %v8904_v61, %v17358_v54 }
0x19f6   :  { %12800 = vtanh.f32 %v9059_v8  ;;  %v9061_v25 = vmul.f32 0.7978846, %v9029_v9  ;;  %v8967_v16 = vmul.f32 %v8935_v57, %v17577_v6  ;;  %v8937_v4 = vmul.f32 %v17587_v10, %v17587_v10 }
0x19f7   :  { %12802 = vtanh.f32 %v9060_v45  ;;  %v9062_v24 = vmul.f32 0.7978846, %v9030_v47  ;;  %v8968_v14 = vmul.f32 %v8936_v58, %v17581_v43  ;;  %v8938_v28 = vmul.f32 %v17593_v34, %v17593_v34 }
0x19f8   :  { %12804 = vtanh.f32 %v9061_v25  ;;  %v8999_v27 = vmul.f32 0.044715, %v8967_v16  ;;  %v8969_v12 = vmul.f32 %v8937_v4, %v17587_v10  ;;  %v9154_v54 = vmul.f32 0.5, %v9122_v40 }
0x19f9   :  { %12806 = vtanh.f32 %v9062_v24  ;;  %v9000_v20 = vmul.f32 0.044715, %v8968_v14  ;;  %v8970_v19 = vmul.f32 %v8938_v28, %v17593_v34  ;;  %v9184_v37 = vmul.f32 %v9152_v44, %v17521_v55 }
0x19fa   :  { %v9031_v46 = vadd.f32 %v8999_v27, %v17577_v6  ;;  %v9001_v30 = vmul.f32 0.044715, %v8969_v12  ;;  %v9186_v2 = vmul.f32 %v9154_v54, %v17533_v39  ;;  %v9153_v63 = vmul.f32 0.5, %v9121_v0 }
0x19fb   :  { %v9032_v15 = vadd.f32 %v9000_v20, %v17581_v43  ;;  %v9002_v22 = vmul.f32 0.044715, %v8970_v19  ;;  %v9183_v53 = vmul.f32 %v9151_v62, %v17516_v31 }
0x19fc   :  { %v9063_v51 = vmul.f32 0.7978846, %v9031_v46  ;;  %v9033_v41 = vadd.f32 %v9001_v30, %v17587_v10  ;;  %v9206_v56 = vpack.c.bf16 %v9186_v2, %v9184_v37  ;;  %v9185_v40 = vmul.f32 %v9153_v63, %v17527_v18 }
0x19fd   :  { %v9064_v38 = vmul.f32 0.7978846, %v9032_v15  ;;  %v9034_v55 = vadd.f32 %v9002_v22, %v17593_v34 }
0x19fe   :  { %12808 = vtanh.f32 %v9063_v51  ;;  %v9065_v60 = vmul.f32 0.7978846, %v9033_v41  ;;  %9420 = vmatprep.mubr.bf16.mxu1 %v9206_v56  ;;  %v9205_v11 = vpack.c.bf16 %v9185_v40, %v9183_v53  ;;  %v17622_v56 = vld [vmem:[%s17930_s15 + $0x1] ss:$0 sm:$0xff] }
0x19ff   :  { %12810 = vtanh.f32 %v9064_v38  ;;  %v9066_v39 = vmul.f32 0.7978846, %v9034_v55 }
0x1a00   :  { %v12801_v0 = vpop.eup %12800  ;;  %12812 = vtanh.f32 %v9065_v60  ;;  %9421 = vmatmul.mubr.bf16.gmra.mrb[252].mxu1 %v9205_v11 }
0x1a01   :  { %v12803_v44 = vpop.eup %12802  ;;  %v9123_v31 = vadd.f32 1.0, %v12801_v0  ;;  %12814 = vtanh.f32 %v9066_v39 }
0x1a02   :  { %v12805_v62 = vpop.eup %12804  ;;  %v9124_v8 = vadd.f32 1.0, %v12803_v44 }
0x1a03   :  { %v12807_v9 = vpop.eup %12806  ;;  %v9155_v57 = vmul.f32 0.5, %v9123_v31  ;;  %v9125_v18 = vadd.f32 1.0, %v12805_v62 }
0x1a04   :  { %v9126_v61 = vadd.f32 1.0, %v12807_v9  ;;  %v9156_v45 = vmul.f32 0.5, %v9124_v8 }
0x1a05   :  { %v9157_v47 = vmul.f32 0.5, %v9125_v18  ;;  %v9187_v25 = vmul.f32 %v9155_v57, %v17548_v29 }
0x1a06   :  { %v9158_v58 = vmul.f32 0.5, %v9126_v61  ;;  %v9188_v24 = vmul.f32 %v9156_v45, %v17551_v48 }
0x1a07   :  { %v9189_v16 = vmul.f32 %v9157_v47, %v17556_v42 }
0x1a08   :  { %v12809_v4 = vpop.eup %12808  ;;  %v9190_v14 = vmul.f32 %v9158_v58, %v17561_v59 }
0x1a09   :  { %v12811_v28 = vpop.eup %12810  ;;  %v9207_v27 = vpack.c.bf16 %v9189_v16, %v9187_v25  ;;  %v9127_v12 = vadd.f32 1.0, %v12809_v4 }
0x1a0a   :  { %v12813_v54 = vpop.eup %12812  ;;  %v9208_v20 = vpack.c.bf16 %v9190_v14, %v9188_v24  ;;  %v9128_v19 = vadd.f32 1.0, %v12811_v28 }
0x1a0b   :  { %v12815_v37 = vpop.eup %12814  ;;  %v9159_v46 = vmul.f32 0.5, %v9127_v12  ;;  %v9129_v30 = vadd.f32 1.0, %v12813_v54 }
0x1a0c   :  { %9428 = vmatprep.mubr.bf16.mxu1 %v9208_v20  ;;  %v9130_v2 = vadd.f32 1.0, %v12815_v37  ;;  %v9160_v63 = vmul.f32 0.5, %v9128_v19 }
0x1a0d   :  { %v9161_v29 = vmul.f32 0.5, %v9129_v30  ;;  %9429 = vmatmul.mubr.bf16.gmra.mrb[0].mxu1 %v9207_v27  ;;  %v9191_v15 = vmul.f32 %v9159_v46, %v17577_v6 }
0x1a0e   :  { %v9162_v42 = vmul.f32 0.5, %v9130_v2  ;;  %v9192_v59 = vmul.f32 %v9160_v63, %v17581_v43 }
0x1a0f   :  { %v9193_v48 = vmul.f32 %v9161_v29, %v17587_v10 }
0x1a10   :  { %v9194_v22 = vmul.f32 %v9162_v42, %v17593_v34 }
0x1a11   :  { %v9209_v53 = vpack.c.bf16 %v9193_v48, %v9191_v15 }
0x1a12   :  { %v9210_v51 = vpack.c.bf16 %v9194_v22, %v9192_v59 }
0x1a14   :  { %9436 = vmatprep.mubr.bf16.mxu1 %v9210_v51 }
0x1a15   :  { %9437 = vmatmul.mubr.bf16.gmra.mrb[4].mxu1 %v9209_v53 }
0x1a9b   :  { %v10830_v41 = vpop.f32.mrb[16].mxu0 }
0x1a9c   :  { %v10831_v40 = vpop.f32.mrb[17].mxu0 }
0x1a9d   :  { %v10832_v38 = vadd.f32 %v10831_v40, %v10830_v41  ;;  %v10833_v55 = vpop.f32.mrb[18].mxu0 }
0x1a9e   :  { %v10834_v6 = vpop.f32.mrb[19].mxu0 }
0x1a9f   :  { %v9383_v10 = vadd.f32 %v10832_v38, %v17622_v56  ;;  %v10835_v60 = vadd.f32 %v10834_v6, %v10833_v55 }
0x1aa1   :  { %v9386_v43 = vadd.f32 %v10835_v60, %v17622_v56  ;;  %v17627_v34 = vadd.f32 %v9383_v10, %v17253_v23 }
0x1aa3   :  { %v10836_v11 = vpop.f32.mrb[20].mxu0  ;;  %9465 = vadd.xlane.f32.xlu0 %v17627_v34  ;;  %v17631_v31 = vadd.f32 %v9386_v43, %v17256_v21 }
0x1aa4   :  { %v10837_v39 = vpop.f32.mrb[21].mxu0 }
0x1aa5   :  { %v10838_v0 = vadd.f32 %v10837_v39, %v10836_v11  ;;  %v10839_v44 = vpop.f32.mrb[22].mxu0  ;;  %v10842_v62 = vpop.f32.mrb[240].mxu1 }
0x1aa6   :  { %v10840_v8 = vpop.f32.mrb[23].mxu0  ;;  %v10843_v9 = vpop.f32.mrb[241].mxu1 }
0x1aa7   :  { %v9391_v57 = vadd.f32 %v10838_v0, %v17622_v56  ;;  %v10841_v18 = vadd.f32 %v10840_v8, %v10839_v44  ;;  %9467 = vadd.xlane.f32.xlu0 %v17631_v31  ;;  %v10844_v61 = vadd.f32 %v10843_v9, %v10842_v62  ;;  %v10845_v23 = vpop.f32.mrb[242].mxu1 }
0x1aa8   :  { %v10846_v45 = vpop.f32.mrb[243].mxu1 }
0x1aa9   :  { %v9394_v47 = vadd.f32 %v10841_v18, %v17622_v56  ;;  %v17637_v58 = vadd.f32 %v9391_v57, %v17270_v26  ;;  %v9399_v25 = vadd.f32 %v10844_v61, %v17622_v56  ;;  %v10847_v21 = vadd.f32 %v10846_v45, %v10845_v23 }
0x1aab   :  { %9469 = vadd.xlane.f32.xlu0 %v17637_v58  ;;  %v17642_v16 = vadd.f32 %v9394_v47, %v17266_v7  ;;  %v17645_v4 = vadd.f32 %v9399_v25, %v17283_v32  ;;  %v9402_v24 = vadd.f32 %v10847_v21, %v17622_v56 }
0x1aad   :  { %9471 = vadd.xlane.f32.xlu1 %v17642_v16  ;;  %v17651_v26 = vadd.f32 %v9402_v24, %v17279_v3 }
0x1aaf   :  { %9473 = vadd.xlane.f32.xlu0 %v17645_v4 }
0x1ab3   :  { %9475 = vadd.xlane.f32.xlu0 %v17651_v26 }
0x1ab4   :  { %v10848_v14 = vpop.f32.mrb[244].mxu1 }
0x1ab5   :  { %v10849_v28 = vpop.f32.mrb[245].mxu1 }
0x1ab6   :  { %v10850_v27 = vadd.f32 %v10849_v28, %v10848_v14  ;;  %v10851_v12 = vpop.f32.mrb[246].mxu1 }
0x1ab7   :  { %v10852_v7 = vpop.f32.mrb[247].mxu1 }
0x1ab8   :  { %v9407_v54 = vadd.f32 %v10850_v27, %v17622_v56  ;;  %v10853_v32 = vadd.f32 %v10852_v7, %v10851_v12 }
0x1aba   :  { %v17656_v20 = vadd.f32 %v9407_v54, %v17295_v13  ;;  %v9410_v29 = vadd.f32 %v10853_v32, %v17622_v56 }
0x1abc   :  { %9477 = vadd.xlane.f32.xlu0 %v17656_v20  ;;  %v17671_v48 = vadd.f32 %v9410_v29, %v17292_v35 }
0x1ac6   :  { %v10854_v19 = vpop.f32.mrb[248].mxu1 }
0x1ac7   :  { %v10855_v37 = vpop.f32.mrb[249].mxu1 }
0x1ac8   :  { %v10856_v46 = vadd.f32 %v10855_v37, %v10854_v19  ;;  %v10857_v3 = vpop.f32.mrb[250].mxu1 }
0x1ac9   :  { %v10858_v30 = vpop.f32.mrb[251].mxu1 }
0x1aca   :  { %v9415_v2 = vadd.f32 %v10856_v46, %v17622_v56  ;;  %v10859_v63 = vadd.f32 %v10858_v30, %v10857_v3 }
0x1acc   :  { %v9418_v42 = vadd.f32 %v10859_v63, %v17622_v56  ;;  %v17663_v15 = vadd.f32 %v9415_v2, %v17305_v36 }
0x1ace   :  { %9481 = vadd.xlane.f32.xlu0 %v17663_v15  ;;  %v17667_v13 = vadd.f32 %v9418_v42, %v17308_v5 }
0x1ad0   :  { %9483 = vadd.xlane.f32.xlu1 %v17667_v13 }
0x1ad2   :  { %9479 = vadd.xlane.f32.xlu0 %v17671_v48 }
0x1ad3   :  { %v10860_v59 = vpop.f32.mrb[252].mxu1 }
0x1ad4   :  { %v10861_v22 = vpop.f32.mrb[253].mxu1 }
0x1ad5   :  { %v10862_v53 = vadd.f32 %v10861_v22, %v10860_v59  ;;  %v10863_v51 = vpop.f32.mrb[254].mxu1 }
0x1ad6   :  { %v10864_v41 = vpop.f32.mrb[255].mxu1 }
0x1ad7   :  { %v9423_v36 = vadd.f32 %v10862_v53, %v17622_v56  ;;  %v10865_v40 = vadd.f32 %v10864_v41, %v10863_v51 }
0x1ad9   :  { %v9426_v38 = vadd.f32 %v10865_v40, %v17622_v56  ;;  %v17677_v5 = vadd.f32 %v9423_v36, %v17321_v49 }
0x1adb   :  { %9485 = vadd.xlane.f32.xlu1 %v17677_v5  ;;  %v17681_v35 = vadd.f32 %v9426_v38, %v17318_v1 }
0x1adf   :  { %9487 = vadd.xlane.f32.xlu1 %v17681_v35 }
0x1ae0   :  { %v10866_v55 = vpop.f32.mrb[0].mxu1 }
0x1ae1   :  { %v10867_v6 = vpop.f32.mrb[1].mxu1 }
0x1ae2   :  { %v10868_v10 = vadd.f32 %v10867_v6, %v10866_v55  ;;  %v10869_v60 = vpop.f32.mrb[2].mxu1 }
0x1ae3   :  { %v10870_v43 = vpop.f32.mrb[3].mxu1 }
0x1ae4   :  { %v9431_v11 = vadd.f32 %v10868_v10, %v17622_v56  ;;  %v10871_v39 = vadd.f32 %v10870_v43, %v10869_v60 }
0x1ae6   :  { %v9434_v0 = vadd.f32 %v10871_v39, %v17622_v56  ;;  %v17687_v49 = vadd.f32 %v9431_v11, %v17331_v50 }
0x1ae8   :  { %9489 = vadd.xlane.f32.xlu1 %v17687_v49  ;;  %v10872_v44 = vpop.f32.mrb[4].mxu1  ;;  %v17691_v9 = vadd.f32 %v9434_v0, %v17334_v33 }
0x1ae9   :  { %v10873_v1 = vpop.f32.mrb[5].mxu1 }
0x1aea   :  { %v10874_v62 = vadd.f32 %v10873_v1, %v10872_v44  ;;  %v10875_v8 = vpop.f32.mrb[6].mxu1 }
0x1aeb   :  { %v10876_v57 = vpop.f32.mrb[7].mxu1 }
0x1aec   :  { %v9439_v18 = vadd.f32 %v10874_v62, %v17622_v56  ;;  %v10877_v61 = vadd.f32 %v10876_v57, %v10875_v8  ;;  %9491 = vadd.xlane.f32.xlu1 %v17691_v9 }
0x1aee   :  { %v9442_v23 = vadd.f32 %v10877_v61, %v17622_v56  ;;  %v17697_v50 = vadd.f32 %v9439_v18, %v17347_v52 }
0x1af0   :  { %9493 = vadd.xlane.f32.xlu1 %v17697_v50  ;;  %v17701_v45 = vadd.f32 %v9442_v23, %v17344_v17 }
0x1af4   :  { %9495 = vadd.xlane.f32.xlu1 %v17701_v45 }
0x1b30   :  { %v9466_v33 = vpop.xlane.xlu0 %9465 }
0x1b31   :  { %v9497_v47 = vmul.f32 0.0078125, %v9466_v33 }
0x1b33   :  { %v17705_v25 = vsub.f32 %v17627_v34, %v9497_v47 }
0x1b34   :  { %v9468_v21 = vpop.xlane.xlu0 %9467 }
0x1b35   :  { %v9498_v24 = vmul.f32 0.0078125, %v9468_v21  ;;  %v9529_v56 = vmul.f32 %v17705_v25, %v17705_v25 }
0x1b37   :  { %v17710_v52 = vsub.f32 %v17631_v31, %v9498_v24  ;;  %9545 = vadd.xlane.f32.xlu0 %v9529_v56  ;;  %v12881_v56 = vld [vmem:[%s18119_s23 + $0x8] sm:$0xff] }
0x1b38   :  { %v9470_v14 = vpop.xlane.xlu0 %9469 }
0x1b39   :  { %v9499_v28 = vmul.f32 0.0078125, %v9470_v14  ;;  %v9530_v17 = vmul.f32 %v17710_v52, %v17710_v52 }
0x1b3a   :  { %v9472_v27 = vpop.xlane.xlu1 %9471 }
0x1b3b   :  { %v17715_v12 = vsub.f32 %v17637_v58, %v9499_v28  ;;  %v9500_v34 = vmul.f32 0.0078125, %v9472_v27  ;;  %9547 = vadd.xlane.f32.xlu0 %v9530_v17 }
0x1b3c   :  { %v9474_v7 = vpop.xlane.xlu0 %9473 }
0x1b3d   :  { %v17718_v54 = vsub.f32 %v17642_v16, %v9500_v34  ;;  %v9531_v31 = vmul.f32 %v17715_v12, %v17715_v12  ;;  %v9501_v32 = vmul.f32 0.0078125, %v9474_v7 }
0x1b3f   :  { %9549 = vadd.xlane.f32.xlu0 %v9531_v31  ;;  %v17723_v19 = vsub.f32 %v17645_v4, %v9501_v32  ;;  %v9532_v37 = vmul.f32 %v17718_v54, %v17718_v54 }
0x1b40   :  { %v9476_v46 = vpop.xlane.xlu0 %9475 }
0x1b41   :  { %9551 = vadd.xlane.f32.xlu1 %v9532_v37  ;;  %v9502_v58 = vmul.f32 0.0078125, %v9476_v46  ;;  %v9533_v3 = vmul.f32 %v17723_v19, %v17723_v19 }
0x1b43   :  { %v17730_v16 = vsub.f32 %v17651_v26, %v9502_v58  ;;  %9553 = vadd.xlane.f32.xlu0 %v9533_v3 }
0x1b45   :  { %v9534_v30 = vmul.f32 %v17730_v16, %v17730_v16 }
0x1b47   :  { %9555 = vadd.xlane.f32.xlu0 %v9534_v30 }
0x1b49   :  { %v9478_v2 = vpop.xlane.xlu0 %9477 }
0x1b4a   :  { %v9503_v4 = vmul.f32 0.0078125, %v9478_v2 }
0x1b4c   :  { %v17735_v63 = vsub.f32 %v17656_v20, %v9503_v4 }
0x1b4e   :  { %v9535_v29 = vmul.f32 %v17735_v63, %v17735_v63 }
0x1b50   :  { %9557 = vadd.xlane.f32.xlu0 %v9535_v29 }
0x1b5b   :  { %v9482_v42 = vpop.xlane.xlu0 %9481 }
0x1b5c   :  { %v9505_v59 = vmul.f32 0.0078125, %v9482_v42 }
0x1b5d   :  { %v9484_v22 = vpop.xlane.xlu1 %9483 }
0x1b5e   :  { %v17740_v26 = vsub.f32 %v17663_v15, %v9505_v59  ;;  %v9506_v53 = vmul.f32 0.0078125, %v9484_v22 }
0x1b5f   :  { %v9480_v51 = vpop.xlane.xlu0 %9479 }
0x1b60   :  { %v17743_v41 = vsub.f32 %v17667_v13, %v9506_v53  ;;  %v9504_v36 = vmul.f32 0.0078125, %v9480_v51  ;;  %v9537_v20 = vmul.f32 %v17740_v26, %v17740_v26  ;;  %v12880_v13 = vld [vmem:[%s18119_s23] sm:$0xff] }
0x1b61   :  { %v9798_v55 = vsel %vm9797_vm7, %v12880_v13, 0.0  ;;  %v17796_v13 = vld [vmem:[%s17931_s16 + $0x1] ss:$0 sm:$0xff]  ;;  %s13039_s16 = smov [#allocation11]  }
0x1b62   :  { %v17748_v40 = vsub.f32 %v17671_v48, %v9504_v36  ;;  %9561 = vadd.xlane.f32.xlu0 %v9537_v20  ;;  %v9538_v38 = vmul.f32 %v17743_v41, %v17743_v41 }
0x1b64   :  { %9563 = vadd.xlane.f32.xlu1 %v9538_v38  ;;  %v9536_v15 = vmul.f32 %v17748_v40, %v17748_v40 }
0x1b66   :  { %9559 = vadd.xlane.f32.xlu0 %v9536_v15 }
0x1b68   :  { %v9486_v6 = vpop.xlane.xlu1 %9485 }
0x1b69   :  { %v9507_v10 = vmul.f32 0.0078125, %v9486_v6 }
0x1b6a   :  { %9799 = vadd.xlane.f32.xlu0 %v9798_v55 }
0x1b6b   :  { %v17759_v48 = vsub.f32 %v17677_v5, %v9507_v10 }
0x1b6c   :  { %v9488_v60 = vpop.xlane.xlu1 %9487 }
0x1b6d   :  { %v9508_v43 = vmul.f32 0.0078125, %v9488_v60  ;;  %v9539_v11 = vmul.f32 %v17759_v48, %v17759_v48 }
0x1b6f   :  { %v17764_v39 = vsub.f32 %v17681_v35, %v9508_v43  ;;  %9565 = vadd.xlane.f32.xlu1 %v9539_v11  ;;  %v17806_v11 = vld [vmem:[%s17932_s17 + $0x1] ss:$0 sm:$0xff]  ;;  %s9930_s17 = sshll.u32 %s13039_s16, 4  ;;  %s9931_s17 = int_to_ptr.vmem [resolvable:$true] %s9930_s17 }
0x1b70   :  { %s12992_s25 = scalar_lea.vmem %s9931_s17, 256  ;;  %p12997_p13 = scmp.lt.s32.totalorder %s9931_s17, %s9931_s17 }
0x1b71   :  { %v9540_v0 = vmul.f32 %v17764_v39, %v17764_v39  ;;  %p12993_p12 = scmp.ne.s32.totalorder %s9931_s17, %s12992_s25  ;;  %p12998_p0 = scmp.lt.s32.totalorder %s12992_s25, %s12992_s25 }
0x1b73   :  { %9567 = vadd.xlane.f32.xlu1 %v9540_v0  ;;  %p12999_p1 = por %p12998_p0, %p12997_p13 }
0x1b75   :  { %v9490_v44 = vpop.xlane.xlu1 %9489  ;;  %p13000_p2 = pnand %p12999_p1, %p12993_p12 }
0x1b76   :  { %v9509_v1 = vmul.f32 0.0078125, %v9490_v44 }
0x1b78   :  { %v17769_v62 = vsub.f32 %v17687_v49, %v9509_v1 }
0x1b79   :  { %v9492_v5 = vpop.xlane.xlu1 %9491 }
0x1b7a   :  { %v9510_v8 = vmul.f32 0.0078125, %v9492_v5  ;;  %v9541_v57 = vmul.f32 %v17769_v62, %v17769_v62 }
0x1b7c   :  { %v17774_v18 = vsub.f32 %v17691_v9, %v9510_v8  ;;  %9569 = vadd.xlane.f32.xlu1 %v9541_v57  ;;  %v18399_v8 = vld [vmem:[#allocation36_spill] sm:$0xff] }
0x1b7d   :  { %v9494_v35 = vpop.xlane.xlu1 %9493 }
0x1b7e   :  { %v9511_v61 = vmul.f32 0.0078125, %v9494_v35  ;;  %v9542_v23 = vmul.f32 %v17774_v18, %v17774_v18 }
0x1b80   :  { %v17779_v33 = vsub.f32 %v17697_v50, %v9511_v61  ;;  %9571 = vadd.xlane.f32.xlu1 %v9542_v23  ;;  %v9801_v50 = vsel %vm9797_vm7, %v12881_v56, 0.0 }
0x1b81   :  { %v9496_v49 = vpop.xlane.xlu1 %9495 }
0x1b82   :  { %v9512_v47 = vmul.f32 0.0078125, %v9496_v49  ;;  %v9543_v21 = vmul.f32 %v17779_v33, %v17779_v33 }
0x1b84   :  { %v17784_v24 = vsub.f32 %v17701_v45, %v9512_v47  ;;  %9573 = vadd.xlane.f32.xlu1 %v9543_v21  ;;  %v18400_v47 = vld [vmem:[#allocation35_spill] sm:$0xff] }
0x1b86   :  { %v9544_v9 = vmul.f32 %v17784_v24, %v17784_v24 }
0x1b88   :  { %9575 = vadd.xlane.f32.xlu1 %v9544_v9 }
0x1b8c   :  { %9802 = vadd.xlane.f32.xlu1 %v9801_v50  ;;  %v18401_v50 = vld [vmem:[#allocation37_spill] sm:$0xff] }
0x1bc4   :  { %v9546_v14 = vpop.xlane.xlu0 %9545 }
0x1bc5   :  { %v9577_v27 = vmul.f32 0.0078125, %v9546_v14 }
0x1bc7   :  { %v9593_v37 = vadd.f32 1e-12, %v9577_v27 }
0x1bc8   :  { %v9548_v28 = vpop.xlane.xlu0 %9547 }
0x1bc9   :  { %v9578_v17 = vmul.f32 0.0078125, %v9548_v28 }
0x1bcb   :  { %v9594_v7 = vadd.f32 1e-12, %v9578_v17 }
0x1bcc   :  { %v9550_v34 = vpop.xlane.xlu0 %9549 }
0x1bcd   :  { %v9579_v45 = vmul.f32 0.0078125, %v9550_v34  ;;  %12816 = vrsqrt.f32 %v9594_v7  ;;  %v18403_v34 = vld [vmem:[#allocation40_spill] sm:$0xff] }
0x1bce   :  { %v9552_v31 = vpop.xlane.xlu1 %9551  ;;  %12818 = vrsqrt.f32 %v9593_v37 }
0x1bcf   :  { %v9580_v32 = vmul.f32 0.0078125, %v9552_v31  ;;  %v9595_v58 = vadd.f32 1e-12, %v9579_v45 }
0x1bd0   :  { %v9554_v46 = vpop.xlane.xlu0 %9553 }
0x1bd1   :  { %v9581_v3 = vmul.f32 0.0078125, %v9554_v46  ;;  %v9596_v30 = vadd.f32 1e-12, %v9580_v32  ;;  %12820 = vrsqrt.f32 %v9595_v58 }
0x1bd3   :  { %v9597_v2 = vadd.f32 1e-12, %v9581_v3  ;;  %12822 = vrsqrt.f32 %v9596_v30 }
0x1bd4   :  { %v9556_v4 = vpop.xlane.xlu0 %9555 }
0x1bd5   :  { %v9582_v29 = vmul.f32 0.0078125, %v9556_v4  ;;  %12824 = vrsqrt.f32 %v9597_v2 }
0x1bd7   :  { %v9598_v42 = vadd.f32 1e-12, %v9582_v29  ;;  %v12817_v59 = vpop.eup %12816 }
0x1bd8   :  { %v12819_v53 = vpop.eup %12818  ;;  %v9626_v51 = vmul.f32 %v12817_v59, %v17710_v52 }
0x1bd9   :  { %12826 = vrsqrt.f32 %v9598_v42  ;;  %v9625_v55 = vmul.f32 %v12819_v53, %v17705_v25 }
0x1bda   :  { %v9648_v10 = vmul.f32 %v17796_v13, %v9626_v51  ;;  %v18404_v51 = vld [vmem:[#allocation39_spill] sm:$0xff] }
0x1bdb   :  { %v12821_v36 = vpop.eup %12820  ;;  %v9647_v0 = vmul.f32 %v17796_v13, %v9625_v55  ;;  %v18405_v55 = vld [vmem:[#allocation42_spill] sm:$0xff] }
0x1bdc   :  { %v9627_v60 = vmul.f32 %v12821_v36, %v17715_v12  ;;  %v9670_v25 = vadd.f32 %v17806_v11, %v9648_v10 }
0x1bdd   :  { %v9558_v22 = vpop.xlane.xlu0 %9557  ;;  %v12823_v38 = vpop.eup %12822 }
0x1bde   :  { %v9583_v20 = vmul.f32 0.0078125, %v9558_v22  ;;  %v9628_v43 = vmul.f32 %v12823_v38, %v17718_v54  ;;  %v9649_v1 = vmul.f32 %v17796_v13, %v9627_v60  ;;  %v9669_v54 = vadd.f32 %v17806_v11, %v9647_v0 }
0x1bdf   :  { %v12825_v15 = vpop.eup %12824  ;;  %v9686_v57 = vmul.f32 %v9670_v25, %v18399_v8 }
0x1be0   :  { %v9599_v6 = vadd.f32 1e-12, %v9583_v20  ;;  %v9629_v52 = vmul.f32 %v12825_v15, %v17723_v19  ;;  %v9650_v5 = vmul.f32 %v17796_v13, %v9628_v43  ;;  %v9671_v35 = vadd.f32 %v17806_v11, %v9649_v1 }
0x1be1   :  { %v9685_v21 = vmul.f32 %v9669_v54, %v18400_v47  ;;  %v9707_v56 = vrot.slane %v9686_v57, 4 }
0x1be2   :  { %12828 = vrsqrt.f32 %v9599_v6  ;;  %v9651_v12 = vmul.f32 %v17796_v13, %v9629_v52  ;;  %v9672_v61 = vadd.f32 %v17806_v11, %v9650_v5  ;;  %v9687_v14 = vmul.f32 %v9671_v35, %v18401_v50 }
0x1be3   :  { %v12827_v44 = vpop.eup %12826  ;;  %v9701_v32 = vrot.slane %v9685_v21, 4  ;;  %v9708_v58 = vadd.f32 %v9707_v56, %v9686_v57 }
0x1be4   :  { %v9630_v19 = vmul.f32 %v12827_v44, %v17730_v16  ;;  %v9673_v23 = vadd.f32 %v17806_v11, %v9651_v12  ;;  %v18402_v16 = vld [vmem:[#allocation38_spill] sm:$0xff]  ;;  %v9713_v3 = vrot.slane %v9687_v14, 4 }
0x1be5   :  { %v9688_v27 = vmul.f32 %v9672_v61, %v18402_v16  ;;  %v9702_v53 = vadd.f32 %v9701_v32, %v9685_v21  ;;  %v9709_v20 = vrot.slane %v9708_v58, 2 }
0x1be6   :  { %v9652_v9 = vmul.f32 %v17796_v13, %v9630_v19  ;;  %v9689_v7 = vmul.f32 %v9673_v23, %v18403_v34  ;;  %v9714_v38 = vadd.f32 %v9713_v3, %v9687_v14 }
0x1be7   :  { %v9703_v0 = vrot.slane %v9702_v53, 2  ;;  %v9710_v25 = vadd.f32 %v9709_v20, %v9708_v58 }
0x1be8   :  { %v9674_v37 = vadd.f32 %v17806_v11, %v9652_v9  ;;  %v9725_v42 = vrot.slane %v9689_v7, 4  ;;  %v9715_v1 = vrot.slane %v9714_v38, 2 }
0x1be9   :  { %v9704_v47 = vadd.f32 %v9703_v0, %v9702_v53  ;;  %v9711_v21 = vrot.slane %v9710_v25, 1 }
0x1bea   :  { %v9690_v36 = vmul.f32 %v9674_v37, %v18404_v51  ;;  %v9726_v43 = vadd.f32 %v9725_v42, %v9689_v7  ;;  %v9716_v9 = vadd.f32 %v9715_v1, %v9714_v38 }
0x1beb   :  { %v9705_v32 = vrot.slane %v9704_v47, 1  ;;  %v9712_v37 = vadd.f32 %v9711_v21, %v9710_v25 }
0x1bec   :  { %v12829_v49 = vpop.eup %12828  ;;  %v9731_v44 = vrot.slane %v9690_v36, 4  ;;  %v9727_v35 = vrot.slane %v9726_v43, 2 }
0x1bed   :  { %v9631_v28 = vmul.f32 %v12829_v49, %v17735_v63  ;;  %v9719_v63 = vrot.slane %v9688_v27, 4 }
0x1bee   :  { %v9732_v49 = vadd.f32 %v9731_v44, %v9690_v36  ;;  %v9728_v16 = vadd.f32 %v9727_v35, %v9726_v43 }
0x1bef   :  { %v9562_v17 = vpop.xlane.xlu0 %9561  ;;  %v9653_v45 = vmul.f32 %v17796_v13, %v9631_v28  ;;  %v9720_v60 = vadd.f32 %v9719_v63, %v9688_v27 }
0x1bf0   :  { %v9585_v31 = vmul.f32 0.0078125, %v9562_v17  ;;  %v9729_v42 = vrot.slane %v9728_v16, 1 }
0x1bf1   :  { %v9564_v46 = vpop.xlane.xlu1 %9563  ;;  %v9675_v2 = vadd.f32 %v17806_v11, %v9653_v45  ;;  %v9721_v8 = vrot.slane %v9720_v60, 2  ;;  %v9733_v45 = vrot.slane %v9732_v49, 2 }
0x1bf2   :  { %v9586_v30 = vmul.f32 0.0078125, %v9564_v46  ;;  %v9601_v4 = vadd.f32 1e-12, %v9585_v31  ;;  %v9717_v46 = vrot.slane %v9716_v9, 1  ;;  %v9730_v25 = vadd.f32 %v9729_v42, %v9728_v16 }
0x1bf3   :  { %v9560_v29 = vpop.xlane.xlu0 %9559  ;;  %v9691_v6 = vmul.f32 %v9675_v2, %v18405_v55  ;;  %v9722_v17 = vadd.f32 %v9721_v8, %v9720_v60  ;;  %v9734_v53 = vadd.f32 %v9733_v45, %v9732_v49 }
0x1bf4   :  { %v9602_v59 = vadd.f32 1e-12, %v9586_v30  ;;  %v9584_v22 = vmul.f32 0.0078125, %v9560_v29  ;;  %v9718_v20 = vadd.f32 %v9717_v46, %v9716_v9 }
0x1bf5   :  { %v9737_v54 = vrot.slane %v9691_v6, 4  ;;  %v9723_v63 = vrot.slane %v9722_v17, 1  ;;  %v9735_v1 = vrot.slane %v9734_v53, 1 }
0x1bf6   :  { %12830 = vrsqrt.f32 %v9602_v59  ;;  %v9600_v15 = vadd.f32 1e-12, %v9584_v22 }
0x1bf7   :  { %12832 = vrsqrt.f32 %v9601_v4  ;;  %v9800_v10 = vpop.xlane.xlu0 %9799  ;;  %v9738_v50 = vadd.f32 %v9737_v54, %v9691_v6  ;;  %v9724_v60 = vadd.f32 %v9723_v63, %v9722_v17 }
0x1bf8   :  { %12834 = vrsqrt.f32 %v9600_v15  ;;  %v17830_v52 = vmax.f32 %v9800_v10, 1.0  ;;  %v9706_v10 = vadd.f32 %v9705_v32, %v9704_v47 }
0x1bf9   :  { %v9739_v4 = vrot.slane %v9738_v50, 2 }
0x1bfa   :  { %v9808_v5 = vrot.slane %v17830_v52, 1  ;;  %v9809_v12 = vrot.slane %v17830_v52, 2  ;;  %12836 = vrcp.f32 %v17830_v52  ;;  %v9810_v19 = vrot.slane %v17830_v52, 3 }
0x1bfb   :  { %v9811_v61 = vrot.slane %v17830_v52, 4  ;;  %v9812_v27 = vrot.slane %v17830_v52, 5  ;;  %v9813_v58 = vrot.slane %v17830_v52, 6  ;;  %v9814_v51 = vrot.slane %v17830_v52, 7  ;;  %v18406_v52 = vld [vmem:[#allocation41_spill] sm:$0xff] }
0x1bfc   :  { %12838 = vrcp.f32 %v9808_v5  ;;  %v9566_v57 = vpop.xlane.xlu1 %9565  ;;  %v9740_v38 = vadd.f32 %v9739_v4, %v9738_v50 }
0x1bfd   :  { %v9587_v23 = vmul.f32 0.0078125, %v9566_v57  ;;  %12840 = vrcp.f32 %v9809_v12 }
0x1bfe   :  { %12842 = vrcp.f32 %v9810_v19 }
0x1bff   :  { %v9603_v56 = vadd.f32 1e-12, %v9587_v23  ;;  %12844 = vrcp.f32 %v9811_v61  ;;  %v9741_v61 = vrot.slane %v9740_v38, 1 }
0x1c00   :  { %v12831_v14 = vpop.eup %12830  ;;  %v9568_v28 = vpop.xlane.xlu1 %9567 }
0x1c01   :  { %v12833_v34 = vpop.eup %12832  ;;  %12846 = vrsqrt.f32 %v9603_v56  ;;  %v9588_v7 = vmul.f32 0.0078125, %v9568_v28  ;;  %v9634_v3 = vmul.f32 %v12831_v14, %v17743_v41  ;;  %v9736_v14 = vadd.f32 %v9735_v1, %v9734_v53 }
0x1c02   :  { %v12835_v31 = vpop.eup %12834  ;;  %v9633_v29 = vmul.f32 %v12833_v34, %v17740_v26  ;;  %12848 = vrcp.f32 %v9812_v27 }
0x1c03   :  { %v9632_v30 = vmul.f32 %v12835_v31, %v17748_v40  ;;  %v9604_v2 = vadd.f32 1e-12, %v9588_v7  ;;  %v9656_v40 = vmul.f32 %v17796_v13, %v9634_v3  ;;  %v18407_v31 = vld [vmem:[#allocation43_spill] sm:$0xff]  ;;  %v18408_v3 = vld [vmem:[#allocation44_spill] sm:$0xff] }
0x1c04   :  { %v12837_v59 = vpop.eup %12836  ;;  %v9655_v6 = vmul.f32 %v17796_v13, %v9633_v29 }
0x1c05   :  { %v9654_v22 = vmul.f32 %v17796_v13, %v9632_v30  ;;  %12850 = vrsqrt.f32 %v9604_v2  ;;  %v9839_v54 = vmul.f32 %v12837_v59, %v9706_v10  ;;  %v9678_v35 = vadd.f32 %v17806_v11, %v9656_v40 }
0x1c06   :  { %v12839_v36 = vpop.eup %12838  ;;  %12852 = vrcp.f32 %v9813_v58  ;;  %v9677_v47 = vadd.f32 %v17806_v11, %v9655_v6 }
0x1c07   :  { %v12841_v41 = vpop.eup %12840  ;;  %v9676_v26 = vadd.f32 %v17806_v11, %v9654_v22  ;;  %v9841_v15 = vmul.f32 %v12839_v36, %v9712_v37  ;;  %12854 = vrcp.f32 %v9814_v51  ;;  %v9694_v32 = vmul.f32 %v9678_v35, %v18407_v31  ;;  %v18409_v51 = vld [vmem:[#allocation56_spill] sm:$0xff] }
0x1c08   :  { %v12843_v55 = vpop.eup %12842  ;;  %v9843_v43 = vmul.f32 %v12841_v41, %v9718_v20  ;;  %v9742_v37 = vadd.f32 %v9741_v61, %v9740_v38  ;;  %v9693_v30 = vmul.f32 %v9677_v47, %v18408_v3 }
0x1c09   :  { %v9570_v0 = vpop.xlane.xlu1 %9569  ;;  %v9692_v44 = vmul.f32 %v9676_v26, %v18406_v52  ;;  %v12845_v5 = vpop.eup %12844  ;;  %v9886_v19 = vrot.slane %v9841_v15, 7  ;;  %v9845_v49 = vmul.f32 %v12843_v55, %v9724_v60  ;;  %v9755_v26 = vrot.slane %v9694_v32, 4 }
0x1c0a   :  { %v9589_v12 = vmul.f32 0.0078125, %v9570_v0  ;;  %v9889_v8 = vrot.slane %v9843_v43, 6  ;;  %v9847_v17 = vmul.f32 %v12845_v5, %v9730_v25  ;;  %v9749_v52 = vrot.slane %v9693_v30, 4 }
0x1c0b   :  { %v12847_v57 = vpop.eup %12846  ;;  %v9743_v23 = vrot.slane %v9692_v44, 4  ;;  %v9888_v56 = vsel %vm9887_vm10, %v9886_v19, %v9839_v54  ;;  %v9892_v46 = vrot.slane %v9845_v49, 5  ;;  %v9756_v5 = vadd.f32 %v9755_v26, %v9694_v32 }
0x1c0c   :  { %v9635_v21 = vmul.f32 %v12847_v57, %v17759_v48  ;;  %v9605_v9 = vadd.f32 1e-12, %v9589_v12  ;;  %v12849_v16 = vpop.eup %12848  ;;  %v9891_v7 = vsel %vm9890_vm2, %v9889_v8, %v9888_v56  ;;  %v9895_v53 = vrot.slane %v9847_v17, 4 }
0x1c0d   :  { %v9572_v50 = vpop.xlane.xlu1 %9571  ;;  %v9744_v28 = vadd.f32 %v9743_v23, %v9692_v44  ;;  %v9849_v59 = vmul.f32 %v12849_v16, %v9736_v14  ;;  %v9894_v22 = vsel %vm9893_vm14, %v9892_v46, %v9891_v7  ;;  %v18410_v44 = vld [vmem:[#allocation57_spill] sm:$0xff] }
0x1c0e   :  { %v9657_v27 = vmul.f32 %v17796_v13, %v9635_v21  ;;  %12856 = vrsqrt.f32 %v9605_v9  ;;  %v9590_v34 = vmul.f32 0.0078125, %v9572_v50  ;;  %v9897_v10 = vsel %vm9896_vm15, %v9895_v53, %v9894_v22  ;;  %v18412_v53 = vld [vmem:[#allocation59_spill] sm:$0xff] }
0x1c0f   :  { %v12851_v45 = vpop.eup %12850  ;;  %v9745_v48 = vrot.slane %v9744_v28, 2  ;;  %v9898_v0 = vrot.slane %v9849_v59, 3  ;;  %v9750_v21 = vadd.f32 %v9749_v52, %v9693_v30  ;;  %v9757_v50 = vrot.slane %v9756_v5, 2 }
0x1c10   :  { %v12853_v58 = vpop.eup %12852  ;;  %v9679_v2 = vadd.f32 %v17806_v11, %v9657_v27  ;;  %v9636_v4 = vmul.f32 %v12851_v45, %v17764_v39  ;;  %v9606_v29 = vadd.f32 1e-12, %v9590_v34 }
0x1c11   :  { %v9574_v63 = vpop.xlane.xlu1 %9573  ;;  %v9746_v42 = vadd.f32 %v9745_v48, %v9744_v28  ;;  %v12855_v40 = vpop.eup %12854  ;;  %v9851_v15 = vmul.f32 %v12853_v58, %v9742_v37  ;;  %v9900_v54 = vsel %vm9899_vm8, %v9898_v0, %v9897_v10  ;;  %v9751_v31 = vrot.slane %v9750_v21, 2  ;;  %v18411_v37 = vld [vmem:[#allocation58_spill] sm:$0xff] }
0x1c12   :  { %v9695_v36 = vmul.f32 %v9679_v2, %v18409_v51  ;;  %v9658_v20 = vmul.f32 %v17796_v13, %v9636_v4  ;;  %12858 = vrsqrt.f32 %v9606_v29  ;;  %v9591_v41 = vmul.f32 0.0078125, %v9574_v63 }
0x1c13   :  { %v9747_v38 = vrot.slane %v9746_v42, 1  ;;  %v9901_v61 = vrot.slane %v9851_v15, 2  ;;  %v9758_v32 = vadd.f32 %v9757_v50, %v9756_v5 }
0x1c14   :  { %v9761_v55 = vrot.slane %v9695_v36, 4  ;;  %v9680_v39 = vadd.f32 %v17806_v11, %v9658_v20  ;;  %v9607_v6 = vadd.f32 1e-12, %v9591_v41 }
0x1c15   :  { %v9576_v60 = vpop.xlane.xlu1 %9575  ;;  %v9748_v43 = vadd.f32 %v9747_v38, %v9746_v42  ;;  %v9903_v56 = vsel %vm9902_vm9, %v9901_v61, %v9900_v54  ;;  %v9752_v42 = vadd.f32 %v9751_v31, %v9750_v21  ;;  %v9759_v41 = vrot.slane %v9758_v32, 1  ;;  %v18414_v61 = vld [vmem:[#allocation61_spill] sm:$0xff] }
0x1c16   :  { %v9696_v25 = vmul.f32 %v9680_v39, %v18410_v44  ;;  %12860 = vrsqrt.f32 %v9607_v6  ;;  %v9592_v1 = vmul.f32 0.0078125, %v9576_v60  ;;  %v9762_v8 = vadd.f32 %v9761_v55, %v9695_v36  ;;  %v18413_v6 = vld [vmem:[#allocation60_spill] sm:$0xff] }
0x1c17   :  { %v9853_v12 = vmul.f32 %v12855_v40, %v9748_v43  ;;  %v9753_v44 = vrot.slane %v9752_v42, 1 }
0x1c18   :  { %v12857_v19 = vpop.eup %12856  ;;  %v9767_v57 = vrot.slane %v9696_v25, 4  ;;  %v9608_v35 = vadd.f32 1e-12, %v9592_v1  ;;  %v9763_v16 = vrot.slane %v9762_v8, 2 }
0x1c19   :  { %v9637_v23 = vmul.f32 %v12857_v19, %v17769_v62  ;;  %v9803_v49 = vpop.xlane.xlu1 %9802  ;;  %v9904_v47 = vrot.slane %v9853_v12, 1  ;;  %v9754_v21 = vadd.f32 %v9753_v44, %v9752_v42 }
0x1c1a   :  { %12862 = vrsqrt.f32 %v9608_v35  ;;  %v17866_v9 = vmax.f32 %v9803_v49, 1.0  ;;  %v9768_v27 = vadd.f32 %v9767_v57, %v9696_v25  ;;  %v9764_v30 = vadd.f32 %v9763_v16, %v9762_v8 }
0x1c1b   :  { %v9659_v14 = vmul.f32 %v17796_v13, %v9637_v23  ;;  %v9906_v28 = vsel %vm9905_vm13, %v9904_v47, %v9903_v56  ;;  %v9760_v25 = vadd.f32 %v9759_v41, %v9758_v32 }
0x1c1c   :  { %v12859_v17 = vpop.eup %12858  ;;  %v9815_v34 = vrot.slane %v17866_v9, 1  ;;  %v9816_v62 = vrot.slane %v17866_v9, 2  ;;  %9923 = vst [vmem:[#allocation11] sm:$0xff] %v9906_v28  ;;  %v9817_v58 = vrot.slane %v17866_v9, 3  ;;  %v9769_v2 = vrot.slane %v9768_v27, 2 }
0x1c1d   :  { %v9681_v7 = vadd.f32 %v17806_v11, %v9659_v14  ;;  %v9638_v45 = vmul.f32 %v12859_v17, %v17774_v18  ;;  %v9818_v4 = vrot.slane %v17866_v9, 4  ;;  %v9819_v59 = vrot.slane %v17866_v9, 5 }
0x1c1e   :  { %12864 = vrcp.f32 %v9815_v34  ;;  %v9765_v40 = vrot.slane %v9764_v30, 1  ;;  %v9770_v26 = vadd.f32 %v9769_v2, %v9768_v27  ;;  %v9820_v39 = vrot.slane %v17866_v9, 6 }
0x1c1f   :  { %v9697_v48 = vmul.f32 %v9681_v7, %v18411_v37  ;;  %v9660_v46 = vmul.f32 %v17796_v13, %v9638_v45  ;;  %12866 = vrcp.f32 %v9816_v62  ;;  %v9821_v57 = vrot.slane %v17866_v9, 7 }
0x1c20   :  { %v12861_v3 = vpop.eup %12860  ;;  %12868 = vrcp.f32 %v17866_v9  ;;  %v9766_v1 = vadd.f32 %v9765_v40, %v9764_v30  ;;  %v9771_v12 = vrot.slane %v9770_v26, 1 }
0x1c21   :  { %v9773_v29 = vrot.slane %v9697_v48, 4  ;;  %v9682_v63 = vadd.f32 %v17806_v11, %v9660_v46  ;;  %v9639_v18 = vmul.f32 %v12861_v3, %v17779_v33  ;;  %12870 = vrcp.f32 %v9817_v58 }
0x1c22   :  { %12872 = vrcp.f32 %v9818_v4  ;;  %v9772_v27 = vadd.f32 %v9771_v12, %v9770_v26 }
0x1c23   :  { %v9774_v22 = vadd.f32 %v9773_v29, %v9697_v48  ;;  %v9698_v51 = vmul.f32 %v9682_v63, %v18412_v53  ;;  %v9661_v36 = vmul.f32 %v17796_v13, %v9639_v18  ;;  %12874 = vrcp.f32 %v9819_v59 }
0x1c24   :  { %v12863_v20 = vpop.eup %12862  ;;  %12876 = vrcp.f32 %v9820_v39 }
0x1c25   :  { %v9779_v38 = vrot.slane %v9698_v51, 4  ;;  %v9683_v15 = vadd.f32 %v17806_v11, %v9661_v36  ;;  %v9640_v33 = vmul.f32 %v12863_v20, %v17784_v24  ;;  %v9775_v55 = vrot.slane %v9774_v22, 2 }
0x1c26   :  { %12878 = vrcp.f32 %v9821_v57 }
0x1c27   :  { %v9699_v10 = vmul.f32 %v9683_v15, %v18413_v6  ;;  %v9662_v60 = vmul.f32 %v17796_v13, %v9640_v33  ;;  %v9776_v43 = vadd.f32 %v9775_v55, %v9774_v22  ;;  %v9780_v0 = vadd.f32 %v9779_v38, %v9698_v51 }
0x1c28   :  { %v12865_v52 = vpop.eup %12864 }
0x1c29   :  { %v9684_v5 = vadd.f32 %v17806_v11, %v9662_v60  ;;  %v9781_v54 = vrot.slane %v9780_v0, 2  ;;  %v9785_v19 = vrot.slane %v9699_v10, 4  ;;  %v12867_v24 = vpop.eup %12866  ;;  %v9777_v8 = vrot.slane %v9776_v43, 1 }
0x1c2a   :  { %v9857_v35 = vmul.f32 %v12865_v52, %v9760_v25  ;;  %v12869_v47 = vpop.eup %12868  ;;  %v9859_v56 = vmul.f32 %v12867_v24, %v9766_v1 }
0x1c2b   :  { %v9700_v23 = vmul.f32 %v9684_v5, %v18414_v61  ;;  %v9782_v13 = vadd.f32 %v9781_v54, %v9780_v0  ;;  %v9786_v49 = vadd.f32 %v9785_v19, %v9699_v10  ;;  %v12871_v50 = vpop.eup %12870  ;;  %v9778_v34 = vadd.f32 %v9777_v8, %v9776_v43 }
0x1c2c   :  { %v9907_v17 = vrot.slane %v9857_v35, 7  ;;  %v12873_v16 = vpop.eup %12872  ;;  %v9855_v45 = vmul.f32 %v12869_v47, %v9754_v21  ;;  %v9909_v32 = vrot.slane %v9859_v56, 6  ;;  %v9861_v46 = vmul.f32 %v12871_v50, %v9772_v27 }
0x1c2d   :  { %v9783_v14 = vrot.slane %v9782_v13, 1  ;;  %v9787_v28 = vrot.slane %v9786_v49, 2  ;;  %v9791_v11 = vrot.slane %v9700_v23, 4  ;;  %v12875_v31 = vpop.eup %12874  ;;  %v9863_v3 = vmul.f32 %v12873_v16, %v9778_v34 }
0x1c2e   :  { %v9908_v58 = vsel %vm9887_vm10, %v9907_v17, %v9855_v45  ;;  %v12877_v29 = vpop.eup %12876  ;;  %v9911_v59 = vrot.slane %v9861_v46, 5 }
0x1c2f   :  { %v9784_v62 = vadd.f32 %v9783_v14, %v9782_v13  ;;  %v9788_v9 = vadd.f32 %v9787_v28, %v9786_v49  ;;  %v9792_v7 = vadd.f32 %v9791_v11, %v9700_v23  ;;  %v9910_v63 = vsel %vm9890_vm2, %v9909_v32, %v9908_v58 }
0x1c30   :  { %v9913_v22 = vrot.slane %v9863_v3, 4  ;;  %v9912_v51 = vsel %vm9893_vm14, %v9911_v59, %v9910_v63  ;;  %v12879_v20 = vpop.eup %12878 }
0x1c31   :  { %v9789_v37 = vrot.slane %v9788_v9, 1  ;;  %v9793_v48 = vrot.slane %v9792_v7, 2  ;;  %v9865_v4 = vmul.f32 %v12875_v31, %v9784_v62 }
0x1c32   :  { %v9914_v26 = vsel %vm9896_vm15, %v9913_v22, %v9912_v51 }
0x1c33   :  { %v9790_v30 = vadd.f32 %v9789_v37, %v9788_v9  ;;  %v9794_v2 = vadd.f32 %v9793_v48, %v9792_v7  ;;  %v9915_v36 = vrot.slane %v9865_v4, 3 }
0x1c35   :  { %v9795_v18 = vrot.slane %v9794_v2, 1  ;;  %v9867_v42 = vmul.f32 %v12877_v29, %v9790_v30  ;;  %v9916_v38 = vsel %vm9899_vm8, %v9915_v36, %v9914_v26 }
0x1c37   :  { %v9796_v53 = vadd.f32 %v9795_v18, %v9794_v2  ;;  %v9917_v41 = vrot.slane %v9867_v42, 2 }
0x1c39   :  { %v9869_v40 = vmul.f32 %v12879_v20, %v9796_v53  ;;  %v9918_v33 = vsel %vm9902_vm9, %v9917_v41, %v9916_v38 }
0x1c3b   :  { %v9919_v15 = vrot.slane %v9869_v40, 1 }
0x1c3d   :  { %v9920_v55 = vsel %vm9905_vm13, %v9919_v15, %v9918_v33 }
0x1c3e   :  { %9924 = vst [vmem:[#allocation11 + $0x8] sm:$0xff] %v9920_v55 }
0x1c3f   :  { %13003 = shalt.err (!%p13000_p2)
}
0x1c40   :  { %s13004_s2 = scalar_lea.hbm %s17933_s18, 256 }
0x1c41   :  { %p13005_p3 = scmp.ne.s32.totalorder %s17933_s18, %s13004_s2  ;;  %p13008_p4 = scmp.lt.u32.totalorder %s13004_s2, %s17933_s18 }
0x1c43   :  { %p13010_p5 = pnand %p13008_p4, %p13005_p3 }
0x1c45   :  { %13013 = shalt.err (!%p13010_p5)
}
0x1c46   :  { %s18415_s4 = smov 8   ;;  %s18416_s5 = smov 128  }
0x1c47   :  { %9936 = dma.vmem_to_hbm [thread:$0]  %s9931_s17, 256, %s17933_s18, [#allocation4], %s18416_s5, %s18416_s5, %s18415_s4  }
0x1c48   :  { %13020 = dma.done.wait [#allocation4], 256  }
0x1c49   :  { %13021 = vsyncadd [#allocation4], 4294967040 }
0x1c4a   :  { %9940 = vsyncpa [#allocation3], 1 }
0x1c4b   :  { %9941 = vsyncpa [#allocation6], 1 }
0x1c4c   :  { %9942 = vsyncpa [#allocation9], 1 }
0x1c4d   :  { %9943 = vsyncpa [#allocation4], 1 }

</bundles_post_ra>
